<compile_context>
chip_gen: v6e
topology: v6e:2x2x1
jax: 0.10.0
libtpu: 0.0.40
codegen_flags: <defaults>
</compile_context>

<pallas_src>
import jax
import jax.numpy as jnp
from jax import lax
from jax.experimental import pallas as pl
from jax.experimental.pallas import tpu as pltpu

IN_DIM = 32 * 32          # 1024, already lane-aligned
H1, H2, NUM_CLASSES = 1000, 500, 10
H1P, H2P, OUTP = 1024, 512, 128   # lane-padded dims
TB = 128                  # batch tile (rows per grid step)


def mlp_kernel(x_ref, w1_ref, b1_ref, w2_ref, b2_ref, w3_ref, b3_ref, o_ref):
    # Layer 1: (TB, 1024) bf16 @ (1024, 1024) bf16 -> f32, + bias, ReLU
    h1 = jnp.dot(x_ref[...], w1_ref[...], preferred_element_type=jnp.float32)
    h1 = jnp.maximum(h1 + b1_ref[...], 0.0)

    # Layer 2: (TB, 1024) @ (1024, 512)
    h2 = jnp.dot(h1.astype(jnp.bfloat16), w2_ref[...],
                 preferred_element_type=jnp.float32)
    h2 = jnp.maximum(h2 + b2_ref[...], 0.0)

    # Layer 3: (TB, 512) @ (512, 128)  (only first 10 output lanes are real)
    h3 = jnp.dot(h2.astype(jnp.bfloat16), w3_ref[...],
                 preferred_element_type=jnp.float32)
    h3 = jnp.maximum(h3 + b3_ref[...], 0.0)

    # Mask padded class lanes so they contribute 0 to the softmax denominator.
    col = lax.broadcasted_iota(jnp.int32, h3.shape, 1)
    logits = jnp.where(col < NUM_CLASSES, h3, -1e30)

    # Numerically stable softmax over the class dimension.
    m = jnp.max(logits, axis=-1, keepdims=True)
    e = jnp.exp(logits - m)
    denom = jnp.sum(e, axis=-1, keepdims=True)
    o_ref[...] = (e * pl.reciprocal(denom, approx=False)).astype(o_ref.dtype)


def cnn_forward(x, params):
    """x: (B, 1024) float32.  params: padded bf16 weights + f32 biases."""
    w1, b1 = params["w1"], params["b1"]
    w2, b2 = params["w2"], params["b2"]
    w3, b3 = params["w3"], params["b3"]

    B = x.shape[0]
    n_tiles = pl.cdiv(B, TB)
    Bp = n_tiles * TB

    # Pad batch to a tile multiple and cast activations to bf16 (MXU input).
    xp = jnp.zeros((Bp, IN_DIM), jnp.bfloat16).at[:B].set(x.astype(jnp.bfloat16))

    resident = lambda i: (0, 0)          # weights/biases: same block every step
    grid_spec = pltpu.PrefetchScalarGridSpec(
        num_scalar_prefetch=0,
        grid=(n_tiles,),
        in_specs=[
            pl.BlockSpec((TB, IN_DIM), lambda i: (i, 0)),   # x tile
            pl.BlockSpec((IN_DIM, H1P), resident),          # w1
            pl.BlockSpec((1, H1P), resident),               # b1
            pl.BlockSpec((H1P, H2P), resident),             # w2
            pl.BlockSpec((1, H2P), resident),               # b2
            pl.BlockSpec((H2P, OUTP), resident),            # w3
            pl.BlockSpec((1, OUTP), resident),              # b3
        ],
        out_specs=pl.BlockSpec((TB, OUTP), lambda i: (i, 0)),
    )

    out_padded = pl.pallas_call(
        mlp_kernel,
        out_shape=jax.ShapeDtypeStruct((Bp, OUTP), jnp.float32),
        grid_spec=grid_spec,
        compiler_params=pltpu.CompilerParams(
            dimension_semantics=("parallel",)),
    )(xp, w1, b1, w2, b2, w3, b3)

    return out_padded[:B, :NUM_CLASSES]


def init_params(key):
    """Deterministic synthetic init mirroring nn.Linear(1024,1000) etc.
    Weights: (in, out) layout, zero-padded to lane multiples, bf16.
    Biases: (1, padded_out), f32 (tiny; added in f32 inside the kernel)."""
    k1, k2, k3, k4, k5, k6 = jax.random.split(key, 6)
    s1 = 1.0 / jnp.sqrt(1024.0)
    s2 = 1.0 / jnp.sqrt(1000.0)
    s3 = 1.0 / jnp.sqrt(500.0)

    def pad2(a, rows, cols):
        return jnp.zeros((rows, cols), a.dtype).at[:a.shape[0], :a.shape[1]].set(a)

    w1 = jax.random.uniform(k1, (IN_DIM, H1), jnp.float32, -s1, s1)
    b1 = jax.random.uniform(k2, (1, H1), jnp.float32, -s1, s1)
    w2 = jax.random.uniform(k3, (H1, H2), jnp.float32, -s2, s2)
    b2 = jax.random.uniform(k4, (1, H2), jnp.float32, -s2, s2)
    w3 = jax.random.uniform(k5, (H2, NUM_CLASSES), jnp.float32, -s3, s3)
    b3 = jax.random.uniform(k6, (1, NUM_CLASSES), jnp.float32, -s3, s3)

    return {
        "w1": pad2(w1, IN_DIM, H1P).astype(jnp.bfloat16),
        "b1": pad2(b1, 1, H1P),
        "w2": pad2(w2, H1P, H2P).astype(jnp.bfloat16),
        "b2": pad2(b2, 1, H2P),
        "w3": pad2(w3, H2P, OUTP).astype(jnp.bfloat16),
        "b3": pad2(b3, 1, OUTP),
    }


def reference_forward(x, p):
    """Same math as the kernel (bf16 matmul inputs, f32 accumulation)."""
    xb = x.astype(jnp.bfloat16)
    h1 = jnp.maximum(
        jnp.dot(xb, p["w1"], preferred_element_type=jnp.float32) + p["b1"], 0.0)
    h2 = jnp.maximum(
        jnp.dot(h1.astype(jnp.bfloat16), p["w2"],
                preferred_element_type=jnp.float32) + p["b2"], 0.0)
    h3 = jnp.maximum(
        jnp.dot(h2.astype(jnp.bfloat16), p["w3"],
                preferred_element_type=jnp.float32) + p["b3"], 0.0)
    logits = h3[:, :NUM_CLASSES]
    return jax.nn.softmax(logits, axis=-1)


if __name__ == "__main__":
    key = jax.random.PRNGKey(0)
    kx, kp = jax.random.split(key)

    batch = 8
    x = jax.random.normal(kx, (batch, IN_DIM), dtype=jnp.float32)
    params = init_params(kp)

    out = cnn_forward(x, params)
    out = jax.block_until_ready(out)

    ref = reference_forward(x, params)

    assert out.shape == (batch, NUM_CLASSES)
    assert jnp.allclose(jnp.sum(out, axis=-1), 1.0, atol=1e-5)
    assert jnp.allclose(out, ref, atol=1e-3, rtol=1e-3)

    print("KERNEL_OK")
</pallas_src>

<mosaic_0001>
module attributes {stable_mosaic.version = 11 : i64} {
  func.func @mlp_kernel(%arg0: i32, %arg1: memref<128x1024xbf16, #tpu.memory_space<vmem>>, %arg2: memref<1024x1024xbf16, #tpu.memory_space<vmem>>, %arg3: memref<1x1024xf32, #tpu.memory_space<vmem>>, %arg4: memref<1024x512xbf16, #tpu.memory_space<vmem>>, %arg5: memref<1x512xf32, #tpu.memory_space<vmem>>, %arg6: memref<512x128xbf16, #tpu.memory_space<vmem>>, %arg7: memref<1x128xf32, #tpu.memory_space<vmem>>, %arg8: memref<128x128xf32, #tpu.memory_space<vmem>>) attributes {dimension_semantics = [#tpu.dimension_semantics<parallel>], iteration_bounds = array<i64: 1>, scalar_prefetch = 0 : i64, scratch_operands = 0 : i64, tpu.core_type = #tpu.core_type<tc>, window_params = [{transform_indices = @transform_0, window_bounds = array<i64: 128, 1024>}, {pipeline_mode = #tpu.pipeline_mode<synchronous>, transform_indices = @transform_1, window_bounds = array<i64: 1024, 1024>}, {pipeline_mode = #tpu.pipeline_mode<synchronous>, transform_indices = @transform_2, window_bounds = array<i64: 1, 1024>}, {pipeline_mode = #tpu.pipeline_mode<synchronous>, transform_indices = @transform_3, window_bounds = array<i64: 1024, 512>}, {pipeline_mode = #tpu.pipeline_mode<synchronous>, transform_indices = @transform_4, window_bounds = array<i64: 1, 512>}, {pipeline_mode = #tpu.pipeline_mode<synchronous>, transform_indices = @transform_5, window_bounds = array<i64: 512, 128>}, {pipeline_mode = #tpu.pipeline_mode<synchronous>, transform_indices = @transform_6, window_bounds = array<i64: 1, 128>}, {transform_indices = @transform_7, window_bounds = array<i64: 128, 128>}]} {
    %c0 = arith.constant 0 : index
    %c0_0 = arith.constant 0 : index
    %0 = vector.load %arg1[%c0, %c0_0] : memref<128x1024xbf16, #tpu.memory_space<vmem>>, vector<128x1024xbf16>
    %c0_1 = arith.constant 0 : index
    %c0_2 = arith.constant 0 : index
    %1 = vector.load %arg2[%c0_1, %c0_2] : memref<1024x1024xbf16, #tpu.memory_space<vmem>>, vector<1024x1024xbf16>
    %cst = arith.constant dense<0.000000e+00> : vector<128x1024xf32>
    %2 = tpu.matmul %0, %1, %cst {dimension_numbers = #tpu.dot_dimension_numbers<[1], [0], [0], [1], [0, 0, 1, 1], [], []>} : vector<128x1024xbf16>, vector<1024x1024xbf16>, vector<128x1024xf32> -> vector<128x1024xf32>
    %c0_3 = arith.constant 0 : index
    %c0_4 = arith.constant 0 : index
    %3 = vector.load %arg3[%c0_3, %c0_4] : memref<1x1024xf32, #tpu.memory_space<vmem>>, vector<1x1024xf32>
    %4 = vector.broadcast %3 : vector<1x1024xf32> to vector<128x1024xf32>
    %5 = arith.addf %2, %4 : vector<128x1024xf32>
    %cst_5 = arith.constant 0.000000e+00 : f32
    %6 = vector.broadcast %cst_5 : f32 to vector<128x1024xf32>
    %7 = arith.maximumf %5, %6 : vector<128x1024xf32>
    %8 = arith.truncf %7 : vector<128x1024xf32> to vector<128x1024xbf16>
    %c0_6 = arith.constant 0 : index
    %c0_7 = arith.constant 0 : index
    %9 = vector.load %arg4[%c0_6, %c0_7] : memref<1024x512xbf16, #tpu.memory_space<vmem>>, vector<1024x512xbf16>
    %cst_8 = arith.constant dense<0.000000e+00> : vector<128x512xf32>
    %10 = tpu.matmul %8, %9, %cst_8 {dimension_numbers = #tpu.dot_dimension_numbers<[1], [0], [0], [1], [0, 0, 1, 1], [], []>} : vector<128x1024xbf16>, vector<1024x512xbf16>, vector<128x512xf32> -> vector<128x512xf32>
    %c0_9 = arith.constant 0 : index
    %c0_10 = arith.constant 0 : index
    %11 = vector.load %arg5[%c0_9, %c0_10] : memref<1x512xf32, #tpu.memory_space<vmem>>, vector<1x512xf32>
    %12 = vector.broadcast %11 : vector<1x512xf32> to vector<128x512xf32>
    %13 = arith.addf %10, %12 : vector<128x512xf32>
    %cst_11 = arith.constant 0.000000e+00 : f32
    %14 = vector.broadcast %cst_11 : f32 to vector<128x512xf32>
    %15 = arith.maximumf %13, %14 : vector<128x512xf32>
    %16 = arith.truncf %15 : vector<128x512xf32> to vector<128x512xbf16>
    %c0_12 = arith.constant 0 : index
    %c0_13 = arith.constant 0 : index
    %17 = vector.load %arg6[%c0_12, %c0_13] : memref<512x128xbf16, #tpu.memory_space<vmem>>, vector<512x128xbf16>
    %cst_14 = arith.constant dense<0.000000e+00> : vector<128x128xf32>
    %18 = tpu.matmul %16, %17, %cst_14 {dimension_numbers = #tpu.dot_dimension_numbers<[1], [0], [0], [1], [0, 0, 1, 1], [], []>} : vector<128x512xbf16>, vector<512x128xbf16>, vector<128x128xf32> -> vector<128x128xf32>
    %c0_15 = arith.constant 0 : index
    %c0_16 = arith.constant 0 : index
    %19 = vector.load %arg7[%c0_15, %c0_16] : memref<1x128xf32, #tpu.memory_space<vmem>>, vector<1x128xf32>
    %20 = vector.broadcast %19 : vector<1x128xf32> to vector<128x128xf32>
    %21 = arith.addf %18, %20 : vector<128x128xf32>
    %cst_17 = arith.constant 0.000000e+00 : f32
    %22 = vector.broadcast %cst_17 : f32 to vector<128x128xf32>
    %23 = arith.maximumf %21, %22 : vector<128x128xf32>
    %24 = tpu.iota {dimensions = array<i32: 1>} : vector<128x128xi32>
    %c10_i32 = arith.constant 10 : i32
    %25 = vector.broadcast %c10_i32 : i32 to vector<128x128xi32>
    %26 = arith.cmpi slt, %24, %25 : vector<128x128xi32>
    %cst_18 = arith.constant -1.000000e+30 : f32
    %27 = vector.broadcast %cst_18 : f32 to vector<128x128xf32>
    %28 = arith.select %26, %23, %27 : vector<128x128xi1>, vector<128x128xf32>
    %cst_19 = arith.constant dense<0xFF800000> : vector<128xf32>
    %29 = vector.multi_reduction <maximumf>, %28, %cst_19 [1] : vector<128x128xf32> to vector<128xf32>
    %30 = vector.shape_cast %29 : vector<128xf32> to vector<128x1xf32>
    %31 = vector.broadcast %30 : vector<128x1xf32> to vector<128x128xf32>
    %32 = arith.subf %28, %31 : vector<128x128xf32>
    %33 = math.exp %32 : vector<128x128xf32>
    %cst_20 = arith.constant dense<0.000000e+00> : vector<128xf32>
    %34 = vector.multi_reduction <add>, %33, %cst_20 [1] : vector<128x128xf32> to vector<128xf32>
    %35 = vector.shape_cast %34 : vector<128xf32> to vector<128x1xf32>
    %36 = tpu.reciprocal %35 : vector<128x1xf32> -> vector<128x1xf32>
    %37 = vector.broadcast %36 : vector<128x1xf32> to vector<128x128xf32>
    %38 = arith.mulf %33, %37 : vector<128x128xf32>
    %c0_21 = arith.constant 0 : index
    %c0_22 = arith.constant 0 : index
    %39 = vector.load %arg8[%c0_21, %c0_22] : memref<128x128xf32, #tpu.memory_space<vmem>>, vector<128x128xf32>
    tpu.vector_store %arg8[%c0_21, %c0_22], %38 {strides = array<i32>} : memref<128x128xf32, #tpu.memory_space<vmem>>, vector<128x128xf32>,
    return
  }
  func.func @transform_0(%arg0: i32) -> (i32, i32) {
    %c0_i32 = arith.constant 0 : i32
    %c0_i32_0 = arith.constant 0 : i32
    return %arg0, %c0_i32 : i32, i32
  }
  func.func @transform_1(%arg0: i32) -> (i32, i32) {
    %c0_i32 = arith.constant 0 : i32
    %c0_i32_0 = arith.constant 0 : i32
    %c0_i32_1 = arith.constant 0 : i32
    return %c0_i32, %c0_i32_0 : i32, i32
  }
  func.func @transform_2(%arg0: i32) -> (i32, i32) {
    %c0_i32 = arith.constant 0 : i32
    %c0_i32_0 = arith.constant 0 : i32
    %c0_i32_1 = arith.constant 0 : i32
    return %c0_i32, %c0_i32_0 : i32, i32
  }
  func.func @transform_3(%arg0: i32) -> (i32, i32) {
    %c0_i32 = arith.constant 0 : i32
    %c0_i32_0 = arith.constant 0 : i32
    %c0_i32_1 = arith.constant 0 : i32
    return %c0_i32, %c0_i32_0 : i32, i32
  }
  func.func @transform_4(%arg0: i32) -> (i32, i32) {
    %c0_i32 = arith.constant 0 : i32
    %c0_i32_0 = arith.constant 0 : i32
    %c0_i32_1 = arith.constant 0 : i32
    return %c0_i32, %c0_i32_0 : i32, i32
  }
  func.func @transform_5(%arg0: i32) -> (i32, i32) {
    %c0_i32 = arith.constant 0 : i32
    %c0_i32_0 = arith.constant 0 : i32
    %c0_i32_1 = arith.constant 0 : i32
    return %c0_i32, %c0_i32_0 : i32, i32
  }
  func.func @transform_6(%arg0: i32) -> (i32, i32) {
    %c0_i32 = arith.constant 0 : i32
    %c0_i32_0 = arith.constant 0 : i32
    %c0_i32_1 = arith.constant 0 : i32
    return %c0_i32, %c0_i32_0 : i32, i32
  }
  func.func @transform_7(%arg0: i32) -> (i32, i32) {
    %c0_i32 = arith.constant 0 : i32
    %c0_i32_0 = arith.constant 0 : i32
    return %arg0, %c0_i32 : i32, i32
  }
}

</mosaic_0001>

<bundles_post_ra>
// kernel: tpu_custom_call.1
= control target key start
LH: loop header
LB: loop body
LE: loop exit
PB: predicated region body
PF: predicated region fallthrough
CT: control target
= control target key end

     0   :  { %12 = vsyncpa [#allocation3], 0  ;;  %s12753_s0 = inlined_call_operand.hbm [shape: bf16[128,1024], index: 0, kind: input, shape index: {}]   ;;  %s12754_s1 = inlined_call_operand.hbm [shape: bf16[1024,1024], index: 1, kind: input, shape index: {}]   ;;  %s12755_s2 = inlined_call_operand.hbm [shape: f32[1,1024], index: 2, kind: input, shape index: {}]   ;;  %s12756_s3 = inlined_call_operand.hbm [shape: bf16[1024,512], index: 3, kind: input, shape index: {}]   ;;  %s12757_s4 = inlined_call_operand.hbm [shape: f32[1,512], index: 4, kind: input, shape index: {}]   ;;  %s12758_s5 = inlined_call_operand.hbm [shape: bf16[512,128], index: 5, kind: input, shape index: {}]   ;;  %s12759_s6 = inlined_call_operand.hbm [shape: f32[1,128], index: 6, kind: input, shape index: {}]   ;;  %s12760_s7 = inlined_call_operand.hbm [shape: f32[128,128], index: 7, kind: output, shape index: {}]  }
   0x1   :  { %13 = vsyncpa [#allocation6], 0 }
   0x2   :  { %14 = vsyncpa [#allocation9], 0 }
   0x3   :  { %15 = vsyncpa [#allocation12], 0 }
   0x4   :  { %16 = vsyncpa [#allocation4], 0  ;;  %s10508_s24 = smov [#allocation5]   ;;  %s10509_s26 = smov [#allocation8]  }
   0x5   :  { %s34_s25 = sshll.u32 %s10508_s24, 4  ;;  %s56_s27 = sshll.u32 %s10509_s26, 4  ;;  %s35_s25 = int_to_ptr.vmem [resolvable:$true] %s34_s25  ;;  %s57_s27 = int_to_ptr.vmem [resolvable:$true] %s56_s27 }
   0x6   :  { %s10346_s28 = scalar_lea.vmem %s35_s25, 65536  ;;  %p10351_p1 = scmp.lt.s32.totalorder %s35_s25, %s35_s25 }
   0x7   :  { %p10347_p0 = scmp.ne.s32.totalorder %s35_s25, %s10346_s28  ;;  %p10352_p2 = scmp.lt.s32.totalorder %s10346_s28, %s10346_s28 }
   0x9   :  { %p10353_p3 = por %p10352_p2, %p10351_p1 }
   0xb   :  { %p10354_p4 = pnand %p10353_p3, %p10347_p0 }
   0xd   :  { %10357 = shalt.err (!%p10354_p4)
}
   0xe   :  { %s10510_s29 = smov 512   ;;  %s10511_s30 = smov 32  }
   0xf   :  { %40 = dma.hbm_to_vmem [thread:$0]  %s12754_s1, 65536, %s35_s25, [#allocation6], %s10510_s29, %s10510_s29, %s10511_s30  }
  0x10   :  { %s10366_s10 = scalar_lea.vmem %s57_s27, 32768  ;;  %p10371_p6 = scmp.lt.s32.totalorder %s57_s27, %s57_s27 }
  0x11   :  { %p10367_p5 = scmp.ne.s32.totalorder %s57_s27, %s10366_s10  ;;  %p10372_p7 = scmp.lt.s32.totalorder %s10366_s10, %s10366_s10 }
  0x13   :  { %p10373_p8 = por %p10372_p7, %p10371_p6 }
  0x15   :  { %p10374_p9 = pnand %p10373_p8, %p10367_p5 }
  0x17   :  { %10377 = shalt.err (!%p10374_p9)
}
  0x18   :  { %s10512_s11 = smov 256   ;;  %s10513_s12 = smov 16  }
  0x19   :  { %62 = dma.hbm_to_vmem [thread:$0]  %s12756_s3, 32768, %s57_s27, [#allocation9], %s10512_s11, %s10512_s11, %s10513_s12  }
  0x1a   :  { %s10514_s15 = smov [#allocation11]  }
  0x1b   :  { %s78_s16 = sshll.u32 %s10514_s15, 4  ;;  %s79_s16 = int_to_ptr.vmem [resolvable:$true] %s78_s16 }
  0x1c   :  { %s10386_s17 = scalar_lea.vmem %s79_s16, 4096  ;;  %p10391_p11 = scmp.lt.s32.totalorder %s79_s16, %s79_s16 }
  0x1d   :  { %p10387_p10 = scmp.ne.s32.totalorder %s79_s16, %s10386_s17  ;;  %p10392_p12 = scmp.lt.s32.totalorder %s10386_s17, %s10386_s17 }
  0x1f   :  { %p10393_p13 = por %p10392_p12, %p10391_p11 }
  0x21   :  { %p10394_p0 = pnand %p10393_p13, %p10387_p10 }
  0x23   :  { %10397 = shalt.err (!%p10394_p0)
}
  0x24   :  { %s10515_s1 = smov 64   ;;  %s10516_s18 = smov 4  }
  0x25   :  { %84 = dma.hbm_to_vmem [thread:$0]  %s12758_s5, 4096, %s79_s16, [#allocation12], %s10515_s1, %s10515_s1, %s10516_s18  }
  0x26   :  { %s10517_s21 = smov [#allocation2]   ;;  %s10518_s3 = smov [#allocation7]  }
  0x27   :  { %s22_s22 = sshll.u32 %s10517_s21, 4  ;;  %s47_s23 = sshll.u32 %s10518_s3, 4  ;;  %s23_s22 = int_to_ptr.vmem [resolvable:$true] %s22_s22  ;;  %s48_s23 = int_to_ptr.vmem [resolvable:$true] %s47_s23 }
  0x28   :  { %s10406_s24 = scalar_lea.vmem %s23_s22, 8192  ;;  %p10411_p2 = scmp.lt.s32.totalorder %s23_s22, %s23_s22 }
  0x29   :  { %p10407_p1 = scmp.ne.s32.totalorder %s23_s22, %s10406_s24  ;;  %p10412_p3 = scmp.lt.s32.totalorder %s10406_s24, %s10406_s24 }
  0x2b   :  { %p10413_p4 = por %p10412_p3, %p10411_p2 }
  0x2d   :  { %p10414_p5 = pnand %p10413_p4, %p10407_p1 }
  0x2f   :  { %10417 = shalt.err (!%p10414_p5)
}
  0x30   :  { %28 = dma.hbm_to_vmem [thread:$0]  %s12753_s0, 8192, %s23_s22, [#allocation3], %s10510_s29, %s10510_s29, %s10511_s30  }
  0x31   :  { %s10426_s5 = scalar_lea.vmem %s48_s23, 128  ;;  %p10431_p7 = scmp.lt.s32.totalorder %s48_s23, %s48_s23 }
  0x32   :  { %p10427_p6 = scmp.ne.s32.totalorder %s48_s23, %s10426_s5  ;;  %p10432_p8 = scmp.lt.s32.totalorder %s10426_s5, %s10426_s5 }
  0x34   :  { %p10433_p9 = por %p10432_p8, %p10431_p7 }
  0x36   :  { %p10434_p10 = pnand %p10433_p9, %p10427_p6 }
  0x38   :  { %10437 = shalt.err (!%p10434_p10)
}
  0x39   :  { %50 = dma.hbm_to_vmem [thread:$0]  %s12755_s2, 128, %s48_s23, [#allocation6]  }
  0x3a   :  { %s10519_s8 = smov [#allocation10]   ;;  %s10520_s10 = smov [#allocation13]  }
  0x3b   :  { %s69_s9 = sshll.u32 %s10519_s8, 4  ;;  %s91_s11 = sshll.u32 %s10520_s10, 4  ;;  %s70_s9 = int_to_ptr.vmem [resolvable:$true] %s69_s9  ;;  %s92_s11 = int_to_ptr.vmem [resolvable:$true] %s91_s11 }
  0x3c   :  { %s10446_s12 = scalar_lea.vmem %s70_s9, 64  ;;  %p10451_p12 = scmp.lt.s32.totalorder %s70_s9, %s70_s9 }
  0x3d   :  { %p10447_p11 = scmp.ne.s32.totalorder %s70_s9, %s10446_s12  ;;  %p10452_p13 = scmp.lt.s32.totalorder %s10446_s12, %s10446_s12 }
  0x3f   :  { %p10453_p0 = por %p10452_p13, %p10451_p12 }
  0x41   :  { %p10454_p1 = pnand %p10453_p0, %p10447_p11 }
  0x43   :  { %10457 = shalt.err (!%p10454_p1)
}
  0x44   :  { %72 = dma.hbm_to_vmem [thread:$0]  %s12757_s4, 64, %s70_s9, [#allocation9]  }
  0x45   :  { %s10466_s30 = scalar_lea.vmem %s92_s11, 16  ;;  %s10470_s2 = scalar_lea.vmem %s92_s11, 32 }
  0x46   :  { %p10467_p2 = scmp.ne.s32.totalorder %s92_s11, %s10466_s30  ;;  %p10471_p3 = scmp.lt.s32.totalorder %s92_s11, %s92_s11 }
  0x47   :  { %p10472_p4 = scmp.lt.s32.totalorder %s10470_s2, %s10466_s30 }
  0x49   :  { %p10473_p5 = por %p10472_p4, %p10471_p3 }
  0x4b   :  { %p10474_p6 = pnand %p10473_p5, %p10467_p2 }
  0x4d   :  { %10477 = shalt.err (!%p10474_p6)
}
  0x4e   :  { %94 = dma.hbm_to_vmem [thread:$0]  %s12759_s6, 16, %s92_s11, [#allocation12]  }
  0x4f   :  { %10498 = dma.done.wait [#allocation3], 8192  }
  0x50   :  { %10499 = vsyncadd [#allocation3], 4294959104 }
  0x51   :  { %10500 = dma.done.wait [#allocation6], 65664  }
  0x52   :  { %10501 = vsyncadd [#allocation6], 4294901632 }
  0x53   :  { %10502 = dma.done.wait [#allocation9], 32832  }
  0x54   :  { %10503 = vsyncadd [#allocation9], 4294934464 }
  0x55   :  { %10504 = dma.done.wait [#allocation12], 4112  }
  0x56   :  { %10505 = vsyncadd [#allocation12], 4294963184  ;;  %v237_v0 = vld [vmem:[#allocation5 + $0x1c0] sm:$0xff]  ;;  %v10599_v59 = vld [vmem:[#allocation2 + $0x8] sm:$0xff]  ;;  %s10521_s4 = smov [#allocation14]  }
  0x57   :  { %v241_v1 = vld [vmem:[#allocation5 + $0x1e0] sm:$0xff]  ;;  %v10601_v60 = vld [vmem:[#allocation2 + $0x28] sm:$0xff]  ;;  %s8830_s6 = sshll.u32 %s10521_s4, 4  ;;  %s8831_s6 = int_to_ptr.vmem [resolvable:$true] %s8830_s6 }
  0x58   :  { %v365_v2 = vld [vmem:[#allocation5 + $0x5c0] sm:$0xff]  ;;  %v8966_v3 = vcombine.high %v237_v0, %v241_v1  ;;  %v8965_v5 = vcombine.low %v237_v0, %v241_v1  ;;  %v10605_v63 = vcombine.high %v10599_v59, %v10601_v60  ;;  %s10478_s15 = scalar_lea.vmem %s8831_s6, 2048  ;;  %p10483_p8 = scmp.lt.s32.totalorder %s8831_s6, %s8831_s6 }
  0x59   :  { %v369_v4 = vld [vmem:[#allocation5 + $0x5e0] sm:$0xff]  ;;  %p10479_p7 = scmp.ne.s32.totalorder %s8831_s6, %s10478_s15  ;;  %p10484_p9 = scmp.lt.s32.totalorder %s10478_s15, %s10478_s15 }
  0x5a   :  { %v229_v6 = vld [vmem:[#allocation5 + $0x180] sm:$0xff]  ;;  %v9094_v8 = vcombine.high %v365_v2, %v369_v4  ;;  %v9093_v9 = vcombine.low %v365_v2, %v369_v4  ;;  %3615 = vmatprep.subr.bf16.mxu0 %v8966_v3  ;;  %12919 = vst [vmem:[#allocation21_spill] sm:$0xff] %v10605_v63  ;;  %3760 = vmatprep.mubr.bf16.mxu1 %v10605_v63 }
  0x5b   :  { %v233_v7 = vld [vmem:[#allocation5 + $0x1a0] sm:$0xff]  ;;  %3616 = vmatpush1.bf16.msra.mxu0 %v8965_v5  ;;  %p10485_p10 = por %p10484_p9, %p10483_p8 }
  0x5c   :  { %v8958_v10 = vcombine.high %v229_v6, %v233_v7  ;;  %v357_v11 = vld [vmem:[#allocation5 + $0x580] sm:$0xff]  ;;  %3728 = vmatprep.subr.bf16.mxu1 %v9094_v8  ;;  %v8957_v18 = vcombine.low %v229_v6, %v233_v7 }
  0x5d   :  { %v361_v12 = vld [vmem:[#allocation5 + $0x5a0] sm:$0xff]  ;;  %3729 = vmatpush1.bf16.msra.mxu1 %v9093_v9  ;;  %p10486_p11 = pnand %p10485_p10, %p10479_p7 }
  0x5e   :  { %v221_v13 = vld [vmem:[#allocation5 + $0x140] sm:$0xff]  ;;  %v9086_v14 = vcombine.high %v357_v11, %v361_v12  ;;  %3617 = vmatprep.subr.bf16.mxu0 %v8958_v10  ;;  %v9085_v19 = vcombine.low %v357_v11, %v361_v12 }
  0x5f   :  { %v225_v15 = vld [vmem:[#allocation5 + $0x160] sm:$0xff]  ;;  %3618 = vmatpush1.bf16.msra.mxu0 %v8957_v18 }
  0x60   :  { %v349_v16 = vld [vmem:[#allocation5 + $0x540] sm:$0xff]  ;;  %v8950_v20 = vcombine.high %v221_v13, %v225_v15  ;;  %3730 = vmatprep.subr.bf16.mxu1 %v9086_v14  ;;  %v8949_v26 = vcombine.low %v221_v13, %v225_v15 }
  0x61   :  { %v353_v17 = vld [vmem:[#allocation5 + $0x560] sm:$0xff]  ;;  %3731 = vmatpush1.bf16.msra.mxu1 %v9085_v19 }
  0x62   :  { %v9078_v21 = vcombine.high %v349_v16, %v353_v17  ;;  %v213_v22 = vld [vmem:[#allocation5 + $0x100] sm:$0xff]  ;;  %3619 = vmatprep.subr.bf16.mxu0 %v8950_v20  ;;  %v9077_v27 = vcombine.low %v349_v16, %v353_v17 }
  0x63   :  { %v217_v23 = vld [vmem:[#allocation5 + $0x120] sm:$0xff]  ;;  %3620 = vmatpush1.bf16.msra.mxu0 %v8949_v26 }
  0x64   :  { %v341_v24 = vld [vmem:[#allocation5 + $0x500] sm:$0xff]  ;;  %v8942_v28 = vcombine.high %v213_v22, %v217_v23  ;;  %3732 = vmatprep.subr.bf16.mxu1 %v9078_v21  ;;  %v8941_v34 = vcombine.low %v213_v22, %v217_v23 }
  0x65   :  { %v345_v25 = vld [vmem:[#allocation5 + $0x520] sm:$0xff]  ;;  %3733 = vmatpush1.bf16.msra.mxu1 %v9077_v27 }
  0x66   :  { %v9070_v29 = vcombine.high %v341_v24, %v345_v25  ;;  %v205_v30 = vld [vmem:[#allocation5 + $0xc0] sm:$0xff]  ;;  %3621 = vmatprep.subr.bf16.mxu0 %v8942_v28  ;;  %v9069_v35 = vcombine.low %v341_v24, %v345_v25 }
  0x67   :  { %v209_v31 = vld [vmem:[#allocation5 + $0xe0] sm:$0xff]  ;;  %3622 = vmatpush1.bf16.msra.mxu0 %v8941_v34 }
  0x68   :  { %v333_v32 = vld [vmem:[#allocation5 + $0x4c0] sm:$0xff]  ;;  %v8934_v36 = vcombine.high %v205_v30, %v209_v31  ;;  %3734 = vmatprep.subr.bf16.mxu1 %v9070_v29  ;;  %v8933_v42 = vcombine.low %v205_v30, %v209_v31 }
  0x69   :  { %v337_v33 = vld [vmem:[#allocation5 + $0x4e0] sm:$0xff]  ;;  %3735 = vmatpush1.bf16.msra.mxu1 %v9069_v35 }
  0x6a   :  { %v9062_v37 = vcombine.high %v333_v32, %v337_v33  ;;  %v197_v38 = vld [vmem:[#allocation5 + $0x80] sm:$0xff]  ;;  %3623 = vmatprep.subr.bf16.mxu0 %v8934_v36  ;;  %v9061_v43 = vcombine.low %v333_v32, %v337_v33 }
  0x6b   :  { %v201_v39 = vld [vmem:[#allocation5 + $0xa0] sm:$0xff]  ;;  %3624 = vmatpush1.bf16.msra.mxu0 %v8933_v42 }
  0x6c   :  { %v325_v40 = vld [vmem:[#allocation5 + $0x480] sm:$0xff]  ;;  %v8926_v44 = vcombine.high %v197_v38, %v201_v39  ;;  %3736 = vmatprep.subr.bf16.mxu1 %v9062_v37  ;;  %v8925_v50 = vcombine.low %v197_v38, %v201_v39 }
  0x6d   :  { %v329_v41 = vld [vmem:[#allocation5 + $0x4a0] sm:$0xff]  ;;  %3737 = vmatpush1.bf16.msra.mxu1 %v9061_v43 }
  0x6e   :  { %v9054_v45 = vcombine.high %v325_v40, %v329_v41  ;;  %v189_v46 = vld [vmem:[#allocation5 + $0x40] sm:$0xff]  ;;  %3625 = vmatprep.subr.bf16.mxu0 %v8926_v44  ;;  %v9053_v51 = vcombine.low %v325_v40, %v329_v41 }
  0x6f   :  { %v193_v47 = vld [vmem:[#allocation5 + $0x60] sm:$0xff]  ;;  %3626 = vmatpush1.bf16.msra.mxu0 %v8925_v50 }
  0x70   :  { %v317_v48 = vld [vmem:[#allocation5 + $0x440] sm:$0xff]  ;;  %v8918_v52 = vcombine.high %v189_v46, %v193_v47  ;;  %3738 = vmatprep.subr.bf16.mxu1 %v9054_v45  ;;  %v8917_v0 = vcombine.low %v189_v46, %v193_v47 }
  0x71   :  { %v321_v49 = vld [vmem:[#allocation5 + $0x460] sm:$0xff]  ;;  %3739 = vmatpush1.bf16.msra.mxu1 %v9053_v51 }
  0x72   :  { %v181_v53 = vld [vmem:[#allocation5] sm:$0xff]  ;;  %v9046_v56 = vcombine.high %v317_v48, %v321_v49  ;;  %3627 = vmatprep.subr.bf16.mxu0 %v8918_v52  ;;  %v9045_v1 = vcombine.low %v317_v48, %v321_v49 }
  0x73   :  { %v10591_v54 = vld [vmem:[#allocation2] sm:$0xff]  ;;  %3628 = vmatpush1.bf16.msra.mxu0 %v8917_v0 }
  0x74   :  { %v10593_v55 = vld [vmem:[#allocation2 + $0x20] sm:$0xff]  ;;  %3740 = vmatprep.subr.bf16.mxu1 %v9046_v56 }
  0x75   :  { %v185_v57 = vld [vmem:[#allocation5 + $0x20] sm:$0xff]  ;;  %v10597_v58 = vcombine.high %v10591_v54, %v10593_v55  ;;  %3741 = vmatpush1.bf16.msra.mxu1 %v9045_v1 }
  0x76   :  { %v309_v61 = vld [vmem:[#allocation5 + $0x400] sm:$0xff]  ;;  %v8910_v2 = vcombine.high %v181_v53, %v185_v57  ;;  %v8909_v8 = vcombine.low %v181_v53, %v185_v57 }
  0x77   :  { %12918 = vst [vmem:[#allocation20_spill] sm:$0xff] %v10597_v58  ;;  %v313_v62 = vld [vmem:[#allocation5 + $0x420] sm:$0xff]  ;;  %3647 = vmatprep.mubr.bf16.mxu0 %v10597_v58 }
  0x78   :  { %v9038_v3 = vcombine.high %v309_v61, %v313_v62  ;;  %v301_v4 = vld [vmem:[#allocation5 + $0x3c0] sm:$0xff]  ;;  %3629 = vmatprep.subr.bf16.mxu0 %v8910_v2  ;;  %v9037_v9 = vcombine.low %v309_v61, %v313_v62 }
  0x79   :  { %v305_v5 = vld [vmem:[#allocation5 + $0x3e0] sm:$0xff]  ;;  %3630 = vmatpush1.bf16.msra.mxu0 %v8909_v8 }
  0x7a   :  { %v429_v6 = vld [vmem:[#allocation5 + $0x7c0] sm:$0xff]  ;;  %v9030_v10 = vcombine.high %v301_v4, %v305_v5  ;;  %3742 = vmatprep.subr.bf16.mxu1 %v9038_v3  ;;  %v9029_v16 = vcombine.low %v301_v4, %v305_v5 }
  0x7b   :  { %v433_v7 = vld [vmem:[#allocation5 + $0x7e0] sm:$0xff]  ;;  %3743 = vmatpush1.bf16.msra.mxu1 %v9037_v9 }
  0x7c   :  { %v9158_v11 = vcombine.high %v429_v6, %v433_v7  ;;  %v293_v12 = vld [vmem:[#allocation5 + $0x380] sm:$0xff]  ;;  %3631 = vmatprep.subr.bf16.mxu0 %v9030_v10  ;;  %v9157_v17 = vcombine.low %v429_v6, %v433_v7 }
  0x7d   :  { %v297_v13 = vld [vmem:[#allocation5 + $0x3a0] sm:$0xff]  ;;  %3632 = vmatpush2.bf16.msra.mxu0 %v9029_v16 }
  0x7e   :  { %v421_v14 = vld [vmem:[#allocation5 + $0x780] sm:$0xff]  ;;  %v9022_v18 = vcombine.high %v293_v12, %v297_v13  ;;  %3744 = vmatprep.subr.bf16.mxu1 %v9158_v11  ;;  %v9021_v24 = vcombine.low %v293_v12, %v297_v13 }
  0x7f   :  { %v425_v15 = vld [vmem:[#allocation5 + $0x7a0] sm:$0xff]  ;;  %3745 = vmatpush2.bf16.msra.mxu1 %v9157_v17 }
  0x80   :  { %v9150_v19 = vcombine.high %v421_v14, %v425_v15  ;;  %v285_v20 = vld [vmem:[#allocation5 + $0x340] sm:$0xff]  ;;  %3633 = vmatprep.subr.bf16.mxu0 %v9022_v18  ;;  %v9149_v25 = vcombine.low %v421_v14, %v425_v15 }
  0x81   :  { %v289_v21 = vld [vmem:[#allocation5 + $0x360] sm:$0xff]  ;;  %3634 = vmatpush2.bf16.msra.mxu0 %v9021_v24 }
  0x82   :  { %v413_v22 = vld [vmem:[#allocation5 + $0x740] sm:$0xff]  ;;  %v9014_v26 = vcombine.high %v285_v20, %v289_v21  ;;  %3746 = vmatprep.subr.bf16.mxu1 %v9150_v19  ;;  %v9013_v32 = vcombine.low %v285_v20, %v289_v21  ;;  %v10611_v21 = vcombine.low %v10591_v54, %v10593_v55 }
  0x83   :  { %v417_v23 = vld [vmem:[#allocation5 + $0x760] sm:$0xff]  ;;  %3747 = vmatpush2.bf16.msra.mxu1 %v9149_v25  ;;  %v10615_v25 = vcombine.low %v10599_v59, %v10601_v60 }
  0x84   :  { %v9142_v27 = vcombine.high %v413_v22, %v417_v23  ;;  %v277_v28 = vld [vmem:[#allocation5 + $0x300] sm:$0xff]  ;;  %3635 = vmatprep.subr.bf16.mxu0 %v9014_v26  ;;  %v9141_v33 = vcombine.low %v413_v22, %v417_v23 }
  0x85   :  { %v281_v29 = vld [vmem:[#allocation5 + $0x320] sm:$0xff]  ;;  %3636 = vmatpush2.bf16.msra.mxu0 %v9013_v32 }
  0x86   :  { %v405_v30 = vld [vmem:[#allocation5 + $0x700] sm:$0xff]  ;;  %v9006_v34 = vcombine.high %v277_v28, %v281_v29  ;;  %3748 = vmatprep.subr.bf16.mxu1 %v9142_v27  ;;  %v9005_v40 = vcombine.low %v277_v28, %v281_v29  ;;  %v126_v27 = vld [vmem:[#allocation2 + $0x48] sm:$0xff] }
  0x87   :  { %v409_v31 = vld [vmem:[#allocation5 + $0x720] sm:$0xff]  ;;  %3749 = vmatpush2.bf16.msra.mxu1 %v9141_v33  ;;  %v130_v28 = vld [vmem:[#allocation2 + $0x68] sm:$0xff] }
  0x88   :  { %v9134_v35 = vcombine.high %v405_v30, %v409_v31  ;;  %v269_v36 = vld [vmem:[#allocation5 + $0x2c0] sm:$0xff]  ;;  %3637 = vmatprep.subr.bf16.mxu0 %v9006_v34  ;;  %v9133_v41 = vcombine.low %v405_v30, %v409_v31  ;;  %v10620_v33 = vcombine.high %v126_v27, %v130_v28 }
  0x89   :  { %v273_v37 = vld [vmem:[#allocation5 + $0x2e0] sm:$0xff]  ;;  %3638 = vmatpush2.bf16.msra.mxu0 %v9005_v40 }
  0x8a   :  { %v397_v38 = vld [vmem:[#allocation5 + $0x6c0] sm:$0xff]  ;;  %v8998_v42 = vcombine.high %v269_v36, %v273_v37  ;;  %3750 = vmatprep.subr.bf16.mxu1 %v9134_v35  ;;  %v8997_v48 = vcombine.low %v269_v36, %v273_v37  ;;  %12920 = vst [vmem:[#allocation22_spill] sm:$0xff] %v10620_v33 }
  0x8b   :  { %v401_v39 = vld [vmem:[#allocation5 + $0x6e0] sm:$0xff]  ;;  %3751 = vmatpush2.bf16.msra.mxu1 %v9133_v41 }
  0x8c   :  { %v9126_v43 = vcombine.high %v397_v38, %v401_v39  ;;  %v261_v44 = vld [vmem:[#allocation5 + $0x280] sm:$0xff]  ;;  %3639 = vmatprep.subr.bf16.mxu0 %v8998_v42  ;;  %v9125_v49 = vcombine.low %v397_v38, %v401_v39 }
  0x8d   :  { %v265_v45 = vld [vmem:[#allocation5 + $0x2a0] sm:$0xff]  ;;  %3640 = vmatpush2.bf16.msra.mxu0 %v8997_v48  ;;  %v138_v48 = vld [vmem:[#allocation2 + $0xa8] sm:$0xff] }
  0x8e   :  { %v389_v46 = vld [vmem:[#allocation5 + $0x680] sm:$0xff]  ;;  %v8990_v50 = vcombine.high %v261_v44, %v265_v45  ;;  %3752 = vmatprep.subr.bf16.mxu1 %v9126_v43  ;;  %v8989_v61 = vcombine.low %v261_v44, %v265_v45  ;;  %v10627_v45 = vcombine.low %v126_v27, %v130_v28 }
  0x8f   :  { %v393_v47 = vld [vmem:[#allocation5 + $0x6a0] sm:$0xff]  ;;  %3753 = vmatpush2.bf16.msra.mxu1 %v9125_v49 }
  0x90   :  { %v9118_v51 = vcombine.high %v389_v46, %v393_v47  ;;  %v253_v52 = vld [vmem:[#allocation5 + $0x240] sm:$0xff]  ;;  %3641 = vmatprep.subr.bf16.mxu0 %v8990_v50  ;;  %v9117_v62 = vcombine.low %v389_v46, %v393_v47  ;;  %v134_v47 = vld [vmem:[#allocation2 + $0x88] sm:$0xff] }
  0x91   :  { %v257_v53 = vld [vmem:[#allocation5 + $0x260] sm:$0xff]  ;;  %3642 = vmatpush2.bf16.msra.mxu0 %v8989_v61 }
  0x92   :  { %v381_v56 = vld [vmem:[#allocation5 + $0x640] sm:$0xff]  ;;  %v8982_v0 = vcombine.high %v253_v52, %v257_v53  ;;  %3754 = vmatprep.subr.bf16.mxu1 %v9118_v51  ;;  %v8981_v6 = vcombine.low %v253_v52, %v257_v53 }
  0x93   :  { %v385_v57 = vld [vmem:[#allocation5 + $0x660] sm:$0xff]  ;;  %3755 = vmatpush2.bf16.msra.mxu1 %v9117_v62 }
  0x94   :  { %v9110_v1 = vcombine.high %v381_v56, %v385_v57  ;;  %v245_v2 = vld [vmem:[#allocation5 + $0x200] sm:$0xff]  ;;  %3643 = vmatprep.subr.bf16.mxu0 %v8982_v0  ;;  %v9109_v7 = vcombine.low %v381_v56, %v385_v57  ;;  %v10632_v57 = vcombine.high %v134_v47, %v138_v48 }
  0x95   :  { %v249_v3 = vld [vmem:[#allocation5 + $0x220] sm:$0xff]  ;;  %3644 = vmatpush2.bf16.msra.mxu0 %v8981_v6 }
  0x96   :  { %v373_v4 = vld [vmem:[#allocation5 + $0x600] sm:$0xff]  ;;  %v8974_v8 = vcombine.high %v245_v2, %v249_v3  ;;  %3756 = vmatprep.subr.bf16.mxu1 %v9110_v1  ;;  %v8973_v14 = vcombine.low %v245_v2, %v249_v3 }
  0x97   :  { %v377_v5 = vld [vmem:[#allocation5 + $0x620] sm:$0xff]  ;;  %3757 = vmatpush2.bf16.msra.mxu1 %v9109_v7 }
  0x98   :  { %v9102_v9 = vcombine.high %v373_v4, %v377_v5  ;;  %v493_v10 = vld [vmem:[#allocation5 + $0x9c0] sm:$0xff]  ;;  %3645 = vmatprep.subr.bf16.mxu0 %v8974_v8  ;;  %v9101_v15 = vcombine.low %v373_v4, %v377_v5 }
  0x99   :  { %v497_v11 = vld [vmem:[#allocation5 + $0x9e0] sm:$0xff]  ;;  %3646 = vmatpush2.bf16.msra.mxu0 %v8973_v14  ;;  %v146_v14 = vld [vmem:[#allocation2 + $0xe8] sm:$0xff] }
  0x9a   :  { %v621_v12 = vld [vmem:[#allocation5 + $0xdc0] sm:$0xff]  ;;  %v9222_v16 = vcombine.high %v493_v10, %v497_v11  ;;  %3758 = vmatprep.subr.bf16.mxu1 %v9102_v9  ;;  %v9221_v26 = vcombine.low %v493_v10, %v497_v11  ;;  %v10639_v11 = vcombine.low %v134_v47, %v138_v48 }
  0x9b   :  { %v625_v13 = vld [vmem:[#allocation5 + $0xde0] sm:$0xff]  ;;  %3759 = vmatpush2.bf16.msra.mxu1 %v9101_v15 }
  0x9c   :  { %v9350_v17 = vcombine.high %v621_v12, %v625_v13  ;;  %v485_v18 = vld [vmem:[#allocation5 + $0x980] sm:$0xff]  ;;  %3841 = vmatprep.subr.bf16.mxu0 %v9222_v16  ;;  %v9349_v29 = vcombine.low %v621_v12, %v625_v13  ;;  %3648 = vmatmul.mubr.bf16.vlgmr.msra.gmra.mxu0 %v10611_v21  ;;  %v142_v13 = vld [vmem:[#allocation2 + $0xc8] sm:$0xff] }
  0x9d   :  { %v489_v19 = vld [vmem:[#allocation5 + $0x9a0] sm:$0xff]  ;;  %3842 = vmatpush1.bf16.msra.mxu0 %v9221_v26 }
  0x9e   :  { %v613_v20 = vld [vmem:[#allocation5 + $0xd80] sm:$0xff]  ;;  %v9214_v30 = vcombine.high %v485_v18, %v489_v19  ;;  %3954 = vmatprep.subr.bf16.mxu1 %v9350_v17  ;;  %3761 = vmatmul.mubr.bf16.vlgmr.msra.gmra.mxu1 %v10615_v25  ;;  %v9213_v60 = vcombine.low %v485_v18, %v489_v19 }
  0x9f   :  { %v617_v22 = vld [vmem:[#allocation5 + $0xda0] sm:$0xff]  ;;  %3955 = vmatpush1.bf16.msra.mxu1 %v9349_v29  ;;  %3770 = vmatprep.mubr.bf16.mxu1 %v10620_v33 }
  0xa0   :  { %v125_v23 = vld [vmem:[#allocation2 + $0x40] sm:$0xff]  ;;  %v9342_v31 = vcombine.high %v613_v20, %v617_v22  ;;  %3843 = vmatprep.subr.bf16.mxu0 %v9214_v30  ;;  %v9341_v35 = vcombine.low %v613_v20, %v617_v22  ;;  %v10644_v22 = vcombine.high %v142_v13, %v146_v14 }
  0xa1   :  { %v129_v24 = vld [vmem:[#allocation2 + $0x60] sm:$0xff]  ;;  %3844 = vmatpush1.bf16.msra.mxu0 %v9213_v60 }
  0xa2   :  { %v10617_v32 = vcombine.high %v125_v23, %v129_v24  ;;  %v477_v54 = vld [vmem:[#allocation5 + $0x940] sm:$0xff]  ;;  %3956 = vmatprep.subr.bf16.mxu1 %v9342_v31  ;;  %v10625_v41 = vcombine.low %v125_v23, %v129_v24 }
  0xa3   :  { %v481_v55 = vld [vmem:[#allocation5 + $0x960] sm:$0xff]  ;;  %3957 = vmatpush1.bf16.msra.mxu1 %v9341_v35  ;;  %v10651_v35 = vcombine.low %v142_v13, %v146_v14 }
  0xa4   :  { %v605_v34 = vld [vmem:[#allocation5 + $0xd40] sm:$0xff]  ;;  %v9206_v36 = vcombine.high %v477_v54, %v481_v55  ;;  %3657 = vmatprep.mubr.bf16.mxu0 %v10617_v32  ;;  %v9205_v46 = vcombine.low %v477_v54, %v481_v55 }
  0xa5   :  { %v609_v59 = vld [vmem:[#allocation5 + $0xd60] sm:$0xff]  ;;  %3658 = vmatmul.mubr.bf16.gmra.mxu0 %v10625_v41  ;;  %12921 = vst [vmem:[#allocation23_spill] sm:$0xff] %v10651_v35 }
  0xa6   :  { %v9334_v37 = vcombine.high %v605_v34, %v609_v59  ;;  %v469_v38 = vld [vmem:[#allocation5 + $0x900] sm:$0xff]  ;;  %3845 = vmatprep.subr.bf16.mxu0 %v9206_v36  ;;  %v9333_v49 = vcombine.low %v605_v34, %v609_v59  ;;  %3771 = vmatmul.mubr.bf16.gmra.mxu1 %v10627_v45 }
  0xa7   :  { %v473_v39 = vld [vmem:[#allocation5 + $0x920] sm:$0xff]  ;;  %3846 = vmatpush1.bf16.msra.mxu0 %v9205_v46  ;;  %3780 = vmatprep.mubr.bf16.mxu1 %v10632_v57 }
  0xa8   :  { %v597_v40 = vld [vmem:[#allocation5 + $0xd00] sm:$0xff]  ;;  %v9198_v50 = vcombine.high %v469_v38, %v473_v39  ;;  %3958 = vmatprep.subr.bf16.mxu1 %v9334_v37  ;;  %v9197_v0 = vcombine.low %v469_v38, %v473_v39  ;;  %v150_v37 = vld [vmem:[#allocation2 + $0x108] sm:$0xff] }
  0xa9   :  { %v601_v42 = vld [vmem:[#allocation5 + $0xd20] sm:$0xff]  ;;  %3959 = vmatpush1.bf16.msra.mxu1 %v9333_v49  ;;  %v154_v38 = vld [vmem:[#allocation2 + $0x128] sm:$0xff] }
  0xaa   :  { %v133_v43 = vld [vmem:[#allocation2 + $0x80] sm:$0xff]  ;;  %v9326_v51 = vcombine.high %v597_v40, %v601_v42  ;;  %3847 = vmatprep.subr.bf16.mxu0 %v9198_v50  ;;  %v9325_v1 = vcombine.low %v597_v40, %v601_v42  ;;  %v10656_v47 = vcombine.high %v150_v37, %v154_v38 }
  0xab   :  { %v137_v44 = vld [vmem:[#allocation2 + $0xa0] sm:$0xff]  ;;  %3848 = vmatpush1.bf16.msra.mxu0 %v9197_v0 }
  0xac   :  { %v10629_v52 = vcombine.high %v133_v43, %v137_v44  ;;  %v461_v53 = vld [vmem:[#allocation5 + $0x8c0] sm:$0xff]  ;;  %3960 = vmatprep.subr.bf16.mxu1 %v9326_v51  ;;  %v10637_v7 = vcombine.low %v133_v43, %v137_v44  ;;  %12923 = vst [vmem:[#allocation25_spill] sm:$0xff] %v10656_v47 }
  0xad   :  { %v465_v56 = vld [vmem:[#allocation5 + $0x8e0] sm:$0xff]  ;;  %3961 = vmatpush1.bf16.msra.mxu1 %v9325_v1 }
  0xae   :  { %v589_v61 = vld [vmem:[#allocation5 + $0xcc0] sm:$0xff]  ;;  %v9190_v2 = vcombine.high %v461_v53, %v465_v56  ;;  %3667 = vmatprep.mubr.bf16.mxu0 %v10629_v52  ;;  %v9189_v12 = vcombine.low %v461_v53, %v465_v56  ;;  %3781 = vmatmul.mubr.bf16.gmra.mxu1 %v10639_v11 }
  0xaf   :  { %v593_v62 = vld [vmem:[#allocation5 + $0xce0] sm:$0xff]  ;;  %3668 = vmatmul.mubr.bf16.gmra.mxu0 %v10637_v7  ;;  %3790 = vmatprep.mubr.bf16.mxu1 %v10644_v22 }
  0xb0   :  { %v9318_v3 = vcombine.high %v589_v61, %v593_v62  ;;  %v453_v4 = vld [vmem:[#allocation5 + $0x880] sm:$0xff]  ;;  %3849 = vmatprep.subr.bf16.mxu0 %v9190_v2  ;;  %v9317_v15 = vcombine.low %v589_v61, %v593_v62 }
  0xb1   :  { %v457_v5 = vld [vmem:[#allocation5 + $0x8a0] sm:$0xff]  ;;  %3850 = vmatpush1.bf16.msra.mxu0 %v9189_v12 }
  0xb2   :  { %v581_v6 = vld [vmem:[#allocation5 + $0xc80] sm:$0xff]  ;;  %v9182_v16 = vcombine.high %v453_v4, %v457_v5  ;;  %3962 = vmatprep.subr.bf16.mxu1 %v9318_v3  ;;  %v9181_v26 = vcombine.low %v453_v4, %v457_v5  ;;  %v158_v5 = vld [vmem:[#allocation2 + $0x148] sm:$0xff] }
  0xb3   :  { %v585_v8 = vld [vmem:[#allocation5 + $0xca0] sm:$0xff]  ;;  %3963 = vmatpush1.bf16.msra.mxu1 %v9317_v15 }
  0xb4   :  { %v141_v9 = vld [vmem:[#allocation2 + $0xc0] sm:$0xff]  ;;  %v9310_v17 = vcombine.high %v581_v6, %v585_v8  ;;  %3851 = vmatprep.subr.bf16.mxu0 %v9182_v16  ;;  %v9309_v27 = vcombine.low %v581_v6, %v585_v8  ;;  %v162_v6 = vld [vmem:[#allocation2 + $0x168] sm:$0xff]  ;;  %v10663_v8 = vcombine.low %v150_v37, %v154_v38 }
  0xb5   :  { %v145_v10 = vld [vmem:[#allocation2 + $0xe0] sm:$0xff]  ;;  %3852 = vmatpush1.bf16.msra.mxu0 %v9181_v26  ;;  %v10675_v37 = vcombine.low %v158_v5, %v162_v6 }
  0xb6   :  { %v10641_v18 = vcombine.high %v141_v9, %v145_v10  ;;  %v445_v19 = vld [vmem:[#allocation5 + $0x840] sm:$0xff]  ;;  %3964 = vmatprep.subr.bf16.mxu1 %v9310_v17  ;;  %v10649_v55 = vcombine.low %v141_v9, %v145_v10  ;;  %3791 = vmatmul.mubr.bf16.gmra.mxu1 %v10651_v35  ;;  %12925 = vst [vmem:[#allocation27_spill] sm:$0xff] %v10663_v8 }
  0xb7   :  { %v449_v20 = vld [vmem:[#allocation5 + $0x860] sm:$0xff]  ;;  %3965 = vmatpush1.bf16.msra.mxu1 %v9309_v27  ;;  %3800 = vmatprep.mubr.bf16.mxu1 %v10656_v47  ;;  %12929 = vst [vmem:[#allocation31_spill] sm:$0xff] %v10675_v37 }
  0xb8   :  { %v573_v23 = vld [vmem:[#allocation5 + $0xc40] sm:$0xff]  ;;  %v9174_v28 = vcombine.high %v445_v19, %v449_v20  ;;  %3677 = vmatprep.mubr.bf16.mxu0 %v10641_v18  ;;  %v9173_v36 = vcombine.low %v445_v19, %v449_v20  ;;  %v10668_v20 = vcombine.high %v158_v5, %v162_v6 }
  0xb9   :  { %v577_v24 = vld [vmem:[#allocation5 + $0xc60] sm:$0xff]  ;;  %3678 = vmatmul.mubr.bf16.gmra.mxu0 %v10649_v55 }
  0xba   :  { %v9302_v29 = vcombine.high %v573_v23, %v577_v24  ;;  %v437_v30 = vld [vmem:[#allocation5 + $0x800] sm:$0xff]  ;;  %3853 = vmatprep.subr.bf16.mxu0 %v9174_v28  ;;  %v9301_v39 = vcombine.low %v573_v23, %v577_v24  ;;  %12927 = vst [vmem:[#allocation29_spill] sm:$0xff] %v10668_v20 }
  0xbb   :  { %v441_v31 = vld [vmem:[#allocation5 + $0x820] sm:$0xff]  ;;  %3854 = vmatpush1.bf16.msra.mxu0 %v9173_v36 }
  0xbc   :  { %v565_v54 = vld [vmem:[#allocation5 + $0xc00] sm:$0xff]  ;;  %v9166_v40 = vcombine.high %v437_v30, %v441_v31  ;;  %3966 = vmatprep.subr.bf16.mxu1 %v9302_v29  ;;  %v9165_v50 = vcombine.low %v437_v30, %v441_v31 }
  0xbd   :  { %v569_v34 = vld [vmem:[#allocation5 + $0xc20] sm:$0xff]  ;;  %3967 = vmatpush1.bf16.msra.mxu1 %v9301_v39 }
  0xbe   :  { %v149_v59 = vld [vmem:[#allocation2 + $0x100] sm:$0xff]  ;;  %v9294_v42 = vcombine.high %v565_v54, %v569_v34  ;;  %3855 = vmatprep.subr.bf16.mxu0 %v9166_v40  ;;  %v9293_v51 = vcombine.low %v565_v54, %v569_v34  ;;  %3801 = vmatmul.mubr.bf16.gmra.mxu1 %v10663_v8 }
  0xbf   :  { %v153_v60 = vld [vmem:[#allocation2 + $0x120] sm:$0xff]  ;;  %3856 = vmatpush1.bf16.msra.mxu0 %v9165_v50  ;;  %3810 = vmatprep.mubr.bf16.mxu1 %v10668_v20 }
  0xc0   :  { %v10653_v43 = vcombine.high %v149_v59, %v153_v60  ;;  %v557_v44 = vld [vmem:[#allocation5 + $0xbc0] sm:$0xff]  ;;  %3968 = vmatprep.subr.bf16.mxu1 %v9294_v42  ;;  %v10661_v3 = vcombine.low %v149_v59, %v153_v60  ;;  %v166_v59 = vld [vmem:[#allocation2 + $0x188] sm:$0xff] }
  0xc1   :  { %v561_v46 = vld [vmem:[#allocation5 + $0xbe0] sm:$0xff]  ;;  %3969 = vmatpush1.bf16.msra.mxu1 %v9293_v51  ;;  %v170_v60 = vld [vmem:[#allocation2 + $0x1a8] sm:$0xff] }
  0xc2   :  { %12922 = vst [vmem:[#allocation24_spill] sm:$0xff] %v10653_v43  ;;  %v685_v48 = vld [vmem:[#allocation5 + $0xfc0] sm:$0xff]  ;;  %v9286_v53 = vcombine.high %v557_v44, %v561_v46  ;;  %3687 = vmatprep.mubr.bf16.mxu0 %v10653_v43  ;;  %12924 = vst [vmem:[#allocation26_spill] sm:$0xff] %v10661_v3  ;;  %v9285_v9 = vcombine.low %v557_v44, %v561_v46  ;;  %v10680_v51 = vcombine.high %v166_v59, %v170_v60 }
  0xc3   :  { %v689_v49 = vld [vmem:[#allocation5 + $0xfe0] sm:$0xff]  ;;  %3688 = vmatmul.mubr.bf16.gmra.mxu0 %v10661_v3 }
  0xc4   :  { %v549_v56 = vld [vmem:[#allocation5 + $0xb80] sm:$0xff]  ;;  %v9414_v62 = vcombine.high %v685_v48, %v689_v49  ;;  %3857 = vmatprep.subr.bf16.mxu0 %v9286_v53  ;;  %v9413_v10 = vcombine.low %v685_v48, %v689_v49  ;;  %12931 = vst [vmem:[#allocation33_spill] sm:$0xff] %v10680_v51 }
  0xc5   :  { %v553_v61 = vld [vmem:[#allocation5 + $0xba0] sm:$0xff]  ;;  %3858 = vmatpush2.bf16.msra.mxu0 %v9285_v9  ;;  %v174_v9 = vld [vmem:[#allocation2 + $0x1c8] sm:$0xff] }
  0xc6   :  { %v677_v0 = vld [vmem:[#allocation5 + $0xf80] sm:$0xff]  ;;  %v9278_v12 = vcombine.high %v549_v56, %v553_v61  ;;  %3970 = vmatprep.subr.bf16.mxu1 %v9414_v62  ;;  %v9277_v23 = vcombine.low %v549_v56, %v553_v61  ;;  %3811 = vmatmul.mubr.bf16.gmra.mxu1 %v10675_v37 }
  0xc7   :  { %v681_v1 = vld [vmem:[#allocation5 + $0xfa0] sm:$0xff]  ;;  %3971 = vmatpush2.bf16.msra.mxu1 %v9413_v10  ;;  %v178_v10 = vld [vmem:[#allocation2 + $0x1e8] sm:$0xff]  ;;  %3820 = vmatprep.mubr.bf16.mxu1 %v10680_v51 }
  0xc8   :  { %v157_v2 = vld [vmem:[#allocation2 + $0x140] sm:$0xff]  ;;  %v9406_v16 = vcombine.high %v677_v0, %v681_v1  ;;  %3859 = vmatprep.subr.bf16.mxu0 %v9278_v12  ;;  %v9405_v27 = vcombine.low %v677_v0, %v681_v1 }
  0xc9   :  { %v161_v4 = vld [vmem:[#allocation2 + $0x160] sm:$0xff]  ;;  %3860 = vmatpush2.bf16.msra.mxu0 %v9277_v23 }
  0xca   :  { %v541_v13 = vld [vmem:[#allocation5 + $0xb40] sm:$0xff]  ;;  %v10665_v17 = vcombine.high %v157_v2, %v161_v4  ;;  %3972 = vmatprep.subr.bf16.mxu1 %v9406_v16  ;;  %v10673_v36 = vcombine.low %v157_v2, %v161_v4 }
  0xcb   :  { %v545_v14 = vld [vmem:[#allocation5 + $0xb60] sm:$0xff]  ;;  %3973 = vmatpush2.bf16.msra.mxu1 %v9405_v27 }
  0xcc   :  { %v669_v15 = vld [vmem:[#allocation5 + $0xf40] sm:$0xff]  ;;  %12926 = vst [vmem:[#allocation28_spill] sm:$0xff] %v10665_v17  ;;  %v9270_v28 = vcombine.high %v541_v13, %v545_v14  ;;  %3697 = vmatprep.mubr.bf16.mxu0 %v10665_v17  ;;  %12928 = vst [vmem:[#allocation30_spill] sm:$0xff] %v10673_v36  ;;  %v9269_v38 = vcombine.low %v541_v13, %v545_v14  ;;  %v10687_v13 = vcombine.low %v166_v59, %v170_v60 }
  0xcd   :  { %v673_v19 = vld [vmem:[#allocation5 + $0xf60] sm:$0xff]  ;;  %3698 = vmatmul.mubr.bf16.gmra.mxu0 %v10673_v36 }
  0xce   :  { %v533_v24 = vld [vmem:[#allocation5 + $0xb00] sm:$0xff]  ;;  %v9398_v34 = vcombine.high %v669_v15, %v673_v19  ;;  %3861 = vmatprep.subr.bf16.mxu0 %v9270_v28  ;;  %v9397_v39 = vcombine.low %v669_v15, %v673_v19  ;;  %12933 = vst [vmem:[#allocation35_spill] sm:$0xff] %v10687_v13  ;;  %3821 = vmatmul.mubr.bf16.gmra.mxu1 %v10687_v13 }
  0xcf   :  { %v537_v26 = vld [vmem:[#allocation5 + $0xb20] sm:$0xff]  ;;  %3862 = vmatpush2.bf16.msra.mxu0 %v9269_v38 }
  0xd0   :  { %v661_v29 = vld [vmem:[#allocation5 + $0xf00] sm:$0xff]  ;;  %v9262_v40 = vcombine.high %v533_v24, %v537_v26  ;;  %3974 = vmatprep.subr.bf16.mxu1 %v9398_v34  ;;  %v9261_v53 = vcombine.low %v533_v24, %v537_v26 }
  0xd1   :  { %v665_v30 = vld [vmem:[#allocation5 + $0xf20] sm:$0xff]  ;;  %3975 = vmatpush2.bf16.msra.mxu1 %v9397_v39  ;;  %v119_v39 = vld [vmem:[#allocation2 + $0x10] sm:$0xff] }
  0xd2   :  { %v165_v31 = vld [vmem:[#allocation2 + $0x180] sm:$0xff]  ;;  %v9390_v48 = vcombine.high %v661_v29, %v665_v30  ;;  %3863 = vmatprep.subr.bf16.mxu0 %v9262_v40  ;;  %v9389_v62 = vcombine.low %v661_v29, %v665_v30  ;;  %v10692_v29 = vcombine.high %v174_v9, %v178_v10  ;;  %v123_v40 = vld [vmem:[#allocation2 + $0x30] sm:$0xff] }
  0xd3   :  { %v169_v54 = vld [vmem:[#allocation2 + $0x1a0] sm:$0xff]  ;;  %3864 = vmatpush2.bf16.msra.mxu0 %v9261_v53 }
  0xd4   :  { %v525_v42 = vld [vmem:[#allocation5 + $0xac0] sm:$0xff]  ;;  %v10677_v49 = vcombine.high %v165_v31, %v169_v54  ;;  %3976 = vmatprep.subr.bf16.mxu1 %v9390_v48  ;;  %v10685_v12 = vcombine.low %v165_v31, %v169_v54  ;;  %12935 = vst [vmem:[#allocation37_spill] sm:$0xff] %v10692_v29  ;;  %3830 = vmatprep.mubr.bf16.mxu1 %v10692_v29 }
  0xd5   :  { %v529_v44 = vld [vmem:[#allocation5 + $0xae0] sm:$0xff]  ;;  %3977 = vmatpush2.bf16.msra.mxu1 %v9389_v62  ;;  %v238_v62 = vld [vmem:[#allocation5 + $0x1c8] sm:$0xff] }
  0xd6   :  { %v653_v46 = vld [vmem:[#allocation5 + $0xec0] sm:$0xff]  ;;  %12930 = vst [vmem:[#allocation32_spill] sm:$0xff] %v10677_v49  ;;  %v9254_v0 = vcombine.high %v525_v42, %v529_v44  ;;  %3707 = vmatprep.mubr.bf16.mxu0 %v10677_v49  ;;  %12932 = vst [vmem:[#allocation34_spill] sm:$0xff] %v10685_v12  ;;  %v9253_v14 = vcombine.low %v525_v42, %v529_v44  ;;  %v120_v44 = vld [vmem:[#allocation2 + $0x18] sm:$0xff] }
  0xd7   :  { %v657_v50 = vld [vmem:[#allocation5 + $0xee0] sm:$0xff]  ;;  %3708 = vmatmul.mubr.bf16.gmra.mxu0 %v10685_v12 }
  0xd8   :  { %v517_v56 = vld [vmem:[#allocation5 + $0xa80] sm:$0xff]  ;;  %v9382_v6 = vcombine.high %v653_v46, %v657_v50  ;;  %3865 = vmatprep.subr.bf16.mxu0 %v9254_v0  ;;  %v9381_v15 = vcombine.low %v653_v46, %v657_v50  ;;  %v124_v46 = vld [vmem:[#allocation2 + $0x38] sm:$0xff]  ;;  %v10699_v50 = vcombine.low %v174_v9, %v178_v10  ;;  %v242_v0 = vld [vmem:[#allocation5 + $0x1e8] sm:$0xff] }
  0xd9   :  { %v521_v61 = vld [vmem:[#allocation5 + $0xaa0] sm:$0xff]  ;;  %3866 = vmatpush2.bf16.msra.mxu0 %v9253_v14  ;;  %v370_v14 = vld [vmem:[#allocation5 + $0x5e8] sm:$0xff] }
  0xda   :  { %v645_v1 = vld [vmem:[#allocation5 + $0xe80] sm:$0xff]  ;;  %v9246_v16 = vcombine.high %v517_v56, %v521_v61  ;;  %3978 = vmatprep.subr.bf16.mxu1 %v9382_v6  ;;  %v9245_v30 = vcombine.low %v517_v56, %v521_v61  ;;  %12937 = vst [vmem:[#allocation39_spill] sm:$0xff] %v10699_v50  ;;  %v10701_v6 = vcombine.high %v119_v39, %v123_v40  ;;  %v230_v9 = vld [vmem:[#allocation5 + $0x188] sm:$0xff] }
  0xdb   :  { %v649_v2 = vld [vmem:[#allocation5 + $0xea0] sm:$0xff]  ;;  %3979 = vmatpush2.bf16.msra.mxu1 %v9381_v15  ;;  %v234_v10 = vld [vmem:[#allocation5 + $0x1a8] sm:$0xff] }
  0xdc   :  { %v173_v4 = vld [vmem:[#allocation2 + $0x1c0] sm:$0xff]  ;;  %v9374_v26 = vcombine.high %v645_v1, %v649_v2  ;;  %3867 = vmatprep.subr.bf16.mxu0 %v9246_v16  ;;  %v9373_v34 = vcombine.low %v645_v1, %v649_v2  ;;  %v366_v1 = vld [vmem:[#allocation5 + $0x5c8] sm:$0xff]  ;;  %12938 = vst [vmem:[#allocation40_spill] sm:$0xff] %v10701_v6  ;;  %3831 = vmatmul.mubr.bf16.gmra.mxu1 %v10699_v50 }
  0xdd   :  { %v177_v5 = vld [vmem:[#allocation2 + $0x1e0] sm:$0xff]  ;;  %3868 = vmatpush2.bf16.msra.mxu0 %v9245_v30  ;;  %v8968_v16 = vcombine.high %v238_v62, %v242_v0  ;;  %v128_v30 = vld [vmem:[#allocation2 + $0x58] sm:$0xff] }
  0xde   :  { %v509_v19 = vld [vmem:[#allocation5 + $0xa40] sm:$0xff]  ;;  %v10689_v27 = vcombine.high %v173_v4, %v177_v5  ;;  %3980 = vmatprep.subr.bf16.mxu1 %v9374_v26  ;;  %v10697_v48 = vcombine.low %v173_v4, %v177_v5  ;;  %v10704_v4 = vcombine.high %v120_v44, %v124_v46  ;;  %v131_v26 = vld [vmem:[#allocation2 + $0x70] sm:$0xff] }
  0xdf   :  { %v513_v23 = vld [vmem:[#allocation5 + $0xa60] sm:$0xff]  ;;  %3981 = vmatpush2.bf16.msra.mxu1 %v9373_v34  ;;  %v132_v34 = vld [vmem:[#allocation2 + $0x78] sm:$0xff] }
  0xe0   :  { %v637_v24 = vld [vmem:[#allocation5 + $0xe40] sm:$0xff]  ;;  %12934 = vst [vmem:[#allocation36_spill] sm:$0xff] %v10689_v27  ;;  %v9238_v59 = vcombine.high %v509_v19, %v513_v23  ;;  %3717 = vmatprep.mubr.bf16.mxu0 %v10689_v27  ;;  %12936 = vst [vmem:[#allocation38_spill] sm:$0xff] %v10697_v48  ;;  %v9237_v53 = vcombine.low %v509_v19, %v513_v23  ;;  %v358_v19 = vld [vmem:[#allocation5 + $0x588] sm:$0xff]  ;;  %3986 = vmatprep.mubr.bf16.mxu1 %v10704_v4 }
  0xe1   :  { %v641_v28 = vld [vmem:[#allocation5 + $0xe60] sm:$0xff]  ;;  %3718 = vmatmul.mubr.bf16.gmra.mxu0 %v10697_v48  ;;  %12939 = vst [vmem:[#allocation41_spill] sm:$0xff] %v10704_v4  ;;  %v362_v23 = vld [vmem:[#allocation5 + $0x5a8] sm:$0xff] }
  0xe2   :  { %v501_v31 = vld [vmem:[#allocation5 + $0xa00] sm:$0xff]  ;;  %v9366_v42 = vcombine.high %v637_v24, %v641_v28  ;;  %3869 = vmatprep.subr.bf16.mxu0 %v9238_v59  ;;  %v9365_v56 = vcombine.low %v637_v24, %v641_v28  ;;  %v127_v24 = vld [vmem:[#allocation2 + $0x50] sm:$0xff]  ;;  %3873 = vmatprep.mubr.bf16.mxu0 %v10701_v6  ;;  %v9096_v28 = vcombine.high %v366_v1, %v370_v14  ;;  %v354_v6 = vld [vmem:[#allocation5 + $0x568] sm:$0xff] }
  0xe3   :  { %v505_v54 = vld [vmem:[#allocation5 + $0xa20] sm:$0xff]  ;;  %3870 = vmatpush2.bf16.msra.mxu0 %v9237_v53  ;;  %v10708_v59 = vcombine.low %v119_v39, %v123_v40  ;;  %v226_v53 = vld [vmem:[#allocation5 + $0x168] sm:$0xff]  ;;  %v10716_v39 = vcombine.high %v128_v30, %v132_v34  ;;  %v8959_v40 = vcombine.low %v230_v9, %v234_v10 }
  0xe4   :  { %v629_v60 = vld [vmem:[#allocation5 + $0xe00] sm:$0xff]  ;;  %v9230_v61 = vcombine.high %v501_v31, %v505_v54  ;;  %3982 = vmatprep.subr.bf16.mxu1 %v9366_v42  ;;  %v9229_v5 = vcombine.low %v501_v31, %v505_v54  ;;  %v10711_v31 = vcombine.low %v120_v44, %v124_v46  ;;  %v8967_v54 = vcombine.low %v238_v62, %v242_v0  ;;  %v222_v42 = vld [vmem:[#allocation5 + $0x148] sm:$0xff] }
  0xe5   :  { %v633_v38 = vld [vmem:[#allocation5 + $0xe20] sm:$0xff]  ;;  %3983 = vmatpush2.bf16.msra.mxu1 %v9365_v56  ;;  %12940 = vst [vmem:[#allocation42_spill] sm:$0xff] %v10708_v59  ;;  %v9088_v56 = vcombine.high %v358_v19, %v362_v23  ;;  %12943 = vst [vmem:[#allocation45_spill] sm:$0xff] %v10716_v39  ;;  %v214_v44 = vld [vmem:[#allocation5 + $0x108] sm:$0xff]  ;;  %v9087_v62 = vcombine.low %v358_v19, %v362_v23  ;;  %v8952_v0 = vcombine.high %v222_v42, %v226_v53 }
  0xe6   :  { %v9358_v2 = vcombine.high %v629_v60, %v633_v38  ;;  %3871 = vmatprep.subr.bf16.mxu0 %v9230_v61  ;;  %v9357_v15 = vcombine.low %v629_v60, %v633_v38  ;;  %12941 = vst [vmem:[#allocation43_spill] sm:$0xff] %v10711_v31  ;;  %v9095_v60 = vcombine.low %v366_v1, %v370_v14  ;;  %v218_v46 = vld [vmem:[#allocation5 + $0x128] sm:$0xff] }
  0xe7   :  { %3872 = vmatpush2.bf16.msra.mxu0 %v9229_v5  ;;  %v8960_v38 = vcombine.high %v230_v9, %v234_v10  ;;  %v10713_v61 = vcombine.high %v127_v24, %v131_v26  ;;  %v342_v1 = vld [vmem:[#allocation5 + $0x508] sm:$0xff]  ;;  %v135_v5 = vld [vmem:[#allocation2 + $0x90] sm:$0xff]  ;;  %v10723_v9 = vcombine.low %v128_v30, %v132_v34  ;;  %v8951_v10 = vcombine.low %v222_v42, %v226_v53 }
  0xe8   :  { %3984 = vmatprep.subr.bf16.mxu1 %v9358_v2  ;;  %4067 = vmatprep.subr.bf16.mxu0 %v8968_v16  ;;  %v350_v2 = vld [vmem:[#allocation5 + $0x548] sm:$0xff]  ;;  %v8944_v23 = vcombine.high %v214_v44, %v218_v46 }
  0xe9   :  { %3985 = vmatpush2.bf16.msra.mxu1 %v9357_v15  ;;  %12942 = vst [vmem:[#allocation44_spill] sm:$0xff] %v10713_v61  ;;  %v346_v14 = vld [vmem:[#allocation5 + $0x528] sm:$0xff]  ;;  %v139_v15 = vld [vmem:[#allocation2 + $0xb0] sm:$0xff]  ;;  %v9080_v16 = vcombine.high %v350_v2, %v354_v6  ;;  %12945 = vst [vmem:[#allocation47_spill] sm:$0xff] %v10723_v9  ;;  %v9079_v19 = vcombine.low %v350_v2, %v354_v6 }
  0xea   :  { %4180 = vmatprep.subr.bf16.mxu1 %v9096_v28  ;;  %3874 = vmatmul.mubr.bf16.vlgmr.msra.gmra.mxu0 %v10708_v59  ;;  %v136_v28 = vld [vmem:[#allocation2 + $0x98] sm:$0xff]  ;;  %v338_v4 = vld [vmem:[#allocation5 + $0x4e8] sm:$0xff]  ;;  %v9071_v6 = vcombine.low %v342_v1, %v346_v14 }
  0xeb   :  { %4068 = vmatpush1.bf16.msra.mxu0 %v8967_v54  ;;  %3883 = vmatprep.mubr.bf16.mxu0 %v10713_v61  ;;  %v140_v59 = vld [vmem:[#allocation2 + $0xb8] sm:$0xff]  ;;  %v10721_v54 = vcombine.low %v127_v24, %v131_v26  ;;  %v9072_v61 = vcombine.high %v342_v1, %v346_v14  ;;  %v8943_v26 = vcombine.low %v214_v44, %v218_v46  ;;  %v198_v30 = vld [vmem:[#allocation5 + $0x88] sm:$0xff] }
  0xec   :  { %3987 = vmatmul.mubr.bf16.vlgmr.msra.gmra.mxu1 %v10711_v31  ;;  %4069 = vmatprep.subr.bf16.mxu0 %v8960_v38  ;;  %v210_v38 = vld [vmem:[#allocation5 + $0xe8] sm:$0xff]  ;;  %v10725_v31 = vcombine.high %v135_v5, %v139_v15  ;;  %v10728_v24 = vcombine.high %v136_v28, %v140_v59  ;;  %v10735_v44 = vcombine.low %v136_v28, %v140_v59 }
  0xed   :  { %4181 = vmatpush1.bf16.msra.mxu1 %v9095_v60  ;;  %3996 = vmatprep.mubr.bf16.mxu1 %v10716_v39  ;;  %12944 = vst [vmem:[#allocation46_spill] sm:$0xff] %v10721_v54  ;;  %v206_v60 = vld [vmem:[#allocation5 + $0xc8] sm:$0xff] }
  0xee   :  { %4182 = vmatprep.subr.bf16.mxu1 %v9088_v56  ;;  %v334_v56 = vld [vmem:[#allocation5 + $0x4c8] sm:$0xff]  ;;  %12946 = vst [vmem:[#allocation48_spill] sm:$0xff] %v10725_v31  ;;  %12947 = vst [vmem:[#allocation49_spill] sm:$0xff] %v10728_v24  ;;  %v8936_v42 = vcombine.high %v206_v60, %v210_v38  ;;  %v8935_v46 = vcombine.low %v206_v60, %v210_v38 }
  0xef   :  { %4070 = vmatpush1.bf16.msra.mxu0 %v8959_v40  ;;  %v202_v34 = vld [vmem:[#allocation5 + $0xa8] sm:$0xff]  ;;  %v143_v40 = vld [vmem:[#allocation2 + $0xd0] sm:$0xff]  ;;  %12949 = vst [vmem:[#allocation51_spill] sm:$0xff] %v10735_v44  ;;  %v9063_v1 = vcombine.low %v334_v56, %v338_v4 }
  0xf0   :  { %4071 = vmatprep.subr.bf16.mxu0 %v8952_v0  ;;  %v326_v53 = vld [vmem:[#allocation5 + $0x488] sm:$0xff]  ;;  %v9064_v0 = vcombine.high %v334_v56, %v338_v4  ;;  %v8928_v14 = vcombine.high %v198_v30, %v202_v34  ;;  %v8927_v59 = vcombine.low %v198_v30, %v202_v34 }
  0xf1   :  { %4183 = vmatpush1.bf16.msra.mxu1 %v9087_v62  ;;  %v330_v2 = vld [vmem:[#allocation5 + $0x4a8] sm:$0xff]  ;;  %v147_v62 = vld [vmem:[#allocation2 + $0xf0] sm:$0xff] }
  0xf2   :  { %4184 = vmatprep.subr.bf16.mxu1 %v9080_v16  ;;  %3884 = vmatmul.mubr.bf16.gmra.mxu0 %v10721_v54  ;;  %v144_v16 = vld [vmem:[#allocation2 + $0xd8] sm:$0xff]  ;;  %v322_v39 = vld [vmem:[#allocation5 + $0x468] sm:$0xff]  ;;  %v9055_v4 = vcombine.low %v326_v53, %v330_v2 }
  0xf3   :  { %4072 = vmatpush1.bf16.msra.mxu0 %v8951_v10  ;;  %3893 = vmatprep.mubr.bf16.mxu0 %v10725_v31  ;;  %v148_v54 = vld [vmem:[#allocation2 + $0xf8] sm:$0xff]  ;;  %v10733_v10 = vcombine.low %v135_v5, %v139_v15  ;;  %v9056_v31 = vcombine.high %v326_v53, %v330_v2  ;;  %v182_v15 = vld [vmem:[#allocation5 + $0x8] sm:$0xff] }
  0xf4   :  { %3997 = vmatmul.mubr.bf16.gmra.mxu1 %v10723_v9  ;;  %4073 = vmatprep.subr.bf16.mxu0 %v8944_v23  ;;  %v194_v23 = vld [vmem:[#allocation5 + $0x68] sm:$0xff]  ;;  %v10737_v9 = vcombine.high %v143_v40, %v147_v62  ;;  %v10740_v5 = vcombine.high %v144_v16, %v148_v54  ;;  %v10747_v30 = vcombine.low %v144_v16, %v148_v54 }
  0xf5   :  { %4185 = vmatpush1.bf16.msra.mxu1 %v9079_v19  ;;  %4006 = vmatprep.mubr.bf16.mxu1 %v10728_v24  ;;  %12948 = vst [vmem:[#allocation50_spill] sm:$0xff] %v10733_v10  ;;  %v190_v19 = vld [vmem:[#allocation5 + $0x48] sm:$0xff] }
  0xf6   :  { %4186 = vmatprep.subr.bf16.mxu1 %v9072_v61  ;;  %v318_v61 = vld [vmem:[#allocation5 + $0x448] sm:$0xff]  ;;  %12950 = vst [vmem:[#allocation52_spill] sm:$0xff] %v10737_v9  ;;  %12951 = vst [vmem:[#allocation53_spill] sm:$0xff] %v10740_v5  ;;  %v8920_v60 = vcombine.high %v190_v19, %v194_v23  ;;  %v8919_v34 = vcombine.low %v190_v19, %v194_v23 }
  0xf7   :  { %4074 = vmatpush1.bf16.msra.mxu0 %v8943_v26  ;;  %v186_v28 = vld [vmem:[#allocation5 + $0x28] sm:$0xff]  ;;  %v151_v26 = vld [vmem:[#allocation2 + $0x110] sm:$0xff]  ;;  %12953 = vst [vmem:[#allocation55_spill] sm:$0xff] %v10747_v30  ;;  %v9047_v53 = vcombine.low %v318_v61, %v322_v39 }
  0xf8   :  { %4075 = vmatprep.subr.bf16.mxu0 %v8936_v42  ;;  %v310_v38 = vld [vmem:[#allocation5 + $0x408] sm:$0xff]  ;;  %v9048_v42 = vcombine.high %v318_v61, %v322_v39  ;;  %v8912_v2 = vcombine.high %v182_v15, %v186_v28  ;;  %v8911_v54 = vcombine.low %v182_v15, %v186_v28 }
  0xf9   :  { %4187 = vmatpush1.bf16.msra.mxu1 %v9071_v6  ;;  %v314_v56 = vld [vmem:[#allocation5 + $0x428] sm:$0xff]  ;;  %v155_v6 = vld [vmem:[#allocation2 + $0x130] sm:$0xff] }
  0xfa   :  { %4188 = vmatprep.subr.bf16.mxu1 %v9064_v0  ;;  %3894 = vmatmul.mubr.bf16.gmra.mxu0 %v10733_v10  ;;  %v152_v0 = vld [vmem:[#allocation2 + $0x118] sm:$0xff]  ;;  %v434_v24 = vld [vmem:[#allocation5 + $0x7e8] sm:$0xff]  ;;  %v9039_v39 = vcombine.low %v310_v38, %v314_v56 }
  0xfb   :  { %4076 = vmatpush1.bf16.msra.mxu0 %v8935_v46  ;;  %3903 = vmatprep.mubr.bf16.mxu0 %v10737_v9  ;;  %v156_v10 = vld [vmem:[#allocation2 + $0x138] sm:$0xff]  ;;  %v10745_v46 = vcombine.low %v143_v40, %v147_v62  ;;  %v9040_v9 = vcombine.high %v310_v38, %v314_v56  ;;  %v294_v62 = vld [vmem:[#allocation5 + $0x388] sm:$0xff] }
  0xfc   :  { %4007 = vmatmul.mubr.bf16.gmra.mxu1 %v10735_v44  ;;  %4077 = vmatprep.subr.bf16.mxu0 %v8928_v14  ;;  %v306_v14 = vld [vmem:[#allocation5 + $0x3e8] sm:$0xff]  ;;  %v10749_v44 = vcombine.high %v151_v26, %v155_v6  ;;  %v10752_v40 = vcombine.high %v152_v0, %v156_v10  ;;  %v10759_v15 = vcombine.low %v152_v0, %v156_v10 }
  0xfd   :  { %4189 = vmatpush1.bf16.msra.mxu1 %v9063_v1  ;;  %4016 = vmatprep.mubr.bf16.mxu1 %v10740_v5  ;;  %12952 = vst [vmem:[#allocation54_spill] sm:$0xff] %v10745_v46  ;;  %v302_v1 = vld [vmem:[#allocation5 + $0x3c8] sm:$0xff] }
  0xfe   :  { %4190 = vmatprep.subr.bf16.mxu1 %v9056_v31  ;;  %v430_v31 = vld [vmem:[#allocation5 + $0x7c8] sm:$0xff]  ;;  %12954 = vst [vmem:[#allocation56_spill] sm:$0xff] %v10749_v44  ;;  %12955 = vst [vmem:[#allocation57_spill] sm:$0xff] %v10752_v40  ;;  %v9032_v19 = vcombine.high %v302_v1, %v306_v14  ;;  %v9031_v28 = vcombine.low %v302_v1, %v306_v14 }
  0xff   :  { %4078 = vmatpush1.bf16.msra.mxu0 %v8927_v59  ;;  %v298_v16 = vld [vmem:[#allocation5 + $0x3a8] sm:$0xff]  ;;  %v159_v59 = vld [vmem:[#allocation2 + $0x150] sm:$0xff]  ;;  %12957 = vst [vmem:[#allocation59_spill] sm:$0xff] %v10759_v15  ;;  %v9159_v38 = vcombine.low %v430_v31, %v434_v24 }
 0x100   :  { %4079 = vmatprep.subr.bf16.mxu0 %v8920_v60  ;;  %v422_v23 = vld [vmem:[#allocation5 + $0x788] sm:$0xff]  ;;  %v9160_v60 = vcombine.high %v430_v31, %v434_v24  ;;  %v9024_v56 = vcombine.high %v294_v62, %v298_v16  ;;  %v9023_v10 = vcombine.low %v294_v62, %v298_v16 }
 0x101   :  { %4191 = vmatpush1.bf16.msra.mxu1 %v9055_v4  ;;  %v426_v61 = vld [vmem:[#allocation5 + $0x7a8] sm:$0xff]  ;;  %v163_v4 = vld [vmem:[#allocation2 + $0x170] sm:$0xff] }
 0x102   :  { %4192 = vmatprep.subr.bf16.mxu1 %v9048_v42  ;;  %3904 = vmatmul.mubr.bf16.gmra.mxu0 %v10745_v46  ;;  %v160_v42 = vld [vmem:[#allocation2 + $0x158] sm:$0xff]  ;;  %v418_v5 = vld [vmem:[#allocation5 + $0x768] sm:$0xff]  ;;  %v9151_v24 = vcombine.low %v422_v23, %v426_v61 }
 0x103   :  { %4080 = vmatpush1.bf16.msra.mxu0 %v8919_v34  ;;  %3913 = vmatprep.mubr.bf16.mxu0 %v10749_v44  ;;  %v164_v46 = vld [vmem:[#allocation2 + $0x178] sm:$0xff]  ;;  %v10757_v34 = vcombine.low %v151_v26, %v155_v6  ;;  %v9152_v44 = vcombine.high %v422_v23, %v426_v61  ;;  %v278_v6 = vld [vmem:[#allocation5 + $0x308] sm:$0xff] }
 0x104   :  { %4017 = vmatmul.mubr.bf16.gmra.mxu1 %v10747_v30  ;;  %4081 = vmatprep.subr.bf16.mxu0 %v8912_v2  ;;  %v290_v2 = vld [vmem:[#allocation5 + $0x368] sm:$0xff]  ;;  %v10761_v30 = vcombine.high %v159_v59, %v163_v4  ;;  %v10764_v26 = vcombine.high %v160_v42, %v164_v46  ;;  %v10771_v62 = vcombine.low %v160_v42, %v164_v46 }
 0x105   :  { %4193 = vmatpush1.bf16.msra.mxu1 %v9047_v53  ;;  %4026 = vmatprep.mubr.bf16.mxu1 %v10752_v40  ;;  %12956 = vst [vmem:[#allocation58_spill] sm:$0xff] %v10757_v34  ;;  %v286_v53 = vld [vmem:[#allocation5 + $0x348] sm:$0xff] }
 0x106   :  { %4194 = vmatprep.subr.bf16.mxu1 %v9040_v9  ;;  %v414_v9 = vld [vmem:[#allocation5 + $0x748] sm:$0xff]  ;;  %12958 = vst [vmem:[#allocation60_spill] sm:$0xff] %v10761_v30  ;;  %12959 = vst [vmem:[#allocation61_spill] sm:$0xff] %v10764_v26  ;;  %v9016_v1 = vcombine.high %v286_v53, %v290_v2  ;;  %v9015_v16 = vcombine.low %v286_v53, %v290_v2 }
 0x107   :  { %4082 = vmatpush1.bf16.msra.mxu0 %v8911_v54  ;;  %v282_v0 = vld [vmem:[#allocation5 + $0x328] sm:$0xff]  ;;  %v167_v54 = vld [vmem:[#allocation2 + $0x190] sm:$0xff]  ;;  %12961 = vst [vmem:[#allocation63_spill] sm:$0xff] %v10771_v62  ;;  %v9143_v23 = vcombine.low %v414_v9, %v418_v5 }
 0x108   :  { %4083 = vmatprep.subr.bf16.mxu0 %v9032_v19  ;;  %v406_v14 = vld [vmem:[#allocation5 + $0x708] sm:$0xff]  ;;  %v9144_v19 = vcombine.high %v414_v9, %v418_v5  ;;  %v9008_v61 = vcombine.high %v278_v6, %v282_v0  ;;  %v9007_v46 = vcombine.low %v278_v6, %v282_v0 }
 0x109   :  { %4195 = vmatpush1.bf16.msra.mxu1 %v9039_v39  ;;  %v410_v31 = vld [vmem:[#allocation5 + $0x728] sm:$0xff]  ;;  %v171_v39 = vld [vmem:[#allocation2 + $0x1b0] sm:$0xff] }
 0x10a   :  { %4196 = vmatprep.subr.bf16.mxu1 %v9160_v60  ;;  %3914 = vmatmul.mubr.bf16.gmra.mxu0 %v10757_v34  ;;  %v168_v60 = vld [vmem:[#allocation2 + $0x198] sm:$0xff]  ;;  %v402_v40 = vld [vmem:[#allocation5 + $0x6e8] sm:$0xff]  ;;  %v9135_v5 = vcombine.low %v406_v14, %v410_v31 }
 0x10b   :  { %4084 = vmatpush2.bf16.msra.mxu0 %v9031_v28  ;;  %3923 = vmatprep.mubr.bf16.mxu0 %v10761_v30  ;;  %v172_v34 = vld [vmem:[#allocation2 + $0x1b8] sm:$0xff]  ;;  %v10769_v28 = vcombine.low %v159_v59, %v163_v4  ;;  %v9136_v30 = vcombine.high %v406_v14, %v410_v31  ;;  %v262_v4 = vld [vmem:[#allocation5 + $0x288] sm:$0xff] }
 0x10c   :  { %4027 = vmatmul.mubr.bf16.gmra.mxu1 %v10759_v15  ;;  %4085 = vmatprep.subr.bf16.mxu0 %v9024_v56  ;;  %v274_v56 = vld [vmem:[#allocation5 + $0x2e8] sm:$0xff]  ;;  %v10773_v15 = vcombine.high %v167_v54, %v171_v39  ;;  %v10776_v59 = vcombine.high %v168_v60, %v172_v34  ;;  %v10783_v6 = vcombine.low %v168_v60, %v172_v34 }
 0x10d   :  { %4197 = vmatpush2.bf16.msra.mxu1 %v9159_v38  ;;  %4036 = vmatprep.mubr.bf16.mxu1 %v10764_v26  ;;  %12960 = vst [vmem:[#allocation62_spill] sm:$0xff] %v10769_v28  ;;  %v270_v38 = vld [vmem:[#allocation5 + $0x2c8] sm:$0xff] }
 0x10e   :  { %4198 = vmatprep.subr.bf16.mxu1 %v9152_v44  ;;  %v398_v44 = vld [vmem:[#allocation5 + $0x6c8] sm:$0xff]  ;;  %12962 = vst [vmem:[#allocation64_spill] sm:$0xff] %v10773_v15  ;;  %12963 = vst [vmem:[#allocation65_spill] sm:$0xff] %v10776_v59  ;;  %v9000_v53 = vcombine.high %v270_v38, %v274_v56  ;;  %v8999_v0 = vcombine.low %v270_v38, %v274_v56 }
 0x10f   :  { %4086 = vmatpush2.bf16.msra.mxu0 %v9023_v10  ;;  %v266_v42 = vld [vmem:[#allocation5 + $0x2a8] sm:$0xff]  ;;  %v175_v10 = vld [vmem:[#allocation2 + $0x1d0] sm:$0xff]  ;;  %12965 = vst [vmem:[#allocation67_spill] sm:$0xff] %v10783_v6  ;;  %v9127_v14 = vcombine.low %v398_v44, %v402_v40 }
 0x110   :  { %4087 = vmatprep.subr.bf16.mxu0 %v9016_v1  ;;  %v390_v2 = vld [vmem:[#allocation5 + $0x688] sm:$0xff]  ;;  %v9128_v1 = vcombine.high %v398_v44, %v402_v40  ;;  %v8992_v31 = vcombine.high %v262_v4, %v266_v42  ;;  %v8991_v34 = vcombine.low %v262_v4, %v266_v42 }
 0x111   :  { %4199 = vmatpush2.bf16.msra.mxu1 %v9151_v24  ;;  %v394_v9 = vld [vmem:[#allocation5 + $0x6a8] sm:$0xff]  ;;  %v179_v24 = vld [vmem:[#allocation2 + $0x1f0] sm:$0xff] }
 0x112   :  { %4200 = vmatprep.subr.bf16.mxu1 %v9144_v19  ;;  %3924 = vmatmul.mubr.bf16.gmra.mxu0 %v10769_v28  ;;  %v176_v19 = vld [vmem:[#allocation2 + $0x1d8] sm:$0xff]  ;;  %v386_v26 = vld [vmem:[#allocation5 + $0x668] sm:$0xff]  ;;  %v9119_v40 = vcombine.low %v390_v2, %v394_v9 }
 0x113   :  { %4088 = vmatpush2.bf16.msra.mxu0 %v9015_v16  ;;  %3933 = vmatprep.mubr.bf16.mxu0 %v10773_v15  ;;  %v180_v28 = vld [vmem:[#allocation2 + $0x1f8] sm:$0xff]  ;;  %v10781_v16 = vcombine.low %v167_v54, %v171_v39  ;;  %v9120_v15 = vcombine.high %v390_v2, %v394_v9  ;;  %v246_v60 = vld [vmem:[#allocation5 + $0x208] sm:$0xff] }
 0x114   :  { %4037 = vmatmul.mubr.bf16.gmra.mxu1 %v10771_v62  ;;  %4089 = vmatprep.subr.bf16.mxu0 %v9008_v61  ;;  %v258_v61 = vld [vmem:[#allocation5 + $0x268] sm:$0xff]  ;;  %v10785_v62 = vcombine.high %v175_v10, %v179_v24  ;;  %v10788_v54 = vcombine.high %v176_v19, %v180_v28 }
 0x115   :  { %4201 = vmatpush2.bf16.msra.mxu1 %v9143_v23  ;;  %4046 = vmatprep.mubr.bf16.mxu1 %v10776_v59  ;;  %12964 = vst [vmem:[#allocation66_spill] sm:$0xff] %v10781_v16  ;;  %v254_v23 = vld [vmem:[#allocation5 + $0x248] sm:$0xff] }
 0x116   :  { %4202 = vmatprep.subr.bf16.mxu1 %v9136_v30  ;;  %v382_v30 = vld [vmem:[#allocation5 + $0x648] sm:$0xff]  ;;  %12966 = vst [vmem:[#allocation68_spill] sm:$0xff] %v10785_v62  ;;  %12967 = vst [vmem:[#allocation69_spill] sm:$0xff] %v10788_v54  ;;  %v8984_v39 = vcombine.high %v254_v23, %v258_v61  ;;  %v8983_v4 = vcombine.low %v254_v23, %v258_v61 }
 0x117   :  { %4090 = vmatpush2.bf16.msra.mxu0 %v9007_v46  ;;  %v250_v38 = vld [vmem:[#allocation5 + $0x228] sm:$0xff]  ;;  %v9112_v44 = vcombine.high %v382_v30, %v386_v26  ;;  %v9111_v42 = vcombine.low %v382_v30, %v386_v26 }
 0x118   :  { %4091 = vmatprep.subr.bf16.mxu0 %v9000_v53  ;;  %v374_v56 = vld [vmem:[#allocation5 + $0x608] sm:$0xff]  ;;  %v10795_v53 = vcombine.low %v176_v19, %v180_v28  ;;  %v8976_v2 = vcombine.high %v246_v60, %v250_v38 }
 0x119   :  { %4203 = vmatpush2.bf16.msra.mxu1 %v9135_v5  ;;  %v378_v46 = vld [vmem:[#allocation5 + $0x628] sm:$0xff]  ;;  %v10793_v5 = vcombine.low %v175_v10, %v179_v24  ;;  %v8975_v10 = vcombine.low %v246_v60, %v250_v38 }
 0x11a   :  { %4204 = vmatprep.subr.bf16.mxu1 %v9128_v1  ;;  %3934 = vmatmul.mubr.bf16.gmra.mxu0 %v10781_v16  ;;  %12969 = vst [vmem:[#allocation71_spill] sm:$0xff] %v10795_v53  ;;  %v494_v9 = vld [vmem:[#allocation5 + $0x9c8] sm:$0xff]  ;;  %v9103_v28 = vcombine.low %v374_v56, %v378_v46 }
 0x11b   :  { %4092 = vmatpush2.bf16.msra.mxu0 %v8999_v0  ;;  %3943 = vmatprep.mubr.bf16.mxu0 %v10785_v62  ;;  %12968 = vst [vmem:[#allocation70_spill] sm:$0xff] %v10793_v5  ;;  %v498_v1 = vld [vmem:[#allocation5 + $0x9e8] sm:$0xff] }
 0x11c   :  { %4047 = vmatmul.mubr.bf16.gmra.mxu1 %v10783_v6  ;;  %4093 = vmatprep.subr.bf16.mxu0 %v8992_v31  ;;  %v622_v0 = vld [vmem:[#allocation5 + $0xdc8] sm:$0xff]  ;;  %v9224_v24 = vcombine.high %v494_v9, %v498_v1  ;;  %v9223_v30 = vcombine.low %v494_v9, %v498_v1 }
 0x11d   :  { %4205 = vmatpush2.bf16.msra.mxu1 %v9127_v14  ;;  %4056 = vmatprep.mubr.bf16.mxu1 %v10788_v54  ;;  %v626_v14 = vld [vmem:[#allocation5 + $0xde8] sm:$0xff] }
 0x11e   :  { %4206 = vmatprep.subr.bf16.mxu1 %v9120_v15  ;;  %v9104_v15 = vcombine.high %v374_v56, %v378_v46  ;;  %v486_v19 = vld [vmem:[#allocation5 + $0x988] sm:$0xff]  ;;  %v9352_v23 = vcombine.high %v622_v0, %v626_v14 }
 0x11f   :  { %4094 = vmatpush2.bf16.msra.mxu0 %v8991_v34  ;;  %v490_v31 = vld [vmem:[#allocation5 + $0x9a8] sm:$0xff]  ;;  %v9351_v34 = vcombine.low %v622_v0, %v626_v14 }
 0x120   :  { %4095 = vmatprep.subr.bf16.mxu0 %v8984_v39  ;;  %v614_v26 = vld [vmem:[#allocation5 + $0xd88] sm:$0xff]  ;;  %v9215_v46 = vcombine.low %v486_v19, %v490_v31 }
 0x121   :  { %4207 = vmatpush2.bf16.msra.mxu1 %v9119_v40  ;;  %v618_v61 = vld [vmem:[#allocation5 + $0xda8] sm:$0xff]  ;;  %v9216_v40 = vcombine.high %v486_v19, %v490_v31 }
 0x122   :  { %4208 = vmatprep.subr.bf16.mxu1 %v9112_v44  ;;  %3944 = vmatmul.mubr.bf16.gmra.mxu0 %v10793_v5  ;;  %v478_v39 = vld [vmem:[#allocation5 + $0x948] sm:$0xff]  ;;  %v9344_v56 = vcombine.high %v614_v26, %v618_v61 }
 0x123   :  { %4096 = vmatpush2.bf16.msra.mxu0 %v8983_v4  ;;  %4099 = vmatprep.mubr.bf16.mxu0 %v10597_v58  ;;  %v482_v60 = vld [vmem:[#allocation5 + $0x968] sm:$0xff]  ;;  %v9343_v4 = vcombine.low %v614_v26, %v618_v61 }
 0x124   :  { %4057 = vmatmul.mubr.bf16.gmra.mxu1 %v10795_v53  ;;  %4097 = vmatprep.subr.bf16.mxu0 %v8976_v2  ;;  %v606_v38 = vld [vmem:[#allocation5 + $0xd48] sm:$0xff]  ;;  %v9207_v14 = vcombine.low %v478_v39, %v482_v60 }
 0x125   :  { %4209 = vmatpush2.bf16.msra.mxu1 %v9111_v42  ;;  %4212 = vmatprep.mubr.bf16.mxu1 %v10605_v63  ;;  %v610_v44 = vld [vmem:[#allocation5 + $0xd68] sm:$0xff]  ;;  %v9208_v42 = vcombine.high %v478_v39, %v482_v60 }
 0x126   :  { %4210 = vmatprep.subr.bf16.mxu1 %v9104_v15  ;;  %v470_v2 = vld [vmem:[#allocation5 + $0x908] sm:$0xff]  ;;  %v9336_v0 = vcombine.high %v606_v38, %v610_v44 }
 0x127   :  { %4098 = vmatpush2.bf16.msra.mxu0 %v8975_v10  ;;  %v474_v9 = vld [vmem:[#allocation5 + $0x928] sm:$0xff]  ;;  %v9335_v10 = vcombine.low %v606_v38, %v610_v44 }
 0x128   :  { %4293 = vmatprep.subr.bf16.mxu0 %v9224_v24  ;;  %v598_v1 = vld [vmem:[#allocation5 + $0xd08] sm:$0xff]  ;;  %v9199_v61 = vcombine.low %v470_v2, %v474_v9 }
 0x129   :  { %4211 = vmatpush2.bf16.msra.mxu1 %v9103_v28  ;;  %v602_v15 = vld [vmem:[#allocation5 + $0xd28] sm:$0xff]  ;;  %v9200_v28 = vcombine.high %v470_v2, %v474_v9 }
 0x12a   :  { %4406 = vmatprep.subr.bf16.mxu1 %v9352_v23  ;;  %4100 = vmatmul.mubr.bf16.vlgmr.msra.gmra.mxu0 %v10611_v21  ;;  %v462_v24 = vld [vmem:[#allocation5 + $0x8c8] sm:$0xff]  ;;  %v9328_v26 = vcombine.high %v598_v1, %v602_v15 }
 0x12b   :  { %4294 = vmatpush1.bf16.msra.mxu0 %v9223_v30  ;;  %4109 = vmatprep.mubr.bf16.mxu0 %v10617_v32  ;;  %v466_v19 = vld [vmem:[#allocation5 + $0x8e8] sm:$0xff]  ;;  %v9327_v30 = vcombine.low %v598_v1, %v602_v15 }
 0x12c   :  { %4213 = vmatmul.mubr.bf16.vlgmr.msra.gmra.mxu1 %v10615_v25  ;;  %4295 = vmatprep.subr.bf16.mxu0 %v9216_v40  ;;  %v590_v31 = vld [vmem:[#allocation5 + $0xcc8] sm:$0xff]  ;;  %v9191_v44 = vcombine.low %v462_v24, %v466_v19 }
 0x12d   :  { %4407 = vmatpush1.bf16.msra.mxu1 %v9351_v34  ;;  %4222 = vmatprep.mubr.bf16.mxu1 %v10620_v33  ;;  %v594_v23 = vld [vmem:[#allocation5 + $0xce8] sm:$0xff]  ;;  %v9192_v34 = vcombine.high %v462_v24, %v466_v19 }
 0x12e   :  { %4408 = vmatprep.subr.bf16.mxu1 %v9344_v56  ;;  %v454_v40 = vld [vmem:[#allocation5 + $0x888] sm:$0xff]  ;;  %v9320_v38 = vcombine.high %v590_v31, %v594_v23 }
 0x12f   :  { %4296 = vmatpush1.bf16.msra.mxu0 %v9215_v46  ;;  %v458_v39 = vld [vmem:[#allocation5 + $0x8a8] sm:$0xff]  ;;  %v9319_v46 = vcombine.low %v590_v31, %v594_v23 }
 0x130   :  { %4297 = vmatprep.subr.bf16.mxu0 %v9208_v42  ;;  %v582_v60 = vld [vmem:[#allocation5 + $0xc88] sm:$0xff]  ;;  %v9183_v15 = vcombine.low %v454_v40, %v458_v39 }
 0x131   :  { %4409 = vmatpush1.bf16.msra.mxu1 %v9343_v4  ;;  %v586_v56 = vld [vmem:[#allocation5 + $0xca8] sm:$0xff]  ;;  %v9184_v4 = vcombine.high %v454_v40, %v458_v39 }
 0x132   :  { %4410 = vmatprep.subr.bf16.mxu1 %v9336_v0  ;;  %4110 = vmatmul.mubr.bf16.gmra.mxu0 %v10625_v41  ;;  %v446_v42 = vld [vmem:[#allocation5 + $0x848] sm:$0xff]  ;;  %v9312_v1 = vcombine.high %v582_v60, %v586_v56 }
 0x133   :  { %4298 = vmatpush1.bf16.msra.mxu0 %v9207_v14  ;;  %4119 = vmatprep.mubr.bf16.mxu0 %v10629_v52  ;;  %v450_v2 = vld [vmem:[#allocation5 + $0x868] sm:$0xff]  ;;  %v9311_v14 = vcombine.low %v582_v60, %v586_v56 }
 0x134   :  { %4223 = vmatmul.mubr.bf16.gmra.mxu1 %v10627_v45  ;;  %4299 = vmatprep.subr.bf16.mxu0 %v9200_v28  ;;  %v574_v9 = vld [vmem:[#allocation5 + $0xc48] sm:$0xff]  ;;  %v9175_v23 = vcombine.low %v446_v42, %v450_v2 }
 0x135   :  { %4411 = vmatpush1.bf16.msra.mxu1 %v9335_v10  ;;  %4232 = vmatprep.mubr.bf16.mxu1 %v10632_v57  ;;  %v578_v0 = vld [vmem:[#allocation5 + $0xc68] sm:$0xff]  ;;  %v9176_v10 = vcombine.high %v446_v42, %v450_v2 }
 0x136   :  { %4412 = vmatprep.subr.bf16.mxu1 %v9328_v26  ;;  %v438_v28 = vld [vmem:[#allocation5 + $0x808] sm:$0xff]  ;;  %v9304_v31 = vcombine.high %v574_v9, %v578_v0 }
 0x137   :  { %4300 = vmatpush1.bf16.msra.mxu0 %v9199_v61  ;;  %v442_v24 = vld [vmem:[#allocation5 + $0x828] sm:$0xff]  ;;  %v9303_v61 = vcombine.low %v574_v9, %v578_v0 }
 0x138   :  { %4301 = vmatprep.subr.bf16.mxu0 %v9192_v34  ;;  %v566_v19 = vld [vmem:[#allocation5 + $0xc08] sm:$0xff]  ;;  %v9167_v56 = vcombine.low %v438_v28, %v442_v24 }
 0x139   :  { %4413 = vmatpush1.bf16.msra.mxu1 %v9327_v30  ;;  %v570_v26 = vld [vmem:[#allocation5 + $0xc28] sm:$0xff]  ;;  %v9168_v30 = vcombine.high %v438_v28, %v442_v24 }
 0x13a   :  { %4414 = vmatprep.subr.bf16.mxu1 %v9320_v38  ;;  %4120 = vmatmul.mubr.bf16.gmra.mxu0 %v10637_v7  ;;  %v558_v34 = vld [vmem:[#allocation5 + $0xbc8] sm:$0xff]  ;;  %v9296_v60 = vcombine.high %v566_v19, %v570_v26 }
 0x13b   :  { %4302 = vmatpush1.bf16.msra.mxu0 %v9191_v44  ;;  %4129 = vmatprep.mubr.bf16.mxu0 %v10641_v18  ;;  %v562_v40 = vld [vmem:[#allocation5 + $0xbe8] sm:$0xff]  ;;  %v9295_v44 = vcombine.low %v566_v19, %v570_v26 }
 0x13c   :  { %4233 = vmatmul.mubr.bf16.gmra.mxu1 %v10639_v11  ;;  %4303 = vmatprep.subr.bf16.mxu0 %v9184_v4  ;;  %v686_v39 = vld [vmem:[#allocation5 + $0xfc8] sm:$0xff]  ;;  %v9287_v0 = vcombine.low %v558_v34, %v562_v40 }
 0x13d   :  { %4415 = vmatpush1.bf16.msra.mxu1 %v9319_v46  ;;  %4242 = vmatprep.mubr.bf16.mxu1 %v10644_v22  ;;  %v690_v38 = vld [vmem:[#allocation5 + $0xfe8] sm:$0xff]  ;;  %v9288_v46 = vcombine.high %v558_v34, %v562_v40 }
 0x13e   :  { %4416 = vmatprep.subr.bf16.mxu1 %v9312_v1  ;;  %v550_v4 = vld [vmem:[#allocation5 + $0xb88] sm:$0xff]  ;;  %v9416_v9 = vcombine.high %v686_v39, %v690_v38 }
 0x13f   :  { %4304 = vmatpush1.bf16.msra.mxu0 %v9183_v15  ;;  %v554_v42 = vld [vmem:[#allocation5 + $0xba8] sm:$0xff]  ;;  %v9415_v15 = vcombine.low %v686_v39, %v690_v38 }
 0x140   :  { %4305 = vmatprep.subr.bf16.mxu0 %v9176_v10  ;;  %v678_v2 = vld [vmem:[#allocation5 + $0xf88] sm:$0xff]  ;;  %v9279_v26 = vcombine.low %v550_v4, %v554_v42 }
 0x141   :  { %4417 = vmatpush1.bf16.msra.mxu1 %v9311_v14  ;;  %v682_v1 = vld [vmem:[#allocation5 + $0xfa8] sm:$0xff]  ;;  %v9280_v14 = vcombine.high %v550_v4, %v554_v42 }
 0x142   :  { %4418 = vmatprep.subr.bf16.mxu1 %v9304_v31  ;;  %4130 = vmatmul.mubr.bf16.gmra.mxu0 %v10649_v55  ;;  %v542_v10 = vld [vmem:[#allocation5 + $0xb48] sm:$0xff]  ;;  %v9408_v19 = vcombine.high %v678_v2, %v682_v1 }
 0x143   :  { %4306 = vmatpush1.bf16.msra.mxu0 %v9175_v23  ;;  %4139 = vmatprep.mubr.bf16.mxu0 %v10653_v43  ;;  %v546_v28 = vld [vmem:[#allocation5 + $0xb68] sm:$0xff]  ;;  %v9407_v23 = vcombine.low %v678_v2, %v682_v1 }
 0x144   :  { %4243 = vmatmul.mubr.bf16.gmra.mxu1 %v10651_v35  ;;  %4307 = vmatprep.subr.bf16.mxu0 %v9168_v30  ;;  %v670_v24 = vld [vmem:[#allocation5 + $0xf48] sm:$0xff]  ;;  %v9271_v38 = vcombine.low %v542_v10, %v546_v28  ;;  %v287_v35 = vld [vmem:[#allocation5 + $0x350] sm:$0xff] }
 0x145   :  { %4419 = vmatpush1.bf16.msra.mxu1 %v9303_v61  ;;  %4252 = vmatprep.mubr.bf16.mxu1 %v10656_v47  ;;  %v674_v31 = vld [vmem:[#allocation5 + $0xf68] sm:$0xff]  ;;  %v9272_v61 = vcombine.high %v542_v10, %v546_v28  ;;  %v299_v47 = vld [vmem:[#allocation5 + $0x3b0] sm:$0xff] }
 0x146   :  { %4420 = vmatprep.subr.bf16.mxu1 %v9296_v60  ;;  %v534_v30 = vld [vmem:[#allocation5 + $0xb08] sm:$0xff]  ;;  %v9400_v39 = vcombine.high %v670_v24, %v674_v31 }
 0x147   :  { %4308 = vmatpush1.bf16.msra.mxu0 %v9167_v56  ;;  %v538_v34 = vld [vmem:[#allocation5 + $0xb28] sm:$0xff]  ;;  %v9399_v56 = vcombine.low %v670_v24, %v674_v31 }
 0x148   :  { %4309 = vmatprep.subr.bf16.mxu0 %v9288_v46  ;;  %v662_v40 = vld [vmem:[#allocation5 + $0xf08] sm:$0xff]  ;;  %v9263_v1 = vcombine.low %v534_v30, %v538_v34 }
 0x149   :  { %4421 = vmatpush1.bf16.msra.mxu1 %v9295_v44  ;;  %v666_v60 = vld [vmem:[#allocation5 + $0xf28] sm:$0xff]  ;;  %v9264_v44 = vcombine.high %v534_v30, %v538_v34 }
 0x14a   :  { %4422 = vmatprep.subr.bf16.mxu1 %v9416_v9  ;;  %4140 = vmatmul.mubr.bf16.gmra.mxu0 %v10661_v3  ;;  %v526_v46 = vld [vmem:[#allocation5 + $0xac8] sm:$0xff]  ;;  %v9392_v2 = vcombine.high %v662_v40, %v666_v60  ;;  %v12986_v3 = vld [vmem:[#allocation54_spill] sm:$0xff] }
 0x14b   :  { %4310 = vmatpush2.bf16.msra.mxu0 %v9287_v0  ;;  %4149 = vmatprep.mubr.bf16.mxu0 %v10665_v17  ;;  %v530_v4 = vld [vmem:[#allocation5 + $0xae8] sm:$0xff]  ;;  %v9391_v0 = vcombine.low %v662_v40, %v666_v60  ;;  %v12811_v60 = vlaneseq }
 0x14c   :  { %4253 = vmatmul.mubr.bf16.gmra.mxu1 %v10663_v8  ;;  %4311 = vmatprep.subr.bf16.mxu0 %v9280_v14  ;;  %v654_v42 = vld [vmem:[#allocation5 + $0xec8] sm:$0xff]  ;;  %v9255_v31 = vcombine.low %v526_v46, %v530_v4  ;;  %v303_v8 = vld [vmem:[#allocation5 + $0x3d0] sm:$0xff] }
 0x14d   :  { %4423 = vmatpush2.bf16.msra.mxu1 %v9415_v15  ;;  %4262 = vmatprep.mubr.bf16.mxu1 %v10668_v20  ;;  %v658_v9 = vld [vmem:[#allocation5 + $0xee8] sm:$0xff]  ;;  %v9256_v15 = vcombine.high %v526_v46, %v530_v4  ;;  %v187_v20 = vld [vmem:[#allocation5 + $0x30] sm:$0xff] }
 0x14e   :  { %4424 = vmatprep.subr.bf16.mxu1 %v9408_v19  ;;  %v518_v14 = vld [vmem:[#allocation5 + $0xa88] sm:$0xff]  ;;  %v9384_v24 = vcombine.high %v654_v42, %v658_v9 }
 0x14f   :  { %4312 = vmatpush2.bf16.msra.mxu0 %v9279_v26  ;;  %v522_v10 = vld [vmem:[#allocation5 + $0xaa8] sm:$0xff]  ;;  %v9383_v26 = vcombine.low %v654_v42, %v658_v9 }
 0x150   :  { %4313 = vmatprep.subr.bf16.mxu0 %v9272_v61  ;;  %v646_v28 = vld [vmem:[#allocation5 + $0xe88] sm:$0xff] }
 0x151   :  { %4425 = vmatpush2.bf16.msra.mxu1 %v9407_v23  ;;  %v650_v19 = vld [vmem:[#allocation5 + $0xea8] sm:$0xff]  ;;  %v9248_v23 = vcombine.high %v518_v14, %v522_v10 }
 0x152   :  { %4426 = vmatprep.subr.bf16.mxu1 %v9400_v39  ;;  %4150 = vmatmul.mubr.bf16.gmra.mxu0 %v10673_v36  ;;  %v510_v61 = vld [vmem:[#allocation5 + $0xa48] sm:$0xff]  ;;  %v9376_v40 = vcombine.high %v646_v28, %v650_v19  ;;  %v12982_v36 = vld [vmem:[#allocation50_spill] sm:$0xff] }
 0x153   :  { %4314 = vmatpush2.bf16.msra.mxu0 %v9271_v38  ;;  %4159 = vmatprep.mubr.bf16.mxu0 %v10677_v49  ;;  %v514_v30 = vld [vmem:[#allocation5 + $0xa68] sm:$0xff]  ;;  %v9247_v38 = vcombine.low %v518_v14, %v522_v10  ;;  %v239_v10 = vld [vmem:[#allocation5 + $0x1d0] sm:$0xff] }
 0x154   :  { %4263 = vmatmul.mubr.bf16.gmra.mxu1 %v10675_v37  ;;  %4315 = vmatprep.subr.bf16.mxu0 %v9264_v44  ;;  %v638_v34 = vld [vmem:[#allocation5 + $0xe48] sm:$0xff]  ;;  %v9240_v44 = vcombine.high %v510_v61, %v514_v30  ;;  %v191_v37 = vld [vmem:[#allocation5 + $0x50] sm:$0xff] }
 0x155   :  { %4427 = vmatpush2.bf16.msra.mxu1 %v9399_v56  ;;  %4272 = vmatprep.mubr.bf16.mxu1 %v10680_v51  ;;  %v642_v39 = vld [vmem:[#allocation5 + $0xe68] sm:$0xff]  ;;  %v9375_v56 = vcombine.low %v646_v28, %v650_v19  ;;  %v243_v28 = vld [vmem:[#allocation5 + $0x1f0] sm:$0xff] }
 0x156   :  { %4428 = vmatprep.subr.bf16.mxu1 %v9392_v2  ;;  %v502_v46 = vld [vmem:[#allocation5 + $0xa08] sm:$0xff]  ;;  %v9368_v2 = vcombine.high %v638_v34, %v642_v39  ;;  %v203_v51 = vld [vmem:[#allocation5 + $0xb0] sm:$0xff] }
 0x157   :  { %4316 = vmatpush2.bf16.msra.mxu0 %v9263_v1  ;;  %v506_v4 = vld [vmem:[#allocation5 + $0xa28] sm:$0xff]  ;;  %v10829_v1 = vshrl.u32 %v12811_v60, 7  ;;  %v363_v60 = vld [vmem:[#allocation5 + $0x5b0] sm:$0xff] }
 0x158   :  { %4317 = vmatprep.subr.bf16.mxu0 %v9256_v15  ;;  %v630_v42 = vld [vmem:[#allocation5 + $0xe08] sm:$0xff]  ;;  %v9367_v15 = vcombine.low %v638_v34, %v642_v39  ;;  %v9232_v14 = vcombine.high %v502_v46, %v506_v4  ;;  %v231_v34 = vld [vmem:[#allocation5 + $0x190] sm:$0xff] }
 0x159   :  { %4429 = vmatpush2.bf16.msra.mxu1 %v9391_v0  ;;  %v634_v9 = vld [vmem:[#allocation5 + $0xe28] sm:$0xff]  ;;  %12970 = vst [vmem:[#allocation72_spill] sm:$0xff] %v10829_v1  ;;  %v9239_v0 = vcombine.low %v510_v61, %v514_v30  ;;  %v8970_v30 = vcombine.high %v239_v10, %v243_v28  ;;  %v235_v39 = vld [vmem:[#allocation5 + $0x1b0] sm:$0xff] }
 0x15a   :  { %4430 = vmatprep.subr.bf16.mxu1 %v9384_v24  ;;  %4160 = vmatmul.mubr.bf16.gmra.mxu0 %v10685_v12  ;;  %v367_v24 = vld [vmem:[#allocation5 + $0x5d0] sm:$0xff]  ;;  %v9360_v19 = vcombine.high %v630_v42, %v634_v9  ;;  %v9359_v61 = vcombine.low %v630_v42, %v634_v9  ;;  %v8962_v9 = vcombine.high %v231_v34, %v235_v39  ;;  %v12978_v12 = vld [vmem:[#allocation46_spill] sm:$0xff] }
 0x15b   :  { %4318 = vmatpush2.bf16.msra.mxu0 %v9255_v31  ;;  %4169 = vmatprep.mubr.bf16.mxu0 %v10689_v27  ;;  %v12972_v31 = vld [vmem:[#allocation41_spill] sm:$0xff] }
 0x15c   :  { %4273 = vmatmul.mubr.bf16.gmra.mxu1 %v10687_v13  ;;  %4319 = vmatprep.subr.bf16.mxu0 %v9248_v23  ;;  %v693_v23 = vld [vmem:[#allocation7] sm:$0xff]  ;;  %v207_v13 = vld [vmem:[#allocation5 + $0xd0] sm:$0xff] }
 0x15d   :  { %4431 = vmatpush2.bf16.msra.mxu1 %v9383_v26  ;;  %4282 = vmatprep.mubr.bf16.mxu1 %v10692_v29  ;;  %v371_v26 = vld [vmem:[#allocation5 + $0x5f0] sm:$0xff] }
 0x15e   :  { %4432 = vmatprep.subr.bf16.mxu1 %v9376_v40  ;;  %v9231_v40 = vcombine.low %v502_v46, %v506_v4  ;;  %v8969_v4 = vcombine.low %v239_v10, %v243_v28  ;;  %v9097_v42 = vcombine.low %v367_v24, %v371_v26  ;;  %v3762_v10 = vpop.f32.mrf.mxu1  ;;  %v12975_v28 = vld [vmem:[#allocation43_spill] sm:$0xff]  ;;  %v219_v29 = vld [vmem:[#allocation5 + $0x130] sm:$0xff] }
 0x15f   :  { %4320 = vmatpush2.bf16.msra.mxu0 %v9247_v38  ;;  %v359_v38 = vld [vmem:[#allocation5 + $0x590] sm:$0xff] }
 0x160   :  { %4321 = vmatprep.subr.bf16.mxu0 %v9240_v44  ;;  %v9098_v44 = vcombine.high %v367_v24, %v371_v26  ;;  %v8961_v24 = vcombine.low %v231_v34, %v235_v39  ;;  %v343_v34 = vld [vmem:[#allocation5 + $0x510] sm:$0xff] }
 0x161   :  { %4433 = vmatpush2.bf16.msra.mxu1 %v9375_v56  ;;  %v12971_v56 = vld [vmem:[#allocation40_spill] sm:$0xff] }
 0x162   :  { %4434 = vmatprep.subr.bf16.mxu1 %v9368_v2  ;;  %4170 = vmatmul.mubr.bf16.gmra.mxu0 %v10697_v48  ;;  %v12816_v2 = vsub.s32 1, %v10829_v1  ;;  %v355_v48 = vld [vmem:[#allocation5 + $0x570] sm:$0xff] }
 0x163   :  { %4322 = vmatpush2.bf16.msra.mxu0 %v9239_v0  ;;  %4325 = vmatprep.mubr.bf16.mxu0 %v12971_v56  ;;  %v12973_v0 = vsub.s32 0, %v10829_v1  ;;  %v227_v56 = vld [vmem:[#allocation5 + $0x170] sm:$0xff] }
 0x164   :  { %4283 = vmatmul.mubr.bf16.gmra.mxu1 %v10699_v50  ;;  %4323 = vmatprep.subr.bf16.mxu0 %v9232_v14  ;;  %v9090_v14 = vcombine.high %v359_v38, %v363_v60  ;;  %v3649_v50 = vpop.f32.mrf.mxu0  ;;  %v347_v39 = vld [vmem:[#allocation5 + $0x530] sm:$0xff] }
 0x165   :  { %4435 = vmatpush2.bf16.msra.mxu1 %v9367_v15  ;;  %4438 = vmatprep.mubr.bf16.mxu1 %v12972_v31  ;;  %v10840_v46 = vrot.slane %v693_v23, %v12973_v0  ;;  %v10844_v15 = vrot.slane %v693_v23, %v12816_v2  ;;  %v12974_v31 = vld [vmem:[#allocation42_spill] sm:$0xff]  ;;  %v9089_v23 = vcombine.low %v359_v38, %v363_v60  ;;  %v3764_v2 = vpop.f32.mrf.mxu1 }
 0x166   :  { %4436 = vmatprep.subr.bf16.mxu1 %v9360_v19  ;;  %v223_v19 = vld [vmem:[#allocation5 + $0x150] sm:$0xff]  ;;  %v3651_v26 = vpop.f32.mrf.mxu0 }
 0x167   :  { %4324 = vmatpush2.bf16.msra.mxu0 %v9231_v40  ;;  %v351_v40 = vld [vmem:[#allocation5 + $0x550] sm:$0xff]  ;;  %v3650_v0 = vadd.f32 %v3649_v50, %v10840_v46  ;;  %v3766_v38 = vpop.f32.mrf.mxu1 }
 0x168   :  { %4519 = vmatprep.subr.bf16.mxu0 %v8970_v30  ;;  %v9082_v1 = vcombine.high %v351_v40, %v355_v48  ;;  %v215_v50 = vld [vmem:[#allocation5 + $0x110] sm:$0xff]  ;;  %v3653_v27 = vpop.f32.mrf.mxu0 }
 0x169   :  { %4437 = vmatpush2.bf16.msra.mxu1 %v9359_v61  ;;  %v8954_v61 = vcombine.high %v223_v19, %v227_v56  ;;  %v10849_v30 = vadd.f32 %v3762_v10, %v3650_v0  ;;  %v3654_v60 = vadd.f32 %v3653_v27, %v10840_v46  ;;  %v8946_v0 = vcombine.high %v215_v50, %v219_v29  ;;  %v335_v27 = vld [vmem:[#allocation5 + $0x4d0] sm:$0xff] }
 0x16a   :  { %4632 = vmatprep.subr.bf16.mxu1 %v9098_v44  ;;  %4326 = vmatmul.mubr.bf16.vlgmr.msra.gmra.mxu0 %v12974_v31  ;;  %v3652_v44 = vadd.f32 %v3651_v26, %v10844_v15  ;;  %v12976_v31 = vld [vmem:[#allocation44_spill] sm:$0xff] }
 0x16b   :  { %4520 = vmatpush1.bf16.msra.mxu0 %v8969_v4  ;;  %4335 = vmatprep.mubr.bf16.mxu0 %v12976_v31  ;;  %v10857_v10 = vadd.f32 %v3766_v38, %v3654_v60  ;;  %v3768_v31 = vpop.f32.mrf.mxu1 }
 0x16c   :  { %4439 = vmatmul.mubr.bf16.vlgmr.msra.gmra.mxu1 %v12975_v28  ;;  %4521 = vmatprep.subr.bf16.mxu0 %v8962_v9  ;;  %v12977_v28 = vld [vmem:[#allocation45_spill] sm:$0xff]  ;;  %v10854_v4 = vadd.f32 %v3764_v2, %v3652_v44  ;;  %v3655_v9 = vpop.f32.mrf.mxu0 }
 0x16d   :  { %4633 = vmatpush1.bf16.msra.mxu1 %v9097_v42  ;;  %4448 = vmatprep.mubr.bf16.mxu1 %v12977_v28  ;;  %v8953_v42 = vcombine.low %v223_v19, %v227_v56  ;;  %v3656_v26 = vadd.f32 %v3655_v9, %v10844_v15  ;;  %v9074_v28 = vcombine.high %v343_v34, %v347_v39  ;;  %v211_v2 = vld [vmem:[#allocation5 + $0xf0] sm:$0xff] }
 0x16e   :  { %4634 = vmatprep.subr.bf16.mxu1 %v9090_v14  ;;  %v9081_v14 = vcombine.low %v351_v40, %v355_v48  ;;  %v3659_v44 = vpop.f32.mrf.mxu0  ;;  %v3772_v48 = vpop.f32.mrf.mxu1  ;;  %v12979_v40 = vld [vmem:[#allocation47_spill] sm:$0xff]  ;;  %v8938_v60 = vcombine.high %v207_v13, %v211_v2 }
 0x16f   :  { %4522 = vmatpush1.bf16.msra.mxu0 %v8961_v24  ;;  %v339_v24 = vld [vmem:[#allocation5 + $0x4f0] sm:$0xff]  ;;  %v10861_v56 = vadd.f32 %v3768_v31, %v3656_v26  ;;  %v3660_v19 = vadd.f32 %v3659_v44, %v10840_v46 }
 0x170   :  { %4523 = vmatprep.subr.bf16.mxu0 %v8954_v61  ;;  %v3661_v61 = vpop.f32.mrf.mxu0  ;;  %v12980_v31 = vld [vmem:[#allocation48_spill] sm:$0xff]  ;;  %v9066_v26 = vcombine.high %v335_v27, %v339_v24 }
 0x171   :  { %4635 = vmatpush1.bf16.msra.mxu1 %v9089_v23  ;;  %v8945_v23 = vcombine.low %v215_v50, %v219_v29  ;;  %v10865_v38 = vadd.f32 %v3772_v48, %v3660_v19  ;;  %v3662_v9 = vadd.f32 %v3661_v61, %v10844_v15  ;;  %v199_v44 = vld [vmem:[#allocation5 + $0x90] sm:$0xff] }
 0x172   :  { %4636 = vmatprep.subr.bf16.mxu1 %v9082_v1  ;;  %4336 = vmatmul.mubr.bf16.gmra.mxu0 %v12978_v12  ;;  %v9073_v1 = vcombine.low %v343_v34, %v347_v39  ;;  %v3774_v12 = vpop.f32.mrf.mxu1  ;;  %v3663_v49 = vpop.f32.mrf.mxu0  ;;  %v327_v29 = vld [vmem:[#allocation5 + $0x490] sm:$0xff]  ;;  %v8930_v19 = vcombine.high %v199_v44, %v203_v51 }
 0x173   :  { %4524 = vmatpush1.bf16.msra.mxu0 %v8953_v42  ;;  %4345 = vmatprep.mubr.bf16.mxu0 %v12980_v31  ;;  %v331_v50 = vld [vmem:[#allocation5 + $0x4b0] sm:$0xff]  ;;  %v10870_v42 = vadd.f32 %v3774_v12, %v3662_v9  ;;  %v3664_v34 = vadd.f32 %v3663_v49, %v10840_v46 }
 0x174   :  { %4449 = vmatmul.mubr.bf16.gmra.mxu1 %v12979_v40  ;;  %4525 = vmatprep.subr.bf16.mxu0 %v8946_v0  ;;  %v12981_v40 = vld [vmem:[#allocation49_spill] sm:$0xff]  ;;  %v3776_v39 = vpop.f32.mrf.mxu1  ;;  %v3665_v0 = vpop.f32.mrf.mxu0 }
 0x175   :  { %4637 = vmatpush1.bf16.msra.mxu1 %v9081_v14  ;;  %4458 = vmatprep.mubr.bf16.mxu1 %v12981_v40  ;;  %v8937_v14 = vcombine.low %v207_v13, %v211_v2  ;;  %v10873_v48 = vadd.f32 %v3776_v39, %v3664_v34  ;;  %v3666_v61 = vadd.f32 %v3665_v0, %v10844_v15  ;;  %v195_v12 = vld [vmem:[#allocation5 + $0x70] sm:$0xff] }
 0x176   :  { %4638 = vmatprep.subr.bf16.mxu1 %v9074_v28  ;;  %v9065_v28 = vcombine.low %v335_v27, %v339_v24  ;;  %v3778_v31 = vpop.f32.mrf.mxu1  ;;  %v9058_v40 = vcombine.high %v327_v29, %v331_v50  ;;  %v3669_v9 = vpop.f32.mrf.mxu0  ;;  %v319_v49 = vld [vmem:[#allocation5 + $0x450] sm:$0xff]  ;;  %v12983_v24 = vld [vmem:[#allocation51_spill] sm:$0xff]  ;;  %v8922_v34 = vcombine.high %v191_v37, %v195_v12 }
 0x177   :  { %4526 = vmatpush1.bf16.msra.mxu0 %v8945_v23  ;;  %v323_v23 = vld [vmem:[#allocation5 + $0x470] sm:$0xff]  ;;  %v10877_v13 = vadd.f32 %v3778_v31, %v3666_v61  ;;  %v3670_v2 = vadd.f32 %v3669_v9, %v10840_v46 }
 0x178   :  { %4527 = vmatprep.subr.bf16.mxu0 %v8938_v60  ;;  %v3782_v27 = vpop.f32.mrf.mxu1  ;;  %v3671_v60 = vpop.f32.mrf.mxu0  ;;  %v12984_v31 = vld [vmem:[#allocation52_spill] sm:$0xff]  ;;  %v9050_v61 = vcombine.high %v319_v49, %v323_v23 }
 0x179   :  { %4639 = vmatpush1.bf16.msra.mxu1 %v9073_v1  ;;  %v8929_v1 = vcombine.low %v199_v44, %v203_v51  ;;  %v10881_v39 = vadd.f32 %v3782_v27, %v3670_v2  ;;  %v3672_v0 = vadd.f32 %v3671_v60, %v10844_v15  ;;  %v183_v9 = vld [vmem:[#allocation5 + $0x10] sm:$0xff] }
 0x17a   :  { %4640 = vmatprep.subr.bf16.mxu1 %v9066_v26  ;;  %4346 = vmatmul.mubr.bf16.gmra.mxu0 %v12982_v36  ;;  %v9057_v26 = vcombine.low %v327_v29, %v331_v50  ;;  %v3784_v36 = vpop.f32.mrf.mxu1  ;;  %v3673_v17 = vpop.f32.mrf.mxu0  ;;  %v311_v51 = vld [vmem:[#allocation5 + $0x410] sm:$0xff]  ;;  %v8914_v2 = vcombine.high %v183_v9, %v187_v20 }
 0x17b   :  { %4528 = vmatpush1.bf16.msra.mxu0 %v8937_v14  ;;  %4355 = vmatprep.mubr.bf16.mxu0 %v12984_v31  ;;  %v315_v44 = vld [vmem:[#allocation5 + $0x430] sm:$0xff]  ;;  %v10886_v14 = vadd.f32 %v3784_v36, %v3672_v0  ;;  %v3674_v29 = vadd.f32 %v3673_v17, %v10840_v46 }
 0x17c   :  { %4459 = vmatmul.mubr.bf16.gmra.mxu1 %v12983_v24  ;;  %4529 = vmatprep.subr.bf16.mxu0 %v8930_v19  ;;  %v12985_v24 = vld [vmem:[#allocation53_spill] sm:$0xff]  ;;  %v3786_v50 = vpop.f32.mrf.mxu1  ;;  %v3675_v19 = vpop.f32.mrf.mxu0 }
 0x17d   :  { %4641 = vmatpush1.bf16.msra.mxu1 %v9065_v28  ;;  %4468 = vmatprep.mubr.bf16.mxu1 %v12985_v24  ;;  %v8921_v28 = vcombine.low %v191_v37, %v195_v12  ;;  %v10889_v27 = vadd.f32 %v3786_v50, %v3674_v29  ;;  %v3676_v60 = vadd.f32 %v3675_v19, %v10844_v15  ;;  %v307_v36 = vld [vmem:[#allocation5 + $0x3f0] sm:$0xff] }
 0x17e   :  { %4642 = vmatprep.subr.bf16.mxu1 %v9058_v40  ;;  %v9049_v40 = vcombine.low %v319_v49, %v323_v23  ;;  %v3788_v31 = vpop.f32.mrf.mxu1  ;;  %v9042_v24 = vcombine.high %v311_v51, %v315_v44  ;;  %v3679_v0 = vpop.f32.mrf.mxu0  ;;  %v431_v17 = vld [vmem:[#allocation5 + $0x7d0] sm:$0xff]  ;;  %v12987_v23 = vld [vmem:[#allocation55_spill] sm:$0xff]  ;;  %v9034_v29 = vcombine.high %v303_v8, %v307_v36 }
 0x17f   :  { %4530 = vmatpush1.bf16.msra.mxu0 %v8929_v1  ;;  %v435_v1 = vld [vmem:[#allocation5 + $0x7f0] sm:$0xff]  ;;  %v10893_v37 = vadd.f32 %v3788_v31, %v3676_v60  ;;  %v3680_v12 = vadd.f32 %v3679_v0, %v10840_v46 }
 0x180   :  { %4531 = vmatprep.subr.bf16.mxu0 %v8922_v34  ;;  %v3792_v49 = vpop.f32.mrf.mxu1  ;;  %v3681_v34 = vpop.f32.mrf.mxu0  ;;  %v12988_v31 = vld [vmem:[#allocation56_spill] sm:$0xff]  ;;  %v9162_v60 = vcombine.high %v431_v17, %v435_v1 }
 0x181   :  { %4643 = vmatpush1.bf16.msra.mxu1 %v9057_v26  ;;  %v8913_v26 = vcombine.low %v183_v9, %v187_v20  ;;  %v10897_v50 = vadd.f32 %v3792_v49, %v3680_v12  ;;  %v3682_v19 = vadd.f32 %v3681_v34, %v10844_v15  ;;  %v295_v0 = vld [vmem:[#allocation5 + $0x390] sm:$0xff] }
 0x182   :  { %4644 = vmatprep.subr.bf16.mxu1 %v9050_v61  ;;  %4356 = vmatmul.mubr.bf16.gmra.mxu0 %v12986_v3  ;;  %v9041_v61 = vcombine.low %v311_v51, %v315_v44  ;;  %v3794_v3 = vpop.f32.mrf.mxu1  ;;  %v3683_v43 = vpop.f32.mrf.mxu0  ;;  %v423_v20 = vld [vmem:[#allocation5 + $0x790] sm:$0xff]  ;;  %v9026_v12 = vcombine.high %v295_v0, %v299_v47 }
 0x183   :  { %4532 = vmatpush1.bf16.msra.mxu0 %v8921_v28  ;;  %4365 = vmatprep.mubr.bf16.mxu0 %v12988_v31  ;;  %v427_v9 = vld [vmem:[#allocation5 + $0x7b0] sm:$0xff]  ;;  %v10902_v28 = vadd.f32 %v3794_v3, %v3682_v19  ;;  %v3684_v51 = vadd.f32 %v3683_v43, %v10840_v46 }
 0x184   :  { %4469 = vmatmul.mubr.bf16.gmra.mxu1 %v12987_v23  ;;  %4533 = vmatprep.subr.bf16.mxu0 %v8914_v2  ;;  %v12989_v23 = vld [vmem:[#allocation57_spill] sm:$0xff]  ;;  %v3796_v44 = vpop.f32.mrf.mxu1  ;;  %v3685_v2 = vpop.f32.mrf.mxu0 }
 0x185   :  { %4645 = vmatpush1.bf16.msra.mxu1 %v9049_v40  ;;  %4478 = vmatprep.mubr.bf16.mxu1 %v12989_v23  ;;  %12990 = vst [vmem:[#allocation73_spill] sm:$0xff] %v10902_v28  ;;  %v9033_v40 = vcombine.low %v303_v8, %v307_v36  ;;  %v10905_v49 = vadd.f32 %v3796_v44, %v3684_v51  ;;  %v291_v3 = vld [vmem:[#allocation5 + $0x370] sm:$0xff]  ;;  %v12992_v28 = vld [vmem:[#allocation58_spill] sm:$0xff] }
 0x186   :  { %4646 = vmatprep.subr.bf16.mxu1 %v9042_v24  ;;  %v9161_v24 = vcombine.low %v431_v17, %v435_v1  ;;  %v3686_v34 = vadd.f32 %v3685_v2, %v10844_v15  ;;  %v3798_v31 = vpop.f32.mrf.mxu1  ;;  %v9154_v23 = vcombine.high %v423_v20, %v427_v9  ;;  %v3689_v19 = vpop.f32.mrf.mxu0  ;;  %v415_v43 = vld [vmem:[#allocation5 + $0x750] sm:$0xff]  ;;  %v12994_v1 = vld [vmem:[#allocation59_spill] sm:$0xff]  ;;  %v9018_v51 = vcombine.high %v287_v35, %v291_v3 }
 0x187   :  { %4534 = vmatpush1.bf16.msra.mxu0 %v8913_v26  ;;  %12991 = vst [vmem:[#allocation74_spill] sm:$0xff] %v10905_v49  ;;  %v419_v26 = vld [vmem:[#allocation5 + $0x770] sm:$0xff]  ;;  %v3690_v36 = vadd.f32 %v3689_v19, %v10840_v46 }
 0x188   :  { %4535 = vmatprep.subr.bf16.mxu0 %v9034_v29  ;;  %v10909_v8 = vadd.f32 %v3798_v31, %v3686_v34  ;;  %v3802_v17 = vpop.f32.mrf.mxu1  ;;  %v3691_v29 = vpop.f32.mrf.mxu0  ;;  %v12996_v31 = vld [vmem:[#allocation60_spill] sm:$0xff]  ;;  %v9146_v34 = vcombine.high %v415_v43, %v419_v26 }
 0x189   :  { %4647 = vmatpush1.bf16.msra.mxu1 %v9041_v61  ;;  %v9025_v61 = vcombine.low %v295_v0, %v299_v47  ;;  %v10913_v44 = vadd.f32 %v3802_v17, %v3690_v36  ;;  %v3692_v2 = vadd.f32 %v3691_v29, %v10844_v15  ;;  %v279_v19 = vld [vmem:[#allocation5 + $0x310] sm:$0xff] }
 0x18a   :  { %4648 = vmatprep.subr.bf16.mxu1 %v9162_v60  ;;  %4366 = vmatmul.mubr.bf16.gmra.mxu0 %v12992_v28  ;;  %12993 = vst [vmem:[#allocation75_spill] sm:$0xff] %v10909_v8  ;;  %v9153_v60 = vcombine.low %v423_v20, %v427_v9  ;;  %v3804_v28 = vpop.f32.mrf.mxu1  ;;  %v283_v8 = vld [vmem:[#allocation5 + $0x330] sm:$0xff]  ;;  %v3693_v49 = vpop.f32.mrf.mxu0 }
 0x18b   :  { %4536 = vmatpush2.bf16.msra.mxu0 %v9033_v40  ;;  %12995 = vst [vmem:[#allocation76_spill] sm:$0xff] %v10913_v44  ;;  %4375 = vmatprep.mubr.bf16.mxu0 %v12996_v31  ;;  %v407_v47 = vld [vmem:[#allocation5 + $0x710] sm:$0xff]  ;;  %v10918_v40 = vadd.f32 %v3804_v28, %v3692_v2  ;;  %v3694_v20 = vadd.f32 %v3693_v49, %v10840_v46 }
 0x18c   :  { %4479 = vmatmul.mubr.bf16.gmra.mxu1 %v12994_v1  ;;  %4537 = vmatprep.subr.bf16.mxu0 %v9026_v12  ;;  %v12997_v1 = vld [vmem:[#allocation61_spill] sm:$0xff]  ;;  %v3806_v9 = vpop.f32.mrf.mxu1  ;;  %v3695_v12 = vpop.f32.mrf.mxu0  ;;  %v9010_v36 = vcombine.high %v279_v19, %v283_v8 }
 0x18d   :  { %4649 = vmatpush2.bf16.msra.mxu1 %v9161_v24  ;;  %4488 = vmatprep.mubr.bf16.mxu1 %v12997_v1  ;;  %v411_v0 = vld [vmem:[#allocation5 + $0x730] sm:$0xff]  ;;  %12998 = vst [vmem:[#allocation77_spill] sm:$0xff] %v10918_v40  ;;  %v9017_v24 = vcombine.low %v287_v35, %v291_v3  ;;  %v10921_v17 = vadd.f32 %v3806_v9, %v3694_v20  ;;  %v13000_v40 = vld [vmem:[#allocation62_spill] sm:$0xff] }
 0x18e   :  { %4650 = vmatprep.subr.bf16.mxu1 %v9154_v23  ;;  %v9145_v23 = vcombine.low %v415_v43, %v419_v26  ;;  %v3696_v29 = vadd.f32 %v3695_v12, %v10844_v15  ;;  %v3808_v31 = vpop.f32.mrf.mxu1  ;;  %v9138_v1 = vcombine.high %v407_v47, %v411_v0  ;;  %v271_v44 = vld [vmem:[#allocation5 + $0x2d0] sm:$0xff]  ;;  %v3699_v2 = vpop.f32.mrf.mxu0  ;;  %v13002_v26 = vld [vmem:[#allocation63_spill] sm:$0xff] }
 0x18f   :  { %4538 = vmatpush2.bf16.msra.mxu0 %v9025_v61  ;;  %12999 = vst [vmem:[#allocation78_spill] sm:$0xff] %v10921_v17  ;;  %v275_v28 = vld [vmem:[#allocation5 + $0x2f0] sm:$0xff]  ;;  %v3700_v3 = vadd.f32 %v3699_v2, %v10840_v46 }
 0x190   :  { %4539 = vmatprep.subr.bf16.mxu0 %v9018_v51  ;;  %v399_v49 = vld [vmem:[#allocation5 + $0x6d0] sm:$0xff]  ;;  %v10925_v35 = vadd.f32 %v3808_v31, %v3696_v29  ;;  %v3812_v43 = vpop.f32.mrf.mxu1  ;;  %v3701_v51 = vpop.f32.mrf.mxu0  ;;  %v9002_v20 = vcombine.high %v271_v44, %v275_v28 }
 0x191   :  { %4651 = vmatpush2.bf16.msra.mxu1 %v9153_v60  ;;  %v403_v61 = vld [vmem:[#allocation5 + $0x6f0] sm:$0xff]  ;;  %v9009_v60 = vcombine.low %v279_v19, %v283_v8  ;;  %v10929_v9 = vadd.f32 %v3812_v43, %v3700_v3  ;;  %v3702_v12 = vadd.f32 %v3701_v51, %v10844_v15 }
 0x192   :  { %4652 = vmatprep.subr.bf16.mxu1 %v9146_v34  ;;  %4376 = vmatmul.mubr.bf16.gmra.mxu0 %v13000_v40  ;;  %13001 = vst [vmem:[#allocation79_spill] sm:$0xff] %v10925_v35  ;;  %v9137_v34 = vcombine.low %v407_v47, %v411_v0  ;;  %v3814_v40 = vpop.f32.mrf.mxu1  ;;  %v13003_v31 = vld [vmem:[#allocation64_spill] sm:$0xff]  ;;  %v9130_v29 = vcombine.high %v399_v49, %v403_v61  ;;  %v3703_v17 = vpop.f32.mrf.mxu0 }
 0x193   :  { %4540 = vmatpush2.bf16.msra.mxu0 %v9017_v24  ;;  %4385 = vmatprep.mubr.bf16.mxu0 %v13003_v31  ;;  %v263_v2 = vld [vmem:[#allocation5 + $0x290] sm:$0xff]  ;;  %v10934_v24 = vadd.f32 %v3814_v40, %v3702_v12  ;;  %v3704_v47 = vadd.f32 %v3703_v17, %v10840_v46 }
 0x194   :  { %4489 = vmatmul.mubr.bf16.gmra.mxu1 %v13002_v26  ;;  %4541 = vmatprep.subr.bf16.mxu0 %v9010_v36  ;;  %v267_v35 = vld [vmem:[#allocation5 + $0x2b0] sm:$0xff]  ;;  %v3816_v0 = vpop.f32.mrf.mxu1  ;;  %v3705_v36 = vpop.f32.mrf.mxu0 }
 0x195   :  { %4653 = vmatpush2.bf16.msra.mxu1 %v9145_v23  ;;  %4498 = vmatprep.mubr.bf16.mxu1 %v10776_v59  ;;  %v391_v8 = vld [vmem:[#allocation5 + $0x690] sm:$0xff]  ;;  %v9001_v23 = vcombine.low %v271_v44, %v275_v28  ;;  %v8994_v3 = vcombine.high %v263_v2, %v267_v35  ;;  %v10937_v43 = vadd.f32 %v3816_v0, %v3704_v47 }
 0x196   :  { %4654 = vmatprep.subr.bf16.mxu1 %v9138_v1  ;;  %v395_v19 = vld [vmem:[#allocation5 + $0x6b0] sm:$0xff]  ;;  %v9129_v1 = vcombine.low %v399_v49, %v403_v61  ;;  %v3706_v51 = vadd.f32 %v3705_v36, %v10844_v15  ;;  %v3818_v31 = vpop.f32.mrf.mxu1  ;;  %v8993_v61 = vcombine.low %v263_v2, %v267_v35 }
 0x197   :  { %4542 = vmatpush2.bf16.msra.mxu0 %v9009_v60  ;;  %v9122_v59 = vcombine.high %v391_v8, %v395_v19  ;;  %v255_v26 = vld [vmem:[#allocation5 + $0x250] sm:$0xff]  ;;  %v3709_v12 = vpop.f32.mrf.mxu0 }
 0x198   :  { %4543 = vmatprep.subr.bf16.mxu0 %v9002_v20  ;;  %v259_v40 = vld [vmem:[#allocation5 + $0x270] sm:$0xff]  ;;  %v10941_v44 = vadd.f32 %v3818_v31, %v3706_v51  ;;  %v3710_v28 = vadd.f32 %v3709_v12, %v10840_v46  ;;  %v3822_v49 = vpop.f32.mrf.mxu1  ;;  %v9121_v20 = vcombine.low %v391_v8, %v395_v19 }
 0x199   :  { %4655 = vmatpush2.bf16.msra.mxu1 %v9137_v34  ;;  %v383_v17 = vld [vmem:[#allocation5 + $0x650] sm:$0xff]  ;;  %v3711_v34 = vpop.f32.mrf.mxu0 }
 0x19a   :  { %4656 = vmatprep.subr.bf16.mxu1 %v9130_v29  ;;  %4386 = vmatmul.mubr.bf16.gmra.mxu0 %v10781_v16  ;;  %v387_v60 = vld [vmem:[#allocation5 + $0x670] sm:$0xff]  ;;  %v8986_v29 = vcombine.high %v255_v26, %v259_v40  ;;  %v10945_v47 = vadd.f32 %v3822_v49, %v3710_v28  ;;  %v3712_v0 = vadd.f32 %v3711_v34, %v10844_v15  ;;  %v3824_v36 = vpop.f32.mrf.mxu1 }
 0x19b   :  { %4544 = vmatpush2.bf16.msra.mxu0 %v9001_v23  ;;  %4395 = vmatprep.mubr.bf16.mxu0 %v10785_v62  ;;  %v9114_v31 = vcombine.high %v383_v17, %v387_v60  ;;  %v247_v51 = vld [vmem:[#allocation5 + $0x210] sm:$0xff]  ;;  %v3713_v16 = vpop.f32.mrf.mxu0 }
 0x19c   :  { %4499 = vmatmul.mubr.bf16.gmra.mxu1 %v10783_v6  ;;  %4545 = vmatprep.subr.bf16.mxu0 %v8994_v3  ;;  %v251_v12 = vld [vmem:[#allocation5 + $0x230] sm:$0xff]  ;;  %v10950_v23 = vadd.f32 %v3824_v36, %v3712_v0  ;;  %v3714_v8 = vadd.f32 %v3713_v16, %v10840_v46  ;;  %v3826_v19 = vpop.f32.mrf.mxu1 }
 0x19d   :  { %4657 = vmatpush2.bf16.msra.mxu1 %v9129_v1  ;;  %4508 = vmatprep.mubr.bf16.mxu1 %v10788_v54  ;;  %v375_v35 = vld [vmem:[#allocation5 + $0x610] sm:$0xff]  ;;  %v8985_v1 = vcombine.low %v255_v26, %v259_v40  ;;  %v3715_v3 = vpop.f32.mrf.mxu0  ;;  %v8978_v28 = vcombine.high %v247_v51, %v251_v12 }
 0x19e   :  { %4658 = vmatprep.subr.bf16.mxu1 %v9122_v59  ;;  %v379_v2 = vld [vmem:[#allocation5 + $0x630] sm:$0xff]  ;;  %v9113_v59 = vcombine.low %v383_v17, %v387_v60  ;;  %v10953_v49 = vadd.f32 %v3826_v19, %v3714_v8  ;;  %v3716_v34 = vadd.f32 %v3715_v3, %v10844_v15  ;;  %v3828_v62 = vpop.f32.mrf.mxu1  ;;  %v8977_v60 = vcombine.low %v247_v51, %v251_v12 }
 0x19f   :  { %4546 = vmatpush2.bf16.msra.mxu0 %v8993_v61  ;;  %v9106_v54 = vcombine.high %v375_v35, %v379_v2  ;;  %v495_v6 = vld [vmem:[#allocation5 + $0x9d0] sm:$0xff] }
 0x1a0   :  { %4547 = vmatprep.subr.bf16.mxu0 %v8986_v29  ;;  %v499_v0 = vld [vmem:[#allocation5 + $0x9f0] sm:$0xff]  ;;  %v10957_v26 = vadd.f32 %v3828_v62, %v3716_v34  ;;  %v3832_v17 = vpop.f32.mrf.mxu1  ;;  %v9105_v29 = vcombine.low %v375_v35, %v379_v2 }
 0x1a1   :  { %4659 = vmatpush2.bf16.msra.mxu1 %v9121_v20  ;;  %v3719_v36 = vpop.f32.mrf.mxu0  ;;  %v623_v16 = vld [vmem:[#allocation5 + $0xdd0] sm:$0xff] }
 0x1a2   :  { %4660 = vmatprep.subr.bf16.mxu1 %v9114_v31  ;;  %4396 = vmatmul.mubr.bf16.gmra.mxu0 %v10793_v5  ;;  %v627_v61 = vld [vmem:[#allocation5 + $0xdf0] sm:$0xff]  ;;  %v3720_v40 = vadd.f32 %v3719_v36, %v10840_v46  ;;  %v9226_v31 = vcombine.high %v495_v6, %v499_v0  ;;  %v3834_v3 = vpop.f32.mrf.mxu1 }
 0x1a3   :  { %4548 = vmatpush2.bf16.msra.mxu0 %v8985_v1  ;;  %v3721_v20 = vpop.f32.mrf.mxu0  ;;  %4551 = vmatprep.mubr.bf16.mxu0 %v10597_v58  ;;  %v9354_v62 = vcombine.high %v623_v16, %v627_v61  ;;  %v487_v34 = vld [vmem:[#allocation5 + $0x990] sm:$0xff] }
 0x1a4   :  { %4509 = vmatmul.mubr.bf16.gmra.mxu1 %v10795_v53  ;;  %4549 = vmatprep.subr.bf16.mxu0 %v8978_v28  ;;  %v10961_v8 = vadd.f32 %v3832_v17, %v3720_v40  ;;  %v3722_v19 = vadd.f32 %v3721_v20, %v10844_v15  ;;  %v491_v36 = vld [vmem:[#allocation5 + $0x9b0] sm:$0xff]  ;;  %v3836_v2 = vpop.f32.mrf.mxu1 }
 0x1a5   :  { %4661 = vmatpush2.bf16.msra.mxu1 %v9113_v59  ;;  %v3723_v5 = vpop.f32.mrf.mxu0  ;;  %4664 = vmatprep.mubr.bf16.mxu1 %v10605_v63  ;;  %v615_v51 = vld [vmem:[#allocation5 + $0xd90] sm:$0xff]  ;;  %v9225_v59 = vcombine.low %v495_v6, %v499_v0  ;;  %v9218_v40 = vcombine.high %v487_v34, %v491_v36 }
 0x1a6   :  { %4662 = vmatprep.subr.bf16.mxu1 %v9106_v54  ;;  %v619_v12 = vld [vmem:[#allocation5 + $0xdb0] sm:$0xff]  ;;  %v10966_v1 = vadd.f32 %v3834_v3, %v3722_v19  ;;  %v3724_v35 = vadd.f32 %v3723_v5, %v10840_v46  ;;  %v9353_v54 = vcombine.low %v623_v16, %v627_v61  ;;  %v3838_v58 = vpop.f32.mrf.mxu1  ;;  %v9217_v61 = vcombine.low %v487_v34, %v491_v36 }
 0x1a7   :  { %4550 = vmatpush2.bf16.msra.mxu0 %v8977_v60  ;;  %v3725_v28 = vpop.f32.mrf.mxu0  ;;  %v9346_v63 = vcombine.high %v615_v51, %v619_v12  ;;  %v479_v53 = vld [vmem:[#allocation5 + $0x950] sm:$0xff]  ;;  %v9345_v60 = vcombine.low %v615_v51, %v619_v12 }
 0x1a8   :  { %4745 = vmatprep.subr.bf16.mxu0 %v9226_v31  ;;  %v10969_v17 = vadd.f32 %v3836_v2, %v3724_v35  ;;  %v3726_v20 = vadd.f32 %v3725_v28, %v10844_v15  ;;  %v483_v19 = vld [vmem:[#allocation5 + $0x970] sm:$0xff] }
 0x1a9   :  { %4663 = vmatpush2.bf16.msra.mxu1 %v9105_v29  ;;  %v607_v5 = vld [vmem:[#allocation5 + $0xd50] sm:$0xff]  ;;  %v9210_v29 = vcombine.high %v479_v53, %v483_v19  ;;  %v9209_v12 = vcombine.low %v479_v53, %v483_v19 }
 0x1aa   :  { %4858 = vmatprep.subr.bf16.mxu1 %v9354_v62  ;;  %v3875_v3 = vpop.f32.mrf.mxu0  ;;  %4552 = vmatmul.mubr.bf16.vlgmr.msra.gmra.mxu0 %v10611_v21  ;;  %v611_v46 = vld [vmem:[#allocation5 + $0xd70] sm:$0xff]  ;;  %v10973_v6 = vadd.f32 %v3838_v58, %v3726_v20 }
 0x1ab   :  { %v3876_v0 = vadd.f32 %v3875_v3, %v10849_v30  ;;  %4746 = vmatpush1.bf16.msra.mxu0 %v9225_v59  ;;  %4561 = vmatprep.mubr.bf16.mxu0 %v10617_v32  ;;  %v9338_v58 = vcombine.high %v607_v5, %v611_v46  ;;  %v471_v2 = vld [vmem:[#allocation5 + $0x910] sm:$0xff] }
 0x1ac   :  { %v3988_v16 = vpop.f32.mrf.mxu1  ;;  %4665 = vmatmul.mubr.bf16.vlgmr.msra.gmra.mxu1 %v10615_v25  ;;  %v3877_v15 = vpop.f32.mrf.mxu0  ;;  %4747 = vmatprep.subr.bf16.mxu0 %v9218_v40  ;;  %v475_v30 = vld [vmem:[#allocation5 + $0x930] sm:$0xff] }
 0x1ad   :  { %4859 = vmatpush1.bf16.msra.mxu1 %v9353_v54  ;;  %v3989_v31 = vadd.f32 %v3988_v16, %v3876_v0  ;;  %v3878_v62 = vadd.f32 %v3877_v15, %v10854_v4  ;;  %4674 = vmatprep.mubr.bf16.mxu1 %v10620_v33  ;;  %v599_v59 = vld [vmem:[#allocation5 + $0xd10] sm:$0xff]  ;;  %v9202_v40 = vcombine.high %v471_v2, %v475_v30 }
 0x1ae   :  { %v3990_v35 = vpop.f32.mrf.mxu1  ;;  %4860 = vmatprep.subr.bf16.mxu1 %v9346_v63  ;;  %v3879_v28 = vpop.f32.mrf.mxu0  ;;  %v603_v34 = vld [vmem:[#allocation5 + $0xd30] sm:$0xff]  ;;  %v9337_v63 = vcombine.low %v607_v5, %v611_v46  ;;  %v9201_v53 = vcombine.low %v471_v2, %v475_v30 }
 0x1af   :  { %v3991_v36 = vadd.f32 %v3990_v35, %v3878_v62  ;;  %v3880_v54 = vadd.f32 %v3879_v28, %v10857_v10  ;;  %4748 = vmatpush1.bf16.msra.mxu0 %v9217_v61  ;;  %v10981_v20 = vld [vmem:[#allocation5 + $0x8d0] sm:$0xff]  ;;  %v9330_v15 = vcombine.high %v599_v59, %v603_v34  ;;  %v5423_v19 = vmax.f32 %v3989_v31, 0.0 }
 0x1b0   :  { %v3992_v51 = vpop.f32.mrf.mxu1  ;;  %v3881_v4 = vpop.f32.mrf.mxu0  ;;  %4749 = vmatprep.subr.bf16.mxu0 %v9210_v29  ;;  %v467_v33 = vld [vmem:[#allocation5 + $0x8f0] sm:$0xff] }
 0x1b1   :  { %4861 = vmatpush1.bf16.msra.mxu1 %v9345_v60  ;;  %v3993_v3 = vadd.f32 %v3992_v51, %v3880_v54  ;;  %v3882_v0 = vadd.f32 %v3881_v4, %v10861_v56  ;;  %v10984_v62 = vld [vmem:[#allocation5 + $0xcd0] sm:$0xff]  ;;  %v5424_v56 = vmax.f32 %v3991_v36, 0.0  ;;  %v9194_v28 = vcombine.high %v10981_v20, %v467_v33 }
 0x1b2   :  { %v3994_v16 = vpop.f32.mrf.mxu1  ;;  %4862 = vmatprep.subr.bf16.mxu1 %v9338_v58  ;;  %v595_v10 = vld [vmem:[#allocation5 + $0xcf0] sm:$0xff]  ;;  %v3885_v35 = vpop.f32.mrf.mxu0  ;;  %4562 = vmatmul.mubr.bf16.gmra.mxu0 %v10625_v41  ;;  %v9329_v58 = vcombine.low %v599_v59, %v603_v34 }
 0x1b3   :  { %v5431_v61 = vmax.f32 %v3993_v3, 0.0  ;;  %v3995_v5 = vadd.f32 %v3994_v16, %v3882_v0  ;;  %v3886_v46 = vadd.f32 %v3885_v35, %v10865_v38  ;;  %4750 = vmatpush1.bf16.msra.mxu0 %v9209_v12  ;;  %v9322_v54 = vcombine.high %v10984_v62, %v595_v10  ;;  %4571 = vmatprep.mubr.bf16.mxu0 %v10629_v52  ;;  %v455_v12 = vld [vmem:[#allocation5 + $0x890] sm:$0xff] }
 0x1b4   :  { %v3998_v60 = vpop.f32.mrf.mxu1  ;;  %4675 = vmatmul.mubr.bf16.gmra.mxu1 %v10627_v45  ;;  %v3887_v29 = vpop.f32.mrf.mxu0  ;;  %4751 = vmatprep.subr.bf16.mxu0 %v9202_v40  ;;  %v459_v36 = vld [vmem:[#allocation5 + $0x8b0] sm:$0xff]  ;;  %v9193_v0 = vcombine.low %v10981_v20, %v467_v33 }
 0x1b5   :  { %4863 = vmatpush1.bf16.msra.mxu1 %v9337_v63  ;;  %v10991_v51 = vpack.c.bf16 %v5431_v61, %v5423_v19  ;;  %v5432_v31 = vmax.f32 %v3995_v5, 0.0  ;;  %v3999_v2 = vadd.f32 %v3998_v60, %v3886_v46  ;;  %v3888_v30 = vadd.f32 %v3887_v29, %v10870_v42  ;;  %4684 = vmatprep.mubr.bf16.mxu1 %v10632_v57  ;;  %v583_v59 = vld [vmem:[#allocation5 + $0xc90] sm:$0xff] }
 0x1b6   :  { %v4000_v38 = vpop.f32.mrf.mxu1  ;;  %4864 = vmatprep.subr.bf16.mxu1 %v9330_v15  ;;  %v3889_v4 = vpop.f32.mrf.mxu0  ;;  %v587_v34 = vld [vmem:[#allocation5 + $0xcb0] sm:$0xff]  ;;  %v9321_v15 = vcombine.low %v10984_v62, %v595_v10  ;;  %v9186_v35 = vcombine.high %v455_v12, %v459_v36 }
 0x1b7   :  { %13004 = vst [vmem:[#allocation80_spill] sm:$0xff] %v10991_v51  ;;  %v4001_v63 = vadd.f32 %v4000_v38, %v3888_v30  ;;  %v3890_v40 = vadd.f32 %v3889_v4, %v10873_v48  ;;  %4752 = vmatpush1.bf16.msra.mxu0 %v9201_v53  ;;  %v10998_v16 = vpack.c.bf16 %v5432_v31, %v5424_v56  ;;  %v11001_v19 = vld [vmem:[#allocation5 + $0x850] sm:$0xff]  ;;  %v5439_v29 = vmax.f32 %v3999_v2, 0.0 }
 0x1b8   :  { %v4002_v3 = vpop.f32.mrf.mxu1  ;;  %v3891_v42 = vpop.f32.mrf.mxu0  ;;  %4753 = vmatprep.subr.bf16.mxu0 %v9194_v28  ;;  %v9314_v48 = vcombine.high %v583_v59, %v587_v34  ;;  %v451_v60 = vld [vmem:[#allocation5 + $0x870] sm:$0xff]  ;;  %v9185_v56 = vcombine.low %v455_v12, %v459_v36  ;;  %v9313_v31 = vcombine.low %v583_v59, %v587_v34 }
 0x1b9   :  { %13005 = vst [vmem:[#allocation81_spill] sm:$0xff] %v10998_v16  ;;  %4865 = vmatpush1.bf16.msra.mxu1 %v9329_v58  ;;  %v4003_v61 = vadd.f32 %v4002_v3, %v3890_v40  ;;  %v3892_v5 = vadd.f32 %v3891_v42, %v10877_v13  ;;  %v11004_v53 = vld [vmem:[#allocation5 + $0xc50] sm:$0xff]  ;;  %v5440_v13 = vmax.f32 %v4001_v63, 0.0  ;;  %v9178_v30 = vcombine.high %v11001_v19, %v451_v60 }
 0x1ba   :  { %v4004_v46 = vpop.f32.mrf.mxu1  ;;  %4866 = vmatprep.subr.bf16.mxu1 %v9322_v54  ;;  %v579_v33 = vld [vmem:[#allocation5 + $0xc70] sm:$0xff]  ;;  %v3895_v20 = vpop.f32.mrf.mxu0  ;;  %4572 = vmatmul.mubr.bf16.gmra.mxu0 %v10637_v7 }
 0x1bb   :  { %v5447_v58 = vmax.f32 %v4003_v61, 0.0  ;;  %v4005_v62 = vadd.f32 %v4004_v46, %v3892_v5  ;;  %v3896_v10 = vadd.f32 %v3895_v20, %v10881_v39  ;;  %4754 = vmatpush1.bf16.msra.mxu0 %v9193_v0  ;;  %v9306_v38 = vcombine.high %v11004_v53, %v579_v33  ;;  %4581 = vmatprep.mubr.bf16.mxu0 %v10641_v18  ;;  %v439_v40 = vld [vmem:[#allocation5 + $0x810] sm:$0xff] }
 0x1bc   :  { %v4008_v28 = vpop.f32.mrf.mxu1  ;;  %4685 = vmatmul.mubr.bf16.gmra.mxu1 %v10639_v11  ;;  %v3897_v54 = vpop.f32.mrf.mxu0  ;;  %4755 = vmatprep.subr.bf16.mxu0 %v9186_v35  ;;  %v443_v63 = vld [vmem:[#allocation5 + $0x830] sm:$0xff]  ;;  %v9177_v35 = vcombine.low %v11001_v19, %v451_v60  ;;  %v9305_v5 = vcombine.low %v11004_v53, %v579_v33 }
 0x1bd   :  { %4867 = vmatpush1.bf16.msra.mxu1 %v9321_v15  ;;  %v11011_v4 = vpack.c.bf16 %v5447_v58, %v5439_v29  ;;  %v5448_v2 = vmax.f32 %v4005_v62, 0.0  ;;  %v4009_v12 = vadd.f32 %v4008_v28, %v3896_v10  ;;  %v3898_v36 = vadd.f32 %v3897_v54, %v10886_v14  ;;  %4694 = vmatprep.mubr.bf16.mxu1 %v10644_v22  ;;  %v567_v59 = vld [vmem:[#allocation5 + $0xc10] sm:$0xff] }
 0x1be   :  { %v4010_v39 = vpop.f32.mrf.mxu1  ;;  %4868 = vmatprep.subr.bf16.mxu1 %v9314_v48  ;;  %v3899_v3 = vpop.f32.mrf.mxu0  ;;  %v571_v34 = vld [vmem:[#allocation5 + $0xc30] sm:$0xff]  ;;  %v9170_v46 = vcombine.high %v439_v40, %v443_v63  ;;  %v9169_v10 = vcombine.low %v439_v40, %v443_v63 }
 0x1bf   :  { %13006 = vst [vmem:[#allocation82_spill] sm:$0xff] %v11011_v4  ;;  %v4011_v0 = vadd.f32 %v4010_v39, %v3898_v36  ;;  %v3900_v42 = vadd.f32 %v3899_v3, %v10889_v27  ;;  %4756 = vmatpush1.bf16.msra.mxu0 %v9185_v56  ;;  %v11018_v61 = vpack.c.bf16 %v5448_v2, %v5440_v13  ;;  %v11021_v48 = vld [vmem:[#allocation5 + $0xbd0] sm:$0xff]  ;;  %v5455_v28 = vmax.f32 %v4009_v12, 0.0 }
 0x1c0   :  { %v4012_v15 = vpop.f32.mrf.mxu1  ;;  %v3901_v14 = vpop.f32.mrf.mxu0  ;;  %4757 = vmatprep.subr.bf16.mxu0 %v9178_v30  ;;  %v9298_v27 = vcombine.high %v567_v59, %v571_v34  ;;  %v563_v62 = vld [vmem:[#allocation5 + $0xbf0] sm:$0xff] }
 0x1c1   :  { %13007 = vst [vmem:[#allocation83_spill] sm:$0xff] %v11018_v61  ;;  %4869 = vmatpush1.bf16.msra.mxu1 %v9313_v31  ;;  %v4013_v20 = vadd.f32 %v4012_v15, %v3900_v42  ;;  %v3902_v29 = vadd.f32 %v3901_v14, %v10893_v37  ;;  %v11024_v56 = vld [vmem:[#allocation5 + $0xfd0] sm:$0xff]  ;;  %v13008_v31 = vld [vmem:[#allocation23_spill] sm:$0xff]  ;;  %v5456_v37 = vmax.f32 %v4011_v0, 0.0  ;;  %v9290_v2 = vcombine.high %v11021_v48, %v563_v62 }
 0x1c2   :  { %v4014_v58 = vpop.f32.mrf.mxu1  ;;  %4870 = vmatprep.subr.bf16.mxu1 %v9306_v38  ;;  %v691_v19 = vld [vmem:[#allocation5 + $0xff0] sm:$0xff]  ;;  %v3905_v60 = vpop.f32.mrf.mxu0  ;;  %4582 = vmatmul.mubr.bf16.gmra.mxu0 %v10649_v55  ;;  %v9297_v38 = vcombine.low %v567_v59, %v571_v34 }
 0x1c3   :  { %v5463_v13 = vmax.f32 %v4013_v20, 0.0  ;;  %v4015_v53 = vadd.f32 %v4014_v58, %v3902_v29  ;;  %v3906_v33 = vadd.f32 %v3905_v60, %v10897_v50  ;;  %4758 = vmatpush1.bf16.msra.mxu0 %v9177_v35  ;;  %v9418_v36 = vcombine.high %v11024_v56, %v691_v19  ;;  %v13010_v63 = vld [vmem:[#allocation73_spill] sm:$0xff]  ;;  %v13011_v42 = vld [vmem:[#allocation24_spill] sm:$0xff] }
 0x1c4   :  { %v4018_v54 = vpop.f32.mrf.mxu1  ;;  %4695 = vmatmul.mubr.bf16.gmra.mxu1 %v13008_v31  ;;  %v3907_v30 = vpop.f32.mrf.mxu0  ;;  %4759 = vmatprep.subr.bf16.mxu0 %v9170_v46  ;;  %v551_v15 = vld [vmem:[#allocation5 + $0xb90] sm:$0xff]  ;;  %v13013_v46 = vld [vmem:[#allocation74_spill] sm:$0xff]  ;;  %v9289_v58 = vcombine.low %v11021_v48, %v563_v62 }
 0x1c5   :  { %4871 = vmatpush1.bf16.msra.mxu1 %v9305_v5  ;;  %v11031_v39 = vpack.c.bf16 %v5463_v13, %v5455_v28  ;;  %v5464_v12 = vmax.f32 %v4015_v53, 0.0  ;;  %v4019_v40 = vadd.f32 %v4018_v54, %v3906_v33  ;;  %v3908_v3 = vadd.f32 %v3907_v30, %v13010_v63  ;;  %4591 = vmatprep.mubr.bf16.mxu0 %v13011_v42  ;;  %v555_v0 = vld [vmem:[#allocation5 + $0xbb0] sm:$0xff]  ;;  %v13015_v54 = vld [vmem:[#allocation75_spill] sm:$0xff] }
 0x1c6   :  { %v4020_v50 = vpop.f32.mrf.mxu1  ;;  %4872 = vmatprep.subr.bf16.mxu1 %v9298_v27  ;;  %v3909_v35 = vpop.f32.mrf.mxu0  ;;  %v13012_v14 = vld [vmem:[#allocation25_spill] sm:$0xff]  ;;  %v9417_v28 = vcombine.low %v11024_v56, %v691_v19  ;;  %v9282_v13 = vcombine.high %v551_v15, %v555_v0  ;;  %v13017_v19 = vld [vmem:[#allocation76_spill] sm:$0xff] }
 0x1c7   :  { %13009 = vst [vmem:[#allocation23_spill] sm:$0xff] %v11031_v39  ;;  %4704 = vmatprep.mubr.bf16.mxu1 %v13012_v14  ;;  %v679_v59 = vld [vmem:[#allocation5 + $0xf90] sm:$0xff]  ;;  %v4021_v5 = vadd.f32 %v4020_v50, %v3908_v3  ;;  %v3910_v20 = vadd.f32 %v3909_v35, %v13013_v46  ;;  %4760 = vmatpush1.bf16.msra.mxu0 %v9169_v10 }
 0x1c8   :  { %v683_v34 = vld [vmem:[#allocation5 + $0xfb0] sm:$0xff]  ;;  %v4022_v29 = vpop.f32.mrf.mxu1  ;;  %v11038_v60 = vpack.c.bf16 %v5464_v12, %v5456_v37  ;;  %v3911_v27 = vpop.f32.mrf.mxu0  ;;  %4761 = vmatprep.subr.bf16.mxu0 %v9290_v2  ;;  %v13016_v37 = vld [vmem:[#allocation26_spill] sm:$0xff]  ;;  %v5471_v2 = vmax.f32 %v4019_v40, 0.0 }
 0x1c9   :  { %4873 = vmatpush1.bf16.msra.mxu1 %v9297_v38  ;;  %v11041_v53 = vld [vmem:[#allocation5 + $0xb50] sm:$0xff]  ;;  %v4023_v33 = vadd.f32 %v4022_v29, %v3910_v20  ;;  %v3912_v30 = vadd.f32 %v3911_v27, %v13015_v54  ;;  %v9410_v3 = vcombine.high %v679_v59, %v683_v34  ;;  %v9281_v38 = vcombine.low %v551_v15, %v555_v0  ;;  %v13018_v20 = vld [vmem:[#allocation27_spill] sm:$0xff] }
 0x1ca   :  { %13014 = vst [vmem:[#allocation73_spill] sm:$0xff] %v11038_v60  ;;  %v4024_v63 = vpop.f32.mrf.mxu1  ;;  %4874 = vmatprep.subr.bf16.mxu1 %v9418_v36  ;;  %v547_v50 = vld [vmem:[#allocation5 + $0xb70] sm:$0xff]  ;;  %v3915_v62 = vpop.f32.mrf.mxu0  ;;  %4592 = vmatmul.mubr.bf16.gmra.mxu0 %v13016_v37  ;;  %v5472_v29 = vmax.f32 %v4021_v5, 0.0  ;;  %v9409_v27 = vcombine.low %v679_v59, %v683_v34 }
 0x1cb   :  { %v11044_v10 = vld [vmem:[#allocation5 + $0xf50] sm:$0xff]  ;;  %v5479_v12 = vmax.f32 %v4023_v33, 0.0  ;;  %v4025_v56 = vadd.f32 %v4024_v63, %v3912_v30  ;;  %v3916_v35 = vadd.f32 %v3915_v62, %v13017_v19  ;;  %4762 = vmatpush2.bf16.msra.mxu0 %v9289_v58  ;;  %v9274_v54 = vcombine.high %v11041_v53, %v547_v50  ;;  %v13023_v19 = vld [vmem:[#allocation78_spill] sm:$0xff] }
 0x1cc   :  { %v675_v48 = vld [vmem:[#allocation5 + $0xf70] sm:$0xff]  ;;  %v4028_v46 = vpop.f32.mrf.mxu1  ;;  %4705 = vmatmul.mubr.bf16.gmra.mxu1 %v13018_v20  ;;  %v3917_v36 = vpop.f32.mrf.mxu0  ;;  %4763 = vmatprep.subr.bf16.mxu0 %v9282_v13 }
 0x1cd   :  { %4875 = vmatpush2.bf16.msra.mxu1 %v9417_v28  ;;  %v9402_v39 = vcombine.high %v11044_v10, %v675_v48  ;;  %v11051_v60 = vpack.c.bf16 %v5479_v12, %v5471_v2  ;;  %v5480_v40 = vmax.f32 %v4025_v56, 0.0  ;;  %v4029_v15 = vadd.f32 %v4028_v46, %v3916_v35  ;;  %v13020_v0 = vld [vmem:[#allocation77_spill] sm:$0xff]  ;;  %v13021_v63 = vld [vmem:[#allocation28_spill] sm:$0xff] }
 0x1ce   :  { %v3918_v33 = vadd.f32 %v3917_v36, %v13020_v0  ;;  %v4030_v30 = vpop.f32.mrf.mxu1  ;;  %4876 = vmatprep.subr.bf16.mxu1 %v9410_v3  ;;  %4601 = vmatprep.mubr.bf16.mxu0 %v13021_v63  ;;  %v535_v58 = vld [vmem:[#allocation5 + $0xb10] sm:$0xff]  ;;  %v3919_v28 = vpop.f32.mrf.mxu0  ;;  %v9273_v12 = vcombine.low %v11041_v53, %v547_v50  ;;  %v9401_v35 = vcombine.low %v11044_v10, %v675_v48  ;;  %v13069_v63 = vld [vmem:[#allocation62_spill] sm:$0xff] }
 0x1cf   :  { %13019 = vst [vmem:[#allocation24_spill] sm:$0xff] %v11051_v60  ;;  %v539_v5 = vld [vmem:[#allocation5 + $0xb30] sm:$0xff]  ;;  %v3920_v4 = vadd.f32 %v3919_v28, %v13023_v19  ;;  %4764 = vmatpush2.bf16.msra.mxu0 %v9281_v38  ;;  %v11058_v56 = vpack.c.bf16 %v5480_v40, %v5472_v29  ;;  %v13025_v60 = vld [vmem:[#allocation79_spill] sm:$0xff]  ;;  %v13026_v29 = vld [vmem:[#allocation30_spill] sm:$0xff] }
 0x1d0   :  { %v13022_v62 = vld [vmem:[#allocation29_spill] sm:$0xff]  ;;  %v4031_v13 = vadd.f32 %v4030_v30, %v3918_v33  ;;  %v4032_v2 = vpop.f32.mrf.mxu1  ;;  %v3921_v3 = vpop.f32.mrf.mxu0  ;;  %4765 = vmatprep.subr.bf16.mxu0 %v9274_v54  ;;  %v9266_v46 = vcombine.high %v535_v58, %v539_v5  ;;  %v5487_v54 = vmax.f32 %v4029_v15, 0.0 }
 0x1d1   :  { %4714 = vmatprep.mubr.bf16.mxu1 %v13022_v62  ;;  %v663_v59 = vld [vmem:[#allocation5 + $0xf10] sm:$0xff]  ;;  %13024 = vst [vmem:[#allocation25_spill] sm:$0xff] %v11058_v56  ;;  %4877 = vmatpush2.bf16.msra.mxu1 %v9409_v27  ;;  %v4033_v0 = vadd.f32 %v4032_v2, %v3920_v4  ;;  %v3922_v61 = vadd.f32 %v3921_v3, %v13025_v60  ;;  %v13027_v4 = vld [vmem:[#allocation31_spill] sm:$0xff]  ;;  %v272_v62 = vld [vmem:[#allocation5 + $0x2d8] sm:$0xff] }
 0x1d2   :  { %v667_v34 = vld [vmem:[#allocation5 + $0xf30] sm:$0xff]  ;;  %v4034_v33 = vpop.f32.mrf.mxu1  ;;  %4878 = vmatprep.subr.bf16.mxu1 %v9402_v39  ;;  %v3925_v50 = vpop.f32.mrf.mxu0  ;;  %4602 = vmatmul.mubr.bf16.gmra.mxu0 %v13026_v29  ;;  %v9265_v27 = vcombine.low %v535_v58, %v539_v5  ;;  %v5488_v60 = vmax.f32 %v4031_v13, 0.0 }
 0x1d3   :  { %v11061_v36 = vld [vmem:[#allocation5 + $0xad0] sm:$0xff]  ;;  %v9394_v30 = vcombine.high %v663_v59, %v667_v34  ;;  %v5495_v40 = vmax.f32 %v4033_v0, 0.0  ;;  %v4035_v10 = vadd.f32 %v4034_v33, %v3922_v61  ;;  %v3926_v48 = vadd.f32 %v3925_v50, %v10929_v9  ;;  %4766 = vmatpush2.bf16.msra.mxu0 %v9273_v12 }
 0x1d4   :  { %v531_v28 = vld [vmem:[#allocation5 + $0xaf0] sm:$0xff]  ;;  %v4038_v19 = vpop.f32.mrf.mxu1  ;;  %4715 = vmatmul.mubr.bf16.gmra.mxu1 %v13027_v4  ;;  %v3927_v39 = vpop.f32.mrf.mxu0  ;;  %4767 = vmatprep.subr.bf16.mxu0 %v9266_v46  ;;  %v9393_v2 = vcombine.low %v663_v59, %v667_v34  ;;  %v284_v4 = vld [vmem:[#allocation5 + $0x338] sm:$0xff] }
 0x1d5   :  { %v11064_v38 = vld [vmem:[#allocation5 + $0xed0] sm:$0xff]  ;;  %4879 = vmatpush2.bf16.msra.mxu1 %v9401_v35  ;;  %v9258_v3 = vcombine.high %v11061_v36, %v531_v28  ;;  %v11071_v51 = vpack.c.bf16 %v5495_v40, %v5487_v54  ;;  %v5496_v15 = vmax.f32 %v4035_v10, 0.0  ;;  %v4039_v58 = vadd.f32 %v4038_v19, %v3926_v48 }
 0x1d6   :  { %v659_v53 = vld [vmem:[#allocation5 + $0xef0] sm:$0xff]  ;;  %v3928_v61 = vadd.f32 %v3927_v39, %v10934_v24  ;;  %v4040_v9 = vpop.f32.mrf.mxu1  ;;  %4880 = vmatprep.subr.bf16.mxu1 %v9394_v30  ;;  %v3929_v35 = vpop.f32.mrf.mxu0  ;;  %v9257_v54 = vcombine.low %v11061_v36, %v531_v28 }
 0x1d7   :  { %v9386_v56 = vcombine.high %v11064_v38, %v659_v53  ;;  %13028 = vst [vmem:[#allocation74_spill] sm:$0xff] %v11071_v51  ;;  %v13029_v5 = vld [vmem:[#allocation32_spill] sm:$0xff]  ;;  %v13030_v0 = vld [vmem:[#allocation33_spill] sm:$0xff]  ;;  %v3930_v33 = vadd.f32 %v3929_v35, %v10937_v43  ;;  %4768 = vmatpush2.bf16.msra.mxu0 %v9265_v27  ;;  %v11078_v40 = vpack.c.bf16 %v5496_v15, %v5488_v60  ;;  %v13032_v60 = vld [vmem:[#allocation34_spill] sm:$0xff] }
 0x1d8   :  { %4611 = vmatprep.mubr.bf16.mxu0 %v13029_v5  ;;  %v519_v12 = vld [vmem:[#allocation5 + $0xa90] sm:$0xff]  ;;  %4724 = vmatprep.mubr.bf16.mxu1 %v13030_v0  ;;  %v4041_v46 = vadd.f32 %v4040_v9, %v3928_v61  ;;  %v4042_v50 = vpop.f32.mrf.mxu1  ;;  %v3931_v24 = vpop.f32.mrf.mxu0  ;;  %v9385_v30 = vcombine.low %v11064_v38, %v659_v53  ;;  %v5503_v38 = vmax.f32 %v4039_v58, 0.0  ;;  %v288_v0 = vld [vmem:[#allocation5 + $0x358] sm:$0xff] }
 0x1d9   :  { %v523_v13 = vld [vmem:[#allocation5 + $0xab0] sm:$0xff]  ;;  %13031 = vst [vmem:[#allocation75_spill] sm:$0xff] %v11078_v40  ;;  %4881 = vmatpush2.bf16.msra.mxu1 %v9393_v2  ;;  %4769 = vmatprep.subr.bf16.mxu0 %v9258_v3  ;;  %v4043_v19 = vadd.f32 %v4042_v50, %v3930_v33  ;;  %v3932_v39 = vadd.f32 %v3931_v24, %v10941_v44  ;;  %v13033_v44 = vld [vmem:[#allocation35_spill] sm:$0xff]  ;;  %v13064_v5 = vld [vmem:[#allocation58_spill] sm:$0xff] }
 0x1da   :  { %v647_v59 = vld [vmem:[#allocation5 + $0xe90] sm:$0xff]  ;;  %v9250_v10 = vcombine.high %v519_v12, %v523_v13  ;;  %v4044_v61 = vpop.f32.mrf.mxu1  ;;  %4882 = vmatprep.subr.bf16.mxu1 %v9386_v56  ;;  %v3935_v28 = vpop.f32.mrf.mxu0  ;;  %4612 = vmatmul.mubr.bf16.gmra.mxu0 %v13032_v60  ;;  %v9249_v2 = vcombine.low %v519_v12, %v523_v13  ;;  %v5504_v56 = vmax.f32 %v4041_v46, 0.0 }
 0x1db   :  { %v651_v34 = vld [vmem:[#allocation5 + $0xeb0] sm:$0xff]  ;;  %v5511_v53 = vmax.f32 %v4043_v19, 0.0  ;;  %v4045_v3 = vadd.f32 %v4044_v61, %v3932_v39  ;;  %v3936_v15 = vadd.f32 %v3935_v28, %v10945_v47  ;;  %4770 = vmatpush2.bf16.msra.mxu0 %v9257_v54 }
 0x1dc   :  { %v11081_v48 = vld [vmem:[#allocation5 + $0xa50] sm:$0xff]  ;;  %v9378_v43 = vcombine.high %v647_v59, %v651_v34  ;;  %v4048_v35 = vpop.f32.mrf.mxu1  ;;  %4725 = vmatmul.mubr.bf16.gmra.mxu1 %v13033_v44  ;;  %v3937_v33 = vpop.f32.mrf.mxu0  ;;  %4771 = vmatprep.subr.bf16.mxu0 %v9250_v10  ;;  %v9377_v50 = vcombine.low %v647_v59, %v651_v34  ;;  %v300_v44 = vld [vmem:[#allocation5 + $0x3b8] sm:$0xff] }
 0x1dd   :  { %v11084_v9 = vld [vmem:[#allocation5 + $0xa70] sm:$0xff]  ;;  %4883 = vmatpush2.bf16.msra.mxu1 %v9385_v30  ;;  %v11097_v58 = vpack.c.bf16 %v5511_v53, %v5503_v38  ;;  %v5512_v13 = vmax.f32 %v4045_v3, 0.0  ;;  %v4049_v19 = vadd.f32 %v4048_v35, %v3936_v15  ;;  %v3938_v47 = vadd.f32 %v3937_v33, %v10950_v23  ;;  %v11112_v33 = vld [vmem:[#allocation5 + $0x1d8] sm:$0xff] }
 0x1de   :  { %v11086_v27 = vld [vmem:[#allocation5 + $0xe50] sm:$0xff]  ;;  %v9242_v24 = vcombine.high %v11081_v48, %v11084_v9  ;;  %v4050_v39 = vpop.f32.mrf.mxu1  ;;  %4884 = vmatprep.subr.bf16.mxu1 %v9378_v43  ;;  %v3939_v59 = vpop.f32.mrf.mxu0  ;;  %v9241_v23 = vcombine.low %v11081_v48, %v11084_v9  ;;  %v11117_v48 = vld [vmem:[#allocation5 + $0x5d8] sm:$0xff] }
 0x1df   :  { %v11088_v36 = vld [vmem:[#allocation5 + $0xe70] sm:$0xff]  ;;  %13034 = vst [vmem:[#allocation26_spill] sm:$0xff] %v11097_v58  ;;  %v4051_v28 = vadd.f32 %v4050_v39, %v3938_v47  ;;  %v3940_v38 = vadd.f32 %v3939_v59, %v10953_v49  ;;  %4772 = vmatpush2.bf16.msra.mxu0 %v9249_v2  ;;  %v11107_v3 = vpack.c.bf16 %v5512_v13, %v5504_v56  ;;  %v11115_v59 = vld [vmem:[#allocation5 + $0x1f8] sm:$0xff]  ;;  %v13040_v58 = vld [vmem:[#allocation39_spill] sm:$0xff] }
 0x1e0   :  { %v9370_v12 = vcombine.high %v11086_v27, %v11088_v36  ;;  %v13035_v54 = vld [vmem:[#allocation36_spill] sm:$0xff]  ;;  %v13036_v34 = vld [vmem:[#allocation37_spill] sm:$0xff]  ;;  %v4052_v53 = vpop.f32.mrf.mxu1  ;;  %v3941_v43 = vpop.f32.mrf.mxu0  ;;  %4773 = vmatprep.subr.bf16.mxu0 %v9242_v24  ;;  %v9369_v15 = vcombine.low %v11086_v27, %v11088_v36  ;;  %v8972_v40 = vcombine.high %v11112_v33, %v11115_v59 }
 0x1e1   :  { %4621 = vmatprep.mubr.bf16.mxu0 %v13035_v54  ;;  %v11101_v46 = vld [vmem:[#allocation5 + $0xa10] sm:$0xff]  ;;  %4734 = vmatprep.mubr.bf16.mxu1 %v13036_v34  ;;  %13037 = vst [vmem:[#allocation76_spill] sm:$0xff] %v11107_v3  ;;  %v4053_v47 = vadd.f32 %v4052_v53, %v3940_v38  ;;  %v3942_v49 = vadd.f32 %v3941_v43, %v10957_v26  ;;  %v11119_v9 = vld [vmem:[#allocation5 + $0x5f8] sm:$0xff]  ;;  %v5519_v38 = vmax.f32 %v4049_v19, 0.0  ;;  %v5520_v3 = vmax.f32 %v4051_v28, 0.0 }
 0x1e2   :  { %v507_v30 = vld [vmem:[#allocation5 + $0xa30] sm:$0xff]  ;;  %4885 = vmatpush2.bf16.msra.mxu1 %v9377_v50  ;;  %v4054_v39 = vpop.f32.mrf.mxu1  ;;  %v3945_v56 = vpop.f32.mrf.mxu0  ;;  %v13038_v50 = vld [vmem:[#allocation38_spill] sm:$0xff]  ;;  %v9099_v19 = vcombine.low %v11117_v48, %v11119_v9 }
 0x1e3   :  { %v631_v10 = vld [vmem:[#allocation5 + $0xe10] sm:$0xff]  ;;  %v9234_v35 = vcombine.high %v11101_v46, %v507_v30  ;;  %4886 = vmatprep.subr.bf16.mxu1 %v9370_v12  ;;  %4622 = vmatmul.mubr.bf16.gmra.mxu0 %v13038_v50  ;;  %v9233_v27 = vcombine.low %v11101_v46, %v507_v30  ;;  %v5527_v53 = vmax.f32 %v4053_v47, 0.0  ;;  %v4055_v26 = vadd.f32 %v4054_v39, %v3942_v49  ;;  %v10334_v39 = vld [vmem:[#allocation7] sm:$0xff]  ;;  %v304_v34 = vld [vmem:[#allocation5 + $0x3d8] sm:$0xff] }
 0x1e4   :  { %v635_v61 = vld [vmem:[#allocation5 + $0xe30] sm:$0xff]  ;;  %v3946_v12 = vadd.f32 %v3945_v56, %v10961_v8  ;;  %v4058_v43 = vpop.f32.mrf.mxu1  ;;  %4735 = vmatmul.mubr.bf16.gmra.mxu1 %v13040_v58  ;;  %4774 = vmatpush2.bf16.msra.mxu0 %v9241_v23  ;;  %v3947_v51 = vpop.f32.mrf.mxu0  ;;  %v9100_v46 = vcombine.high %v11117_v48, %v11119_v9  ;;  %v232_v23 = vld [vmem:[#allocation5 + $0x198] sm:$0xff] }
 0x1e5   :  { %v9362_v2 = vcombine.high %v631_v10, %v635_v61  ;;  %v9361_v36 = vcombine.low %v631_v10, %v635_v61  ;;  %v13039_v24 = vld [vmem:[#allocation72_spill] sm:$0xff]  ;;  %4775 = vmatprep.subr.bf16.mxu0 %v9234_v35  ;;  %v11131_v30 = vpack.c.bf16 %v5527_v53, %v5519_v38  ;;  %v5528_v10 = vmax.f32 %v4055_v26, 0.0  ;;  %v13043_v49 = vld [vmem:[#allocation41_spill] sm:$0xff]  ;;  %v13056_v58 = vld [vmem:[#allocation50_spill] sm:$0xff] }
 0x1e6   :  { %v12877_v13 = vsub.s32 2, %v13039_v24  ;;  %4887 = vmatpush2.bf16.msra.mxu1 %v9369_v15  ;;  %v4059_v8 = vadd.f32 %v4058_v43, %v3946_v12  ;;  %v3948_v61 = vadd.f32 %v3947_v51, %v10966_v1  ;;  %v4060_v47 = vpop.f32.mrf.mxu1  ;;  %v13042_v28 = vld [vmem:[#allocation40_spill] sm:$0xff]  ;;  %v236_v15 = vld [vmem:[#allocation5 + $0x1b8] sm:$0xff]  ;;  %v3949_v35 = vpop.f32.mrf.mxu0  ;;  %4890 = vmatprep.mubr.bf16.mxu1 %v13043_v49  ;;  %v8971_v51 = vcombine.low %v11112_v33, %v11115_v59 }
 0x1e7   :  { %13041 = vst [vmem:[#allocation27_spill] sm:$0xff] %v11131_v30  ;;  %4888 = vmatprep.subr.bf16.mxu1 %v9362_v2  ;;  %4777 = vmatprep.mubr.bf16.mxu0 %v13042_v28  ;;  %v360_v38 = vld [vmem:[#allocation5 + $0x598] sm:$0xff]  ;;  %v3950_v12 = vadd.f32 %v3949_v35, %v10969_v17  ;;  %v11143_v2 = vpack.c.bf16 %v5528_v10, %v5520_v3 }
 0x1e8   :  { %v11138_v56 = vrot.slane %v10334_v39, %v12877_v13  ;;  %v364_v53 = vld [vmem:[#allocation5 + $0x5b8] sm:$0xff]  ;;  %v4061_v26 = vadd.f32 %v4060_v47, %v3948_v61  ;;  %v4062_v1 = vpop.f32.mrf.mxu1  ;;  %4776 = vmatpush2.bf16.msra.mxu0 %v9233_v27  ;;  %v3951_v43 = vpop.f32.mrf.mxu0  ;;  %v8964_v13 = vcombine.high %v232_v23, %v236_v15  ;;  %v13045_v27 = vsub.s32 3, %v13039_v24 }
 0x1e9   :  { %13044 = vst [vmem:[#allocation77_spill] sm:$0xff] %v11143_v2  ;;  %4971 = vmatprep.subr.bf16.mxu0 %v8972_v40  ;;  %v11147_v30 = vld [vmem:[#allocation5 + $0x158] sm:$0xff]  ;;  %v4063_v16 = vadd.f32 %v4062_v1, %v3950_v12  ;;  %v3952_v61 = vadd.f32 %v3951_v43, %v10973_v6  ;;  %v9092_v3 = vcombine.high %v360_v38, %v364_v53  ;;  %v5535_v9 = vmax.f32 %v4059_v8, 0.0  ;;  %v13047_v1 = vld [vmem:[#allocation43_spill] sm:$0xff] }
 0x1ea   :  { %4889 = vmatpush2.bf16.msra.mxu1 %v9361_v36  ;;  %v4064_v17 = vpop.f32.mrf.mxu1  ;;  %v11152_v47 = vrot.slane %v10334_v39, %v13045_v27  ;;  %v228_v33 = vld [vmem:[#allocation5 + $0x178] sm:$0xff]  ;;  %v4101_v40 = vpop.f32.mrf.mxu0  ;;  %v8963_v48 = vcombine.low %v232_v23, %v236_v15  ;;  %v9091_v43 = vcombine.low %v360_v38, %v364_v53 }
 0x1eb   :  { %5084 = vmatprep.subr.bf16.mxu1 %v9100_v46  ;;  %v352_v59 = vld [vmem:[#allocation5 + $0x558] sm:$0xff]  ;;  %v5543_v35 = vmax.f32 %v4063_v16, 0.0  ;;  %v4065_v2 = vadd.f32 %v4064_v17, %v3952_v61  ;;  %v4102_v12 = vadd.f32 %v4101_v40, %v11138_v56  ;;  %v5536_v46 = vmax.f32 %v4061_v26, 0.0  ;;  %v13049_v61 = vld [vmem:[#allocation44_spill] sm:$0xff] }
 0x1ec   :  { %v356_v36 = vld [vmem:[#allocation5 + $0x578] sm:$0xff]  ;;  %v4214_v6 = vpop.f32.mrf.mxu1  ;;  %v4103_v39 = vpop.f32.mrf.mxu0  ;;  %v8956_v27 = vcombine.high %v11147_v30, %v228_v33 }
 0x1ed   :  { %v13046_v10 = vld [vmem:[#allocation42_spill] sm:$0xff]  ;;  %4891 = vmatmul.mubr.bf16.vlgmr.msra.gmra.mxu1 %v13047_v1  ;;  %v9084_v49 = vcombine.high %v352_v59, %v356_v36  ;;  %v11158_v28 = vpack.c.bf16 %v5543_v35, %v5535_v9  ;;  %v5544_v23 = vmax.f32 %v4065_v2, 0.0  ;;  %v11160_v8 = vadd.f32 %v4214_v6, %v4102_v12  ;;  %v13050_v17 = vld [vmem:[#allocation45_spill] sm:$0xff] }
 0x1ee   :  { %4778 = vmatmul.mubr.bf16.vlgmr.msra.gmra.mxu0 %v13046_v10  ;;  %5085 = vmatpush1.bf16.msra.mxu1 %v9099_v19  ;;  %v4104_v16 = vadd.f32 %v4103_v39, %v11152_v47  ;;  %v4216_v15 = vpop.f32.mrf.mxu1  ;;  %v220_v26 = vld [vmem:[#allocation5 + $0x138] sm:$0xff]  ;;  %v4105_v19 = vpop.f32.mrf.mxu0  ;;  %v8955_v9 = vcombine.low %v11147_v30, %v228_v33  ;;  %v9083_v12 = vcombine.low %v352_v59, %v356_v36  ;;  %v13053_v36 = vld [vmem:[#allocation47_spill] sm:$0xff] }
 0x1ef   :  { %4972 = vmatpush1.bf16.msra.mxu0 %v8971_v51  ;;  %13048 = vst [vmem:[#allocation78_spill] sm:$0xff] %v11158_v28  ;;  %5086 = vmatprep.subr.bf16.mxu1 %v9092_v3  ;;  %v216_v51 = vld [vmem:[#allocation5 + $0x118] sm:$0xff]  ;;  %v4106_v40 = vadd.f32 %v4105_v19, %v11138_v56  ;;  %v11169_v35 = vpack.c.bf16 %v5544_v23, %v5536_v46 }
 0x1f0   :  { %4973 = vmatprep.subr.bf16.mxu0 %v8964_v13  ;;  %4787 = vmatprep.mubr.bf16.mxu0 %v13049_v61  ;;  %v344_v13 = vld [vmem:[#allocation5 + $0x518] sm:$0xff]  ;;  %v11165_v53 = vadd.f32 %v4216_v15, %v4104_v16  ;;  %v4218_v2 = vpop.f32.mrf.mxu1  ;;  %v4107_v3 = vpop.f32.mrf.mxu0  ;;  %v8948_v6 = vcombine.high %v216_v51, %v220_v26 }
 0x1f1   :  { %4900 = vmatprep.mubr.bf16.mxu1 %v13050_v17  ;;  %v348_v38 = vld [vmem:[#allocation5 + $0x538] sm:$0xff]  ;;  %13051 = vst [vmem:[#allocation79_spill] sm:$0xff] %v11169_v35  ;;  %v11171_v39 = vadd.f32 %v4218_v2, %v4106_v40  ;;  %v4108_v28 = vadd.f32 %v4107_v3, %v11152_v47 }
 0x1f2   :  { %5087 = vmatpush1.bf16.msra.mxu1 %v9091_v43  ;;  %v4220_v17 = vpop.f32.mrf.mxu1  ;;  %v9076_v16 = vcombine.high %v344_v13, %v348_v38  ;;  %v208_v15 = vld [vmem:[#allocation5 + $0xd8] sm:$0xff]  ;;  %v4111_v61 = vpop.f32.mrf.mxu0 }
 0x1f3   :  { %4974 = vmatpush1.bf16.msra.mxu0 %v8963_v48  ;;  %5088 = vmatprep.subr.bf16.mxu1 %v9084_v49  ;;  %v212_v19 = vld [vmem:[#allocation5 + $0xf8] sm:$0xff]  ;;  %v11175_v46 = vadd.f32 %v4220_v17, %v4108_v28  ;;  %v4112_v43 = vadd.f32 %v4111_v61, %v11138_v56  ;;  %v9075_v49 = vcombine.low %v344_v13, %v348_v38  ;;  %v13054_v28 = vld [vmem:[#allocation48_spill] sm:$0xff] }
 0x1f4   :  { %4975 = vmatprep.subr.bf16.mxu0 %v8956_v27  ;;  %v13052_v48 = vld [vmem:[#allocation46_spill] sm:$0xff]  ;;  %v4224_v59 = vpop.f32.mrf.mxu1  ;;  %v8947_v27 = vcombine.low %v216_v51, %v220_v26  ;;  %v4113_v23 = vpop.f32.mrf.mxu0  ;;  %v8940_v40 = vcombine.high %v208_v15, %v212_v19 }
 0x1f5   :  { %v336_v30 = vld [vmem:[#allocation5 + $0x4d8] sm:$0xff]  ;;  %4901 = vmatmul.mubr.bf16.gmra.mxu1 %v13053_v36  ;;  %v11179_v2 = vadd.f32 %v4224_v59, %v4112_v43  ;;  %v4114_v3 = vadd.f32 %v4113_v23, %v11152_v47 }
 0x1f6   :  { %4788 = vmatmul.mubr.bf16.gmra.mxu0 %v13052_v48  ;;  %v340_v33 = vld [vmem:[#allocation5 + $0x4f8] sm:$0xff]  ;;  %5089 = vmatpush1.bf16.msra.mxu1 %v9083_v12  ;;  %v4226_v35 = vpop.f32.mrf.mxu1  ;;  %v4115_v1 = vpop.f32.mrf.mxu0  ;;  %v8939_v12 = vcombine.low %v208_v15, %v212_v19 }
 0x1f7   :  { %4976 = vmatpush1.bf16.msra.mxu0 %v8955_v9  ;;  %5090 = vmatprep.subr.bf16.mxu1 %v9076_v16  ;;  %v9068_v17 = vcombine.high %v336_v30, %v340_v33  ;;  %v200_v61 = vld [vmem:[#allocation5 + $0x98] sm:$0xff]  ;;  %v11184_v9 = vadd.f32 %v4226_v35, %v4114_v3  ;;  %v4116_v13 = vadd.f32 %v4115_v1, %v11138_v56 }
 0x1f8   :  { %4977 = vmatprep.subr.bf16.mxu0 %v8948_v6  ;;  %4797 = vmatprep.mubr.bf16.mxu0 %v13054_v28  ;;  %v204_v48 = vld [vmem:[#allocation5 + $0xb8] sm:$0xff]  ;;  %v4228_v38 = vpop.f32.mrf.mxu1  ;;  %v4117_v6 = vpop.f32.mrf.mxu0  ;;  %v9067_v16 = vcombine.low %v336_v30, %v340_v33  ;;  %v13057_v33 = vld [vmem:[#allocation51_spill] sm:$0xff] }
 0x1f9   :  { %v13055_v36 = vld [vmem:[#allocation49_spill] sm:$0xff]  ;;  %v8932_v43 = vcombine.high %v200_v61, %v204_v48  ;;  %v11187_v59 = vadd.f32 %v4228_v38, %v4116_v13  ;;  %v4118_v23 = vadd.f32 %v4117_v6, %v11152_v47  ;;  %v13060_v54 = vld [vmem:[#allocation54_spill] sm:$0xff] }
 0x1fa   :  { %4910 = vmatprep.mubr.bf16.mxu1 %v13055_v36  ;;  %v328_v51 = vld [vmem:[#allocation5 + $0x498] sm:$0xff]  ;;  %5091 = vmatpush1.bf16.msra.mxu1 %v9075_v49  ;;  %v4230_v28 = vpop.f32.mrf.mxu1  ;;  %v4121_v3 = vpop.f32.mrf.mxu0  ;;  %v8931_v49 = vcombine.low %v200_v61, %v204_v48 }
 0x1fb   :  { %v332_v26 = vld [vmem:[#allocation5 + $0x4b8] sm:$0xff]  ;;  %4978 = vmatpush1.bf16.msra.mxu0 %v8947_v27  ;;  %5092 = vmatprep.subr.bf16.mxu1 %v9068_v17  ;;  %v11191_v15 = vadd.f32 %v4230_v28, %v4118_v23  ;;  %v4122_v19 = vadd.f32 %v4121_v3, %v11138_v56  ;;  %v13058_v28 = vld [vmem:[#allocation52_spill] sm:$0xff] }
 0x1fc   :  { %4979 = vmatprep.subr.bf16.mxu0 %v8940_v40  ;;  %v9060_v36 = vcombine.high %v328_v51, %v332_v26  ;;  %v192_v10 = vld [vmem:[#allocation5 + $0x58] sm:$0xff]  ;;  %v4234_v30 = vpop.f32.mrf.mxu1  ;;  %v4123_v40 = vpop.f32.mrf.mxu0  ;;  %v9059_v17 = vcombine.low %v328_v51, %v332_v26 }
 0x1fd   :  { %v196_v35 = vld [vmem:[#allocation5 + $0x78] sm:$0xff]  ;;  %4911 = vmatmul.mubr.bf16.gmra.mxu1 %v13057_v33  ;;  %v11195_v38 = vadd.f32 %v4234_v30, %v4122_v19  ;;  %v4124_v6 = vadd.f32 %v4123_v40, %v11152_v47 }
 0x1fe   :  { %4798 = vmatmul.mubr.bf16.gmra.mxu0 %v13056_v58  ;;  %v320_v1 = vld [vmem:[#allocation5 + $0x458] sm:$0xff]  ;;  %5093 = vmatpush1.bf16.msra.mxu1 %v9067_v16  ;;  %v8924_v13 = vcombine.high %v192_v10, %v196_v35  ;;  %v4236_v58 = vpop.f32.mrf.mxu1  ;;  %v4125_v50 = vpop.f32.mrf.mxu0  ;;  %v8923_v16 = vcombine.low %v192_v10, %v196_v35 }
 0x1ff   :  { %v324_v27 = vld [vmem:[#allocation5 + $0x478] sm:$0xff]  ;;  %4980 = vmatpush1.bf16.msra.mxu0 %v8939_v12  ;;  %5094 = vmatprep.subr.bf16.mxu1 %v9060_v36  ;;  %v11200_v12 = vadd.f32 %v4236_v58, %v4124_v6  ;;  %v4126_v51 = vadd.f32 %v4125_v50, %v11138_v56 }
 0x200   :  { %4981 = vmatprep.subr.bf16.mxu0 %v8932_v43  ;;  %4807 = vmatprep.mubr.bf16.mxu0 %v13058_v28  ;;  %v9052_v23 = vcombine.high %v320_v1, %v324_v27  ;;  %v184_v3 = vld [vmem:[#allocation5 + $0x18] sm:$0xff]  ;;  %v4238_v26 = vpop.f32.mrf.mxu1  ;;  %v4127_v43 = vpop.f32.mrf.mxu0  ;;  %v9051_v36 = vcombine.low %v320_v1, %v324_v27  ;;  %v13061_v27 = vld [vmem:[#allocation55_spill] sm:$0xff] }
 0x201   :  { %v188_v24 = vld [vmem:[#allocation5 + $0x38] sm:$0xff]  ;;  %v11203_v30 = vadd.f32 %v4238_v26, %v4126_v51  ;;  %v4128_v40 = vadd.f32 %v4127_v43, %v11152_v47 }
 0x202   :  { %v13059_v33 = vld [vmem:[#allocation53_spill] sm:$0xff]  ;;  %5095 = vmatpush1.bf16.msra.mxu1 %v9059_v17  ;;  %v8916_v19 = vcombine.high %v184_v3, %v188_v24  ;;  %v4240_v28 = vpop.f32.mrf.mxu1  ;;  %v4131_v6 = vpop.f32.mrf.mxu0  ;;  %v8915_v17 = vcombine.low %v184_v3, %v188_v24 }
 0x203   :  { %4920 = vmatprep.mubr.bf16.mxu1 %v13059_v33  ;;  %v312_v48 = vld [vmem:[#allocation5 + $0x418] sm:$0xff]  ;;  %4982 = vmatpush1.bf16.msra.mxu0 %v8931_v49  ;;  %v11207_v10 = vadd.f32 %v4240_v28, %v4128_v40  ;;  %v4132_v35 = vadd.f32 %v4131_v6, %v11138_v56  ;;  %v13062_v28 = vld [vmem:[#allocation56_spill] sm:$0xff] }
 0x204   :  { %v316_v61 = vld [vmem:[#allocation5 + $0x438] sm:$0xff]  ;;  %4983 = vmatprep.subr.bf16.mxu0 %v8924_v13  ;;  %5096 = vmatprep.subr.bf16.mxu1 %v9052_v23  ;;  %v4244_v1 = vpop.f32.mrf.mxu1  ;;  %v4133_v13 = vpop.f32.mrf.mxu0 }
 0x205   :  { %v9044_v33 = vcombine.high %v312_v48, %v316_v61  ;;  %v308_v58 = vld [vmem:[#allocation5 + $0x3f8] sm:$0xff]  ;;  %4921 = vmatmul.mubr.bf16.gmra.mxu1 %v13061_v27  ;;  %v9043_v23 = vcombine.low %v312_v48, %v316_v61  ;;  %v11211_v26 = vadd.f32 %v4244_v1, %v4132_v35  ;;  %v4134_v43 = vadd.f32 %v4133_v13, %v11152_v47 }
 0x206   :  { %4808 = vmatmul.mubr.bf16.gmra.mxu0 %v13060_v54  ;;  %v432_v50 = vld [vmem:[#allocation5 + $0x7d8] sm:$0xff]  ;;  %5097 = vmatpush1.bf16.msra.mxu1 %v9051_v36  ;;  %v9036_v51 = vcombine.high %v304_v34, %v308_v58  ;;  %v4246_v54 = vpop.f32.mrf.mxu1  ;;  %v4135_v60 = vpop.f32.mrf.mxu0  ;;  %v9035_v36 = vcombine.low %v304_v34, %v308_v58 }
 0x207   :  { %v436_v49 = vld [vmem:[#allocation5 + $0x7f8] sm:$0xff]  ;;  %4984 = vmatpush1.bf16.msra.mxu0 %v8923_v16  ;;  %5098 = vmatprep.subr.bf16.mxu1 %v9044_v33  ;;  %v11216_v16 = vadd.f32 %v4246_v54, %v4134_v43  ;;  %v4136_v48 = vadd.f32 %v4135_v60, %v11138_v56 }
 0x208   :  { %4985 = vmatprep.subr.bf16.mxu0 %v8916_v19  ;;  %4817 = vmatprep.mubr.bf16.mxu0 %v13062_v28  ;;  %v9164_v40 = vcombine.high %v432_v50, %v436_v49  ;;  %v296_v6 = vld [vmem:[#allocation5 + $0x398] sm:$0xff]  ;;  %v4248_v61 = vpop.f32.mrf.mxu1  ;;  %v4137_v19 = vpop.f32.mrf.mxu0  ;;  %v9163_v33 = vcombine.low %v432_v50, %v436_v49  ;;  %v13065_v49 = vld [vmem:[#allocation59_spill] sm:$0xff] }
 0x209   :  { %v13063_v27 = vld [vmem:[#allocation57_spill] sm:$0xff]  ;;  %v9028_v35 = vcombine.high %v296_v6, %v300_v44  ;;  %v11219_v1 = vadd.f32 %v4248_v61, %v4136_v48  ;;  %v4138_v13 = vadd.f32 %v4137_v19, %v11152_v47 }
 0x20a   :  { %4930 = vmatprep.mubr.bf16.mxu1 %v13063_v27  ;;  %v424_v24 = vld [vmem:[#allocation5 + $0x798] sm:$0xff]  ;;  %5099 = vmatpush1.bf16.msra.mxu1 %v9043_v23  ;;  %v4250_v28 = vpop.f32.mrf.mxu1  ;;  %v4141_v43 = vpop.f32.mrf.mxu0  ;;  %v9027_v23 = vcombine.low %v296_v6, %v300_v44 }
 0x20b   :  { %v428_v3 = vld [vmem:[#allocation5 + $0x7b8] sm:$0xff]  ;;  %4986 = vmatpush1.bf16.msra.mxu0 %v8915_v17  ;;  %5100 = vmatprep.subr.bf16.mxu1 %v9164_v40  ;;  %v11223_v34 = vadd.f32 %v4250_v28, %v4138_v13  ;;  %v4142_v58 = vadd.f32 %v4141_v43, %v11138_v56  ;;  %v13066_v28 = vld [vmem:[#allocation60_spill] sm:$0xff] }
 0x20c   :  { %4987 = vmatprep.subr.bf16.mxu0 %v9036_v51  ;;  %v9156_v27 = vcombine.high %v424_v24, %v428_v3  ;;  %v292_v54 = vld [vmem:[#allocation5 + $0x378] sm:$0xff]  ;;  %v4254_v50 = vpop.f32.mrf.mxu1  ;;  %v4143_v51 = vpop.f32.mrf.mxu0  ;;  %v9155_v40 = vcombine.low %v424_v24, %v428_v3 }
 0x20d   :  { %v416_v60 = vld [vmem:[#allocation5 + $0x758] sm:$0xff]  ;;  %4931 = vmatmul.mubr.bf16.gmra.mxu1 %v13065_v49  ;;  %v9020_v48 = vcombine.high %v288_v0, %v292_v54  ;;  %v11227_v61 = vadd.f32 %v4254_v50, %v4142_v58  ;;  %v4144_v19 = vadd.f32 %v4143_v51, %v11152_v47 }
 0x20e   :  { %4818 = vmatmul.mubr.bf16.gmra.mxu0 %v13064_v5  ;;  %v420_v17 = vld [vmem:[#allocation5 + $0x778] sm:$0xff]  ;;  %5101 = vmatpush2.bf16.msra.mxu1 %v9163_v33  ;;  %v4256_v5 = vpop.f32.mrf.mxu1  ;;  %v4145_v29 = vpop.f32.mrf.mxu0  ;;  %v9019_v33 = vcombine.low %v288_v0, %v292_v54 }
 0x20f   :  { %4988 = vmatpush2.bf16.msra.mxu0 %v9035_v36  ;;  %5102 = vmatprep.subr.bf16.mxu1 %v9156_v27  ;;  %v9148_v13 = vcombine.high %v416_v60, %v420_v17  ;;  %v280_v43 = vld [vmem:[#allocation5 + $0x318] sm:$0xff]  ;;  %v11232_v36 = vadd.f32 %v4256_v5, %v4144_v19  ;;  %v4146_v24 = vadd.f32 %v4145_v29, %v11138_v56 }
 0x210   :  { %4989 = vmatprep.subr.bf16.mxu0 %v9028_v35  ;;  %4827 = vmatprep.mubr.bf16.mxu0 %v13066_v28  ;;  %v13067_v49 = vld [vmem:[#allocation61_spill] sm:$0xff]  ;;  %v4258_v3 = vpop.f32.mrf.mxu1  ;;  %v4147_v35 = vpop.f32.mrf.mxu0  ;;  %v9147_v27 = vcombine.low %v416_v60, %v420_v17  ;;  %v9012_v58 = vcombine.high %v280_v43, %v284_v4  ;;  %v13071_v17 = vld [vmem:[#allocation63_spill] sm:$0xff] }
 0x211   :  { %4940 = vmatprep.mubr.bf16.mxu1 %v13067_v49  ;;  %v408_v44 = vld [vmem:[#allocation5 + $0x718] sm:$0xff]  ;;  %v11235_v50 = vadd.f32 %v4258_v3, %v4146_v24  ;;  %v4148_v51 = vadd.f32 %v4147_v35, %v11152_v47 }
 0x212   :  { %v412_v6 = vld [vmem:[#allocation5 + $0x738] sm:$0xff]  ;;  %5103 = vmatpush2.bf16.msra.mxu1 %v9155_v40  ;;  %v4260_v28 = vpop.f32.mrf.mxu1  ;;  %v4151_v19 = vpop.f32.mrf.mxu0  ;;  %v9011_v40 = vcombine.low %v280_v43, %v284_v4 }
 0x213   :  { %4990 = vmatpush2.bf16.msra.mxu0 %v9027_v23  ;;  %13068 = vst [vmem:[#allocation84_spill] sm:$0xff] %v11235_v50  ;;  %5104 = vmatprep.subr.bf16.mxu1 %v9148_v13  ;;  %v9140_v49 = vcombine.high %v408_v44, %v412_v6  ;;  %v276_v5 = vld [vmem:[#allocation5 + $0x2f8] sm:$0xff]  ;;  %v11239_v0 = vadd.f32 %v4260_v28, %v4148_v51  ;;  %v13073_v28 = vld [vmem:[#allocation64_spill] sm:$0xff] }
 0x214   :  { %4991 = vmatprep.subr.bf16.mxu0 %v9020_v48  ;;  %v400_v29 = vld [vmem:[#allocation5 + $0x6d8] sm:$0xff]  ;;  %v4152_v54 = vadd.f32 %v4151_v19, %v11138_v56  ;;  %v4264_v60 = vpop.f32.mrf.mxu1  ;;  %v4153_v48 = vpop.f32.mrf.mxu0  ;;  %v9139_v13 = vcombine.low %v408_v44, %v412_v6  ;;  %v9004_v24 = vcombine.high %v272_v62, %v276_v5 }
 0x215   :  { %v404_v23 = vld [vmem:[#allocation5 + $0x6f8] sm:$0xff]  ;;  %13070 = vst [vmem:[#allocation85_spill] sm:$0xff] %v11239_v0  ;;  %4941 = vmatmul.mubr.bf16.gmra.mxu1 %v13071_v17  ;;  %v4154_v35 = vadd.f32 %v4153_v48, %v11152_v47 }
 0x216   :  { %4828 = vmatmul.mubr.bf16.gmra.mxu0 %v13069_v63  ;;  %5105 = vmatpush2.bf16.msra.mxu1 %v9147_v27  ;;  %v11243_v3 = vadd.f32 %v4264_v60, %v4152_v54  ;;  %v4266_v63 = vpop.f32.mrf.mxu1  ;;  %v9132_v51 = vcombine.high %v400_v29, %v404_v23  ;;  %v264_v19 = vld [vmem:[#allocation5 + $0x298] sm:$0xff]  ;;  %v4155_v50 = vpop.f32.mrf.mxu0  ;;  %v9003_v27 = vcombine.low %v272_v62, %v276_v5 }
 0x217   :  { %4992 = vmatpush2.bf16.msra.mxu0 %v9019_v33  ;;  %5106 = vmatprep.subr.bf16.mxu1 %v9140_v49  ;;  %v268_v0 = vld [vmem:[#allocation5 + $0x2b8] sm:$0xff]  ;;  %v11248_v33 = vadd.f32 %v4266_v63, %v4154_v35  ;;  %v4156_v44 = vadd.f32 %v4155_v50, %v11138_v56  ;;  %v9131_v49 = vcombine.low %v400_v29, %v404_v23  ;;  %v13079_v23 = vld [vmem:[#allocation67_spill] sm:$0xff] }
 0x218   :  { %4993 = vmatprep.subr.bf16.mxu0 %v9012_v58  ;;  %13072 = vst [vmem:[#allocation86_spill] sm:$0xff] %v11243_v3  ;;  %4837 = vmatprep.mubr.bf16.mxu0 %v13073_v28  ;;  %v13074_v17 = vld [vmem:[#allocation65_spill] sm:$0xff]  ;;  %v4268_v6 = vpop.f32.mrf.mxu1  ;;  %v4157_v58 = vpop.f32.mrf.mxu0  ;;  %v8996_v54 = vcombine.high %v264_v19, %v268_v0 }
 0x219   :  { %4950 = vmatprep.mubr.bf16.mxu1 %v13074_v17  ;;  %v392_v4 = vld [vmem:[#allocation5 + $0x698] sm:$0xff]  ;;  %13075 = vst [vmem:[#allocation87_spill] sm:$0xff] %v11248_v33  ;;  %v11251_v60 = vadd.f32 %v4268_v6, %v4156_v44  ;;  %v4158_v48 = vadd.f32 %v4157_v58, %v11152_v47 }
 0x21a   :  { %v396_v43 = vld [vmem:[#allocation5 + $0x6b8] sm:$0xff]  ;;  %5107 = vmatpush2.bf16.msra.mxu1 %v9139_v13  ;;  %v4270_v28 = vpop.f32.mrf.mxu1  ;;  %v4161_v35 = vpop.f32.mrf.mxu0  ;;  %v8995_v13 = vcombine.low %v264_v19, %v268_v0 }
 0x21b   :  { %4994 = vmatpush2.bf16.msra.mxu0 %v9011_v40  ;;  %13076 = vst [vmem:[#allocation88_spill] sm:$0xff] %v11251_v60  ;;  %5108 = vmatprep.subr.bf16.mxu1 %v9132_v51  ;;  %v9124_v17 = vcombine.high %v392_v4, %v396_v43  ;;  %v256_v3 = vld [vmem:[#allocation5 + $0x258] sm:$0xff]  ;;  %v11255_v62 = vadd.f32 %v4270_v28, %v4158_v48  ;;  %v13081_v28 = vld [vmem:[#allocation68_spill] sm:$0xff] }
 0x21c   :  { %4995 = vmatprep.subr.bf16.mxu0 %v9004_v24  ;;  %v260_v63 = vld [vmem:[#allocation5 + $0x278] sm:$0xff]  ;;  %v4162_v5 = vadd.f32 %v4161_v35, %v11138_v56  ;;  %v4274_v29 = vpop.f32.mrf.mxu1  ;;  %v4163_v24 = vpop.f32.mrf.mxu0  ;;  %v9123_v51 = vcombine.low %v392_v4, %v396_v43 }
 0x21d   :  { %v13077_v33 = vld [vmem:[#allocation66_spill] sm:$0xff]  ;;  %13078 = vst [vmem:[#allocation89_spill] sm:$0xff] %v11255_v62  ;;  %4951 = vmatmul.mubr.bf16.gmra.mxu1 %v13079_v23  ;;  %v8988_v44 = vcombine.high %v256_v3, %v260_v63  ;;  %v4164_v58 = vadd.f32 %v4163_v24, %v11152_v47  ;;  %v13082_v23 = vld [vmem:[#allocation69_spill] sm:$0xff] }
 0x21e   :  { %4838 = vmatmul.mubr.bf16.gmra.mxu0 %v13077_v33  ;;  %v384_v50 = vld [vmem:[#allocation5 + $0x658] sm:$0xff]  ;;  %5109 = vmatpush2.bf16.msra.mxu1 %v9131_v49  ;;  %v11259_v6 = vadd.f32 %v4274_v29, %v4162_v5  ;;  %v4276_v33 = vpop.f32.mrf.mxu1  ;;  %v4165_v60 = vpop.f32.mrf.mxu0  ;;  %v8987_v49 = vcombine.low %v256_v3, %v260_v63 }
 0x21f   :  { %v388_v40 = vld [vmem:[#allocation5 + $0x678] sm:$0xff]  ;;  %4996 = vmatpush2.bf16.msra.mxu0 %v9003_v27  ;;  %5110 = vmatprep.subr.bf16.mxu1 %v9124_v17  ;;  %v11264_v27 = vadd.f32 %v4276_v33, %v4164_v58  ;;  %v4166_v4 = vadd.f32 %v4165_v60, %v11138_v56 }
 0x220   :  { %4997 = vmatprep.subr.bf16.mxu0 %v8996_v54  ;;  %13080 = vst [vmem:[#allocation90_spill] sm:$0xff] %v11259_v6  ;;  %4847 = vmatprep.mubr.bf16.mxu0 %v13081_v28  ;;  %v9116_v48 = vcombine.high %v384_v50, %v388_v40  ;;  %v248_v35 = vld [vmem:[#allocation5 + $0x218] sm:$0xff]  ;;  %v4278_v43 = vpop.f32.mrf.mxu1  ;;  %v4167_v54 = vpop.f32.mrf.mxu0  ;;  %v9115_v17 = vcombine.low %v384_v50, %v388_v40  ;;  %v13087_v40 = vld [vmem:[#allocation71_spill] sm:$0xff] }
 0x221   :  { %v252_v62 = vld [vmem:[#allocation5 + $0x238] sm:$0xff]  ;;  %4960 = vmatprep.mubr.bf16.mxu1 %v13082_v23  ;;  %13083 = vst [vmem:[#allocation91_spill] sm:$0xff] %v11264_v27  ;;  %v11267_v29 = vadd.f32 %v4278_v43, %v4166_v4  ;;  %v4168_v24 = vadd.f32 %v4167_v54, %v11152_v47 }
 0x222   :  { %v376_v0 = vld [vmem:[#allocation5 + $0x618] sm:$0xff]  ;;  %5111 = vmatpush2.bf16.msra.mxu1 %v9123_v51  ;;  %v8980_v5 = vcombine.high %v248_v35, %v252_v62  ;;  %v4280_v28 = vpop.f32.mrf.mxu1  ;;  %v4171_v58 = vpop.f32.mrf.mxu0  ;;  %v8979_v51 = vcombine.low %v248_v35, %v252_v62 }
 0x223   :  { %v380_v19 = vld [vmem:[#allocation5 + $0x638] sm:$0xff]  ;;  %4998 = vmatpush2.bf16.msra.mxu0 %v8995_v13  ;;  %13084 = vst [vmem:[#allocation92_spill] sm:$0xff] %v11267_v29  ;;  %5112 = vmatprep.subr.bf16.mxu1 %v9116_v48  ;;  %v11271_v3 = vadd.f32 %v4280_v28, %v4168_v24  ;;  %v4172_v63 = vadd.f32 %v4171_v58, %v11138_v56  ;;  %v13089_v28 = vld [vmem:[#allocation20_spill] sm:$0xff] }
 0x224   :  { %4999 = vmatprep.subr.bf16.mxu0 %v8988_v44  ;;  %v9108_v23 = vcombine.high %v376_v0, %v380_v19  ;;  %v496_v6 = vld [vmem:[#allocation5 + $0x9d8] sm:$0xff]  ;;  %v4284_v50 = vpop.f32.mrf.mxu1  ;;  %v4173_v44 = vpop.f32.mrf.mxu0  ;;  %v9107_v48 = vcombine.low %v376_v0, %v380_v19 }
 0x225   :  { %v500_v33 = vld [vmem:[#allocation5 + $0x9f8] sm:$0xff]  ;;  %13086 = vst [vmem:[#allocation93_spill] sm:$0xff] %v11271_v3  ;;  %4961 = vmatmul.mubr.bf16.gmra.mxu1 %v13087_v40  ;;  %v11275_v43 = vadd.f32 %v4284_v50, %v4172_v63  ;;  %v4174_v54 = vadd.f32 %v4173_v44, %v11152_v47 }
 0x226   :  { %v13085_v27 = vld [vmem:[#allocation70_spill] sm:$0xff]  ;;  %5113 = vmatpush2.bf16.msra.mxu1 %v9115_v17  ;;  %v9228_v4 = vcombine.high %v496_v6, %v500_v33  ;;  %v4175_v29 = vpop.f32.mrf.mxu0  ;;  %v13090_v40 = vld [vmem:[#allocation21_spill] sm:$0xff]  ;;  %v9227_v17 = vcombine.low %v496_v6, %v500_v33 }
 0x227   :  { %4848 = vmatmul.mubr.bf16.gmra.mxu0 %v13085_v27  ;;  %v624_v60 = vld [vmem:[#allocation5 + $0xdd8] sm:$0xff]  ;;  %13088 = vst [vmem:[#allocation94_spill] sm:$0xff] %v11275_v43  ;;  %v4286_v27 = vpop.f32.mrf.mxu1  ;;  %5114 = vmatprep.subr.bf16.mxu1 %v9108_v23  ;;  %v4176_v0 = vadd.f32 %v4175_v29, %v11138_v56 }
 0x228   :  { %v628_v13 = vld [vmem:[#allocation5 + $0xdf8] sm:$0xff]  ;;  %5000 = vmatpush2.bf16.msra.mxu0 %v8987_v49  ;;  %5003 = vmatprep.mubr.bf16.mxu0 %v13089_v28  ;;  %v11280_v49 = vadd.f32 %v4286_v27, %v4174_v54 }
 0x229   :  { %5001 = vmatprep.subr.bf16.mxu0 %v8980_v5  ;;  %v9356_v24 = vcombine.high %v624_v60, %v628_v13  ;;  %v488_v58 = vld [vmem:[#allocation5 + $0x998] sm:$0xff]  ;;  %5116 = vmatprep.mubr.bf16.mxu1 %v13090_v40  ;;  %v4288_v19 = vpop.f32.mrf.mxu1  ;;  %v4177_v5 = vpop.f32.mrf.mxu0  ;;  %v9355_v23 = vcombine.low %v624_v60, %v628_v13 }
 0x22a   :  { %v492_v3 = vld [vmem:[#allocation5 + $0x9b8] sm:$0xff]  ;;  %5115 = vmatpush2.bf16.msra.mxu1 %v9107_v48  ;;  %v11283_v50 = vadd.f32 %v4288_v19, %v4176_v0  ;;  %v4178_v44 = vadd.f32 %v4177_v5, %v11152_v47 }
 0x22b   :  { %v616_v62 = vld [vmem:[#allocation5 + $0xd98] sm:$0xff]  ;;  %v9220_v63 = vcombine.high %v488_v58, %v492_v3  ;;  %v4290_v28 = vpop.f32.mrf.mxu1  ;;  %5310 = vmatprep.subr.bf16.mxu1 %v9356_v24  ;;  %v4327_v54 = vpop.f32.mrf.mxu0  ;;  %v9219_v13 = vcombine.low %v488_v58, %v492_v3 }
 0x22c   :  { %v620_v35 = vld [vmem:[#allocation5 + $0xdb8] sm:$0xff]  ;;  %5002 = vmatpush2.bf16.msra.mxu0 %v8979_v51  ;;  %v11287_v6 = vadd.f32 %v4290_v28, %v4178_v44  ;;  %v4328_v33 = vadd.f32 %v4327_v54, %v11160_v8 }
 0x22d   :  { %5197 = vmatprep.subr.bf16.mxu0 %v9228_v4  ;;  %v9348_v40 = vcombine.high %v616_v62, %v620_v35  ;;  %v480_v43 = vld [vmem:[#allocation5 + $0x958] sm:$0xff]  ;;  %v4440_v60 = vpop.f32.mrf.mxu1  ;;  %5117 = vmatmul.mubr.bf16.vlgmr.msra.gmra.mxu1 %v10615_v25  ;;  %v4329_v47 = vpop.f32.mrf.mxu0  ;;  %v9347_v51 = vcombine.low %v616_v62, %v620_v35 }
 0x22e   :  { %v484_v27 = vld [vmem:[#allocation5 + $0x978] sm:$0xff]  ;;  %5311 = vmatpush1.bf16.msra.mxu1 %v9355_v23  ;;  %v4441_v4 = vadd.f32 %v4440_v60, %v4328_v33  ;;  %v4330_v24 = vadd.f32 %v4329_v47, %v11165_v53 }
 0x22f   :  { %5004 = vmatmul.mubr.bf16.vlgmr.msra.gmra.mxu0 %v10611_v21  ;;  %v608_v56 = vld [vmem:[#allocation5 + $0xd58] sm:$0xff]  ;;  %v9212_v48 = vcombine.high %v480_v43, %v484_v27  ;;  %v4442_v21 = vpop.f32.mrf.mxu1  ;;  %5312 = vmatprep.subr.bf16.mxu1 %v9348_v40  ;;  %v4331_v5 = vpop.f32.mrf.mxu0  ;;  %v9211_v35 = vcombine.low %v480_v43, %v484_v27 }
 0x230   :  { %v612_v29 = vld [vmem:[#allocation5 + $0xd78] sm:$0xff]  ;;  %5198 = vmatpush1.bf16.msra.mxu0 %v9227_v17  ;;  %5013 = vmatprep.mubr.bf16.mxu0 %v10617_v32  ;;  %v4443_v58 = vadd.f32 %v4442_v21, %v4330_v24  ;;  %v4332_v17 = vadd.f32 %v4331_v5, %v11171_v39  ;;  %v5425_v27 = vmax.f32 %v4441_v4, 0.0 }
 0x231   :  { %5199 = vmatprep.subr.bf16.mxu0 %v9220_v63  ;;  %v9340_v0 = vcombine.high %v608_v56, %v612_v29  ;;  %v472_v19 = vld [vmem:[#allocation5 + $0x918] sm:$0xff]  ;;  %v4444_v62 = vpop.f32.mrf.mxu1  ;;  %v4333_v53 = vpop.f32.mrf.mxu0  ;;  %v9339_v23 = vcombine.low %v608_v56, %v612_v29 }
 0x232   :  { %v476_v8 = vld [vmem:[#allocation5 + $0x938] sm:$0xff]  ;;  %5313 = vmatpush1.bf16.msra.mxu1 %v9347_v51  ;;  %v4445_v28 = vadd.f32 %v4444_v62, %v4332_v17  ;;  %v4334_v40 = vadd.f32 %v4333_v53, %v11175_v46  ;;  %v5426_v46 = vmax.f32 %v4443_v58, 0.0 }
 0x233   :  { %v13091_v44 = vld [vmem:[#allocation22_spill] sm:$0xff]  ;;  %v9204_v63 = vcombine.high %v472_v19, %v476_v8  ;;  %v4446_v54 = vpop.f32.mrf.mxu1  ;;  %5314 = vmatprep.subr.bf16.mxu1 %v9340_v0  ;;  %v4337_v24 = vpop.f32.mrf.mxu0  ;;  %v9203_v43 = vcombine.low %v472_v19, %v476_v8 }
 0x234   :  { %5126 = vmatprep.mubr.bf16.mxu1 %v13091_v44  ;;  %v600_v25 = vld [vmem:[#allocation5 + $0xd18] sm:$0xff]  ;;  %5200 = vmatpush1.bf16.msra.mxu0 %v9219_v13  ;;  %v5433_v13 = vmax.f32 %v4445_v28, 0.0  ;;  %v4447_v56 = vadd.f32 %v4446_v54, %v4334_v40  ;;  %v4338_v29 = vadd.f32 %v4337_v24, %v11179_v2 }
 0x235   :  { %v604_v3 = vld [vmem:[#allocation5 + $0xd38] sm:$0xff]  ;;  %5201 = vmatprep.subr.bf16.mxu0 %v9212_v48  ;;  %v4450_v51 = vpop.f32.mrf.mxu1  ;;  %5127 = vmatmul.mubr.bf16.gmra.mxu1 %v10627_v45  ;;  %v4339_v48 = vpop.f32.mrf.mxu0 }
 0x236   :  { %v11295_v32 = vld [vmem:[#allocation5 + $0x8d8] sm:$0xff]  ;;  %v9332_v33 = vcombine.high %v600_v25, %v604_v3  ;;  %5315 = vmatpush1.bf16.msra.mxu1 %v9339_v23  ;;  %v9331_v21 = vcombine.low %v600_v25, %v604_v3  ;;  %v5434_v4 = vmax.f32 %v4447_v56, 0.0  ;;  %v4451_v19 = vadd.f32 %v4450_v51, %v4338_v29  ;;  %5136 = vmatprep.mubr.bf16.mxu1 %v10632_v57 }
 0x237   :  { %v468_v60 = vld [vmem:[#allocation5 + $0x8f8] sm:$0xff]  ;;  %5014 = vmatmul.mubr.bf16.gmra.mxu0 %v10625_v41  ;;  %v11305_v41 = vpack.c.bf16 %v5433_v13, %v5425_v27  ;;  %v4340_v8 = vadd.f32 %v4339_v48, %v11184_v9  ;;  %v4452_v2 = vpop.f32.mrf.mxu1  ;;  %v4341_v58 = vpop.f32.mrf.mxu0 }
 0x238   :  { %v11298_v47 = vld [vmem:[#allocation5 + $0xcd8] sm:$0xff]  ;;  %5202 = vmatpush1.bf16.msra.mxu0 %v9211_v35  ;;  %v9196_v0 = vcombine.high %v11295_v32, %v468_v60  ;;  %5316 = vmatprep.subr.bf16.mxu1 %v9332_v33  ;;  %v4342_v62 = vadd.f32 %v4341_v58, %v11187_v59  ;;  %v9195_v53 = vcombine.low %v11295_v32, %v468_v60  ;;  %v5441_v27 = vmax.f32 %v4451_v19, 0.0 }
 0x239   :  { %v596_v39 = vld [vmem:[#allocation5 + $0xcf8] sm:$0xff]  ;;  %5203 = vmatprep.subr.bf16.mxu0 %v9204_v63  ;;  %13092 = vst [vmem:[#allocation20_spill] sm:$0xff] %v11305_v41  ;;  %5023 = vmatprep.mubr.bf16.mxu0 %v10629_v52  ;;  %v4453_v17 = vadd.f32 %v4452_v2, %v4340_v8  ;;  %v4454_v35 = vpop.f32.mrf.mxu1  ;;  %v11312_v23 = vpack.c.bf16 %v5434_v4, %v5426_v46  ;;  %v4343_v9 = vpop.f32.mrf.mxu0 }
 0x23a   :  { %v9324_v5 = vcombine.high %v11298_v47, %v596_v39  ;;  %v456_v45 = vld [vmem:[#allocation5 + $0x898] sm:$0xff]  ;;  %5317 = vmatpush1.bf16.msra.mxu1 %v9331_v21  ;;  %v9323_v52 = vcombine.low %v11298_v47, %v596_v39  ;;  %v4455_v57 = vadd.f32 %v4454_v35, %v4342_v62  ;;  %v4344_v40 = vadd.f32 %v4343_v9, %v11191_v15 }
 0x23b   :  { %v460_v44 = vld [vmem:[#allocation5 + $0x8b8] sm:$0xff]  ;;  %13093 = vst [vmem:[#allocation21_spill] sm:$0xff] %v11312_v23  ;;  %v4456_v54 = vpop.f32.mrf.mxu1  ;;  %v4347_v60 = vpop.f32.mrf.mxu0  ;;  %v5442_v15 = vmax.f32 %v4453_v17, 0.0 }
 0x23c   :  { %v584_v25 = vld [vmem:[#allocation5 + $0xc98] sm:$0xff]  ;;  %5204 = vmatpush1.bf16.msra.mxu0 %v9203_v43  ;;  %v9188_v63 = vcombine.high %v456_v45, %v460_v44  ;;  %5318 = vmatprep.subr.bf16.mxu1 %v9324_v5  ;;  %v9187_v43 = vcombine.low %v456_v45, %v460_v44  ;;  %v5449_v13 = vmax.f32 %v4455_v57, 0.0  ;;  %v4457_v47 = vadd.f32 %v4456_v54, %v4344_v40 }
 0x23d   :  { %v588_v3 = vld [vmem:[#allocation5 + $0xcb8] sm:$0xff]  ;;  %5205 = vmatprep.subr.bf16.mxu0 %v9196_v0  ;;  %v4348_v39 = vadd.f32 %v4347_v60, %v11195_v38  ;;  %v4460_v56 = vpop.f32.mrf.mxu1  ;;  %5137 = vmatmul.mubr.bf16.gmra.mxu1 %v10639_v11  ;;  %v4349_v29 = vpop.f32.mrf.mxu0 }
 0x23e   :  { %v11315_v28 = vld [vmem:[#allocation5 + $0x858] sm:$0xff]  ;;  %v9316_v59 = vcombine.high %v584_v25, %v588_v3  ;;  %5319 = vmatpush1.bf16.msra.mxu1 %v9323_v52  ;;  %v9315_v51 = vcombine.low %v584_v25, %v588_v3  ;;  %v5450_v21 = vmax.f32 %v4457_v47, 0.0  ;;  %v4350_v5 = vadd.f32 %v4349_v29, %v11200_v12  ;;  %5146 = vmatprep.mubr.bf16.mxu1 %v10644_v22 }
 0x23f   :  { %v452_v33 = vld [vmem:[#allocation5 + $0x878] sm:$0xff]  ;;  %5024 = vmatmul.mubr.bf16.gmra.mxu0 %v10637_v7  ;;  %v11325_v7 = vpack.c.bf16 %v5449_v13, %v5441_v27  ;;  %v4461_v0 = vadd.f32 %v4460_v56, %v4348_v39  ;;  %v4462_v38 = vpop.f32.mrf.mxu1  ;;  %v4351_v19 = vpop.f32.mrf.mxu0 }
 0x240   :  { %v11318_v24 = vld [vmem:[#allocation5 + $0xc58] sm:$0xff]  ;;  %5206 = vmatpush1.bf16.msra.mxu0 %v9195_v53  ;;  %v9180_v46 = vcombine.high %v11315_v28, %v452_v33  ;;  %5320 = vmatprep.subr.bf16.mxu1 %v9316_v59  ;;  %v4463_v45 = vadd.f32 %v4462_v38, %v4350_v5  ;;  %v4352_v44 = vadd.f32 %v4351_v19, %v11203_v30 }
 0x241   :  { %v580_v32 = vld [vmem:[#allocation5 + $0xc78] sm:$0xff]  ;;  %5207 = vmatprep.subr.bf16.mxu0 %v9188_v63  ;;  %13094 = vst [vmem:[#allocation22_spill] sm:$0xff] %v11325_v7  ;;  %5033 = vmatprep.mubr.bf16.mxu0 %v10641_v18  ;;  %v4464_v58 = vpop.f32.mrf.mxu1  ;;  %v9179_v25 = vcombine.low %v11315_v28, %v452_v33  ;;  %v11332_v3 = vpack.c.bf16 %v5450_v21, %v5442_v15  ;;  %v4353_v12 = vpop.f32.mrf.mxu0  ;;  %v5457_v40 = vmax.f32 %v4461_v0, 0.0 }
 0x242   :  { %v9308_v48 = vcombine.high %v11318_v24, %v580_v32  ;;  %v440_v11 = vld [vmem:[#allocation5 + $0x818] sm:$0xff]  ;;  %5321 = vmatpush1.bf16.msra.mxu1 %v9315_v51  ;;  %v9307_v18 = vcombine.low %v11318_v24, %v580_v32  ;;  %v4465_v22 = vadd.f32 %v4464_v58, %v4352_v44  ;;  %v4354_v35 = vadd.f32 %v4353_v12, %v11207_v10 }
 0x243   :  { %v444_v4 = vld [vmem:[#allocation5 + $0x838] sm:$0xff]  ;;  %13095 = vst [vmem:[#allocation95_spill] sm:$0xff] %v11332_v3  ;;  %v4466_v53 = vpop.f32.mrf.mxu1  ;;  %v4357_v28 = vpop.f32.mrf.mxu0  ;;  %v5458_v10 = vmax.f32 %v4463_v45, 0.0 }
 0x244   :  { %v568_v8 = vld [vmem:[#allocation5 + $0xc18] sm:$0xff]  ;;  %5208 = vmatpush1.bf16.msra.mxu0 %v9187_v43  ;;  %v9172_v17 = vcombine.high %v440_v11, %v444_v4  ;;  %5322 = vmatprep.subr.bf16.mxu1 %v9308_v48  ;;  %v9171_v57 = vcombine.low %v440_v11, %v444_v4  ;;  %v5465_v54 = vmax.f32 %v4465_v22, 0.0  ;;  %v4467_v59 = vadd.f32 %v4466_v53, %v4354_v35 }
 0x245   :  { %v572_v2 = vld [vmem:[#allocation5 + $0xc38] sm:$0xff]  ;;  %5209 = vmatprep.subr.bf16.mxu0 %v9180_v46  ;;  %v4358_v33 = vadd.f32 %v4357_v28, %v11211_v26  ;;  %v4470_v24 = vpop.f32.mrf.mxu1  ;;  %5147 = vmatmul.mubr.bf16.gmra.mxu1 %v13008_v31  ;;  %v4359_v32 = vpop.f32.mrf.mxu0  ;;  %v13099_v28 = vld [vmem:[#allocation28_spill] sm:$0xff] }
 0x246   :  { %v11335_v62 = vld [vmem:[#allocation5 + $0xbd8] sm:$0xff]  ;;  %v9300_v30 = vcombine.high %v568_v8, %v572_v2  ;;  %5323 = vmatpush1.bf16.msra.mxu1 %v9307_v18  ;;  %v9299_v60 = vcombine.low %v568_v8, %v572_v2  ;;  %v5466_v13 = vmax.f32 %v4467_v59, 0.0  ;;  %v4360_v39 = vadd.f32 %v4359_v32, %v11216_v16  ;;  %5156 = vmatprep.mubr.bf16.mxu1 %v13012_v14 }
 0x247   :  { %v564_v9 = vld [vmem:[#allocation5 + $0xbf8] sm:$0xff]  ;;  %5034 = vmatmul.mubr.bf16.gmra.mxu0 %v10649_v55  ;;  %v11345_v55 = vpack.c.bf16 %v5465_v54, %v5457_v40  ;;  %v4471_v47 = vadd.f32 %v4470_v24, %v4358_v33  ;;  %v4472_v26 = vpop.f32.mrf.mxu1  ;;  %v4361_v15 = vpop.f32.mrf.mxu0 }
 0x248   :  { %v11338_v52 = vld [vmem:[#allocation5 + $0xfd8] sm:$0xff]  ;;  %5210 = vmatpush1.bf16.msra.mxu0 %v9179_v25  ;;  %v9292_v43 = vcombine.high %v11335_v62, %v564_v9  ;;  %5324 = vmatprep.subr.bf16.mxu1 %v9300_v30  ;;  %v4473_v46 = vadd.f32 %v4472_v26, %v4360_v39  ;;  %v4362_v48 = vadd.f32 %v4361_v15, %v11219_v1 }
 0x249   :  { %v692_v63 = vld [vmem:[#allocation5 + $0xff8] sm:$0xff]  ;;  %5211 = vmatprep.subr.bf16.mxu0 %v9172_v17  ;;  %13096 = vst [vmem:[#allocation96_spill] sm:$0xff] %v11345_v55  ;;  %5043 = vmatprep.mubr.bf16.mxu0 %v13011_v42  ;;  %v4474_v21 = vpop.f32.mrf.mxu1  ;;  %v9291_v0 = vcombine.low %v11335_v62, %v564_v9  ;;  %v11352_v5 = vpack.c.bf16 %v5466_v13, %v5458_v10  ;;  %v4363_v16 = vpop.f32.mrf.mxu0  ;;  %v5473_v25 = vmax.f32 %v4471_v47, 0.0  ;;  %v13101_v10 = vld [vmem:[#allocation84_spill] sm:$0xff] }
 0x24a   :  { %v9420_v27 = vcombine.high %v11338_v52, %v692_v63  ;;  %v552_v31 = vld [vmem:[#allocation5 + $0xb98] sm:$0xff]  ;;  %5325 = vmatpush1.bf16.msra.mxu1 %v9299_v60  ;;  %v9419_v42 = vcombine.low %v11338_v52, %v692_v63  ;;  %v4475_v14 = vadd.f32 %v4474_v21, %v4362_v48  ;;  %v4364_v4 = vadd.f32 %v4363_v16, %v11223_v34 }
 0x24b   :  { %v556_v56 = vld [vmem:[#allocation5 + $0xbb8] sm:$0xff]  ;;  %13097 = vst [vmem:[#allocation97_spill] sm:$0xff] %v11352_v5  ;;  %v4476_v19 = vpop.f32.mrf.mxu1  ;;  %v4367_v44 = vpop.f32.mrf.mxu0  ;;  %v5474_v34 = vmax.f32 %v4473_v46, 0.0 }
 0x24c   :  { %v680_v29 = vld [vmem:[#allocation5 + $0xf98] sm:$0xff]  ;;  %5212 = vmatpush1.bf16.msra.mxu0 %v9171_v57  ;;  %v9284_v38 = vcombine.high %v552_v31, %v556_v56  ;;  %5326 = vmatprep.subr.bf16.mxu1 %v9420_v27  ;;  %v9283_v58 = vcombine.low %v552_v31, %v556_v56  ;;  %v5481_v12 = vmax.f32 %v4475_v14, 0.0  ;;  %v4477_v18 = vadd.f32 %v4476_v19, %v4364_v4 }
 0x24d   :  { %v684_v51 = vld [vmem:[#allocation5 + $0xfb8] sm:$0xff]  ;;  %5213 = vmatprep.subr.bf16.mxu0 %v9292_v43  ;;  %v4368_v17 = vadd.f32 %v4367_v44, %v11227_v61  ;;  %v4480_v62 = vpop.f32.mrf.mxu1  ;;  %5157 = vmatmul.mubr.bf16.gmra.mxu1 %v13018_v20  ;;  %v4369_v22 = vpop.f32.mrf.mxu0 }
 0x24e   :  { %v11355_v11 = vld [vmem:[#allocation5 + $0xb58] sm:$0xff]  ;;  %v9412_v1 = vcombine.high %v680_v29, %v684_v51  ;;  %5327 = vmatpush2.bf16.msra.mxu1 %v9419_v42  ;;  %v9411_v35 = vcombine.low %v680_v29, %v684_v51  ;;  %v5482_v9 = vmax.f32 %v4477_v18, 0.0  ;;  %v4370_v63 = vadd.f32 %v4369_v22, %v11232_v36  ;;  %v13109_v22 = vld [vmem:[#allocation32_spill] sm:$0xff] }
 0x24f   :  { %v548_v8 = vld [vmem:[#allocation5 + $0xb78] sm:$0xff]  ;;  %5044 = vmatmul.mubr.bf16.gmra.mxu0 %v13016_v37  ;;  %v11365_v37 = vpack.c.bf16 %v5481_v12, %v5473_v25  ;;  %v4481_v52 = vadd.f32 %v4480_v62, %v4368_v17  ;;  %v4482_v61 = vpop.f32.mrf.mxu1  ;;  %v4371_v40 = vpop.f32.mrf.mxu0  ;;  %v13108_v17 = vld [vmem:[#allocation87_spill] sm:$0xff] }
 0x250   :  { %v11358_v2 = vld [vmem:[#allocation5 + $0xf58] sm:$0xff]  ;;  %5214 = vmatpush2.bf16.msra.mxu0 %v9291_v0  ;;  %v9276_v53 = vcombine.high %v11355_v11, %v548_v8  ;;  %5328 = vmatprep.subr.bf16.mxu1 %v9412_v1  ;;  %v4483_v24 = vadd.f32 %v4482_v61, %v4370_v63  ;;  %v4372_v32 = vadd.f32 %v4371_v40, %v13101_v10  ;;  %v13106_v1 = vld [vmem:[#allocation31_spill] sm:$0xff] }
 0x251   :  { %v676_v45 = vld [vmem:[#allocation5 + $0xf78] sm:$0xff]  ;;  %5215 = vmatprep.subr.bf16.mxu0 %v9284_v38  ;;  %13098 = vst [vmem:[#allocation98_spill] sm:$0xff] %v11365_v37  ;;  %5053 = vmatprep.mubr.bf16.mxu0 %v13099_v28  ;;  %v4484_v60 = vpop.f32.mrf.mxu1  ;;  %v9275_v43 = vcombine.low %v11355_v11, %v548_v8  ;;  %v11372_v27 = vpack.c.bf16 %v5482_v9, %v5474_v34  ;;  %v4373_v36 = vpop.f32.mrf.mxu0  ;;  %v5489_v42 = vmax.f32 %v4481_v52, 0.0  ;;  %v13111_v28 = vld [vmem:[#allocation88_spill] sm:$0xff] }
 0x252   :  { %v9404_v30 = vcombine.high %v11358_v2, %v676_v45  ;;  %v536_v20 = vld [vmem:[#allocation5 + $0xb18] sm:$0xff]  ;;  %5329 = vmatpush2.bf16.msra.mxu1 %v9411_v35  ;;  %v9403_v13 = vcombine.low %v11358_v2, %v676_v45  ;;  %v4485_v26 = vadd.f32 %v4484_v60, %v4372_v32  ;;  %v5490_v8 = vmax.f32 %v4483_v24, 0.0 }
 0x253   :  { %v540_v57 = vld [vmem:[#allocation5 + $0xb38] sm:$0xff]  ;;  %13102 = vst [vmem:[#allocation28_spill] sm:$0xff] %v11372_v27  ;;  %v4486_v15 = vpop.f32.mrf.mxu1  ;;  %v4377_v21 = vpop.f32.mrf.mxu0 }
 0x254   :  { %v13100_v54 = vld [vmem:[#allocation29_spill] sm:$0xff]  ;;  %5216 = vmatpush2.bf16.msra.mxu0 %v9283_v58  ;;  %v9268_v47 = vcombine.high %v536_v20, %v540_v57  ;;  %5330 = vmatprep.subr.bf16.mxu1 %v9404_v30  ;;  %v13104_v0 = vld [vmem:[#allocation30_spill] sm:$0xff]  ;;  %v9267_v16 = vcombine.low %v536_v20, %v540_v57  ;;  %v5497_v38 = vmax.f32 %v4485_v26, 0.0 }
 0x255   :  { %5166 = vmatprep.mubr.bf16.mxu1 %v13100_v54  ;;  %v664_v59 = vld [vmem:[#allocation5 + $0xf18] sm:$0xff]  ;;  %5217 = vmatprep.subr.bf16.mxu0 %v9276_v53  ;;  %v4490_v19 = vpop.f32.mrf.mxu1  ;;  %v4379_v2 = vpop.f32.mrf.mxu0 }
 0x256   :  { %v668_v33 = vld [vmem:[#allocation5 + $0xf38] sm:$0xff]  ;;  %5167 = vmatmul.mubr.bf16.gmra.mxu1 %v13106_v1  ;;  %v11385_v25 = vpack.c.bf16 %v5497_v38, %v5489_v42  ;;  %v4380_v62 = vadd.f32 %v4379_v2, %v13108_v17  ;;  %v13118_v2 = vld [vmem:[#allocation91_spill] sm:$0xff] }
 0x257   :  { %v11375_v39 = vld [vmem:[#allocation5 + $0xad8] sm:$0xff]  ;;  %v9396_v29 = vcombine.high %v664_v59, %v668_v33  ;;  %5054 = vmatmul.mubr.bf16.gmra.mxu0 %v13104_v0  ;;  %5331 = vmatpush2.bf16.msra.mxu1 %v9403_v13  ;;  %v9395_v45 = vcombine.low %v664_v59, %v668_v33  ;;  %v4492_v34 = vpop.f32.mrf.mxu1  ;;  %v4381_v30 = vpop.f32.mrf.mxu0 }
 0x258   :  { %v13103_v31 = vld [vmem:[#allocation85_spill] sm:$0xff]  ;;  %v13105_v14 = vld [vmem:[#allocation86_spill] sm:$0xff]  ;;  %5218 = vmatpush2.bf16.msra.mxu0 %v9275_v43  ;;  %13107 = vst [vmem:[#allocation29_spill] sm:$0xff] %v11385_v25  ;;  %5063 = vmatprep.mubr.bf16.mxu0 %v13109_v22  ;;  %v4493_v61 = vadd.f32 %v4492_v34, %v4380_v62  ;;  %v4382_v20 = vadd.f32 %v4381_v30, %v13111_v28 }
 0x259   :  { %v4374_v56 = vadd.f32 %v4373_v36, %v13103_v31  ;;  %v532_v51 = vld [vmem:[#allocation5 + $0xaf8] sm:$0xff]  ;;  %v4378_v4 = vadd.f32 %v4377_v21, %v13105_v14  ;;  %5219 = vmatprep.subr.bf16.mxu0 %v9268_v47  ;;  %5332 = vmatprep.subr.bf16.mxu1 %v9396_v29  ;;  %v4494_v57 = vpop.f32.mrf.mxu1  ;;  %v4383_v59 = vpop.f32.mrf.mxu0 }
 0x25a   :  { %v11378_v46 = vld [vmem:[#allocation5 + $0xed8] sm:$0xff]  ;;  %v9260_v44 = vcombine.high %v11375_v39, %v532_v51  ;;  %v9259_v40 = vcombine.low %v11375_v39, %v532_v51  ;;  %v4495_v32 = vadd.f32 %v4494_v57, %v4382_v20  ;;  %v5506_v42 = vmax.f32 %v4493_v61, 0.0 }
 0x25b   :  { %v660_v48 = vld [vmem:[#allocation5 + $0xef8] sm:$0xff]  ;;  %v4487_v11 = vadd.f32 %v4486_v15, %v4374_v56  ;;  %v4491_v18 = vadd.f32 %v4490_v19, %v4378_v4  ;;  %5333 = vmatpush2.bf16.msra.mxu1 %v9395_v45  ;;  %v4496_v36 = vpop.f32.mrf.mxu1  ;;  %v4387_v39 = vpop.f32.mrf.mxu0 }
 0x25c   :  { %v9388_v58 = vcombine.high %v11378_v46, %v660_v48  ;;  %v520_v35 = vld [vmem:[#allocation5 + $0xa98] sm:$0xff]  ;;  %5220 = vmatpush2.bf16.msra.mxu0 %v9267_v16  ;;  %v9387_v33 = vcombine.low %v11378_v46, %v660_v48  ;;  %v5513_v51 = vmax.f32 %v4495_v32, 0.0  ;;  %v13116_v16 = vld [vmem:[#allocation35_spill] sm:$0xff] }
 0x25d   :  { %v5498_v12 = vmax.f32 %v4487_v11, 0.0  ;;  %v524_v53 = vld [vmem:[#allocation5 + $0xab8] sm:$0xff]  ;;  %5221 = vmatprep.subr.bf16.mxu0 %v9260_v44  ;;  %v5505_v29 = vmax.f32 %v4491_v18, 0.0  ;;  %v4500_v0 = vpop.f32.mrf.mxu1  ;;  %v4389_v38 = vpop.f32.mrf.mxu0 }
 0x25e   :  { %v13110_v9 = vld [vmem:[#allocation33_spill] sm:$0xff]  ;;  %v9252_v24 = vcombine.high %v520_v35, %v524_v53  ;;  %5334 = vmatprep.subr.bf16.mxu1 %v9388_v58  ;;  %v13114_v56 = vld [vmem:[#allocation34_spill] sm:$0xff]  ;;  %v9251_v15 = vcombine.low %v520_v35, %v524_v53  ;;  %v4390_v45 = vadd.f32 %v4389_v38, %v13118_v2  ;;  %v13119_v58 = vld [vmem:[#allocation36_spill] sm:$0xff] }
 0x25f   :  { %5176 = vmatprep.mubr.bf16.mxu1 %v13110_v9  ;;  %v648_v52 = vld [vmem:[#allocation5 + $0xe98] sm:$0xff]  ;;  %v11392_v54 = vpack.c.bf16 %v5498_v12, %v5490_v8  ;;  %5064 = vmatmul.mubr.bf16.gmra.mxu0 %v13114_v56  ;;  %v11402_v19 = vpack.c.bf16 %v5513_v51, %v5505_v29  ;;  %v4502_v44 = vpop.f32.mrf.mxu1  ;;  %v4391_v17 = vpop.f32.mrf.mxu0  ;;  %v13121_v53 = vld [vmem:[#allocation92_spill] sm:$0xff] }
 0x260   :  { %v652_v63 = vld [vmem:[#allocation5 + $0xeb8] sm:$0xff]  ;;  %5177 = vmatmul.mubr.bf16.gmra.mxu1 %v13116_v16  ;;  %5222 = vmatpush2.bf16.msra.mxu0 %v9259_v40  ;;  %v4503_v35 = vadd.f32 %v4502_v44, %v4390_v45  ;;  %v4392_v30 = vadd.f32 %v4391_v17, %v13121_v53 }
 0x261   :  { %13112 = vst [vmem:[#allocation84_spill] sm:$0xff] %v11392_v54  ;;  %v11395_v10 = vld [vmem:[#allocation5 + $0xa58] sm:$0xff]  ;;  %v9380_v13 = vcombine.high %v648_v52, %v652_v63  ;;  %5335 = vmatpush2.bf16.msra.mxu1 %v9387_v33  ;;  %5223 = vmatprep.subr.bf16.mxu0 %v9252_v24  ;;  %v9379_v11 = vcombine.low %v648_v52, %v652_v63  ;;  %13117 = vst [vmem:[#allocation85_spill] sm:$0xff] %v11402_v19  ;;  %v4504_v9 = vpop.f32.mrf.mxu1  ;;  %v4393_v61 = vpop.f32.mrf.mxu0 }
 0x262   :  { %v13113_v60 = vld [vmem:[#allocation89_spill] sm:$0xff]  ;;  %v13115_v46 = vld [vmem:[#allocation90_spill] sm:$0xff]  ;;  %5073 = vmatprep.mubr.bf16.mxu0 %v13119_v58  ;;  %v4505_v57 = vadd.f32 %v4504_v9, %v4392_v30 }
 0x263   :  { %v4384_v43 = vadd.f32 %v4383_v59, %v13113_v60  ;;  %v516_v47 = vld [vmem:[#allocation5 + $0xa78] sm:$0xff]  ;;  %v4388_v48 = vadd.f32 %v4387_v39, %v13115_v46  ;;  %5336 = vmatprep.subr.bf16.mxu1 %v9380_v13  ;;  %v4506_v33 = vpop.f32.mrf.mxu1  ;;  %v4397_v32 = vpop.f32.mrf.mxu0  ;;  %v10335_v58 = vld [vmem:[#allocation7] sm:$0xff] }
 0x264   :  { %v640_v26 = vld [vmem:[#allocation5 + $0xe58] sm:$0xff]  ;;  %v9244_v14 = vcombine.high %v11395_v10, %v516_v47  ;;  %5224 = vmatpush2.bf16.msra.mxu0 %v9251_v15  ;;  %v9243_v52 = vcombine.low %v11395_v10, %v516_v47  ;;  %v5529_v47 = vmax.f32 %v4505_v57, 0.0 }
 0x265   :  { %v644_v31 = vld [vmem:[#allocation5 + $0xe78] sm:$0xff]  ;;  %v4497_v21 = vadd.f32 %v4496_v36, %v4384_v43  ;;  %v4501_v8 = vadd.f32 %v4500_v0, %v4388_v48  ;;  %5337 = vmatpush2.bf16.msra.mxu1 %v9379_v11  ;;  %v13125_v36 = vld [vmem:[#allocation72_spill] sm:$0xff]  ;;  %v4510_v29 = vpop.f32.mrf.mxu1  ;;  %v4399_v51 = vpop.f32.mrf.mxu0 }
 0x266   :  { %v9372_v4 = vcombine.high %v640_v26, %v644_v31  ;;  %v504_v12 = vld [vmem:[#allocation5 + $0xa18] sm:$0xff]  ;;  %5225 = vmatprep.subr.bf16.mxu0 %v9244_v14  ;;  %v9371_v28 = vcombine.low %v640_v26, %v644_v31  ;;  %v713_v13 = vsub.s32 4, %v13125_v36  ;;  %v13127_v26 = vld [vmem:[#allocation39_spill] sm:$0xff]  ;;  %v5522_v31 = vmax.f32 %v4503_v35, 0.0  ;;  %v13129_v14 = vld [vmem:[#allocation40_spill] sm:$0xff] }
 0x267   :  { %v5514_v1 = vmax.f32 %v4497_v21, 0.0  ;;  %v508_v18 = vld [vmem:[#allocation5 + $0xa38] sm:$0xff]  ;;  %v5521_v10 = vmax.f32 %v4501_v8, 0.0  ;;  %v717_v48 = vsub.s32 5, %v13125_v36  ;;  %v4400_v38 = vadd.f32 %v4399_v51, %v11280_v49  ;;  %v4512_v11 = vpop.f32.mrf.mxu1 }
 0x268   :  { %v13120_v62 = vld [vmem:[#allocation37_spill] sm:$0xff]  ;;  %v9236_v20 = vcombine.high %v504_v12, %v508_v18  ;;  %5338 = vmatprep.subr.bf16.mxu1 %v9372_v4  ;;  %v13124_v60 = vld [vmem:[#allocation38_spill] sm:$0xff]  ;;  %v9235_v43 = vcombine.low %v504_v12, %v508_v18  ;;  %5226 = vmatpush2.bf16.msra.mxu0 %v9243_v52  ;;  %v11423_v12 = vrot.slane %v10335_v58, %v713_v13 }
 0x269   :  { %5186 = vmatprep.mubr.bf16.mxu1 %v13120_v62  ;;  %v632_v34 = vld [vmem:[#allocation5 + $0xe18] sm:$0xff]  ;;  %v11409_v63 = vpack.c.bf16 %v5514_v1, %v5506_v42  ;;  %5074 = vmatmul.mubr.bf16.gmra.mxu0 %v13124_v60  ;;  %v11417_v0 = vpack.c.bf16 %v5529_v47, %v5521_v10  ;;  %v4401_v1 = vpop.f32.mrf.mxu0  ;;  %v4513_v2 = vadd.f32 %v4512_v11, %v4400_v38  ;;  %v4514_v44 = vpop.f32.mrf.mxu1 }
 0x26a   :  { %v636_v22 = vld [vmem:[#allocation5 + $0xe38] sm:$0xff]  ;;  %5187 = vmatmul.mubr.bf16.gmra.mxu1 %v13127_v26  ;;  %5227 = vmatprep.subr.bf16.mxu0 %v9236_v20  ;;  %v4402_v45 = vadd.f32 %v4401_v1, %v11283_v50  ;;  %v11428_v30 = vrot.slane %v10335_v58, %v717_v48 }
 0x26b   :  { %13122 = vst [vmem:[#allocation30_spill] sm:$0xff] %v11409_v63  ;;  %v13123_v40 = vld [vmem:[#allocation93_spill] sm:$0xff]  ;;  %v9364_v24 = vcombine.high %v632_v34, %v636_v22  ;;  %v13126_v56 = vld [vmem:[#allocation94_spill] sm:$0xff]  ;;  %5339 = vmatpush2.bf16.msra.mxu1 %v9371_v28  ;;  %v9363_v21 = vcombine.low %v632_v34, %v636_v22  ;;  %13128 = vst [vmem:[#allocation86_spill] sm:$0xff] %v11417_v0  ;;  %5229 = vmatprep.mubr.bf16.mxu0 %v13129_v14  ;;  %v4403_v49 = vpop.f32.mrf.mxu0  ;;  %v4516_v53 = vpop.f32.mrf.mxu1 }
 0x26c   :  { %v4394_v59 = vadd.f32 %v4393_v61, %v13123_v40  ;;  %v4398_v15 = vadd.f32 %v4397_v32, %v13126_v56  ;;  %v9856_v46 = vld [vmem:[#allocation8 + $0xe4] ss:$16 sps:$4 sm:$0xff]   ;;  %5228 = vmatpush2.bf16.msra.mxu0 %v9235_v43  ;;  %v9854_v18 = vld [vmem:[#allocation8 + $0xe0] ss:$16 sps:$4 sm:$0xff]   ;;  %v4515_v22 = vadd.f32 %v4514_v44, %v4402_v45  ;;  %v4404_v35 = vadd.f32 %v4403_v49, %v11287_v6 }
 0x26d   :  { %5340 = vmatprep.subr.bf16.mxu1 %v9364_v24  ;;  %v9859_v4 = vld [vmem:[#allocation8 + $0x2e4] ss:$16 sps:$4 sm:$0xff]   ;;  %7173 = vmatprep.subr.bf16.mxu0 %v9856_v46  ;;  %v9857_v62 = vld [vmem:[#allocation8 + $0x2e0] ss:$16 sps:$4 sm:$0xff]   ;;  %v4553_v9 = vpop.f32.mrf.mxu0  ;;  %v4666_v40 = vpop.f32.mrf.mxu1  ;;  %v5538_v24 = vmax.f32 %v4513_v2, 0.0 }
 0x26e   :  { %v4507_v39 = vadd.f32 %v4506_v33, %v4394_v59  ;;  %v4511_v42 = vadd.f32 %v4510_v29, %v4398_v15  ;;  %v13130_v8 = vld [vmem:[#allocation41_spill] sm:$0xff]  ;;  %v13132_v52 = vld [vmem:[#allocation42_spill] sm:$0xff]  ;;  %v5545_v28 = vmax.f32 %v4515_v22, 0.0  ;;  %v4517_v20 = vadd.f32 %v4516_v53, %v4404_v35  ;;  %v13133_v59 = vld [vmem:[#allocation43_spill] sm:$0xff] }
 0x26f   :  { %5342 = vmatprep.mubr.bf16.mxu1 %v13130_v8  ;;  %5341 = vmatpush2.bf16.msra.mxu1 %v9363_v21  ;;  %v9862_v34 = vld [vmem:[#allocation8 + $0xc4] ss:$16 sps:$4 sm:$0xff]   ;;  %v4554_v57 = vadd.f32 %v4553_v9, %v11423_v12  ;;  %v9860_v33 = vld [vmem:[#allocation8 + $0xc0] ss:$16 sps:$4 sm:$0xff]   ;;  %v4555_v6 = vpop.f32.mrf.mxu0 }
 0x270   :  { %v5530_v16 = vmax.f32 %v4507_v39, 0.0  ;;  %7286 = vmatprep.subr.bf16.mxu1 %v9859_v4  ;;  %v9865_v50 = vld [vmem:[#allocation8 + $0x2c4] ss:$16 sps:$4 sm:$0xff]   ;;  %v5537_v61 = vmax.f32 %v4511_v42, 0.0  ;;  %v9863_v32 = vld [vmem:[#allocation8 + $0x2c0] ss:$16 sps:$4 sm:$0xff]   ;;  %v4556_v47 = vadd.f32 %v4555_v6, %v11428_v30  ;;  %v4668_v39 = vpop.f32.mrf.mxu1 }
 0x271   :  { %5230 = vmatmul.mubr.bf16.vlgmr.msra.gmra.mxu0 %v13132_v52  ;;  %v9868_v60 = vld [vmem:[#allocation8 + $0xa4] ss:$16 sps:$4 sm:$0xff]   ;;  %v5546_v13 = vmax.f32 %v4517_v20, 0.0  ;;  %v11435_v10 = vadd.f32 %v4666_v40, %v4554_v57  ;;  %v4557_v29 = vpop.f32.mrf.mxu0  ;;  %v9866_v46 = vld [vmem:[#allocation8 + $0xa0] ss:$16 sps:$4 sm:$0xff]  }
 0x272   :  { %v11425_v17 = vpack.c.bf16 %v5530_v16, %v5522_v31  ;;  %5343 = vmatmul.mubr.bf16.vlgmr.msra.gmra.mxu1 %v13133_v59  ;;  %7174 = vmatpush1.bf16.msra.mxu0 %v9854_v18  ;;  %v11433_v43 = vpack.c.bf16 %v5545_v28, %v5537_v61  ;;  %v13135_v56 = vld [vmem:[#allocation44_spill] sm:$0xff]  ;;  %v13136_v26 = vld [vmem:[#allocation45_spill] sm:$0xff]  ;;  %v11440_v31 = vadd.f32 %v4668_v39, %v4556_v47  ;;  %v4670_v21 = vpop.f32.mrf.mxu1  ;;  %v13138_v2 = vld [vmem:[#allocation46_spill] sm:$0xff] }
 0x273   :  { %7287 = vmatpush1.bf16.msra.mxu1 %v9857_v62  ;;  %7175 = vmatprep.subr.bf16.mxu0 %v9862_v34  ;;  %v9871_v15 = vld [vmem:[#allocation8 + $0x2a4] ss:$16 sps:$4 sm:$0xff]   ;;  %v4558_v51 = vadd.f32 %v4557_v29, %v11423_v12  ;;  %v11443_v48 = vpack.c.bf16 %v5546_v13, %v5538_v24  ;;  %v4559_v16 = vpop.f32.mrf.mxu0  ;;  %v9869_v42 = vld [vmem:[#allocation8 + $0x2a0] ss:$16 sps:$4 sm:$0xff]  }
 0x274   :  { %13131 = vst [vmem:[#allocation31_spill] sm:$0xff] %v11425_v17  ;;  %13134 = vst [vmem:[#allocation87_spill] sm:$0xff] %v11433_v43  ;;  %7288 = vmatprep.subr.bf16.mxu1 %v9865_v50  ;;  %5239 = vmatprep.mubr.bf16.mxu0 %v13135_v56  ;;  %v9874_v38 = vld [vmem:[#allocation8 + $0x84] ss:$16 sps:$4 sm:$0xff]   ;;  %v4560_v14 = vadd.f32 %v4559_v16, %v11428_v30  ;;  %v4672_v4 = vpop.f32.mrf.mxu1  ;;  %v9872_v49 = vld [vmem:[#allocation8 + $0x80] ss:$16 sps:$4 sm:$0xff]  }
 0x275   :  { %5352 = vmatprep.mubr.bf16.mxu1 %v13136_v26  ;;  %13137 = vst [vmem:[#allocation32_spill] sm:$0xff] %v11443_v48  ;;  %v11445_v11 = vadd.f32 %v4670_v21, %v4558_v51  ;;  %v9877_v1 = vld [vmem:[#allocation8 + $0x284] ss:$16 sps:$4 sm:$0xff]   ;;  %v4563_v8 = vpop.f32.mrf.mxu0  ;;  %v9875_v34 = vld [vmem:[#allocation8 + $0x280] ss:$16 sps:$4 sm:$0xff]  }
 0x276   :  { %7176 = vmatpush1.bf16.msra.mxu0 %v9860_v33  ;;  %v11449_v45 = vadd.f32 %v4672_v4, %v4560_v14  ;;  %v4564_v44 = vadd.f32 %v4563_v8, %v11423_v12  ;;  %v4676_v58 = vpop.f32.mrf.mxu1  ;;  %v13139_v18 = vld [vmem:[#allocation47_spill] sm:$0xff]  ;;  %v13140_v9 = vld [vmem:[#allocation48_spill] sm:$0xff]  ;;  %v13141_v28 = vld [vmem:[#allocation49_spill] sm:$0xff] }
 0x277   :  { %7289 = vmatpush1.bf16.msra.mxu1 %v9863_v32  ;;  %7177 = vmatprep.subr.bf16.mxu0 %v9868_v60  ;;  %v4565_v62 = vpop.f32.mrf.mxu0  ;;  %v9880_v22 = vld [vmem:[#allocation8 + $0x64] ss:$16 sps:$4 sm:$0xff]   ;;  %v9878_v59 = vld [vmem:[#allocation8 + $0x60] ss:$16 sps:$4 sm:$0xff]  }
 0x278   :  { %7290 = vmatprep.subr.bf16.mxu1 %v9871_v15  ;;  %v11453_v35 = vadd.f32 %v4676_v58, %v4564_v44  ;;  %v4566_v53 = vadd.f32 %v4565_v62, %v11428_v30  ;;  %v4678_v50 = vpop.f32.mrf.mxu1  ;;  %v9883_v52 = vld [vmem:[#allocation8 + $0x264] ss:$16 sps:$4 sm:$0xff]   ;;  %v9881_v24 = vld [vmem:[#allocation8 + $0x260] ss:$16 sps:$4 sm:$0xff]  }
 0x279   :  { %5240 = vmatmul.mubr.bf16.gmra.mxu0 %v13138_v2  ;;  %v4567_v61 = vpop.f32.mrf.mxu0  ;;  %v9886_v6 = vld [vmem:[#allocation8 + $0x44] ss:$16 sps:$4 sm:$0xff]   ;;  %v9884_v21 = vld [vmem:[#allocation8 + $0x40] ss:$16 sps:$4 sm:$0xff]  }
 0x27a   :  { %5353 = vmatmul.mubr.bf16.gmra.mxu1 %v13139_v18  ;;  %7178 = vmatpush1.bf16.msra.mxu0 %v9866_v46  ;;  %v11458_v20 = vadd.f32 %v4678_v50, %v4566_v53  ;;  %v4568_v57 = vadd.f32 %v4567_v61, %v11423_v12  ;;  %v4680_v40 = vpop.f32.mrf.mxu1  ;;  %v9889_v47 = vld [vmem:[#allocation8 + $0x244] ss:$16 sps:$4 sm:$0xff]   ;;  %v9887_v16 = vld [vmem:[#allocation8 + $0x240] ss:$16 sps:$4 sm:$0xff]  }
 0x27b   :  { %7291 = vmatpush1.bf16.msra.mxu1 %v9869_v42  ;;  %7179 = vmatprep.subr.bf16.mxu0 %v9874_v38  ;;  %v4569_v33 = vpop.f32.mrf.mxu0  ;;  %v13142_v56 = vld [vmem:[#allocation50_spill] sm:$0xff]  ;;  %v13143_v51 = vld [vmem:[#allocation51_spill] sm:$0xff]  ;;  %v13145_v44 = vld [vmem:[#allocation53_spill] sm:$0xff] }
 0x27c   :  { %7292 = vmatprep.subr.bf16.mxu1 %v9877_v1  ;;  %5249 = vmatprep.mubr.bf16.mxu0 %v13140_v9  ;;  %v11461_v32 = vadd.f32 %v4680_v40, %v4568_v57  ;;  %v4570_v60 = vadd.f32 %v4569_v33, %v11428_v30  ;;  %v4682_v13 = vpop.f32.mrf.mxu1  ;;  %v9892_v42 = vld [vmem:[#allocation8 + $0x24] ss:$16 sps:$4 sm:$0xff]   ;;  %v9890_v62 = vld [vmem:[#allocation8 + $0x20] ss:$16 sps:$4 sm:$0xff]  }
 0x27d   :  { %5362 = vmatprep.mubr.bf16.mxu1 %v13141_v28  ;;  %v4573_v39 = vpop.f32.mrf.mxu0  ;;  %v13144_v1 = vld [vmem:[#allocation52_spill] sm:$0xff]  ;;  %v13146_v57 = vld [vmem:[#allocation54_spill] sm:$0xff]  ;;  %v9950_v43 = vld [vmem:[#allocation8 + $0x4e0] ss:$16 sps:$4 sm:$0xff]  }
 0x27e   :  { %7180 = vmatpush1.bf16.msra.mxu0 %v9872_v49  ;;  %v11465_v15 = vadd.f32 %v4682_v13, %v4570_v60  ;;  %v4574_v29 = vadd.f32 %v4573_v39, %v11423_v12  ;;  %v4686_v26 = vpop.f32.mrf.mxu1  ;;  %v9895_v8 = vld [vmem:[#allocation8 + $0x224] ss:$16 sps:$4 sm:$0xff]   ;;  %v9899_v13 = vld [vmem:[#allocation8 + $0x200] ss:$16 sps:$4 sm:$0xff]  }
 0x27f   :  { %7293 = vmatpush1.bf16.msra.mxu1 %v9875_v34  ;;  %7181 = vmatprep.subr.bf16.mxu0 %v9880_v22  ;;  %v4575_v46 = vpop.f32.mrf.mxu0  ;;  %v9893_v22 = vld [vmem:[#allocation8 + $0x220] ss:$16 sps:$4 sm:$0xff]   ;;  %v9898_v53 = vld [vmem:[#allocation8 + $0x4] ss:$16 sps:$4 sm:$0xff]  }
 0x280   :  { %7294 = vmatprep.subr.bf16.mxu1 %v9883_v52  ;;  %v11469_v38 = vadd.f32 %v4686_v26, %v4574_v29  ;;  %v4576_v14 = vadd.f32 %v4575_v46, %v11428_v30  ;;  %v4688_v4 = vpop.f32.mrf.mxu1  ;;  %v9901_v61 = vld [vmem:[#allocation8 + $0x204] ss:$16 sps:$4 sm:$0xff]  }
 0x281   :  { %5250 = vmatmul.mubr.bf16.gmra.mxu0 %v13142_v56  ;;  %v4577_v2 = vpop.f32.mrf.mxu0  ;;  %v13148_v26 = vld [vmem:[#allocation56_spill] sm:$0xff]  ;;  %v13149_v46 = vld [vmem:[#allocation57_spill] sm:$0xff] }
 0x282   :  { %5363 = vmatmul.mubr.bf16.gmra.mxu1 %v13143_v51  ;;  %7182 = vmatpush1.bf16.msra.mxu0 %v9878_v59  ;;  %v11474_v58 = vadd.f32 %v4688_v4, %v4576_v14  ;;  %v4578_v18 = vadd.f32 %v4577_v2, %v11423_v12  ;;  %v4690_v49 = vpop.f32.mrf.mxu1  ;;  %v9907_v51 = vld [vmem:[#allocation8 + $0x3e4] ss:$16 sps:$4 sm:$0xff]   ;;  %v9902_v4 = vld [vmem:[#allocation8 + $0x1e0] ss:$16 sps:$4 sm:$0xff]  }
 0x283   :  { %7295 = vmatpush1.bf16.msra.mxu1 %v9881_v24  ;;  %7183 = vmatprep.subr.bf16.mxu0 %v9886_v6  ;;  %v4579_v34 = vpop.f32.mrf.mxu0  ;;  %v13147_v24 = vld [vmem:[#allocation55_spill] sm:$0xff] }
 0x284   :  { %7296 = vmatprep.subr.bf16.mxu1 %v9889_v47  ;;  %5259 = vmatprep.mubr.bf16.mxu0 %v13144_v1  ;;  %v11477_v50 = vadd.f32 %v4690_v49, %v4578_v18  ;;  %v4580_v9 = vadd.f32 %v4579_v34, %v11428_v30  ;;  %v4692_v52 = vpop.f32.mrf.mxu1  ;;  %v9896_v6 = vld [vmem:[#allocation8] ss:$16 sps:$4 sm:$0xff]   ;;  %v9904_v47 = vld [vmem:[#allocation8 + $0x1e4] ss:$16 sps:$4 sm:$0xff]  }
 0x285   :  { %5372 = vmatprep.mubr.bf16.mxu1 %v13145_v44  ;;  %v4583_v28 = vpop.f32.mrf.mxu0  ;;  %v9910_v2 = vld [vmem:[#allocation8 + $0x1c4] ss:$16 sps:$4 sm:$0xff]  }
 0x286   :  { %7184 = vmatpush1.bf16.msra.mxu0 %v9884_v21  ;;  %v11481_v40 = vadd.f32 %v4692_v52, %v4580_v9  ;;  %v4584_v59 = vadd.f32 %v4583_v28, %v11423_v12  ;;  %v4696_v33 = vpop.f32.mrf.mxu1  ;;  %v9908_v28 = vld [vmem:[#allocation8 + $0x1c0] ss:$16 sps:$4 sm:$0xff]  }
 0x287   :  { %7297 = vmatpush1.bf16.msra.mxu1 %v9887_v16  ;;  %7185 = vmatprep.subr.bf16.mxu0 %v9892_v42  ;;  %v4585_v60 = vpop.f32.mrf.mxu0 }
 0x288   :  { %7298 = vmatprep.subr.bf16.mxu1 %v9895_v8  ;;  %v11485_v39 = vadd.f32 %v4696_v33, %v4584_v59  ;;  %v4586_v56 = vadd.f32 %v4585_v60, %v11428_v30  ;;  %v4698_v29 = vpop.f32.mrf.mxu1  ;;  %v9905_v8 = vld [vmem:[#allocation8 + $0x3e0] ss:$16 sps:$4 sm:$0xff]   ;;  %v9916_v33 = vld [vmem:[#allocation8 + $0x1a4] ss:$16 sps:$4 sm:$0xff]  }
 0x289   :  { %5260 = vmatmul.mubr.bf16.gmra.mxu0 %v13146_v57  ;;  %v4587_v21 = vpop.f32.mrf.mxu0  ;;  %v9911_v59 = vld [vmem:[#allocation8 + $0x3c0] ss:$16 sps:$4 sm:$0xff]  }
 0x28a   :  { %5373 = vmatmul.mubr.bf16.gmra.mxu1 %v13147_v24  ;;  %7186 = vmatpush1.bf16.msra.mxu0 %v9890_v62  ;;  %v11490_v16 = vadd.f32 %v4698_v29, %v4586_v56  ;;  %v4588_v42 = vadd.f32 %v4587_v21, %v11423_v12  ;;  %v4700_v14 = vpop.f32.mrf.mxu1  ;;  %v9913_v62 = vld [vmem:[#allocation8 + $0x3c4] ss:$16 sps:$4 sm:$0xff]  }
 0x28b   :  { %7299 = vmatpush1.bf16.msra.mxu1 %v9893_v22  ;;  %7187 = vmatprep.subr.bf16.mxu0 %v9898_v53  ;;  %v4589_v1 = vpop.f32.mrf.mxu0  ;;  %v13150_v22 = vld [vmem:[#allocation58_spill] sm:$0xff]  ;;  %v13153_v29 = vld [vmem:[#allocation61_spill] sm:$0xff] }
 0x28c   :  { %7300 = vmatprep.subr.bf16.mxu1 %v9901_v61  ;;  %5269 = vmatprep.mubr.bf16.mxu0 %v13148_v26  ;;  %v11493_v44 = vadd.f32 %v4700_v14, %v4588_v42  ;;  %v4590_v18 = vadd.f32 %v4589_v1, %v11428_v30  ;;  %v4702_v49 = vpop.f32.mrf.mxu1  ;;  %v13151_v61 = vld [vmem:[#allocation59_spill] sm:$0xff] }
 0x28d   :  { %5382 = vmatprep.mubr.bf16.mxu1 %v13149_v46  ;;  %v4593_v34 = vpop.f32.mrf.mxu0  ;;  %v9914_v46 = vld [vmem:[#allocation8 + $0x1a0] ss:$16 sps:$4 sm:$0xff]  }
 0x28e   :  { %7188 = vmatpush1.bf16.msra.mxu0 %v9896_v6  ;;  %v11497_v53 = vadd.f32 %v4702_v49, %v4590_v18  ;;  %v4594_v9 = vadd.f32 %v4593_v34, %v11423_v12  ;;  %v4706_v52 = vpop.f32.mrf.mxu1  ;;  %v9917_v14 = vld [vmem:[#allocation8 + $0x3a0] ss:$16 sps:$4 sm:$0xff]   ;;  %v9925_v18 = vld [vmem:[#allocation8 + $0x384] ss:$16 sps:$4 sm:$0xff]  }
 0x28f   :  { %7301 = vmatpush1.bf16.msra.mxu1 %v9899_v13  ;;  %7189 = vmatprep.subr.bf16.mxu0 %v9904_v47  ;;  %v4595_v57 = vpop.f32.mrf.mxu0  ;;  %v13152_v13 = vld [vmem:[#allocation60_spill] sm:$0xff] }
 0x290   :  { %7302 = vmatprep.subr.bf16.mxu1 %v9907_v51  ;;  %v11501_v24 = vadd.f32 %v4706_v52, %v4594_v9  ;;  %v4596_v6 = vadd.f32 %v4595_v57, %v11428_v30  ;;  %v4708_v60 = vpop.f32.mrf.mxu1  ;;  %v9919_v47 = vld [vmem:[#allocation8 + $0x3a4] ss:$16 sps:$4 sm:$0xff]   ;;  %v9923_v57 = vld [vmem:[#allocation8 + $0x380] ss:$16 sps:$4 sm:$0xff]  }
 0x291   :  { %5270 = vmatmul.mubr.bf16.gmra.mxu0 %v13150_v22  ;;  %v4597_v56 = vpop.f32.mrf.mxu0  ;;  %v13155_v52 = vld [vmem:[#allocation63_spill] sm:$0xff] }
 0x292   :  { %5383 = vmatmul.mubr.bf16.gmra.mxu1 %v13151_v61  ;;  %7190 = vmatpush2.bf16.msra.mxu0 %v9902_v4  ;;  %v11506_v26 = vadd.f32 %v4708_v60, %v4596_v6  ;;  %v4598_v51 = vadd.f32 %v4597_v56, %v11423_v12  ;;  %v4710_v21 = vpop.f32.mrf.mxu1  ;;  %v9922_v4 = vld [vmem:[#allocation8 + $0x184] ss:$16 sps:$4 sm:$0xff]   ;;  %v9920_v61 = vld [vmem:[#allocation8 + $0x180] ss:$16 sps:$4 sm:$0xff]  }
 0x293   :  { %7303 = vmatpush2.bf16.msra.mxu1 %v9905_v8  ;;  %7191 = vmatprep.subr.bf16.mxu0 %v9910_v2  ;;  %v4599_v42 = vpop.f32.mrf.mxu0 }
 0x294   :  { %7304 = vmatprep.subr.bf16.mxu1 %v9913_v62  ;;  %5279 = vmatprep.mubr.bf16.mxu0 %v13152_v13  ;;  %v11509_v1 = vadd.f32 %v4710_v21, %v4598_v51  ;;  %v4600_v8 = vadd.f32 %v4599_v42, %v11428_v30  ;;  %v4712_v2 = vpop.f32.mrf.mxu1  ;;  %v13154_v62 = vld [vmem:[#allocation62_spill] sm:$0xff]  ;;  %v13156_v13 = vld [vmem:[#allocation64_spill] sm:$0xff]  ;;  %v9926_v42 = vld [vmem:[#allocation8 + $0x160] ss:$16 sps:$4 sm:$0xff]  }
 0x295   :  { %5392 = vmatprep.mubr.bf16.mxu1 %v13153_v29  ;;  %v4603_v49 = vpop.f32.mrf.mxu0  ;;  %v13157_v29 = vld [vmem:[#allocation65_spill] sm:$0xff] }
 0x296   :  { %7192 = vmatpush2.bf16.msra.mxu0 %v9908_v28  ;;  %v11513_v34 = vadd.f32 %v4712_v2, %v4600_v8  ;;  %v4604_v22 = vadd.f32 %v4603_v49, %v11423_v12  ;;  %v4716_v9 = vpop.f32.mrf.mxu1  ;;  %v9934_v8 = vld [vmem:[#allocation8 + $0x144] ss:$16 sps:$4 sm:$0xff]  }
 0x297   :  { %7305 = vmatpush2.bf16.msra.mxu1 %v9911_v59  ;;  %7193 = vmatprep.subr.bf16.mxu0 %v9916_v33  ;;  %v4605_v28 = vpop.f32.mrf.mxu0  ;;  %v9928_v59 = vld [vmem:[#allocation8 + $0x164] ss:$16 sps:$4 sm:$0xff]  }
 0x298   :  { %7306 = vmatprep.subr.bf16.mxu1 %v9919_v47  ;;  %v11517_v33 = vadd.f32 %v4716_v9, %v4604_v22  ;;  %v4606_v6 = vadd.f32 %v4605_v28, %v11428_v30  ;;  %v4718_v60 = vpop.f32.mrf.mxu1  ;;  %v9931_v47 = vld [vmem:[#allocation8 + $0x364] ss:$16 sps:$4 sm:$0xff]  }
 0x299   :  { %5280 = vmatmul.mubr.bf16.gmra.mxu0 %v13154_v62  ;;  %v4607_v56 = vpop.f32.mrf.mxu0  ;;  %v9937_v62 = vld [vmem:[#allocation8 + $0x344] ss:$16 sps:$4 sm:$0xff]  }
 0x29a   :  { %5393 = vmatmul.mubr.bf16.gmra.mxu1 %v13155_v52  ;;  %7194 = vmatpush2.bf16.msra.mxu0 %v9914_v46  ;;  %v11522_v51 = vadd.f32 %v4718_v60, %v4606_v6  ;;  %v4608_v21 = vadd.f32 %v4607_v56, %v11423_v12  ;;  %v4720_v46 = vpop.f32.mrf.mxu1  ;;  %v13158_v9 = vld [vmem:[#allocation66_spill] sm:$0xff]  ;;  %v9935_v60 = vld [vmem:[#allocation8 + $0x340] ss:$16 sps:$4 sm:$0xff]  }
 0x29b   :  { %7307 = vmatpush2.bf16.msra.mxu1 %v9917_v14  ;;  %7195 = vmatprep.subr.bf16.mxu0 %v9922_v4  ;;  %v4609_v14 = vpop.f32.mrf.mxu0  ;;  %v9929_v4 = vld [vmem:[#allocation8 + $0x360] ss:$16 sps:$4 sm:$0xff]  }
 0x29c   :  { %7308 = vmatprep.subr.bf16.mxu1 %v9925_v18  ;;  %5289 = vmatprep.mubr.bf16.mxu0 %v13156_v13  ;;  %v11525_v2 = vadd.f32 %v4720_v46, %v4608_v21  ;;  %v4610_v18 = vadd.f32 %v4609_v14, %v11428_v30  ;;  %v4722_v49 = vpop.f32.mrf.mxu1  ;;  %v9940_v13 = vld [vmem:[#allocation8 + $0x124] ss:$16 sps:$4 sm:$0xff]  }
 0x29d   :  { %5402 = vmatprep.mubr.bf16.mxu1 %v13157_v29  ;;  %v4613_v22 = vpop.f32.mrf.mxu0  ;;  %v13160_v21 = vld [vmem:[#allocation68_spill] sm:$0xff] }
 0x29e   :  { %7196 = vmatpush2.bf16.msra.mxu0 %v9920_v61  ;;  %v11529_v52 = vadd.f32 %v4722_v49, %v4610_v18  ;;  %v4614_v61 = vadd.f32 %v4613_v22, %v11423_v12  ;;  %v4726_v28 = vpop.f32.mrf.mxu1  ;;  %v9943_v46 = vld [vmem:[#allocation8 + $0x324] ss:$16 sps:$4 sm:$0xff]  }
 0x29f   :  { %7309 = vmatpush2.bf16.msra.mxu1 %v9923_v57  ;;  %7197 = vmatprep.subr.bf16.mxu0 %v9928_v59  ;;  %v13159_v57 = vld [vmem:[#allocation67_spill] sm:$0xff]  ;;  %v4615_v6 = vpop.f32.mrf.mxu0  ;;  %v13161_v18 = vld [vmem:[#allocation69_spill] sm:$0xff] }
 0x2a0   :  { %7310 = vmatprep.subr.bf16.mxu1 %v9931_v47  ;;  %v9932_v59 = vld [vmem:[#allocation8 + $0x140] ss:$16 sps:$4 sm:$0xff]   ;;  %v11533_v56 = vadd.f32 %v4726_v28, %v4614_v61  ;;  %v4616_v47 = vadd.f32 %v4615_v6, %v11428_v30  ;;  %v4728_v29 = vpop.f32.mrf.mxu1 }
 0x2a1   :  { %5290 = vmatmul.mubr.bf16.gmra.mxu0 %v13158_v9  ;;  %v4617_v14 = vpop.f32.mrf.mxu0  ;;  %v9941_v9 = vld [vmem:[#allocation8 + $0x320] ss:$16 sps:$4 sm:$0xff]  }
 0x2a2   :  { %5403 = vmatmul.mubr.bf16.gmra.mxu1 %v13159_v57  ;;  %7198 = vmatpush2.bf16.msra.mxu0 %v9926_v42  ;;  %v11538_v49 = vadd.f32 %v4728_v29, %v4616_v47  ;;  %v4618_v42 = vadd.f32 %v4617_v14, %v11423_v12  ;;  %v9946_v57 = vld [vmem:[#allocation8 + $0x104] ss:$16 sps:$4 sm:$0xff]  }
 0x2a3   :  { %7311 = vmatpush2.bf16.msra.mxu1 %v9929_v4  ;;  %7199 = vmatprep.subr.bf16.mxu0 %v9934_v8  ;;  %v4730_v4 = vpop.f32.mrf.mxu1  ;;  %v9938_v8 = vld [vmem:[#allocation8 + $0x120] ss:$16 sps:$4 sm:$0xff]   ;;  %v4619_v22 = vpop.f32.mrf.mxu0  ;;  %v9949_v47 = vld [vmem:[#allocation8 + $0x304] ss:$16 sps:$4 sm:$0xff]  }
 0x2a4   :  { %7312 = vmatprep.subr.bf16.mxu1 %v9937_v62  ;;  %5299 = vmatprep.mubr.bf16.mxu0 %v13160_v21  ;;  %v11541_v61 = vadd.f32 %v4730_v4, %v4618_v42  ;;  %v4620_v62 = vadd.f32 %v4619_v22, %v11428_v30  ;;  %v13162_v21 = vld [vmem:[#allocation70_spill] sm:$0xff]  ;;  %v9947_v4 = vld [vmem:[#allocation8 + $0x300] ss:$16 sps:$4 sm:$0xff]  }
 0x2a5   :  { %5412 = vmatprep.mubr.bf16.mxu1 %v13161_v18  ;;  %v4732_v28 = vpop.f32.mrf.mxu1  ;;  %v4623_v6 = vpop.f32.mrf.mxu0  ;;  %v13164_v18 = vld [vmem:[#allocation81_spill] sm:$0xff] }
 0x2a6   :  { %7200 = vmatpush2.bf16.msra.mxu0 %v9932_v59  ;;  %v11545_v29 = vadd.f32 %v4732_v28, %v4620_v62  ;;  %v4624_v59 = vadd.f32 %v4623_v6, %v11423_v12  ;;  %v10012_v6 = vld [vmem:[#allocation8 + $0x6e4] ss:$16 sps:$4 sm:$0xff]  }
 0x2a7   :  { %7313 = vmatpush2.bf16.msra.mxu1 %v9935_v60  ;;  %7201 = vmatprep.subr.bf16.mxu0 %v9940_v13  ;;  %v4736_v14 = vpop.f32.mrf.mxu1  ;;  %v13163_v60 = vld [vmem:[#allocation71_spill] sm:$0xff]  ;;  %v4625_v42 = vpop.f32.mrf.mxu0 }
 0x2a8   :  { %7314 = vmatprep.subr.bf16.mxu1 %v9943_v46  ;;  %v9944_v13 = vld [vmem:[#allocation8 + $0x100] ss:$16 sps:$4 sm:$0xff]   ;;  %v9952_v46 = vld [vmem:[#allocation8 + $0x4e4] ss:$16 sps:$4 sm:$0xff]   ;;  %v11550_v22 = vadd.f32 %v4736_v14, %v4624_v59  ;;  %v4626_v62 = vadd.f32 %v4625_v42, %v11428_v30 }
 0x2a9   :  { %5300 = vmatmul.mubr.bf16.gmra.mxu0 %v13162_v21  ;;  %v4738_v28 = vpop.f32.mrf.mxu1  ;;  %v4627_v21 = vpop.f32.mrf.mxu0 }
 0x2aa   :  { %5413 = vmatmul.mubr.bf16.gmra.mxu1 %v13163_v60  ;;  %7202 = vmatpush2.bf16.msra.mxu0 %v9938_v8  ;;  %13165 = vst [vmem:[#allocation33_spill] sm:$0xff] %v11550_v22  ;;  %v11554_v60 = vadd.f32 %v4738_v28, %v4626_v62  ;;  %v4628_v8 = vadd.f32 %v4627_v21, %v11423_v12  ;;  %v10018_v62 = vld [vmem:[#allocation8 + $0x6c4] ss:$16 sps:$4 sm:$0xff]  }
 0x2ab   :  { %7205 = vmatprep.mubr.bf16.mxu0 %v13164_v18  ;;  %7315 = vmatpush2.bf16.msra.mxu1 %v9941_v9  ;;  %v4740_v18 = vpop.f32.mrf.mxu1  ;;  %v4629_v9 = vpop.f32.mrf.mxu0  ;;  %v9958_v21 = vld [vmem:[#allocation8 + $0x4a4] ss:$16 sps:$4 sm:$0xff]  }
 0x2ac   :  { %7318 = vmatprep.mubr.bf16.mxu1 %v11312_v23  ;;  %7203 = vmatprep.subr.bf16.mxu0 %v9946_v57  ;;  %v11557_v59 = vadd.f32 %v4740_v18, %v4628_v8  ;;  %v4630_v14 = vadd.f32 %v4629_v9, %v11428_v30  ;;  %v9955_v23 = vld [vmem:[#allocation8 + $0x4c4] ss:$16 sps:$4 sm:$0xff]   ;;  %v10010_v57 = vld [vmem:[#allocation8 + $0x6e0] ss:$16 sps:$4 sm:$0xff]  }
 0x2ad   :  { %7316 = vmatprep.subr.bf16.mxu1 %v9949_v47  ;;  %v4742_v42 = vpop.f32.mrf.mxu1  ;;  %v13166_v47 = vld [vmem:[#allocation80_spill] sm:$0xff]  ;;  %v9953_v18 = vld [vmem:[#allocation8 + $0x4c0] ss:$16 sps:$4 sm:$0xff]  }
 0x2ae   :  { %7204 = vmatpush2.bf16.msra.mxu0 %v9944_v13  ;;  %v4779_v22 = vpop.f32.mrf.mxu0  ;;  %v11561_v28 = vadd.f32 %v4742_v42, %v4630_v14  ;;  %v10016_v8 = vld [vmem:[#allocation8 + $0x6c0] ss:$16 sps:$4 sm:$0xff]  }
 0x2af   :  { %7317 = vmatpush2.bf16.msra.mxu1 %v9947_v4  ;;  %7399 = vmatprep.subr.bf16.mxu0 %v9952_v46  ;;  %v4780_v12 = vadd.f32 %v4779_v22, %v11435_v10  ;;  %v4892_v13 = vpop.f32.mrf.mxu1  ;;  %v13168_v4 = vld [vmem:[#allocation83_spill] sm:$0xff] }
 0x2b0   :  { %7512 = vmatprep.subr.bf16.mxu1 %v10012_v6  ;;  %13167 = vst [vmem:[#allocation88_spill] sm:$0xff] %v11561_v28  ;;  %v4781_v30 = vpop.f32.mrf.mxu0  ;;  %v10024_v10 = vld [vmem:[#allocation8 + $0x6a4] ss:$16 sps:$4 sm:$0xff]  }
 0x2b1   :  { %7206 = vmatmul.mubr.bf16.vlgmr.msra.gmra.mxu0 %v13166_v47  ;;  %v4782_v46 = vadd.f32 %v4781_v30, %v11440_v31  ;;  %v4894_v6 = vpop.f32.mrf.mxu1  ;;  %v4893_v22 = vadd.f32 %v4892_v13, %v4780_v12  ;;  %v13169_v28 = vld [vmem:[#allocation82_spill] sm:$0xff] }
 0x2b2   :  { %7319 = vmatmul.mubr.bf16.vlgmr.msra.gmra.mxu1 %v11305_v41  ;;  %7215 = vmatprep.mubr.bf16.mxu0 %v13168_v4  ;;  %v4783_v9 = vpop.f32.mrf.mxu0 }
 0x2b3   :  { %7328 = vmatprep.mubr.bf16.mxu1 %v11332_v3  ;;  %7400 = vmatpush1.bf16.msra.mxu0 %v9950_v43  ;;  %v4784_v14 = vadd.f32 %v4783_v9, %v11445_v11  ;;  %v4896_v42 = vpop.f32.mrf.mxu1  ;;  %v9956_v3 = vld [vmem:[#allocation8 + $0x4a0] ss:$16 sps:$4 sm:$0xff]   ;;  %v4895_v43 = vadd.f32 %v4894_v6, %v4782_v46  ;;  %v5427_v12 = vmax.f32 %v4893_v22, 0.0 }
 0x2b4   :  { %7401 = vmatprep.subr.bf16.mxu0 %v9955_v23  ;;  %7513 = vmatpush1.bf16.msra.mxu1 %v10010_v57  ;;  %v4785_v41 = vpop.f32.mrf.mxu0  ;;  %v9961_v23 = vld [vmem:[#allocation8 + $0x484] ss:$16 sps:$4 sm:$0xff]   ;;  %v10022_v57 = vld [vmem:[#allocation8 + $0x6a0] ss:$16 sps:$4 sm:$0xff]  }
 0x2b5   :  { %7514 = vmatprep.subr.bf16.mxu1 %v10018_v62  ;;  %v4897_v4 = vadd.f32 %v4896_v42, %v4784_v14  ;;  %v4786_v47 = vadd.f32 %v4785_v41, %v11449_v45  ;;  %v4898_v31 = vpop.f32.mrf.mxu1  ;;  %v10030_v62 = vld [vmem:[#allocation8 + $0x684] ss:$16 sps:$4 sm:$0xff]   ;;  %v9959_v45 = vld [vmem:[#allocation8 + $0x480] ss:$16 sps:$4 sm:$0xff]   ;;  %v5428_v6 = vmax.f32 %v4895_v43, 0.0 }
 0x2b6   :  { %v4789_v30 = vpop.f32.mrf.mxu0  ;;  %v13170_v46 = vld [vmem:[#allocation73_spill] sm:$0xff] }
 0x2b7   :  { %7402 = vmatpush1.bf16.msra.mxu0 %v9953_v18  ;;  %v5435_v11 = vmax.f32 %v4897_v4, 0.0  ;;  %v4899_v13 = vadd.f32 %v4898_v31, %v4786_v47  ;;  %v4790_v18 = vadd.f32 %v4789_v30, %v11453_v35  ;;  %v4902_v9 = vpop.f32.mrf.mxu1  ;;  %v9964_v47 = vld [vmem:[#allocation8 + $0x464] ss:$16 sps:$4 sm:$0xff]   ;;  %v10028_v35 = vld [vmem:[#allocation8 + $0x680] ss:$16 sps:$4 sm:$0xff]  }
 0x2b8   :  { %7403 = vmatprep.subr.bf16.mxu0 %v9958_v21  ;;  %7515 = vmatpush1.bf16.msra.mxu1 %v10016_v8  ;;  %v4791_v41 = vpop.f32.mrf.mxu0  ;;  %v10036_v14 = vld [vmem:[#allocation8 + $0x664] ss:$16 sps:$4 sm:$0xff]  }
 0x2b9   :  { %7216 = vmatmul.mubr.bf16.gmra.mxu0 %v13169_v28  ;;  %7516 = vmatprep.subr.bf16.mxu1 %v10024_v10  ;;  %v11575_v21 = vpack.c.bf16 %v5435_v11, %v5427_v12  ;;  %v5436_v8 = vmax.f32 %v4899_v13, 0.0  ;;  %v4792_v10 = vadd.f32 %v4791_v41, %v11458_v20  ;;  %v4904_v4 = vpop.f32.mrf.mxu1  ;;  %v4903_v42 = vadd.f32 %v4902_v9, %v4790_v18  ;;  %v9962_v12 = vld [vmem:[#allocation8 + $0x460] ss:$16 sps:$4 sm:$0xff]  }
 0x2ba   :  { %7329 = vmatmul.mubr.bf16.gmra.mxu1 %v11325_v7  ;;  %7225 = vmatprep.mubr.bf16.mxu0 %v13170_v46  ;;  %v4793_v22 = vpop.f32.mrf.mxu0  ;;  %v10034_v41 = vld [vmem:[#allocation8 + $0x660] ss:$16 sps:$4 sm:$0xff]  }
 0x2bb   :  { %7338 = vmatprep.mubr.bf16.mxu1 %v11352_v5  ;;  %7404 = vmatpush1.bf16.msra.mxu0 %v9956_v3  ;;  %13171 = vst [vmem:[#allocation89_spill] sm:$0xff] %v11575_v21  ;;  %v4794_v31 = vadd.f32 %v4793_v22, %v11461_v32  ;;  %v4906_v3 = vpop.f32.mrf.mxu1  ;;  %v11579_v30 = vpack.c.bf16 %v5436_v8, %v5428_v6  ;;  %v13173_v5 = vld [vmem:[#allocation23_spill] sm:$0xff]  ;;  %v5443_v18 = vmax.f32 %v4903_v42, 0.0 }
 0x2bc   :  { %7405 = vmatprep.subr.bf16.mxu0 %v9961_v23  ;;  %7517 = vmatpush1.bf16.msra.mxu1 %v10022_v57  ;;  %v4795_v43 = vpop.f32.mrf.mxu0  ;;  %v4905_v11 = vadd.f32 %v4904_v4, %v4792_v10  ;;  %v9967_v57 = vld [vmem:[#allocation8 + $0x444] ss:$16 sps:$4 sm:$0xff]   ;;  %v9965_v4 = vld [vmem:[#allocation8 + $0x440] ss:$16 sps:$4 sm:$0xff]  }
 0x2bd   :  { %7518 = vmatprep.subr.bf16.mxu1 %v10030_v62  ;;  %13172 = vst [vmem:[#allocation34_spill] sm:$0xff] %v11579_v30  ;;  %v4907_v13 = vadd.f32 %v4906_v3, %v4794_v31  ;;  %v4796_v20 = vadd.f32 %v4795_v43, %v11465_v15  ;;  %v4908_v23 = vpop.f32.mrf.mxu1  ;;  %v10042_v32 = vld [vmem:[#allocation8 + $0x644] ss:$16 sps:$4 sm:$0xff]  }
 0x2be   :  { %v4799_v62 = vpop.f32.mrf.mxu0  ;;  %v13174_v10 = vld [vmem:[#allocation25_spill] sm:$0xff] }
 0x2bf   :  { %7406 = vmatpush1.bf16.msra.mxu0 %v9959_v45  ;;  %v5451_v9 = vmax.f32 %v4907_v13, 0.0  ;;  %v4909_v6 = vadd.f32 %v4908_v23, %v4796_v20  ;;  %v4800_v45 = vadd.f32 %v4799_v62, %v11469_v38  ;;  %v4912_v8 = vpop.f32.mrf.mxu1  ;;  %v9970_v31 = vld [vmem:[#allocation8 + $0x424] ss:$16 sps:$4 sm:$0xff]   ;;  %v10040_v38 = vld [vmem:[#allocation8 + $0x640] ss:$16 sps:$4 sm:$0xff]  }
 0x2c0   :  { %7407 = vmatprep.subr.bf16.mxu0 %v9964_v47  ;;  %7519 = vmatpush1.bf16.msra.mxu1 %v10028_v35  ;;  %v4801_v15 = vpop.f32.mrf.mxu0  ;;  %v5444_v47 = vmax.f32 %v4905_v11, 0.0  ;;  %v10048_v43 = vld [vmem:[#allocation8 + $0x624] ss:$16 sps:$4 sm:$0xff]   ;;  %v9968_v62 = vld [vmem:[#allocation8 + $0x420] ss:$16 sps:$4 sm:$0xff]  }
 0x2c1   :  { %7226 = vmatmul.mubr.bf16.gmra.mxu0 %v13173_v5  ;;  %7520 = vmatprep.subr.bf16.mxu1 %v10036_v14  ;;  %v11587_v35 = vpack.c.bf16 %v5451_v9, %v5443_v18  ;;  %v5452_v22 = vmax.f32 %v4909_v6, 0.0  ;;  %v4802_v14 = vadd.f32 %v4801_v15, %v11474_v58  ;;  %v4914_v42 = vpop.f32.mrf.mxu1  ;;  %v4913_v13 = vadd.f32 %v4912_v8, %v4800_v45  ;;  %v10046_v6 = vld [vmem:[#allocation8 + $0x620] ss:$16 sps:$4 sm:$0xff]   ;;  %v13177_v15 = vld [vmem:[#allocation24_spill] sm:$0xff] }
 0x2c2   :  { %7339 = vmatmul.mubr.bf16.gmra.mxu1 %v11345_v55  ;;  %7235 = vmatprep.mubr.bf16.mxu0 %v13174_v10  ;;  %v4803_v3 = vpop.f32.mrf.mxu0 }
 0x2c3   :  { %7348 = vmatprep.mubr.bf16.mxu1 %v11372_v27  ;;  %7408 = vmatpush1.bf16.msra.mxu0 %v9962_v12  ;;  %13175 = vst [vmem:[#allocation90_spill] sm:$0xff] %v11587_v35  ;;  %v4804_v20 = vadd.f32 %v4803_v3, %v11477_v50  ;;  %v4916_v12 = vpop.f32.mrf.mxu1  ;;  %v11591_v23 = vpack.c.bf16 %v5452_v22, %v5444_v47  ;;  %v10054_v50 = vld [vmem:[#allocation8 + $0x604] ss:$16 sps:$4 sm:$0xff]   ;;  %v5459_v45 = vmax.f32 %v4913_v13, 0.0  ;;  %v10039_v27 = vld [vmem:[#allocation8 + $0x1ec] ss:$16 sps:$4 sm:$0xff]  }
 0x2c4   :  { %7409 = vmatprep.subr.bf16.mxu0 %v9967_v57  ;;  %7521 = vmatpush1.bf16.msra.mxu1 %v10034_v41  ;;  %v4805_v11 = vpop.f32.mrf.mxu0  ;;  %v4915_v18 = vadd.f32 %v4914_v42, %v4802_v14  ;;  %v9973_v41 = vld [vmem:[#allocation8 + $0x404] ss:$16 sps:$4 sm:$0xff]   ;;  %v9971_v42 = vld [vmem:[#allocation8 + $0x400] ss:$16 sps:$4 sm:$0xff]  }
 0x2c5   :  { %7522 = vmatprep.subr.bf16.mxu1 %v10042_v32  ;;  %13176 = vst [vmem:[#allocation35_spill] sm:$0xff] %v11591_v23  ;;  %v4917_v9 = vadd.f32 %v4916_v12, %v4804_v20  ;;  %v4806_v58 = vadd.f32 %v4805_v11, %v11481_v40  ;;  %v4918_v57 = vpop.f32.mrf.mxu1  ;;  %v13178_v14 = vld [vmem:[#allocation75_spill] sm:$0xff] }
 0x2c6   :  { %v4809_v32 = vpop.f32.mrf.mxu0  ;;  %v9976_v20 = vld [vmem:[#allocation8 + $0x5e4] ss:$16 sps:$4 sm:$0xff]  }
 0x2c7   :  { %7410 = vmatpush1.bf16.msra.mxu0 %v9965_v4  ;;  %v5467_v8 = vmax.f32 %v4917_v9, 0.0  ;;  %v4919_v47 = vadd.f32 %v4918_v57, %v4806_v58  ;;  %v4810_v4 = vadd.f32 %v4809_v32, %v11485_v39  ;;  %v4922_v22 = vpop.f32.mrf.mxu1  ;;  %v10052_v39 = vld [vmem:[#allocation8 + $0x600] ss:$16 sps:$4 sm:$0xff]   ;;  %v10060_v11 = vld [vmem:[#allocation8 + $0x7e4] ss:$16 sps:$4 sm:$0xff]  }
 0x2c8   :  { %7411 = vmatprep.subr.bf16.mxu0 %v9970_v31  ;;  %7523 = vmatpush1.bf16.msra.mxu1 %v10040_v38  ;;  %v4811_v40 = vpop.f32.mrf.mxu0  ;;  %v5460_v31 = vmax.f32 %v4915_v18, 0.0  ;;  %v9974_v32 = vld [vmem:[#allocation8 + $0x5e0] ss:$16 sps:$4 sm:$0xff]  }
 0x2c9   :  { %7236 = vmatmul.mubr.bf16.gmra.mxu0 %v13177_v15  ;;  %7524 = vmatprep.subr.bf16.mxu1 %v10048_v43  ;;  %v11599_v38 = vpack.c.bf16 %v5467_v8, %v5459_v45  ;;  %v5468_v3 = vmax.f32 %v4919_v47, 0.0  ;;  %v4812_v43 = vadd.f32 %v4811_v40, %v11490_v16  ;;  %v4924_v13 = vpop.f32.mrf.mxu1  ;;  %v4923_v9 = vadd.f32 %v4922_v22, %v4810_v4  ;;  %v10058_v47 = vld [vmem:[#allocation8 + $0x7e0] ss:$16 sps:$4 sm:$0xff]   ;;  %v13181_v40 = vld [vmem:[#allocation74_spill] sm:$0xff] }
 0x2ca   :  { %7349 = vmatmul.mubr.bf16.gmra.mxu1 %v11365_v37  ;;  %7245 = vmatprep.mubr.bf16.mxu0 %v13178_v14  ;;  %v4813_v12 = vpop.f32.mrf.mxu0 }
 0x2cb   :  { %7358 = vmatprep.mubr.bf16.mxu1 %v11392_v54  ;;  %7412 = vmatpush1.bf16.msra.mxu0 %v9968_v62  ;;  %13179 = vst [vmem:[#allocation91_spill] sm:$0xff] %v11599_v38  ;;  %v4814_v58 = vadd.f32 %v4813_v12, %v11493_v44  ;;  %v4926_v62 = vpop.f32.mrf.mxu1  ;;  %v11603_v57 = vpack.c.bf16 %v5468_v3, %v5460_v31  ;;  %v10066_v44 = vld [vmem:[#allocation8 + $0x7c4] ss:$16 sps:$4 sm:$0xff]   ;;  %v5475_v4 = vmax.f32 %v4923_v9, 0.0 }
 0x2cc   :  { %7413 = vmatprep.subr.bf16.mxu0 %v9973_v41  ;;  %7525 = vmatpush1.bf16.msra.mxu1 %v10046_v6  ;;  %v4815_v18 = vpop.f32.mrf.mxu0  ;;  %v4925_v45 = vadd.f32 %v4924_v13, %v4812_v43  ;;  %v9979_v6 = vld [vmem:[#allocation8 + $0x5c4] ss:$16 sps:$4 sm:$0xff]   ;;  %v9977_v13 = vld [vmem:[#allocation8 + $0x5c0] ss:$16 sps:$4 sm:$0xff]  }
 0x2cd   :  { %7526 = vmatprep.subr.bf16.mxu1 %v10054_v50  ;;  %13180 = vst [vmem:[#allocation36_spill] sm:$0xff] %v11603_v57  ;;  %v4927_v8 = vadd.f32 %v4926_v62, %v4814_v58  ;;  %v4816_v16 = vadd.f32 %v4815_v18, %v11497_v53  ;;  %v4928_v41 = vpop.f32.mrf.mxu1  ;;  %v13182_v43 = vld [vmem:[#allocation76_spill] sm:$0xff] }
 0x2ce   :  { %v4819_v50 = vpop.f32.mrf.mxu0  ;;  %v9982_v58 = vld [vmem:[#allocation8 + $0x5a4] ss:$16 sps:$4 sm:$0xff]  }
 0x2cf   :  { %7414 = vmatpush1.bf16.msra.mxu0 %v9971_v42  ;;  %v5483_v22 = vmax.f32 %v4927_v8, 0.0  ;;  %v4929_v31 = vadd.f32 %v4928_v41, %v4816_v16  ;;  %v4820_v42 = vadd.f32 %v4819_v50, %v11501_v24  ;;  %v4932_v3 = vpop.f32.mrf.mxu1  ;;  %v10064_v24 = vld [vmem:[#allocation8 + $0x7c0] ss:$16 sps:$4 sm:$0xff]   ;;  %v10072_v18 = vld [vmem:[#allocation8 + $0x7a4] ss:$16 sps:$4 sm:$0xff]  }
 0x2d0   :  { %7415 = vmatprep.subr.bf16.mxu0 %v9976_v20  ;;  %7527 = vmatpush1.bf16.msra.mxu1 %v10052_v39  ;;  %v4821_v53 = vpop.f32.mrf.mxu0  ;;  %v5476_v20 = vmax.f32 %v4925_v45, 0.0  ;;  %v9980_v50 = vld [vmem:[#allocation8 + $0x5a0] ss:$16 sps:$4 sm:$0xff]  }
 0x2d1   :  { %7246 = vmatmul.mubr.bf16.gmra.mxu0 %v13181_v40  ;;  %7528 = vmatprep.subr.bf16.mxu1 %v10060_v11  ;;  %v11611_v39 = vpack.c.bf16 %v5483_v22, %v5475_v4  ;;  %v5484_v12 = vmax.f32 %v4929_v31, 0.0  ;;  %v4822_v11 = vadd.f32 %v4821_v53, %v11506_v26  ;;  %v4934_v9 = vpop.f32.mrf.mxu1  ;;  %v4933_v8 = vadd.f32 %v4932_v3, %v4820_v42  ;;  %v10070_v31 = vld [vmem:[#allocation8 + $0x7a0] ss:$16 sps:$4 sm:$0xff]   ;;  %v13185_v53 = vld [vmem:[#allocation26_spill] sm:$0xff] }
 0x2d2   :  { %7359 = vmatmul.mubr.bf16.gmra.mxu1 %v11385_v25  ;;  %7255 = vmatprep.mubr.bf16.mxu0 %v13182_v43  ;;  %v4823_v62 = vpop.f32.mrf.mxu0  ;;  %v10025_v25 = vld [vmem:[#allocation8 + $0x28] ss:$16 sps:$4 sm:$0xff]  }
 0x2d3   :  { %7368 = vmatprep.mubr.bf16.mxu1 %v11409_v63  ;;  %7416 = vmatpush2.bf16.msra.mxu0 %v9974_v32  ;;  %13183 = vst [vmem:[#allocation37_spill] sm:$0xff] %v11611_v39  ;;  %v4824_v16 = vadd.f32 %v4823_v62, %v11509_v1  ;;  %v4936_v32 = vpop.f32.mrf.mxu1  ;;  %v11615_v41 = vpack.c.bf16 %v5484_v12, %v5476_v20  ;;  %v10078_v1 = vld [vmem:[#allocation8 + $0x784] ss:$16 sps:$4 sm:$0xff]   ;;  %v5491_v42 = vmax.f32 %v4933_v8, 0.0 }
 0x2d4   :  { %7417 = vmatprep.subr.bf16.mxu0 %v9979_v6  ;;  %7529 = vmatpush2.bf16.msra.mxu1 %v10058_v47  ;;  %v4825_v45 = vpop.f32.mrf.mxu0  ;;  %v4935_v4 = vadd.f32 %v4934_v9, %v4822_v11  ;;  %v9985_v47 = vld [vmem:[#allocation8 + $0x584] ss:$16 sps:$4 sm:$0xff]   ;;  %v9983_v9 = vld [vmem:[#allocation8 + $0x580] ss:$16 sps:$4 sm:$0xff]  }
 0x2d5   :  { %7530 = vmatprep.subr.bf16.mxu1 %v10066_v44  ;;  %13184 = vst [vmem:[#allocation92_spill] sm:$0xff] %v11615_v41  ;;  %v4937_v22 = vadd.f32 %v4936_v32, %v4824_v16  ;;  %v4826_v26 = vadd.f32 %v4825_v45, %v11513_v34  ;;  %v4938_v6 = vpop.f32.mrf.mxu1  ;;  %v13186_v11 = vld [vmem:[#allocation77_spill] sm:$0xff] }
 0x2d6   :  { %v4829_v44 = vpop.f32.mrf.mxu0  ;;  %v9988_v16 = vld [vmem:[#allocation8 + $0x564] ss:$16 sps:$4 sm:$0xff]  }
 0x2d7   :  { %7418 = vmatpush2.bf16.msra.mxu0 %v9977_v13  ;;  %v5499_v3 = vmax.f32 %v4937_v22, 0.0  ;;  %v4939_v20 = vadd.f32 %v4938_v6, %v4826_v26  ;;  %v4830_v13 = vadd.f32 %v4829_v44, %v11517_v33  ;;  %v4942_v12 = vpop.f32.mrf.mxu1  ;;  %v10076_v33 = vld [vmem:[#allocation8 + $0x780] ss:$16 sps:$4 sm:$0xff]   ;;  %v10084_v45 = vld [vmem:[#allocation8 + $0x764] ss:$16 sps:$4 sm:$0xff]  }
 0x2d8   :  { %7419 = vmatprep.subr.bf16.mxu0 %v9982_v58  ;;  %7531 = vmatpush2.bf16.msra.mxu1 %v10064_v24  ;;  %v4831_v34 = vpop.f32.mrf.mxu0  ;;  %v5492_v58 = vmax.f32 %v4935_v4, 0.0  ;;  %v9986_v44 = vld [vmem:[#allocation8 + $0x560] ss:$16 sps:$4 sm:$0xff]  }
 0x2d9   :  { %7256 = vmatmul.mubr.bf16.gmra.mxu0 %v13185_v53  ;;  %7532 = vmatprep.subr.bf16.mxu1 %v10072_v18  ;;  %v11623_v24 = vpack.c.bf16 %v5499_v3, %v5491_v42  ;;  %v5500_v62 = vmax.f32 %v4939_v20, 0.0  ;;  %v4832_v18 = vadd.f32 %v4831_v34, %v11522_v51  ;;  %v4944_v8 = vpop.f32.mrf.mxu1  ;;  %v4943_v22 = vadd.f32 %v4942_v12, %v4830_v13  ;;  %v10082_v20 = vld [vmem:[#allocation8 + $0x760] ss:$16 sps:$4 sm:$0xff]  }
 0x2da   :  { %7369 = vmatmul.mubr.bf16.gmra.mxu1 %v11402_v19  ;;  %7265 = vmatprep.mubr.bf16.mxu0 %v13186_v11  ;;  %v4833_v32 = vpop.f32.mrf.mxu0  ;;  %v13189_v34 = vld [vmem:[#allocation27_spill] sm:$0xff] }
 0x2db   :  { %7378 = vmatprep.mubr.bf16.mxu1 %v11425_v17  ;;  %7420 = vmatpush2.bf16.msra.mxu0 %v9980_v50  ;;  %13187 = vst [vmem:[#allocation93_spill] sm:$0xff] %v11623_v24  ;;  %v4834_v26 = vadd.f32 %v4833_v32, %v11525_v2  ;;  %v4946_v50 = vpop.f32.mrf.mxu1  ;;  %v11627_v6 = vpack.c.bf16 %v5500_v62, %v5492_v58  ;;  %v10090_v2 = vld [vmem:[#allocation8 + $0x744] ss:$16 sps:$4 sm:$0xff]   ;;  %v5507_v13 = vmax.f32 %v4943_v22, 0.0  ;;  %v10027_v17 = vld [vmem:[#allocation8 + $0x2c] ss:$16 sps:$4 sm:$0xff]  }
 0x2dc   :  { %7421 = vmatprep.subr.bf16.mxu0 %v9985_v47  ;;  %7533 = vmatpush2.bf16.msra.mxu1 %v10070_v31  ;;  %v4835_v4 = vpop.f32.mrf.mxu0  ;;  %v4945_v42 = vadd.f32 %v4944_v8, %v4832_v18  ;;  %v9991_v31 = vld [vmem:[#allocation8 + $0x544] ss:$16 sps:$4 sm:$0xff]   ;;  %v9989_v8 = vld [vmem:[#allocation8 + $0x540] ss:$16 sps:$4 sm:$0xff]  }
 0x2dd   :  { %7534 = vmatprep.subr.bf16.mxu1 %v10078_v1  ;;  %13188 = vst [vmem:[#allocation38_spill] sm:$0xff] %v11627_v6  ;;  %v4947_v3 = vadd.f32 %v4946_v50, %v4834_v26  ;;  %v4836_v51 = vadd.f32 %v4835_v4, %v11529_v52  ;;  %v4948_v47 = vpop.f32.mrf.mxu1  ;;  %v13190_v18 = vld [vmem:[#allocation79_spill] sm:$0xff] }
 0x2de   :  { %v4839_v1 = vpop.f32.mrf.mxu0  ;;  %v9994_v26 = vld [vmem:[#allocation8 + $0x524] ss:$16 sps:$4 sm:$0xff]  }
 0x2df   :  { %7422 = vmatpush2.bf16.msra.mxu0 %v9983_v9  ;;  %v5515_v12 = vmax.f32 %v4947_v3, 0.0  ;;  %v4949_v58 = vadd.f32 %v4948_v47, %v4836_v51  ;;  %v4840_v9 = vadd.f32 %v4839_v1, %v11533_v56  ;;  %v4952_v62 = vpop.f32.mrf.mxu1  ;;  %v10088_v56 = vld [vmem:[#allocation8 + $0x740] ss:$16 sps:$4 sm:$0xff]   ;;  %v10096_v4 = vld [vmem:[#allocation8 + $0x724] ss:$16 sps:$4 sm:$0xff]  }
 0x2e0   :  { %7423 = vmatprep.subr.bf16.mxu0 %v9988_v16  ;;  %7535 = vmatpush2.bf16.msra.mxu1 %v10076_v33  ;;  %v4841_v52 = vpop.f32.mrf.mxu0  ;;  %v5508_v16 = vmax.f32 %v4945_v42, 0.0  ;;  %v9992_v1 = vld [vmem:[#allocation8 + $0x520] ss:$16 sps:$4 sm:$0xff]  }
 0x2e1   :  { %7266 = vmatmul.mubr.bf16.gmra.mxu0 %v13189_v34  ;;  %7536 = vmatprep.subr.bf16.mxu1 %v10084_v45  ;;  %v11635_v33 = vpack.c.bf16 %v5515_v12, %v5507_v13  ;;  %v5516_v32 = vmax.f32 %v4949_v58, 0.0  ;;  %v4842_v45 = vadd.f32 %v4841_v52, %v11538_v49  ;;  %v4954_v22 = vpop.f32.mrf.mxu1  ;;  %v4953_v3 = vadd.f32 %v4952_v62, %v4840_v9  ;;  %v10094_v58 = vld [vmem:[#allocation8 + $0x720] ss:$16 sps:$4 sm:$0xff]   ;;  %v13193_v52 = vld [vmem:[#allocation78_spill] sm:$0xff] }
 0x2e2   :  { %7379 = vmatmul.mubr.bf16.gmra.mxu1 %v11417_v0  ;;  %7275 = vmatprep.mubr.bf16.mxu0 %v13190_v18  ;;  %v4843_v50 = vpop.f32.mrf.mxu0  ;;  %v10102_v9 = vld [vmem:[#allocation8 + $0x704] ss:$16 sps:$4 sm:$0xff]   ;;  %v10075_v18 = vld [vmem:[#allocation8 + $0x12c] ss:$16 sps:$4 sm:$0xff]  }
 0x2e3   :  { %7388 = vmatprep.mubr.bf16.mxu1 %v11443_v48  ;;  %7424 = vmatpush2.bf16.msra.mxu0 %v9986_v44  ;;  %13191 = vst [vmem:[#allocation94_spill] sm:$0xff] %v11635_v33  ;;  %v4844_v51 = vadd.f32 %v4843_v50, %v11541_v61  ;;  %v4956_v44 = vpop.f32.mrf.mxu1  ;;  %v11639_v47 = vpack.c.bf16 %v5516_v32, %v5508_v16  ;;  %v721_v61 = vsub.s32 6, %v13125_v36  ;;  %v5523_v62 = vmax.f32 %v4953_v3, 0.0  ;;  %v13194_v32 = vld [vmem:[#allocation33_spill] sm:$0xff]  ;;  %v13195_v50 = vld [vmem:[#allocation87_spill] sm:$0xff] }
 0x2e4   :  { %7425 = vmatprep.subr.bf16.mxu0 %v9991_v31  ;;  %7537 = vmatpush2.bf16.msra.mxu1 %v10082_v20  ;;  %v4845_v42 = vpop.f32.mrf.mxu0  ;;  %v4955_v13 = vadd.f32 %v4954_v22, %v4842_v45  ;;  %v9997_v20 = vld [vmem:[#allocation8 + $0x504] ss:$16 sps:$4 sm:$0xff]   ;;  %v10336_v48 = vld [vmem:[#allocation7] sm:$0xff] }
 0x2e5   :  { %7538 = vmatprep.subr.bf16.mxu1 %v10090_v2  ;;  %13192 = vst [vmem:[#allocation39_spill] sm:$0xff] %v11639_v47  ;;  %v4957_v12 = vadd.f32 %v4956_v44, %v4844_v51  ;;  %v4846_v49 = vadd.f32 %v4845_v42, %v11545_v29  ;;  %v4958_v31 = vpop.f32.mrf.mxu1  ;;  %v11652_v0 = vrot.slane %v10336_v48, %v721_v61 }
 0x2e6   :  { %v5524_v51 = vmax.f32 %v4955_v13, 0.0 }
 0x2e7   :  { %7426 = vmatpush2.bf16.msra.mxu0 %v9989_v8  ;;  %v4849_v2 = vpop.f32.mrf.mxu0  ;;  %v5531_v8 = vmax.f32 %v4957_v12, 0.0  ;;  %v4959_v16 = vadd.f32 %v4958_v31, %v4846_v49  ;;  %v4962_v22 = vpop.f32.mrf.mxu1  ;;  %v10000_v12 = vld [vmem:[#allocation8 + $0xec] ss:$16 sps:$4 sm:$0xff]   ;;  %v10100_v49 = vld [vmem:[#allocation8 + $0x700] ss:$16 sps:$4 sm:$0xff]  }
 0x2e8   :  { %7427 = vmatprep.subr.bf16.mxu0 %v9994_v26  ;;  %7539 = vmatpush2.bf16.msra.mxu1 %v10088_v56  ;;  %v4850_v45 = vadd.f32 %v4849_v2, %v13194_v32  ;;  %v9995_v26 = vld [vmem:[#allocation8 + $0x500] ss:$16 sps:$4 sm:$0xff]   ;;  %v725_v56 = vsub.s32 7, %v13125_v36  ;;  %v10108_v2 = vld [vmem:[#allocation8 + $0x2ec] ss:$16 sps:$4 sm:$0xff]  }
 0x2e9   :  { %7276 = vmatmul.mubr.bf16.gmra.mxu0 %v13193_v52  ;;  %7540 = vmatprep.subr.bf16.mxu1 %v10096_v4  ;;  %v4851_v29 = vpop.f32.mrf.mxu0  ;;  %v11648_v44 = vpack.c.bf16 %v5531_v8, %v5523_v62  ;;  %v5532_v4 = vmax.f32 %v4959_v16, 0.0  ;;  %v4964_v42 = vpop.f32.mrf.mxu1  ;;  %v9998_v8 = vld [vmem:[#allocation8 + $0xe8] ss:$16 sps:$4 sm:$0xff]  }
 0x2ea   :  { %7389 = vmatmul.mubr.bf16.gmra.mxu1 %v13195_v50  ;;  %7431 = vmatprep.mubr.bf16.mxu0 %v11579_v30  ;;  %v4852_v3 = vadd.f32 %v4851_v29, %v11554_v60  ;;  %v4963_v32 = vadd.f32 %v4962_v22, %v4850_v45  ;;  %v13198_v16 = vld [vmem:[#allocation88_spill] sm:$0xff] }
 0x2eb   :  { %7428 = vmatpush2.bf16.msra.mxu0 %v9992_v1  ;;  %13196 = vst [vmem:[#allocation40_spill] sm:$0xff] %v11648_v44  ;;  %v4853_v31 = vpop.f32.mrf.mxu0  ;;  %v4966_v50 = vpop.f32.mrf.mxu1  ;;  %v11654_v13 = vpack.c.bf16 %v5532_v4, %v5524_v51  ;;  %v10003_v45 = vld [vmem:[#allocation8 + $0xcc] ss:$16 sps:$4 sm:$0xff]  }
 0x2ec   :  { %7429 = vmatprep.subr.bf16.mxu0 %v9997_v20  ;;  %7541 = vmatpush2.bf16.msra.mxu1 %v10094_v58  ;;  %v4854_v1 = vadd.f32 %v4853_v31, %v11557_v59  ;;  %v4965_v62 = vadd.f32 %v4964_v42, %v4852_v3  ;;  %v5539_v22 = vmax.f32 %v4963_v32, 0.0  ;;  %v10001_v3 = vld [vmem:[#allocation8 + $0xc8] ss:$16 sps:$4 sm:$0xff]  }
 0x2ed   :  { %7542 = vmatprep.subr.bf16.mxu1 %v10102_v9  ;;  %13197 = vst [vmem:[#allocation41_spill] sm:$0xff] %v11654_v13  ;;  %v4855_v60 = vpop.f32.mrf.mxu0  ;;  %v4968_v29 = vpop.f32.mrf.mxu1  ;;  %v11657_v9 = vrot.slane %v10336_v48, %v725_v56 }
 0x2ee   :  { %v4967_v20 = vadd.f32 %v4966_v50, %v4854_v1  ;;  %v4856_v58 = vadd.f32 %v4855_v60, %v13198_v16 }
 0x2ef   :  { %7430 = vmatpush2.bf16.msra.mxu0 %v9995_v26  ;;  %v5005_v59 = vpop.f32.mrf.mxu0  ;;  %v5118_v4 = vpop.f32.mrf.mxu1  ;;  %v5540_v26 = vmax.f32 %v4965_v62, 0.0 }
 0x2f0   :  { %7625 = vmatprep.subr.bf16.mxu0 %v10000_v12  ;;  %7543 = vmatpush2.bf16.msra.mxu1 %v10100_v49  ;;  %v5547_v61 = vmax.f32 %v4967_v20, 0.0  ;;  %v4969_v31 = vadd.f32 %v4968_v29, %v4856_v58  ;;  %v5006_v51 = vadd.f32 %v5005_v59, %v11652_v0  ;;  %v10004_v20 = vld [vmem:[#allocation8 + $0xa8] ss:$16 sps:$4 sm:$0xff]   ;;  %v10009_v58 = vld [vmem:[#allocation8 + $0x8c] ss:$16 sps:$4 sm:$0xff]  }
 0x2f1   :  { %7738 = vmatprep.subr.bf16.mxu1 %v10108_v2  ;;  %v5007_v50 = vpop.f32.mrf.mxu0  ;;  %v5120_v49 = vpop.f32.mrf.mxu1  ;;  %v10006_v2 = vld [vmem:[#allocation8 + $0xac] ss:$16 sps:$4 sm:$0xff]  }
 0x2f2   :  { %7432 = vmatmul.mubr.bf16.vlgmr.msra.gmra.mxu0 %v11575_v21  ;;  %v11662_v48 = vpack.c.bf16 %v5547_v61, %v5539_v22  ;;  %v5548_v56 = vmax.f32 %v4969_v31, 0.0  ;;  %v11664_v42 = vadd.f32 %v5118_v4, %v5006_v51  ;;  %v5008_v12 = vadd.f32 %v5007_v50, %v11657_v9  ;;  %v10007_v61 = vld [vmem:[#allocation8 + $0x88] ss:$16 sps:$4 sm:$0xff]   ;;  %v10063_v21 = vld [vmem:[#allocation8 + $0x16c] ss:$16 sps:$4 sm:$0xff]  }
 0x2f3   :  { %7441 = vmatprep.mubr.bf16.mxu0 %v11591_v23  ;;  %7626 = vmatpush1.bf16.msra.mxu0 %v9998_v8  ;;  %v11667_v32 = vpop.f32.mrf.mxu0  ;;  %v11671_v62 = vpop.f32.mrf.mxu1 }
 0x2f4   :  { %13199 = vst [vmem:[#allocation42_spill] sm:$0xff] %v11662_v48  ;;  %7627 = vmatprep.subr.bf16.mxu0 %v10003_v45  ;;  %v11669_v1 = vadd.f32 %v5120_v49, %v5008_v12  ;;  %v11673_v60 = vpack.c.bf16 %v5548_v56, %v5540_v26  ;;  %v10015_v26 = vld [vmem:[#allocation8 + $0x6c] ss:$16 sps:$4 sm:$0xff]   ;;  %v10013_v49 = vld [vmem:[#allocation8 + $0x68] ss:$16 sps:$4 sm:$0xff]  }
 0x2f5   :  { %v11675_v8 = vpop.f32.mrf.mxu0  ;;  %v11677_v16 = vpop.f32.mrf.mxu1 }
 0x2f6   :  { %13200 = vst [vmem:[#allocation43_spill] sm:$0xff] %v11673_v60 }
 0x2f7   :  { %7628 = vmatpush1.bf16.msra.mxu0 %v10001_v3  ;;  %v5015_v29 = vpop.f32.mrf.mxu0  ;;  %v5128_v59 = vpop.f32.mrf.mxu1 }
 0x2f8   :  { %7629 = vmatprep.subr.bf16.mxu0 %v10006_v2  ;;  %v5016_v45 = vadd.f32 %v5015_v29, %v11652_v0 }
 0x2f9   :  { %v5017_v22 = vpop.f32.mrf.mxu0  ;;  %v5130_v4 = vpop.f32.mrf.mxu1 }
 0x2fa   :  { %7442 = vmatmul.mubr.bf16.gmra.mxu0 %v11587_v35  ;;  %v11682_v31 = vadd.f32 %v5128_v59, %v5016_v45  ;;  %v5018_v51 = vadd.f32 %v5017_v22, %v11657_v9  ;;  %v10019_v22 = vld [vmem:[#allocation8 + $0x48] ss:$16 sps:$4 sm:$0xff]  }
 0x2fb   :  { %7451 = vmatprep.mubr.bf16.mxu0 %v11603_v57  ;;  %7630 = vmatpush1.bf16.msra.mxu0 %v10004_v20  ;;  %v11685_v50 = vpop.f32.mrf.mxu0  ;;  %v11689_v56 = vpop.f32.mrf.mxu1  ;;  %v10021_v20 = vld [vmem:[#allocation8 + $0x4c] ss:$16 sps:$4 sm:$0xff]  }
 0x2fc   :  { %7631 = vmatprep.subr.bf16.mxu0 %v10009_v58  ;;  %v11687_v3 = vadd.f32 %v5130_v4, %v5018_v51 }
 0x2fd   :  { %v11691_v12 = vpop.f32.mrf.mxu0  ;;  %v11693_v2 = vpop.f32.mrf.mxu1 }
 0x2ff   :  { %7632 = vmatpush1.bf16.msra.mxu0 %v10007_v61  ;;  %v5025_v29 = vpop.f32.mrf.mxu0  ;;  %v5138_v59 = vpop.f32.mrf.mxu1 }
 0x300   :  { %7633 = vmatprep.subr.bf16.mxu0 %v10015_v26  ;;  %v5026_v45 = vadd.f32 %v5025_v29, %v11652_v0 }
 0x301   :  { %v5027_v58 = vpop.f32.mrf.mxu0  ;;  %v5140_v4 = vpop.f32.mrf.mxu1 }
 0x302   :  { %7452 = vmatmul.mubr.bf16.gmra.mxu0 %v11599_v38  ;;  %v11698_v51 = vadd.f32 %v5138_v59, %v5026_v45  ;;  %v5028_v61 = vadd.f32 %v5027_v58, %v11657_v9  ;;  %v10033_v45 = vld [vmem:[#allocation8 + $0xc] ss:$16 sps:$4 sm:$0xff]  }
 0x303   :  { %7461 = vmatprep.mubr.bf16.mxu0 %v11615_v41  ;;  %7634 = vmatpush1.bf16.msra.mxu0 %v10013_v49  ;;  %v11701_v26 = vpop.f32.mrf.mxu0  ;;  %v11705_v29 = vpop.f32.mrf.mxu1  ;;  %v10051_v38 = vld [vmem:[#allocation8 + $0x1ac] ss:$16 sps:$4 sm:$0xff]  }
 0x304   :  { %7635 = vmatprep.subr.bf16.mxu0 %v10021_v20  ;;  %v11703_v19 = vadd.f32 %v5140_v4, %v5028_v61  ;;  %v10031_v61 = vld [vmem:[#allocation8 + $0x8] ss:$16 sps:$4 sm:$0xff]  }
 0x305   :  { %v11707_v63 = vpop.f32.mrf.mxu0  ;;  %v11709_v49 = vpop.f32.mrf.mxu1 }
 0x307   :  { %7636 = vmatpush1.bf16.msra.mxu0 %v10019_v22  ;;  %v5035_v59 = vpop.f32.mrf.mxu0  ;;  %v5148_v54 = vpop.f32.mrf.mxu1 }
 0x308   :  { %7637 = vmatprep.subr.bf16.mxu0 %v10027_v17  ;;  %v5036_v58 = vadd.f32 %v5035_v59, %v11652_v0 }
 0x309   :  { %v5037_v20 = vpop.f32.mrf.mxu0  ;;  %v5150_v37 = vpop.f32.mrf.mxu1 }
 0x30a   :  { %7462 = vmatmul.mubr.bf16.gmra.mxu0 %v11611_v39  ;;  %v11714_v4 = vadd.f32 %v5148_v54, %v5036_v58  ;;  %v5038_v22 = vadd.f32 %v5037_v20, %v11657_v9  ;;  %v10045_v54 = vld [vmem:[#allocation8 + $0x1cc] ss:$16 sps:$4 sm:$0xff]  }
 0x30b   :  { %7471 = vmatprep.mubr.bf16.mxu0 %v11627_v6  ;;  %7638 = vmatpush1.bf16.msra.mxu0 %v10025_v25  ;;  %v11717_v17 = vpop.f32.mrf.mxu0  ;;  %v11721_v59 = vpop.f32.mrf.mxu1  ;;  %v10037_v6 = vld [vmem:[#allocation8 + $0x1e8] ss:$16 sps:$4 sm:$0xff]  }
 0x30c   :  { %7639 = vmatprep.subr.bf16.mxu0 %v10033_v45  ;;  %v11719_v55 = vadd.f32 %v5150_v37, %v5038_v22  ;;  %v10043_v45 = vld [vmem:[#allocation8 + $0x1c8] ss:$16 sps:$4 sm:$0xff]  }
 0x30d   :  { %v11723_v39 = vpop.f32.mrf.mxu0  ;;  %v11725_v25 = vpop.f32.mrf.mxu1 }
 0x30f   :  { %7640 = vmatpush1.bf16.msra.mxu0 %v10031_v61  ;;  %v5045_v58 = vpop.f32.mrf.mxu0  ;;  %v5158_v7 = vpop.f32.mrf.mxu1 }
 0x310   :  { %7641 = vmatprep.subr.bf16.mxu0 %v10039_v27  ;;  %v5046_v20 = vadd.f32 %v5045_v58, %v11652_v0 }
 0x311   :  { %v5047_v37 = vpop.f32.mrf.mxu0  ;;  %v5160_v41 = vpop.f32.mrf.mxu1 }
 0x312   :  { %7472 = vmatmul.mubr.bf16.gmra.mxu0 %v11623_v24  ;;  %v11730_v22 = vadd.f32 %v5158_v7, %v5046_v20  ;;  %v5048_v61 = vadd.f32 %v5047_v37, %v11657_v9  ;;  %v10057_v7 = vld [vmem:[#allocation8 + $0x18c] ss:$16 sps:$4 sm:$0xff]  }
 0x313   :  { %7481 = vmatprep.mubr.bf16.mxu0 %v11639_v47  ;;  %7642 = vmatpush2.bf16.msra.mxu0 %v10037_v6  ;;  %v11733_v27 = vpop.f32.mrf.mxu0  ;;  %v11737_v58 = vpop.f32.mrf.mxu1  ;;  %v10049_v47 = vld [vmem:[#allocation8 + $0x1a8] ss:$16 sps:$4 sm:$0xff]  }
 0x314   :  { %7643 = vmatprep.subr.bf16.mxu0 %v10045_v54  ;;  %v11735_v57 = vadd.f32 %v5160_v41, %v5048_v61  ;;  %v10055_v54 = vld [vmem:[#allocation8 + $0x188] ss:$16 sps:$4 sm:$0xff]  }
 0x315   :  { %v11739_v24 = vpop.f32.mrf.mxu0  ;;  %v11741_v6 = vpop.f32.mrf.mxu1 }
 0x317   :  { %7644 = vmatpush2.bf16.msra.mxu0 %v10043_v45  ;;  %v5055_v20 = vpop.f32.mrf.mxu0  ;;  %v5168_v35 = vpop.f32.mrf.mxu1 }
 0x318   :  { %7645 = vmatprep.subr.bf16.mxu0 %v10051_v38  ;;  %v5056_v37 = vadd.f32 %v5055_v20, %v11652_v0 }
 0x319   :  { %v5057_v41 = vpop.f32.mrf.mxu0  ;;  %v5170_v23 = vpop.f32.mrf.mxu1 }
 0x31a   :  { %7482 = vmatmul.mubr.bf16.gmra.mxu0 %v11635_v33  ;;  %v11746_v61 = vadd.f32 %v5168_v35, %v5056_v37  ;;  %v5058_v45 = vadd.f32 %v5057_v41, %v11657_v9  ;;  %v10069_v35 = vld [vmem:[#allocation8 + $0x14c] ss:$16 sps:$4 sm:$0xff]  }
 0x31b   :  { %7491 = vmatprep.mubr.bf16.mxu0 %v11654_v13  ;;  %7646 = vmatpush2.bf16.msra.mxu0 %v10049_v47  ;;  %v11749_v38 = vpop.f32.mrf.mxu0  ;;  %v11753_v20 = vpop.f32.mrf.mxu1  ;;  %v10061_v13 = vld [vmem:[#allocation8 + $0x168] ss:$16 sps:$4 sm:$0xff]  }
 0x31c   :  { %13201 = vst [vmem:[#allocation44_spill] sm:$0xff] %v11746_v61  ;;  %7647 = vmatprep.subr.bf16.mxu0 %v10057_v7  ;;  %v11751_v36 = vadd.f32 %v5170_v23, %v5058_v45  ;;  %v10067_v7 = vld [vmem:[#allocation8 + $0x148] ss:$16 sps:$4 sm:$0xff]  }
 0x31d   :  { %v11755_v33 = vpop.f32.mrf.mxu0  ;;  %v11757_v47 = vpop.f32.mrf.mxu1 }
 0x31e   :  { %13202 = vst [vmem:[#allocation45_spill] sm:$0xff] %v11751_v36  ;;  %13203 = vst [vmem:[#allocation46_spill] sm:$0xff] %v11757_v47 }
 0x31f   :  { %7648 = vmatpush2.bf16.msra.mxu0 %v10055_v54  ;;  %v5065_v37 = vpop.f32.mrf.mxu0 }
 0x320   :  { %7649 = vmatprep.subr.bf16.mxu0 %v10063_v21  ;;  %v5066_v41 = vadd.f32 %v5065_v37, %v11652_v0  ;;  %v5178_v30 = vpop.f32.mrf.mxu1 }
 0x321   :  { %v5067_v23 = vpop.f32.mrf.mxu0 }
 0x322   :  { %7492 = vmatmul.mubr.bf16.gmra.mxu0 %v11648_v44  ;;  %v11762_v45 = vadd.f32 %v5178_v30, %v5066_v41  ;;  %v5068_v54 = vadd.f32 %v5067_v23, %v11657_v9  ;;  %v5180_v52 = vpop.f32.mrf.mxu1  ;;  %v10081_v30 = vld [vmem:[#allocation8 + $0x10c] ss:$16 sps:$4 sm:$0xff]  }
 0x323   :  { %7501 = vmatprep.mubr.bf16.mxu0 %v11673_v60  ;;  %7650 = vmatpush2.bf16.msra.mxu0 %v10061_v13  ;;  %v11765_v21 = vpop.f32.mrf.mxu0  ;;  %v10073_v60 = vld [vmem:[#allocation8 + $0x128] ss:$16 sps:$4 sm:$0xff]  }
 0x324   :  { %13204 = vst [vmem:[#allocation47_spill] sm:$0xff] %v11762_v45  ;;  %7651 = vmatprep.subr.bf16.mxu0 %v10069_v35  ;;  %13205 = vst [vmem:[#allocation48_spill] sm:$0xff] %v11765_v21  ;;  %v11767_v34 = vadd.f32 %v5180_v52, %v5068_v54  ;;  %v11769_v37 = vpop.f32.mrf.mxu1  ;;  %v13210_v35 = vld [vmem:[#allocation81_spill] sm:$0xff]  ;;  %v10079_v54 = vld [vmem:[#allocation8 + $0x108] ss:$16 sps:$4 sm:$0xff]  }
 0x325   :  { %13207 = vst [vmem:[#allocation50_spill] sm:$0xff] %v11769_v37  ;;  %v11771_v44 = vpop.f32.mrf.mxu0 }
 0x326   :  { %13206 = vst [vmem:[#allocation49_spill] sm:$0xff] %v11767_v34  ;;  %13208 = vst [vmem:[#allocation51_spill] sm:$0xff] %v11771_v44  ;;  %v11773_v13 = vpop.f32.mrf.mxu1 }
 0x327   :  { %7652 = vmatpush2.bf16.msra.mxu0 %v10067_v7  ;;  %13209 = vst [vmem:[#allocation52_spill] sm:$0xff] %v11773_v13  ;;  %v10087_v13 = vld [vmem:[#allocation8 + $0x4ec] ss:$16 sps:$4 sm:$0xff]  }
 0x328   :  { %7653 = vmatprep.subr.bf16.mxu0 %v10075_v18 }
 0x329   :  { %v5075_v41 = vpop.f32.mrf.mxu0 }
 0x32a   :  { %v5076_v23 = vadd.f32 %v5075_v41, %v11652_v0  ;;  %v5188_v45 = vpop.f32.mrf.mxu1  ;;  %7502 = vmatmul.mubr.bf16.gmra.mxu0 %v11662_v48 }
 0x32b   :  { %7654 = vmatpush2.bf16.msra.mxu0 %v10073_v60  ;;  %7657 = vmatprep.mubr.bf16.mxu0 %v13210_v35  ;;  %v5077_v52 = vpop.f32.mrf.mxu0  ;;  %v10085_v60 = vld [vmem:[#allocation8 + $0x4e8] ss:$16 sps:$4 sm:$0xff]   ;;  %v5010_v35 = vadd.f32 %v11667_v32, %v11652_v0 }
 0x32c   :  { %v11778_v34 = vadd.f32 %v5188_v45, %v5076_v23  ;;  %v5078_v7 = vadd.f32 %v5077_v52, %v11657_v9  ;;  %v5190_v37 = vpop.f32.mrf.mxu1  ;;  %7655 = vmatprep.subr.bf16.mxu0 %v10081_v30  ;;  %v10093_v23 = vld [vmem:[#allocation8 + $0x4cc] ss:$16 sps:$4 sm:$0xff]   ;;  %v5012_v30 = vadd.f32 %v11675_v8, %v11657_v9 }
 0x32d   :  { %v11781_v18 = vpop.f32.mrf.mxu0 }
 0x32e   :  { %13211 = vst [vmem:[#allocation53_spill] sm:$0xff] %v11778_v34  ;;  %13212 = vst [vmem:[#allocation54_spill] sm:$0xff] %v11781_v18  ;;  %v11783_v44 = vadd.f32 %v5190_v37, %v5078_v7  ;;  %v11785_v41 = vpop.f32.mrf.mxu1  ;;  %v13217_v37 = vld [vmem:[#allocation80_spill] sm:$0xff]  ;;  %v13218_v7 = vld [vmem:[#allocation83_spill] sm:$0xff]  ;;  %v5125_v8 = vadd.f32 %v11677_v16, %v5012_v30 }
 0x32f   :  { %13214 = vst [vmem:[#allocation56_spill] sm:$0xff] %v11785_v41  ;;  %7656 = vmatpush2.bf16.msra.mxu0 %v10079_v54  ;;  %v11787_v48 = vpop.f32.mrf.mxu0  ;;  %v5123_v41 = vadd.f32 %v11671_v62, %v5010_v35 }
 0x330   :  { %13213 = vst [vmem:[#allocation55_spill] sm:$0xff] %v11783_v44  ;;  %13215 = vst [vmem:[#allocation57_spill] sm:$0xff] %v11787_v48  ;;  %v11791_v45 = vpop.f32.mrf.mxu1  ;;  %7851 = vmatprep.subr.bf16.mxu0 %v10087_v13  ;;  %v10091_v44 = vld [vmem:[#allocation8 + $0x4c8] ss:$16 sps:$4 sm:$0xff]   ;;  %v10099_v13 = vld [vmem:[#allocation8 + $0x4ac] ss:$16 sps:$4 sm:$0xff]  }
 0x331   :  { %13216 = vst [vmem:[#allocation58_spill] sm:$0xff] %v11791_v45  ;;  %v5231_v52 = vpop.f32.mrf.mxu0 }
 0x332   :  { %v5344_v34 = vpop.f32.mrf.mxu1  ;;  %7658 = vmatmul.mubr.bf16.vlgmr.msra.gmra.mxu0 %v13217_v37  ;;  %v5232_v45 = vadd.f32 %v5231_v52, %v11664_v42  ;;  %v5022_v42 = vadd.f32 %v11691_v12, %v11657_v9  ;;  %v10111_v52 = vld [vmem:[#allocation8 + $0x46c] ss:$16 sps:$4 sm:$0xff]  }
 0x333   :  { %7667 = vmatprep.mubr.bf16.mxu0 %v13218_v7  ;;  %7852 = vmatpush1.bf16.msra.mxu0 %v10085_v60  ;;  %v5233_v54 = vpop.f32.mrf.mxu0  ;;  %v10097_v7 = vld [vmem:[#allocation8 + $0x4a8] ss:$16 sps:$4 sm:$0xff]   ;;  %v5020_v60 = vadd.f32 %v11685_v50, %v11652_v0 }
 0x334   :  { %v5234_v32 = vadd.f32 %v5233_v54, %v11669_v1  ;;  %v5346_v48 = vpop.f32.mrf.mxu1  ;;  %7853 = vmatprep.subr.bf16.mxu0 %v10093_v23  ;;  %v10105_v23 = vld [vmem:[#allocation8 + $0x48c] ss:$16 sps:$4 sm:$0xff]   ;;  %v5345_v54 = vadd.f32 %v5344_v34, %v5232_v45 }
 0x335   :  { %v5235_v18 = vpop.f32.mrf.mxu0 }
 0x336   :  { %v5236_v21 = vadd.f32 %v5235_v18, %v5123_v41  ;;  %v5348_v47 = vpop.f32.mrf.mxu1  ;;  %v5347_v61 = vadd.f32 %v5346_v48, %v5234_v32  ;;  %v10103_v48 = vld [vmem:[#allocation8 + $0x488] ss:$16 sps:$4 sm:$0xff]   ;;  %v5429_v12 = vmax.f32 %v5345_v54, 0.0 }
 0x337   :  { %7854 = vmatpush1.bf16.msra.mxu0 %v10091_v44  ;;  %v5237_v37 = vpop.f32.mrf.mxu0 }
 0x338   :  { %v5349_v62 = vadd.f32 %v5348_v47, %v5236_v21  ;;  %v5238_v35 = vadd.f32 %v5237_v37, %v5125_v8  ;;  %v5350_v1 = vpop.f32.mrf.mxu1  ;;  %7855 = vmatprep.subr.bf16.mxu0 %v10099_v13  ;;  %v5133_v47 = vadd.f32 %v11689_v56, %v5020_v60  ;;  %v5430_v21 = vmax.f32 %v5347_v61, 0.0  ;;  %v10106_v37 = vld [vmem:[#allocation8 + $0x2e8] ss:$16 sps:$4 sm:$0xff]  }
 0x339   :  { %v5241_v36 = vpop.f32.mrf.mxu0  ;;  %v5030_v56 = vadd.f32 %v11701_v26, %v11652_v0  ;;  %v5032_v26 = vadd.f32 %v11707_v63, %v11657_v9 }
 0x33a   :  { %v5351_v16 = vadd.f32 %v5350_v1, %v5238_v35  ;;  %v5354_v18 = vpop.f32.mrf.mxu1  ;;  %7668 = vmatmul.mubr.bf16.gmra.mxu0 %v13169_v28  ;;  %v5437_v44 = vmax.f32 %v5349_v62, 0.0  ;;  %v5242_v30 = vadd.f32 %v5241_v36, %v11682_v31  ;;  %v5135_v28 = vadd.f32 %v11693_v2, %v5022_v42  ;;  %v10114_v31 = vld [vmem:[#allocation8 + $0x2cc] ss:$16 sps:$4 sm:$0xff]  }
 0x33b   :  { %7677 = vmatprep.mubr.bf16.mxu0 %v13170_v46  ;;  %7856 = vmatpush1.bf16.msra.mxu0 %v10097_v7  ;;  %v5243_v50 = vpop.f32.mrf.mxu0  ;;  %v10109_v7 = vld [vmem:[#allocation8 + $0x468] ss:$16 sps:$4 sm:$0xff]   ;;  %v10117_v2 = vld [vmem:[#allocation8 + $0x44c] ss:$16 sps:$4 sm:$0xff]  }
 0x33c   :  { %v5438_v41 = vmax.f32 %v5351_v16, 0.0  ;;  %v5244_v34 = vadd.f32 %v5243_v50, %v11687_v3  ;;  %v5356_v45 = vpop.f32.mrf.mxu1  ;;  %7857 = vmatprep.subr.bf16.mxu0 %v10105_v23  ;;  %v11815_v61 = vpack.c.bf16 %v5437_v44, %v5429_v12  ;;  %v5355_v1 = vadd.f32 %v5354_v18, %v5242_v30  ;;  %v10112_v16 = vld [vmem:[#allocation8 + $0x2c8] ss:$16 sps:$4 sm:$0xff]  }
 0x33d   :  { %v5245_v32 = vpop.f32.mrf.mxu0  ;;  %v5143_v18 = vadd.f32 %v11705_v29, %v5030_v56  ;;  %v10118_v29 = vld [vmem:[#allocation8 + $0x2a8] ss:$16 sps:$4 sm:$0xff]  }
 0x33e   :  { %v5246_v13 = vadd.f32 %v5245_v32, %v5133_v47  ;;  %v5358_v46 = vpop.f32.mrf.mxu1  ;;  %v11811_v8 = vpack.c.bf16 %v5438_v41, %v5430_v21  ;;  %v5357_v60 = vadd.f32 %v5356_v45, %v5244_v34  ;;  %v10120_v47 = vld [vmem:[#allocation8 + $0x2ac] ss:$16 sps:$4 sm:$0xff]  }
 0x33f   :  { %7858 = vmatpush1.bf16.msra.mxu0 %v10103_v48  ;;  %v5247_v3 = vpop.f32.mrf.mxu0  ;;  %v10115_v48 = vld [vmem:[#allocation8 + $0x448] ss:$16 sps:$4 sm:$0xff]   ;;  %v10123_v45 = vld [vmem:[#allocation8 + $0x42c] ss:$16 sps:$4 sm:$0xff]  }
 0x340   :  { %v5359_v62 = vadd.f32 %v5358_v46, %v5246_v13  ;;  %v5248_v35 = vadd.f32 %v5247_v3, %v5135_v28  ;;  %v5360_v36 = vpop.f32.mrf.mxu1  ;;  %7544 = vmatprep.mubr.bf16.mxu1 %v11811_v8  ;;  %7859 = vmatprep.subr.bf16.mxu0 %v10111_v52  ;;  %v5446_v21 = vmax.f32 %v5357_v60, 0.0  ;;  %v5040_v13 = vadd.f32 %v11717_v17, %v11652_v0  ;;  %v10129_v60 = vld [vmem:[#allocation8 + $0x40c] ss:$16 sps:$4 sm:$0xff]  }
 0x341   :  { %v5251_v23 = vpop.f32.mrf.mxu0  ;;  %7545 = vmatmul.mubr.bf16.vlgmr.msra.gmra.mxu1 %v11815_v61  ;;  %v5042_v17 = vadd.f32 %v11723_v39, %v11657_v9 }
 0x342   :  { %v5361_v54 = vadd.f32 %v5360_v36, %v5248_v35  ;;  %v5364_v42 = vpop.f32.mrf.mxu1  ;;  %7678 = vmatmul.mubr.bf16.gmra.mxu0 %v13173_v5  ;;  %7739 = vmatpush1.bf16.msra.mxu1 %v10106_v37  ;;  %v5453_v44 = vmax.f32 %v5359_v62, 0.0  ;;  %v5445_v5 = vmax.f32 %v5355_v1, 0.0  ;;  %v5252_v52 = vadd.f32 %v5251_v23, %v11698_v51  ;;  %v10121_v37 = vld [vmem:[#allocation8 + $0x428] ss:$16 sps:$4 sm:$0xff]  }
 0x343   :  { %7687 = vmatprep.mubr.bf16.mxu0 %v13174_v10  ;;  %7860 = vmatpush1.bf16.msra.mxu0 %v10109_v7  ;;  %v5253_v50 = vpop.f32.mrf.mxu0  ;;  %v5145_v10 = vadd.f32 %v11709_v49, %v5032_v26  ;;  %v10126_v49 = vld [vmem:[#allocation8 + $0x28c] ss:$16 sps:$4 sm:$0xff]   ;;  %v10127_v26 = vld [vmem:[#allocation8 + $0x408] ss:$16 sps:$4 sm:$0xff]  }
 0x344   :  { %v5454_v41 = vmax.f32 %v5361_v54, 0.0  ;;  %v5254_v34 = vadd.f32 %v5253_v50, %v11703_v19  ;;  %v5366_v63 = vpop.f32.mrf.mxu1  ;;  %7740 = vmatprep.subr.bf16.mxu1 %v10114_v31  ;;  %7861 = vmatprep.subr.bf16.mxu0 %v10117_v2  ;;  %v11831_v19 = vpack.c.bf16 %v5453_v44, %v5445_v5  ;;  %v5365_v62 = vadd.f32 %v5364_v42, %v5252_v52  ;;  %v10124_v2 = vld [vmem:[#allocation8 + $0x288] ss:$16 sps:$4 sm:$0xff]   ;;  %v10132_v54 = vld [vmem:[#allocation8 + $0x26c] ss:$16 sps:$4 sm:$0xff]  }
 0x345   :  { %v5255_v12 = vpop.f32.mrf.mxu0  ;;  %v5153_v42 = vadd.f32 %v11721_v59, %v5040_v13  ;;  %v10130_v59 = vld [vmem:[#allocation8 + $0x268] ss:$16 sps:$4 sm:$0xff]  }
 0x346   :  { %v5256_v30 = vadd.f32 %v5255_v12, %v5143_v18  ;;  %v5368_v32 = vpop.f32.mrf.mxu1  ;;  %7741 = vmatpush1.bf16.msra.mxu1 %v10112_v16  ;;  %v11827_v28 = vpack.c.bf16 %v5454_v41, %v5446_v21  ;;  %v5367_v56 = vadd.f32 %v5366_v63, %v5254_v34  ;;  %v5050_v63 = vadd.f32 %v11733_v27, %v11652_v0  ;;  %v10133_v5 = vld [vmem:[#allocation8 + $0x5e8] ss:$16 sps:$4 sm:$0xff]  }
 0x347   :  { %7862 = vmatpush1.bf16.msra.mxu0 %v10115_v48  ;;  %v5257_v46 = vpop.f32.mrf.mxu0  ;;  %7742 = vmatprep.subr.bf16.mxu1 %v10120_v47  ;;  %v10135_v48 = vld [vmem:[#allocation8 + $0x5ec] ss:$16 sps:$4 sm:$0xff]   ;;  %v5052_v27 = vadd.f32 %v11739_v24, %v11657_v9 }
 0x348   :  { %v5369_v51 = vadd.f32 %v5368_v32, %v5256_v30  ;;  %v5258_v3 = vadd.f32 %v5257_v46, %v5145_v10  ;;  %v5370_v7 = vpop.f32.mrf.mxu1  ;;  %7554 = vmatprep.mubr.bf16.mxu1 %v11827_v28  ;;  %7863 = vmatprep.subr.bf16.mxu0 %v10123_v45  ;;  %v5462_v16 = vmax.f32 %v5367_v56, 0.0  ;;  %v10141_v30 = vld [vmem:[#allocation8 + $0x5cc] ss:$16 sps:$4 sm:$0xff]  }
 0x349   :  { %v5261_v35 = vpop.f32.mrf.mxu0  ;;  %7555 = vmatmul.mubr.bf16.gmra.mxu1 %v11831_v19 }
 0x34a   :  { %v5371_v36 = vadd.f32 %v5370_v7, %v5258_v3  ;;  %v5374_v31 = vpop.f32.mrf.mxu1  ;;  %7688 = vmatmul.mubr.bf16.gmra.mxu0 %v13177_v15  ;;  %7743 = vmatpush1.bf16.msra.mxu1 %v10118_v29  ;;  %v5469_v1 = vmax.f32 %v5369_v51, 0.0  ;;  %v5461_v15 = vmax.f32 %v5365_v62, 0.0  ;;  %v5262_v47 = vadd.f32 %v5261_v35, %v11714_v4  ;;  %v10139_v3 = vld [vmem:[#allocation8 + $0x5c8] ss:$16 sps:$4 sm:$0xff]   ;;  %v10144_v7 = vld [vmem:[#allocation8 + $0x22c] ss:$16 sps:$4 sm:$0xff]  }
 0x34b   :  { %7697 = vmatprep.mubr.bf16.mxu0 %v13178_v14  ;;  %7864 = vmatpush1.bf16.msra.mxu0 %v10121_v37  ;;  %v5263_v23 = vpop.f32.mrf.mxu0  ;;  %v5155_v14 = vadd.f32 %v11725_v25, %v5042_v17  ;;  %v10138_v25 = vld [vmem:[#allocation8 + $0x24c] ss:$16 sps:$4 sm:$0xff]   ;;  %v10136_v37 = vld [vmem:[#allocation8 + $0x248] ss:$16 sps:$4 sm:$0xff]  }
 0x34c   :  { %v5470_v44 = vmax.f32 %v5371_v36, 0.0  ;;  %v5264_v50 = vadd.f32 %v5263_v23, %v11719_v55  ;;  %v5376_v39 = vpop.f32.mrf.mxu1  ;;  %7744 = vmatprep.subr.bf16.mxu1 %v10126_v49  ;;  %7865 = vmatprep.subr.bf16.mxu0 %v10129_v60  ;;  %v11847_v55 = vpack.c.bf16 %v5469_v1, %v5461_v15  ;;  %v5375_v32 = vadd.f32 %v5374_v31, %v5262_v47  ;;  %v10147_v17 = vld [vmem:[#allocation8 + $0x5ac] ss:$16 sps:$4 sm:$0xff]  }
 0x34d   :  { %v5265_v18 = vpop.f32.mrf.mxu0  ;;  %v5163_v49 = vadd.f32 %v11737_v58, %v5050_v63  ;;  %v10142_v58 = vld [vmem:[#allocation8 + $0x228] ss:$16 sps:$4 sm:$0xff]   ;;  %v10156_v63 = vld [vmem:[#allocation8 + $0x3ec] ss:$16 sps:$4 sm:$0xff]  }
 0x34e   :  { %v5266_v21 = vadd.f32 %v5265_v18, %v5153_v42  ;;  %v5378_v41 = vpop.f32.mrf.mxu1  ;;  %7745 = vmatpush1.bf16.msra.mxu1 %v10124_v2  ;;  %v11843_v34 = vpack.c.bf16 %v5470_v44, %v5462_v16  ;;  %v5377_v52 = vadd.f32 %v5376_v39, %v5264_v50  ;;  %v10145_v42 = vld [vmem:[#allocation8 + $0x5a8] ss:$16 sps:$4 sm:$0xff]   ;;  %v10153_v39 = vld [vmem:[#allocation8 + $0x58c] ss:$16 sps:$4 sm:$0xff]  }
 0x34f   :  { %7866 = vmatpush1.bf16.msra.mxu0 %v10127_v26  ;;  %v5267_v45 = vpop.f32.mrf.mxu0  ;;  %7746 = vmatprep.subr.bf16.mxu1 %v10132_v54  ;;  %v5060_v26 = vadd.f32 %v11749_v38, %v11652_v0  ;;  %v5062_v38 = vadd.f32 %v11755_v33, %v11657_v9 }
 0x350   :  { %v5379_v4 = vadd.f32 %v5378_v41, %v5266_v21  ;;  %v5268_v12 = vadd.f32 %v5267_v45, %v5155_v14  ;;  %v5380_v10 = vpop.f32.mrf.mxu1  ;;  %7564 = vmatprep.mubr.bf16.mxu1 %v11843_v34  ;;  %7867 = vmatprep.subr.bf16.mxu0 %v10135_v48  ;;  %v5478_v60 = vmax.f32 %v5377_v52, 0.0  ;;  %v10148_v14 = vld [vmem:[#allocation8 + $0x208] ss:$16 sps:$4 sm:$0xff]  }
 0x351   :  { %v5271_v29 = vpop.f32.mrf.mxu0  ;;  %7565 = vmatmul.mubr.bf16.gmra.mxu1 %v11847_v55  ;;  %v5173_v45 = vadd.f32 %v11753_v20, %v5060_v26  ;;  %v10154_v20 = vld [vmem:[#allocation8 + $0x3e8] ss:$16 sps:$4 sm:$0xff]  }
 0x352   :  { %v5381_v13 = vadd.f32 %v5380_v10, %v5268_v12  ;;  %v5384_v46 = vpop.f32.mrf.mxu1  ;;  %7698 = vmatmul.mubr.bf16.gmra.mxu0 %v13181_v40  ;;  %7747 = vmatpush1.bf16.msra.mxu1 %v10130_v59  ;;  %v5485_v56 = vmax.f32 %v5379_v4, 0.0  ;;  %v5477_v40 = vmax.f32 %v5375_v32, 0.0  ;;  %v5272_v36 = vadd.f32 %v5271_v29, %v11730_v22  ;;  %v10151_v59 = vld [vmem:[#allocation8 + $0x588] ss:$16 sps:$4 sm:$0xff]   ;;  %v13219_v4 = vld [vmem:[#allocation45_spill] sm:$0xff] }
 0x353   :  { %7707 = vmatprep.mubr.bf16.mxu0 %v13182_v43  ;;  %7868 = vmatpush2.bf16.msra.mxu0 %v10133_v5  ;;  %v5273_v51 = vpop.f32.mrf.mxu0  ;;  %v5165_v43 = vadd.f32 %v11741_v6, %v5052_v27  ;;  %v10150_v6 = vld [vmem:[#allocation8 + $0x20c] ss:$16 sps:$4 sm:$0xff]   ;;  %v10160_v26 = vld [vmem:[#allocation8 + $0x3c8] ss:$16 sps:$4 sm:$0xff]  }
 0x354   :  { %v5486_v62 = vmax.f32 %v5381_v13, 0.0  ;;  %v5274_v35 = vadd.f32 %v5273_v51, %v11735_v57  ;;  %v5386_v24 = vpop.f32.mrf.mxu1  ;;  %7748 = vmatprep.subr.bf16.mxu1 %v10138_v25  ;;  %7869 = vmatprep.subr.bf16.mxu0 %v10141_v30  ;;  %v11863_v57 = vpack.c.bf16 %v5485_v56, %v5477_v40  ;;  %v5385_v48 = vadd.f32 %v5384_v46, %v5272_v36  ;;  %v10159_v10 = vld [vmem:[#allocation8 + $0x56c] ss:$16 sps:$4 sm:$0xff]  }
 0x355   :  { %v5275_v31 = vpop.f32.mrf.mxu0  ;;  %v13220_v25 = vld [vmem:[#allocation44_spill] sm:$0xff]  ;;  %v13221_v29 = vld [vmem:[#allocation46_spill] sm:$0xff] }
 0x356   :  { %v5276_v2 = vadd.f32 %v5275_v31, %v5163_v49  ;;  %v5388_v1 = vpop.f32.mrf.mxu1  ;;  %7749 = vmatpush1.bf16.msra.mxu1 %v10136_v37  ;;  %v11859_v23 = vpack.c.bf16 %v5486_v62, %v5478_v60  ;;  %v5387_v16 = vadd.f32 %v5386_v24, %v5274_v35  ;;  %v13222_v37 = vld [vmem:[#allocation48_spill] sm:$0xff]  ;;  %v13223_v31 = vld [vmem:[#allocation51_spill] sm:$0xff] }
 0x357   :  { %7870 = vmatpush2.bf16.msra.mxu0 %v10139_v3  ;;  %v5277_v54 = vpop.f32.mrf.mxu0  ;;  %7750 = vmatprep.subr.bf16.mxu1 %v10144_v7  ;;  %v5070_v56 = vadd.f32 %v13222_v37, %v11652_v0  ;;  %v10157_v7 = vld [vmem:[#allocation8 + $0x568] ss:$16 sps:$4 sm:$0xff]   ;;  %v10162_v24 = vld [vmem:[#allocation8 + $0x3cc] ss:$16 sps:$4 sm:$0xff]  }
 0x358   :  { %v5389_v22 = vadd.f32 %v5388_v1, %v5276_v2  ;;  %v5278_v44 = vadd.f32 %v5277_v54, %v5165_v43  ;;  %v5390_v50 = vpop.f32.mrf.mxu1  ;;  %7574 = vmatprep.mubr.bf16.mxu1 %v11859_v23  ;;  %7871 = vmatprep.subr.bf16.mxu0 %v10147_v17  ;;  %v5494_v5 = vmax.f32 %v5387_v16, 0.0  ;;  %v10165_v17 = vld [vmem:[#allocation8 + $0x54c] ss:$16 sps:$4 sm:$0xff]   ;;  %v5072_v43 = vadd.f32 %v13223_v31, %v11657_v9 }
 0x359   :  { %v5281_v15 = vpop.f32.mrf.mxu0  ;;  %7575 = vmatmul.mubr.bf16.gmra.mxu1 %v11863_v57  ;;  %v10180_v31 = vld [vmem:[#allocation8 + $0x36c] ss:$16 sps:$4 sm:$0xff]  }
 0x35a   :  { %v5391_v47 = vadd.f32 %v5390_v50, %v5278_v44  ;;  %v5394_v18 = vpop.f32.mrf.mxu1  ;;  %7708 = vmatmul.mubr.bf16.gmra.mxu0 %v13185_v53  ;;  %7751 = vmatpush1.bf16.msra.mxu1 %v10142_v58  ;;  %v5501_v21 = vmax.f32 %v5389_v22, 0.0  ;;  %v5493_v53 = vmax.f32 %v5385_v48, 0.0  ;;  %v5282_v30 = vadd.f32 %v5281_v15, %v13220_v25  ;;  %v13224_v58 = vld [vmem:[#allocation27_spill] sm:$0xff]  ;;  %v10163_v22 = vld [vmem:[#allocation8 + $0x548] ss:$16 sps:$4 sm:$0xff]   ;;  %v13227_v15 = vld [vmem:[#allocation49_spill] sm:$0xff] }
 0x35b   :  { %7717 = vmatprep.mubr.bf16.mxu0 %v13186_v11  ;;  %7872 = vmatpush2.bf16.msra.mxu0 %v10145_v42  ;;  %v5283_v41 = vpop.f32.mrf.mxu0  ;;  %v5175_v11 = vadd.f32 %v13221_v29, %v5062_v38  ;;  %v13225_v42 = vld [vmem:[#allocation79_spill] sm:$0xff]  ;;  %v13226_v50 = vld [vmem:[#allocation50_spill] sm:$0xff] }
 0x35c   :  { %v5502_v52 = vmax.f32 %v5391_v47, 0.0  ;;  %v5284_v12 = vadd.f32 %v5283_v41, %v13219_v4  ;;  %v5396_v33 = vpop.f32.mrf.mxu1  ;;  %7752 = vmatprep.subr.bf16.mxu1 %v10150_v6  ;;  %7873 = vmatprep.subr.bf16.mxu0 %v10153_v39  ;;  %v11879_v51 = vpack.c.bf16 %v5501_v21, %v5493_v53  ;;  %v5395_v40 = vadd.f32 %v5394_v18, %v5282_v30  ;;  %v10168_v44 = vld [vmem:[#allocation8 + $0x3ac] ss:$16 sps:$4 sm:$0xff]   ;;  %v10169_v30 = vld [vmem:[#allocation8 + $0x528] ss:$16 sps:$4 sm:$0xff]  }
 0x35d   :  { %v5285_v32 = vpop.f32.mrf.mxu0  ;;  %v5183_v6 = vadd.f32 %v13226_v50, %v5070_v56  ;;  %v10171_v18 = vld [vmem:[#allocation8 + $0x52c] ss:$16 sps:$4 sm:$0xff]  }
 0x35e   :  { %v5286_v27 = vadd.f32 %v5285_v32, %v5173_v45  ;;  %v5398_v13 = vpop.f32.mrf.mxu1  ;;  %7753 = vmatpush1.bf16.msra.mxu1 %v10148_v14  ;;  %v11875_v46 = vpack.c.bf16 %v5502_v52, %v5494_v5  ;;  %v5397_v49 = vadd.f32 %v5396_v33, %v5284_v12  ;;  %v5509_v14 = vmax.f32 %v5395_v40, 0.0  ;;  %v13228_v21 = vld [vmem:[#allocation47_spill] sm:$0xff]  ;;  %v10166_v12 = vld [vmem:[#allocation8 + $0x3a8] ss:$16 sps:$4 sm:$0xff]  }
 0x35f   :  { %7874 = vmatpush2.bf16.msra.mxu0 %v10151_v59  ;;  %v5287_v3 = vpop.f32.mrf.mxu0  ;;  %7754 = vmatprep.subr.bf16.mxu1 %v10156_v63  ;;  %v13229_v63 = vld [vmem:[#allocation52_spill] sm:$0xff]  ;;  %v13230_v33 = vld [vmem:[#allocation54_spill] sm:$0xff] }
 0x360   :  { %v5399_v60 = vadd.f32 %v5398_v13, %v5286_v27  ;;  %v5288_v62 = vadd.f32 %v5287_v3, %v5175_v11  ;;  %v5400_v35 = vpop.f32.mrf.mxu1  ;;  %7584 = vmatprep.mubr.bf16.mxu1 %v11875_v46  ;;  %7875 = vmatprep.subr.bf16.mxu0 %v10159_v10  ;;  %v5510_v39 = vmax.f32 %v5397_v49, 0.0  ;;  %v5185_v45 = vadd.f32 %v13229_v63, %v5072_v43  ;;  %v10174_v13 = vld [vmem:[#allocation8 + $0x38c] ss:$16 sps:$4 sm:$0xff]  }
 0x361   :  { %v5291_v36 = vpop.f32.mrf.mxu0  ;;  %7585 = vmatmul.mubr.bf16.gmra.mxu1 %v11879_v51  ;;  %v5080_v10 = vadd.f32 %v13230_v33, %v11652_v0  ;;  %v13231_v0 = vld [vmem:[#allocation57_spill] sm:$0xff]  ;;  %v13234_v43 = vld [vmem:[#allocation56_spill] sm:$0xff]  ;;  %v13237_v50 = vld [vmem:[#allocation58_spill] sm:$0xff] }
 0x362   :  { %v5401_v2 = vadd.f32 %v5400_v35, %v5288_v62  ;;  %v5404_v1 = vpop.f32.mrf.mxu1  ;;  %7718 = vmatmul.mubr.bf16.gmra.mxu0 %v13224_v58  ;;  %7755 = vmatpush2.bf16.msra.mxu1 %v10154_v20  ;;  %v5517_v54 = vmax.f32 %v5399_v60, 0.0  ;;  %v5292_v41 = vadd.f32 %v5291_v36, %v13228_v21  ;;  %v10177_v20 = vld [vmem:[#allocation8 + $0x50c] ss:$16 sps:$4 sm:$0xff]   ;;  %v5082_v3 = vadd.f32 %v13231_v0, %v11657_v9  ;;  %v10172_v62 = vld [vmem:[#allocation8 + $0x388] ss:$16 sps:$4 sm:$0xff]  }
 0x363   :  { %7727 = vmatprep.mubr.bf16.mxu0 %v13225_v42  ;;  %7876 = vmatpush2.bf16.msra.mxu0 %v10157_v7  ;;  %v5293_v16 = vpop.f32.mrf.mxu0  ;;  %v13232_v60 = vld [vmem:[#allocation78_spill] sm:$0xff]  ;;  %v5871_v36 = vld [vmem:[#allocation10] sm:$0xf] }
 0x364   :  { %v5518_v48 = vmax.f32 %v5401_v2, 0.0  ;;  %v5294_v38 = vadd.f32 %v5293_v16, %v13227_v15  ;;  %v5406_v47 = vpop.f32.mrf.mxu1  ;;  %7756 = vmatprep.subr.bf16.mxu1 %v10162_v24  ;;  %7877 = vmatprep.subr.bf16.mxu0 %v10165_v17  ;;  %v11895_v53 = vpack.c.bf16 %v5517_v54, %v5509_v14  ;;  %v5405_v37 = vadd.f32 %v5404_v1, %v5292_v41  ;;  %v10175_v35 = vld [vmem:[#allocation8 + $0x508] ss:$16 sps:$4 sm:$0xff]   ;;  %v13236_v16 = vld [vmem:[#allocation53_spill] sm:$0xff]  ;;  %v10238_v63 = vld [vmem:[#allocation11 + $0x78] sm:$0xff]  }
 0x365   :  { %v5295_v59 = vpop.f32.mrf.mxu0  ;;  %v13233_v17 = vld [vmem:[#allocation34_spill] sm:$0xff]  ;;  %v5193_v2 = vadd.f32 %v13234_v43, %v5080_v10 }
 0x366   :  { %v5296_v5 = vadd.f32 %v5295_v59, %v5183_v6  ;;  %v5408_v52 = vpop.f32.mrf.mxu1  ;;  %7757 = vmatpush2.bf16.msra.mxu1 %v10160_v26  ;;  %v11891_v4 = vpack.c.bf16 %v5518_v48, %v5510_v39  ;;  %v5407_v32 = vadd.f32 %v5406_v47, %v5294_v38  ;;  %v13235_v26 = vld [vmem:[#allocation55_spill] sm:$0xff]  ;;  %v5525_v42 = vmax.f32 %v5405_v37, 0.0  ;;  %v13238_v38 = vld [vmem:[#allocation72_spill] sm:$0xff] }
 0x367   :  { %7878 = vmatpush2.bf16.msra.mxu0 %v10163_v22  ;;  %v5297_v25 = vpop.f32.mrf.mxu0  ;;  %7758 = vmatprep.subr.bf16.mxu1 %v10168_v44  ;;  %v5195_v6 = vadd.f32 %v13237_v50, %v5082_v3  ;;  %v13239_v47 = vsub.s32 0, %v13238_v38  ;;  %v10178_v14 = vld [vmem:[#allocation8 + $0x368] ss:$16 sps:$4 sm:$0xff]   ;;  %v10183_v59 = vld [vmem:[#allocation8 + $0x34c] ss:$16 sps:$4 sm:$0xff]   ;;  %v13240_v33 = vsub.s32 1, %v13238_v38 }
 0x368   :  { %v5409_v29 = vadd.f32 %v5408_v52, %v5296_v5  ;;  %v5298_v11 = vadd.f32 %v5297_v25, %v5185_v45  ;;  %v5410_v27 = vpop.f32.mrf.mxu1  ;;  %7594 = vmatprep.mubr.bf16.mxu1 %v11891_v4  ;;  %7879 = vmatprep.subr.bf16.mxu0 %v10171_v18  ;;  %v5526_v1 = vmax.f32 %v5407_v32, 0.0  ;;  %v10239_v25 = vld [vmem:[#allocation11 + $0x38] sm:$0xff]  }
 0x369   :  { %v5301_v56 = vpop.f32.mrf.mxu0  ;;  %7595 = vmatmul.mubr.bf16.gmra.mxu1 %v11895_v53  ;;  %v11911_v18 = vrot.slane %v5871_v36, %v13239_v47  ;;  %v11918_v10 = vrot.slane %v5871_v36, %v13240_v33  ;;  %v10186_v3 = vld [vmem:[#allocation8 + $0x32c] ss:$16 sps:$4 sm:$0xff]  }
 0x36a   :  { %v5411_v7 = vadd.f32 %v5410_v27, %v5298_v11  ;;  %v5414_v49 = vpop.f32.mrf.mxu1  ;;  %7728 = vmatmul.mubr.bf16.gmra.mxu0 %v13232_v60  ;;  %7759 = vmatpush2.bf16.msra.mxu1 %v10166_v12  ;;  %v5533_v24 = vmax.f32 %v5409_v29, 0.0  ;;  %v5302_v22 = vadd.f32 %v5301_v56, %v13236_v16  ;;  %v13242_v56 = vld [vmem:[#allocation35_spill] sm:$0xff]  ;;  %v10243_v16 = vld [vmem:[#allocation11 + $0x28] sm:$0xff]  }
 0x36b   :  { %7880 = vmatpush2.bf16.msra.mxu0 %v10169_v30  ;;  %7883 = vmatprep.mubr.bf16.mxu0 %v13233_v17  ;;  %v5303_v40 = vpop.f32.mrf.mxu0  ;;  %v10241_v17 = vld [vmem:[#allocation11 + $0x30] sm:$0xff]   ;;  %v13245_v47 = vld [vmem:[#allocation36_spill] sm:$0xff] }
 0x36c   :  { %v5534_v58 = vmax.f32 %v5411_v7, 0.0  ;;  %v5304_v9 = vadd.f32 %v5303_v40, %v13235_v26  ;;  %v5416_v54 = vpop.f32.mrf.mxu1  ;;  %7760 = vmatprep.subr.bf16.mxu1 %v10174_v13  ;;  %7881 = vmatprep.subr.bf16.mxu0 %v10177_v20  ;;  %v11913_v21 = vpack.c.bf16 %v5533_v24, %v5525_v42  ;;  %v5415_v30 = vadd.f32 %v5414_v49, %v5302_v22  ;;  %v13241_v13 = vld [vmem:[#allocation89_spill] sm:$0xff]  ;;  %v10181_v20 = vld [vmem:[#allocation8 + $0x348] ss:$16 sps:$4 sm:$0xff]  }
 0x36d   :  { %v5305_v44 = vpop.f32.mrf.mxu0  ;;  %v10240_v7 = vld [vmem:[#allocation11 + $0x70] sm:$0xff]   ;;  %v10189_v42 = vld [vmem:[#allocation8 + $0x30c] ss:$16 sps:$4 sm:$0xff]  }
 0x36e   :  { %v5306_v39 = vadd.f32 %v5305_v44, %v5193_v2  ;;  %v5418_v48 = vpop.f32.mrf.mxu1  ;;  %7761 = vmatpush2.bf16.msra.mxu1 %v10172_v62  ;;  %v11907_v15 = vpack.c.bf16 %v5534_v58, %v5526_v1  ;;  %v5417_v45 = vadd.f32 %v5416_v54, %v5304_v9  ;;  %v5541_v40 = vmax.f32 %v5415_v30, 0.0  ;;  %v10184_v1 = vld [vmem:[#allocation8 + $0x328] ss:$16 sps:$4 sm:$0xff]   ;;  %v10242_v9 = vld [vmem:[#allocation11 + $0x68] sm:$0xff]  }
 0x36f   :  { %7882 = vmatpush2.bf16.msra.mxu0 %v10175_v35  ;;  %v5307_v41 = vpop.f32.mrf.mxu0  ;;  %7762 = vmatprep.subr.bf16.mxu1 %v10180_v31 }
 0x370   :  { %v5419_v5 = vadd.f32 %v5418_v48, %v5306_v39  ;;  %v5308_v52 = vadd.f32 %v5307_v41, %v5195_v6  ;;  %v5420_v12 = vpop.f32.mrf.mxu1  ;;  %7604 = vmatprep.mubr.bf16.mxu1 %v11907_v15  ;;  %9710 = vmatprep.subr.bf16.mxu0 %v10238_v63  ;;  %v5542_v49 = vmax.f32 %v5417_v45, 0.0  ;;  %v13243_v6 = vld [vmem:[#allocation90_spill] sm:$0xff]  ;;  %v13244_v48 = vld [vmem:[#allocation21_spill] sm:$0xff] }
 0x371   :  { %v7207_v32 = vpop.f32.mrf.mxu0  ;;  %7605 = vmatmul.mubr.bf16.gmra.mxu1 %v11913_v21  ;;  %v10187_v39 = vld [vmem:[#allocation8 + $0x308] ss:$16 sps:$4 sm:$0xff]   ;;  %v10192_v41 = vld [vmem:[#allocation8 + $0x6ec] ss:$16 sps:$4 sm:$0xff]  }
 0x372   :  { %v5421_v29 = vadd.f32 %v5420_v12, %v5308_v52  ;;  %v7208_v11 = vadd.f32 %v7207_v32, %v11911_v18  ;;  %v7320_v27 = vpop.f32.mrf.mxu1  ;;  %7884 = vmatmul.mubr.bf16.vlgmr.msra.gmra.mxu0 %v13241_v13  ;;  %7763 = vmatpush2.bf16.msra.mxu1 %v10178_v14  ;;  %v5549_v37 = vmax.f32 %v5419_v5, 0.0  ;;  %v10245_v52 = vld [vmem:[#allocation11 + $0x20] sm:$0xff]   ;;  %v10247_v13 = vld [vmem:[#allocation11 + $0x18] sm:$0xff]  }
 0x373   :  { %7893 = vmatprep.mubr.bf16.mxu0 %v13242_v56  ;;  %v7209_v0 = vpop.f32.mrf.mxu0  ;;  %7764 = vmatprep.subr.bf16.mxu1 %v10183_v59  ;;  %v10244_v59 = vld [vmem:[#allocation11 + $0x60] sm:$0xff]  }
 0x374   :  { %v5550_v60 = vmax.f32 %v5421_v29, 0.0  ;;  %v11924_v62 = vadd.f32 %v7320_v27, %v7208_v11  ;;  %v7210_v35 = vadd.f32 %v7209_v0, %v11918_v10  ;;  %v7322_v24 = vpop.f32.mrf.mxu1  ;;  %9711 = vmatpush3.bf16.msra.mxu0 %v10239_v25  ;;  %v11935_v58 = vpack.c.bf16 %v5549_v37, %v5541_v40  ;;  %v10190_v32 = vld [vmem:[#allocation8 + $0x6e8] ss:$16 sps:$4 sm:$0xff]   ;;  %v10246_v29 = vld [vmem:[#allocation11 + $0x58] sm:$0xff]  }
 0x375   :  { %v11927_v36 = vpop.f32.mrf.mxu0  ;;  %9712 = vmatprep.subr.bf16.mxu0 %v10240_v7  ;;  %v10195_v27 = vld [vmem:[#allocation8 + $0x6cc] ss:$16 sps:$4 sm:$0xff]  }
 0x376   :  { %v11929_v31 = vadd.f32 %v7322_v24, %v7210_v35  ;;  %v11931_v43 = vpop.f32.mrf.mxu1  ;;  %7765 = vmatpush2.bf16.msra.mxu1 %v10181_v20  ;;  %v11933_v2 = vpack.c.bf16 %v5550_v60, %v5542_v49  ;;  %v13246_v37 = vld [vmem:[#allocation20_spill] sm:$0xff]  ;;  %v13248_v7 = vld [vmem:[#allocation95_spill] sm:$0xff]  ;;  %v10248_v24 = vld [vmem:[#allocation11 + $0x50] sm:$0xff]  }
 0x377   :  { %v11937_v26 = vpop.f32.mrf.mxu0  ;;  %7766 = vmatprep.subr.bf16.mxu1 %v10186_v3  ;;  %v13247_v3 = vld [vmem:[#allocation91_spill] sm:$0xff]  ;;  %v13249_v49 = vld [vmem:[#allocation92_spill] sm:$0xff] }
 0x378   :  { %v11939_v54 = vpop.f32.mrf.mxu1  ;;  %7614 = vmatprep.mubr.bf16.mxu1 %v11933_v2  ;;  %9713 = vmatpush3.bf16.msra.mxu0 %v10241_v17  ;;  %v10193_v35 = vld [vmem:[#allocation8 + $0x6c8] ss:$16 sps:$4 sm:$0xff]  }
 0x379   :  { %v7217_v22 = vpop.f32.mrf.mxu0  ;;  %7615 = vmatmul.mubr.bf16.gmra.mxu1 %v11935_v58  ;;  %9714 = vmatprep.subr.bf16.mxu0 %v10242_v9  ;;  %v10198_v9 = vld [vmem:[#allocation8 + $0x6ac] ss:$16 sps:$4 sm:$0xff]  }
 0x37a   :  { %v7218_v44 = vadd.f32 %v7217_v22, %v11911_v18  ;;  %v7330_v50 = vpop.f32.mrf.mxu1  ;;  %7894 = vmatmul.mubr.bf16.gmra.mxu0 %v13243_v6  ;;  %7767 = vmatpush2.bf16.msra.mxu1 %v10184_v1  ;;  %v10196_v6 = vld [vmem:[#allocation8 + $0x6a8] ss:$16 sps:$4 sm:$0xff]  }
 0x37b   :  { %7770 = vmatprep.mubr.bf16.mxu1 %v13244_v48  ;;  %7903 = vmatprep.mubr.bf16.mxu0 %v13245_v47  ;;  %v7219_v14 = vpop.f32.mrf.mxu0  ;;  %v10201_v47 = vld [vmem:[#allocation8 + $0x68c] ss:$16 sps:$4 sm:$0xff]  }
 0x37c   :  { %v11947_v63 = vadd.f32 %v7330_v50, %v7218_v44  ;;  %v7220_v45 = vadd.f32 %v7219_v14, %v11918_v10  ;;  %v7332_v5 = vpop.f32.mrf.mxu1  ;;  %7768 = vmatprep.subr.bf16.mxu1 %v10189_v42  ;;  %9715 = vmatpush3.bf16.msra.mxu0 %v10243_v16  ;;  %v10249_v42 = vld [vmem:[#allocation11 + $0x10] sm:$0xff]   ;;  %v10251_v14 = vld [vmem:[#allocation11 + $0x8] sm:$0xff]  }
 0x37d   :  { %v11950_v12 = vpop.f32.mrf.mxu0  ;;  %9716 = vmatprep.subr.bf16.mxu0 %v10244_v59  ;;  %v13250_v59 = vld [vmem:[#allocation22_spill] sm:$0xff] }
 0x37e   :  { %v11952_v33 = vadd.f32 %v7332_v5, %v7220_v45  ;;  %v11954_v25 = vpop.f32.mrf.mxu1  ;;  %7769 = vmatpush2.bf16.msra.mxu1 %v10187_v39  ;;  %v10250_v39 = vld [vmem:[#allocation11 + $0x48] sm:$0xff]  }
 0x37f   :  { %v11956_v30 = vpop.f32.mrf.mxu0  ;;  %7964 = vmatprep.subr.bf16.mxu1 %v10192_v41 }
 0x380   :  { %v11958_v11 = vpop.f32.mrf.mxu1  ;;  %9717 = vmatpush3.bf16.msra.mxu0 %v10245_v52  ;;  %v13251_v52 = vld [vmem:[#allocation37_spill] sm:$0xff] }
 0x381   :  { %v7227_v20 = vpop.f32.mrf.mxu0  ;;  %7771 = vmatmul.mubr.bf16.vlgmr.msra.gmra.mxu1 %v13246_v37  ;;  %9718 = vmatprep.subr.bf16.mxu0 %v10246_v29  ;;  %v13253_v29 = vld [vmem:[#allocation38_spill] sm:$0xff] }
 0x382   :  { %v7228_v56 = vadd.f32 %v7227_v20, %v11911_v18  ;;  %v7340_v0 = vpop.f32.mrf.mxu1  ;;  %7904 = vmatmul.mubr.bf16.gmra.mxu0 %v13247_v3  ;;  %7780 = vmatprep.mubr.bf16.mxu1 %v13248_v7  ;;  %v10252_v20 = vld [vmem:[#allocation11 + $0x40] sm:$0xff]   ;;  %v10204_v3 = vld [vmem:[#allocation8 + $0x66c] ss:$16 sps:$4 sm:$0xff]  }
 0x383   :  { %7913 = vmatprep.mubr.bf16.mxu0 %v13249_v49  ;;  %7965 = vmatpush1.bf16.msra.mxu1 %v10190_v32  ;;  %v7229_v60 = vpop.f32.mrf.mxu0  ;;  %v13252_v32 = vld [vmem:[#allocation97_spill] sm:$0xff]  ;;  %v10253_v7 = vld [vmem:[#allocation11] sm:$0xff]  }
 0x384   :  { %v11965_v17 = vadd.f32 %v7340_v0, %v7228_v56  ;;  %v7230_v40 = vadd.f32 %v7229_v60, %v11918_v10  ;;  %v7342_v1 = vpop.f32.mrf.mxu1  ;;  %7966 = vmatprep.subr.bf16.mxu1 %v10195_v27  ;;  %9719 = vmatpush3.bf16.msra.mxu0 %v10247_v13  ;;  %v10199_v13 = vld [vmem:[#allocation8 + $0x688] ss:$16 sps:$4 sm:$0xff]  }
 0x385   :  { %v11968_v16 = vpop.f32.mrf.mxu0  ;;  %9720 = vmatprep.subr.bf16.mxu0 %v10248_v24 }
 0x386   :  { %v11970_v22 = vadd.f32 %v7342_v1, %v7230_v40  ;;  %v11972_v44 = vpop.f32.mrf.mxu1  ;;  %v10202_v40 = vld [vmem:[#allocation8 + $0x668] ss:$16 sps:$4 sm:$0xff]  }
 0x387   :  { %7967 = vmatpush1.bf16.msra.mxu1 %v10193_v35  ;;  %v11974_v50 = vpop.f32.mrf.mxu0 }
 0x388   :  { %v11976_v48 = vpop.f32.mrf.mxu1  ;;  %7968 = vmatprep.subr.bf16.mxu1 %v10198_v9  ;;  %9721 = vmatpush3.bf16.msra.mxu0 %v10249_v42  ;;  %v10207_v9 = vld [vmem:[#allocation8 + $0x64c] ss:$16 sps:$4 sm:$0xff]  }
 0x389   :  { %v7237_v41 = vpop.f32.mrf.mxu0  ;;  %7781 = vmatmul.mubr.bf16.gmra.mxu1 %v13250_v59  ;;  %9722 = vmatprep.subr.bf16.mxu0 %v10250_v39  ;;  %v13257_v59 = vld [vmem:[#allocation39_spill] sm:$0xff] }
 0x38a   :  { %v7238_v45 = vadd.f32 %v7237_v41, %v11911_v18  ;;  %v7350_v5 = vpop.f32.mrf.mxu1  ;;  %7914 = vmatmul.mubr.bf16.gmra.mxu0 %v13251_v52  ;;  %7790 = vmatprep.mubr.bf16.mxu1 %v13252_v32  ;;  %v13256_v41 = vld [vmem:[#allocation28_spill] sm:$0xff] }
 0x38b   :  { %7923 = vmatprep.mubr.bf16.mxu0 %v13253_v29  ;;  %7969 = vmatpush1.bf16.msra.mxu1 %v10196_v6  ;;  %v7239_v27 = vpop.f32.mrf.mxu0  ;;  %v13254_v6 = vld [vmem:[#allocation96_spill] sm:$0xff] }
 0x38c   :  { %v11983_v37 = vadd.f32 %v7350_v5, %v7238_v45  ;;  %v7240_v56 = vadd.f32 %v7239_v27, %v11918_v10  ;;  %v7352_v0 = vpop.f32.mrf.mxu1  ;;  %7970 = vmatprep.subr.bf16.mxu1 %v10201_v47  ;;  %9723 = vmatpush3.bf16.msra.mxu0 %v10251_v14  ;;  %v13255_v14 = vld [vmem:[#allocation93_spill] sm:$0xff]  ;;  %v10205_v5 = vld [vmem:[#allocation8 + $0x648] ss:$16 sps:$4 sm:$0xff]  }
 0x38d   :  { %v11986_v49 = vpop.f32.mrf.mxu0  ;;  %9724 = vmatprep.subr.bf16.mxu0 %v10252_v20  ;;  %v10210_v27 = vld [vmem:[#allocation8 + $0x62c] ss:$16 sps:$4 sm:$0xff]  }
 0x38e   :  { %v11988_v60 = vadd.f32 %v7352_v0, %v7240_v56  ;;  %v11990_v35 = vpop.f32.mrf.mxu1 }
 0x38f   :  { %7971 = vmatpush1.bf16.msra.mxu1 %v10199_v13  ;;  %v11992_v24 = vpop.f32.mrf.mxu0 }
 0x390   :  { %v11994_v1 = vpop.f32.mrf.mxu1  ;;  %7972 = vmatprep.subr.bf16.mxu1 %v10204_v3  ;;  %9725 = vmatpush3.bf16.msra.mxu0 %v10253_v7  ;;  %v10208_v3 = vld [vmem:[#allocation8 + $0x628] ss:$16 sps:$4 sm:$0xff]  }
 0x391   :  { %v7247_v42 = vpop.f32.mrf.mxu0  ;;  %7791 = vmatmul.mubr.bf16.gmra.mxu1 %v13254_v6  ;;  %v13262_v6 = vld [vmem:[#allocation98_spill] sm:$0xff] }
 0x392   :  { %v7248_v39 = vadd.f32 %v7247_v42, %v11911_v18  ;;  %v7360_v47 = vpop.f32.mrf.mxu1  ;;  %7924 = vmatmul.mubr.bf16.gmra.mxu0 %v13255_v14  ;;  %7800 = vmatprep.mubr.bf16.mxu1 %v13256_v41  ;;  %v13264_v14 = vld [vmem:[#allocation84_spill] sm:$0xff]  ;;  %v13265_v41 = vld [vmem:[#allocation41_spill] sm:$0xff] }
 0x393   :  { %7933 = vmatprep.mubr.bf16.mxu0 %v13257_v59  ;;  %7973 = vmatpush1.bf16.msra.mxu1 %v10202_v40  ;;  %v7249_v45 = vpop.f32.mrf.mxu0  ;;  %v10213_v40 = vld [vmem:[#allocation8 + $0x60c] ss:$16 sps:$4 sm:$0xff]  }
 0x394   :  { %v12001_v52 = vadd.f32 %v7360_v47, %v7248_v39  ;;  %v7250_v32 = vadd.f32 %v7249_v45, %v11918_v10  ;;  %v7362_v29 = vpop.f32.mrf.mxu1  ;;  %7974 = vmatprep.subr.bf16.mxu1 %v10207_v9  ;;  %v13263_v47 = vld [vmem:[#allocation94_spill] sm:$0xff] }
 0x395   :  { %v12004_v13 = vpop.f32.mrf.mxu0  ;;  %v10211_v45 = vld [vmem:[#allocation8 + $0x608] ss:$16 sps:$4 sm:$0xff]  }
 0x396   :  { %13258 = vst [vmem:[#allocation59_spill] sm:$0xff] %v12001_v52  ;;  %v12006_v20 = vadd.f32 %v7362_v29, %v7250_v32  ;;  %v12008_v56 = vpop.f32.mrf.mxu1 }
 0x397   :  { %13260 = vst [vmem:[#allocation61_spill] sm:$0xff] %v12008_v56  ;;  %7975 = vmatpush1.bf16.msra.mxu1 %v10205_v5  ;;  %v12010_v0 = vpop.f32.mrf.mxu0 }
 0x398   :  { %13259 = vst [vmem:[#allocation60_spill] sm:$0xff] %v12006_v20  ;;  %v12012_v7 = vpop.f32.mrf.mxu1  ;;  %7976 = vmatprep.subr.bf16.mxu1 %v10210_v27  ;;  %v10216_v27 = vld [vmem:[#allocation8 + $0x7ec] ss:$16 sps:$4 sm:$0xff]   ;;  %v10256_v20 = vld [vmem:[#allocation11 + $0xf0] sm:$0xff]  }
 0x399   :  { %13261 = vst [vmem:[#allocation62_spill] sm:$0xff] %v12012_v7  ;;  %v7257_v42 = vpop.f32.mrf.mxu0  ;;  %7801 = vmatmul.mubr.bf16.gmra.mxu1 %v13262_v6  ;;  %v10257_v7 = vld [vmem:[#allocation11 + $0xb0] sm:$0xff]  }
 0x39a   :  { %v7258_v9 = vadd.f32 %v7257_v42, %v11911_v18  ;;  %v7370_v39 = vpop.f32.mrf.mxu1  ;;  %7934 = vmatmul.mubr.bf16.gmra.mxu0 %v13263_v47  ;;  %7810 = vmatprep.mubr.bf16.mxu1 %v13264_v14  ;;  %v10214_v14 = vld [vmem:[#allocation8 + $0x7e8] ss:$16 sps:$4 sm:$0xff]  }
 0x39b   :  { %7943 = vmatprep.mubr.bf16.mxu0 %v13265_v41  ;;  %7977 = vmatpush1.bf16.msra.mxu1 %v10208_v3  ;;  %v7259_v59 = vpop.f32.mrf.mxu0  ;;  %v13272_v41 = vld [vmem:[#allocation29_spill] sm:$0xff] }
 0x39c   :  { %v12019_v5 = vadd.f32 %v7370_v39, %v7258_v9  ;;  %v7260_v32 = vadd.f32 %v7259_v59, %v11918_v10  ;;  %v7372_v29 = vpop.f32.mrf.mxu1  ;;  %7978 = vmatprep.subr.bf16.mxu1 %v10213_v40  ;;  %v10219_v9 = vld [vmem:[#allocation8 + $0x7cc] ss:$16 sps:$4 sm:$0xff]  }
 0x39d   :  { %v12022_v6 = vpop.f32.mrf.mxu0 }
 0x39e   :  { %13266 = vst [vmem:[#allocation63_spill] sm:$0xff] %v12019_v5  ;;  %13267 = vst [vmem:[#allocation64_spill] sm:$0xff] %v12022_v6  ;;  %v12024_v42 = vadd.f32 %v7372_v29, %v7260_v32  ;;  %v12026_v38 = vpop.f32.mrf.mxu1  ;;  %v13273_v5 = vld [vmem:[#allocation40_spill] sm:$0xff]  ;;  %v13274_v32 = vld [vmem:[#allocation30_spill] sm:$0xff] }
 0x39f   :  { %13269 = vst [vmem:[#allocation66_spill] sm:$0xff] %v12026_v38  ;;  %7979 = vmatpush1.bf16.msra.mxu1 %v10211_v45  ;;  %v12028_v47 = vpop.f32.mrf.mxu0  ;;  %v13275_v29 = vld [vmem:[#allocation43_spill] sm:$0xff] }
 0x3a0   :  { %13268 = vst [vmem:[#allocation65_spill] sm:$0xff] %v12024_v42  ;;  %13270 = vst [vmem:[#allocation67_spill] sm:$0xff] %v12028_v47  ;;  %v12030_v3 = vpop.f32.mrf.mxu1  ;;  %7980 = vmatprep.subr.bf16.mxu1 %v10216_v27  ;;  %v10217_v42 = vld [vmem:[#allocation8 + $0x7c8] ss:$16 sps:$4 sm:$0xff]   ;;  %v10222_v47 = vld [vmem:[#allocation8 + $0x7ac] ss:$16 sps:$4 sm:$0xff]  }
 0x3a1   :  { %13271 = vst [vmem:[#allocation68_spill] sm:$0xff] %v12030_v3  ;;  %v7267_v39 = vpop.f32.mrf.mxu0  ;;  %7811 = vmatmul.mubr.bf16.gmra.mxu1 %v13272_v41 }
 0x3a2   :  { %v7268_v40 = vadd.f32 %v7267_v39, %v11911_v18  ;;  %v7380_v59 = vpop.f32.mrf.mxu1  ;;  %7944 = vmatmul.mubr.bf16.gmra.mxu0 %v13273_v5  ;;  %7820 = vmatprep.mubr.bf16.mxu1 %v13274_v32  ;;  %v10220_v32 = vld [vmem:[#allocation8 + $0x7a8] ss:$16 sps:$4 sm:$0xff]  }
 0x3a3   :  { %7953 = vmatprep.mubr.bf16.mxu0 %v13275_v29  ;;  %7981 = vmatpush2.bf16.msra.mxu1 %v10214_v14  ;;  %v7269_v45 = vpop.f32.mrf.mxu0  ;;  %v13282_v29 = vld [vmem:[#allocation85_spill] sm:$0xff] }
 0x3a4   :  { %v12037_v38 = vadd.f32 %v7380_v59, %v7268_v40  ;;  %v7270_v27 = vadd.f32 %v7269_v45, %v11918_v10  ;;  %v7382_v3 = vpop.f32.mrf.mxu1  ;;  %7982 = vmatprep.subr.bf16.mxu1 %v10219_v9  ;;  %v10225_v40 = vld [vmem:[#allocation8 + $0x78c] ss:$16 sps:$4 sm:$0xff]  }
 0x3a5   :  { %v12040_v41 = vpop.f32.mrf.mxu0 }
 0x3a6   :  { %13276 = vst [vmem:[#allocation69_spill] sm:$0xff] %v12037_v38  ;;  %13277 = vst [vmem:[#allocation70_spill] sm:$0xff] %v12040_v41  ;;  %v12042_v39 = vadd.f32 %v7382_v3, %v7270_v27  ;;  %v12044_v6 = vpop.f32.mrf.mxu1  ;;  %v13283_v38 = vld [vmem:[#allocation42_spill] sm:$0xff]  ;;  %v13284_v3 = vld [vmem:[#allocation31_spill] sm:$0xff] }
 0x3a7   :  { %13279 = vst [vmem:[#allocation82_spill] sm:$0xff] %v12044_v6  ;;  %7983 = vmatpush2.bf16.msra.mxu1 %v10217_v42  ;;  %v12046_v5 = vpop.f32.mrf.mxu0  ;;  %v10223_v42 = vld [vmem:[#allocation8 + $0x788] ss:$16 sps:$4 sm:$0xff]  }
 0x3a8   :  { %13278 = vst [vmem:[#allocation71_spill] sm:$0xff] %v12042_v39  ;;  %13280 = vst [vmem:[#allocation73_spill] sm:$0xff] %v12046_v5  ;;  %v12048_v14 = vpop.f32.mrf.mxu1  ;;  %7984 = vmatprep.subr.bf16.mxu1 %v10222_v47  ;;  %v10228_v47 = vld [vmem:[#allocation8 + $0x76c] ss:$16 sps:$4 sm:$0xff]  }
 0x3a9   :  { %13281 = vst [vmem:[#allocation23_spill] sm:$0xff] %v12048_v14  ;;  %v7277_v59 = vpop.f32.mrf.mxu0  ;;  %7821 = vmatmul.mubr.bf16.gmra.mxu1 %v13282_v29 }
 0x3aa   :  { %v7278_v9 = vadd.f32 %v7277_v59, %v11911_v18  ;;  %v7390_v45 = vpop.f32.mrf.mxu1  ;;  %7954 = vmatmul.mubr.bf16.gmra.mxu0 %v13283_v38  ;;  %7830 = vmatprep.mubr.bf16.mxu1 %v13284_v3  ;;  %v10226_v38 = vld [vmem:[#allocation8 + $0x768] ss:$16 sps:$4 sm:$0xff]   ;;  %v10231_v3 = vld [vmem:[#allocation8 + $0x74c] ss:$16 sps:$4 sm:$0xff]  }
 0x3ab   :  { %7985 = vmatpush2.bf16.msra.mxu1 %v10220_v32  ;;  %v7279_v27 = vpop.f32.mrf.mxu0  ;;  %v13289_v32 = vld [vmem:[#allocation86_spill] sm:$0xff] }
 0x3ac   :  { %v12054_v39 = vadd.f32 %v7390_v45, %v7278_v9  ;;  %v7280_v6 = vadd.f32 %v7279_v27, %v11918_v10  ;;  %7986 = vmatprep.subr.bf16.mxu1 %v10225_v40  ;;  %v7392_v14 = vpop.f32.mrf.mxu1  ;;  %v13290_v9 = vld [vmem:[#allocation32_spill] sm:$0xff] }
 0x3ad   :  { %v12057_v5 = vpop.f32.mrf.mxu0  ;;  %v10229_v40 = vld [vmem:[#allocation8 + $0x748] ss:$16 sps:$4 sm:$0xff]   ;;  %v10234_v27 = vld [vmem:[#allocation8 + $0x72c] ss:$16 sps:$4 sm:$0xff]  }
 0x3ae   :  { %13285 = vst [vmem:[#allocation25_spill] sm:$0xff] %v12054_v39  ;;  %13286 = vst [vmem:[#allocation24_spill] sm:$0xff] %v12057_v5  ;;  %v12059_v29 = vadd.f32 %v7392_v14, %v7280_v6  ;;  %v10232_v14 = vld [vmem:[#allocation8 + $0x728] ss:$16 sps:$4 sm:$0xff]   ;;  %v13291_v39 = vld [vmem:[#allocation87_spill] sm:$0xff] }
 0x3af   :  { %7987 = vmatpush2.bf16.msra.mxu1 %v10223_v42  ;;  %v12061_v59 = vpop.f32.mrf.mxu0 }
 0x3b0   :  { %13287 = vst [vmem:[#allocation75_spill] sm:$0xff] %v12059_v29  ;;  %13288 = vst [vmem:[#allocation74_spill] sm:$0xff] %v12061_v59  ;;  %7988 = vmatprep.subr.bf16.mxu1 %v10228_v47  ;;  %v10237_v47 = vld [vmem:[#allocation8 + $0x70c] ss:$16 sps:$4 sm:$0xff]  }
 0x3b1   :  { %7831 = vmatmul.mubr.bf16.gmra.mxu1 %v13289_v32 }
 0x3b2   :  { %v12064_v41 = vpop.f32.mrf.mxu0  ;;  %7840 = vmatprep.mubr.bf16.mxu1 %v13290_v9 }
 0x3b3   :  { %7989 = vmatpush2.bf16.msra.mxu1 %v10226_v38  ;;  %v10235_v38 = vld [vmem:[#allocation8 + $0x708] ss:$16 sps:$4 sm:$0xff]  }
 0x3b4   :  { %v12067_v45 = vpop.f32.mrf.mxu0  ;;  %7990 = vmatprep.subr.bf16.mxu1 %v10231_v3 }
 0x3b6   :  { %v12069_v6 = vpop.f32.mrf.mxu0 }
 0x3b7   :  { %7991 = vmatpush2.bf16.msra.mxu1 %v10229_v40 }
 0x3b8   :  { %v12071_v42 = vpop.f32.mrf.mxu0  ;;  %7992 = vmatprep.subr.bf16.mxu1 %v10234_v27 }
 0x3b9   :  { %7841 = vmatmul.mubr.bf16.gmra.mxu1 %v13291_v39 }
 0x3ba   :  { %v12074_v32 = vpop.f32.mrf.mxu0  ;;  %7996 = vmatprep.mubr.bf16.mxu1 %v11811_v8 }
 0x3bb   :  { %7993 = vmatpush2.bf16.msra.mxu1 %v10232_v14 }
 0x3bc   :  { %v12077_v9 = vpop.f32.mrf.mxu0  ;;  %7994 = vmatprep.subr.bf16.mxu1 %v10237_v47 }
 0x3be   :  { %v12079_v3 = vpop.f32.mrf.mxu0 }
 0x3bf   :  { %7995 = vmatpush2.bf16.msra.mxu1 %v10235_v38 }
 0x3c0   :  { %v12081_v40 = vpop.f32.mrf.mxu0 }
 0x3c2   :  { %v12083_v29 = vpop.f32.mrf.mxu0  ;;  %7997 = vmatmul.mubr.bf16.vlgmr.msra.gmra.mxu1 %v11815_v61  ;;  %v10254_v61 = vld [vmem:[#allocation11 + $0xf8] sm:$0xff]  }
 0x3c3   :  { %8006 = vmatprep.mubr.bf16.mxu1 %v11827_v28  ;;  %v10255_v28 = vld [vmem:[#allocation11 + $0xb8] sm:$0xff]   ;;  %9774 = vmatprep.subr.bf16.mxu1 %v10254_v61 }
 0x3c4   :  { %v12087_v39 = vpop.f32.mrf.mxu0  ;;  %9775 = vmatpush3.bf16.msra.mxu1 %v10255_v28  ;;  %v10258_v28 = vld [vmem:[#allocation11 + $0xe8] sm:$0xff]  }
 0x3c5   :  { %9776 = vmatprep.subr.bf16.mxu1 %v10256_v20 }
 0x3c6   :  { %v12089_v27 = vpop.f32.mrf.mxu0 }
 0x3c8   :  { %v12091_v8 = vpop.f32.mrf.mxu0  ;;  %9777 = vmatpush3.bf16.msra.mxu1 %v10257_v7  ;;  %v10260_v7 = vld [vmem:[#allocation11 + $0xe0] sm:$0xff]  }
 0x3c9   :  { %9778 = vmatprep.subr.bf16.mxu1 %v10258_v28  ;;  %v10262_v28 = vld [vmem:[#allocation11 + $0xd8] sm:$0xff]  }
 0x3ca   :  { %v12093_v14 = vpop.f32.mrf.mxu0  ;;  %8007 = vmatmul.mubr.bf16.gmra.mxu1 %v11831_v19 }
 0x3cb   :  { %8016 = vmatprep.mubr.bf16.mxu1 %v11843_v34 }
 0x3cc   :  { %v12097_v47 = vpop.f32.mrf.mxu0 }
 0x3ce   :  { %v12099_v38 = vpop.f32.mrf.mxu0 }
 0x3d0   :  { %v12101_v59 = vpop.f32.mrf.mxu0 }
 0x3d2   :  { %v12103_v5 = vpop.f32.mrf.mxu0  ;;  %8017 = vmatmul.mubr.bf16.gmra.mxu1 %v11847_v55 }
 0x3d3   :  { %13292 = vst [vmem:[#allocation76_spill] sm:$0xff] %v12103_v5  ;;  %8026 = vmatprep.mubr.bf16.mxu1 %v11859_v23  ;;  %v10259_v5 = vld [vmem:[#allocation11 + $0xa8] sm:$0xff]  }
 0x3d4   :  { %v12107_v52 = vpop.f32.mrf.mxu0  ;;  %9779 = vmatpush3.bf16.msra.mxu1 %v10259_v5 }
 0x3d5   :  { %9780 = vmatprep.subr.bf16.mxu1 %v10260_v7  ;;  %v10264_v7 = vld [vmem:[#allocation11 + $0xd0] sm:$0xff]  }
 0x3d6   :  { %v12109_v19 = vpop.f32.mrf.mxu0 }
 0x3d7   :  { %13293 = vst [vmem:[#allocation26_spill] sm:$0xff] %v12109_v19 }
 0x3d8   :  { %v12111_v34 = vpop.f32.mrf.mxu0 }
 0x3da   :  { %v12113_v56 = vpop.f32.mrf.mxu0  ;;  %8027 = vmatmul.mubr.bf16.gmra.mxu1 %v11863_v57 }
 0x3db   :  { %13294 = vst [vmem:[#allocation77_spill] sm:$0xff] %v12113_v56  ;;  %8036 = vmatprep.mubr.bf16.mxu1 %v11875_v46  ;;  %v10261_v56 = vld [vmem:[#allocation11 + $0xa0] sm:$0xff]  }
 0x3dc   :  { %v12117_v55 = vpop.f32.mrf.mxu0  ;;  %9781 = vmatpush3.bf16.msra.mxu1 %v10261_v56 }
 0x3dd   :  { %9782 = vmatprep.subr.bf16.mxu1 %v10262_v28 }
 0x3de   :  { %v12119_v23 = vpop.f32.mrf.mxu0 }
 0x3df   :  { %13295 = vst [vmem:[#allocation33_spill] sm:$0xff] %v12119_v23 }
 0x3e0   :  { %v12121_v61 = vpop.f32.mrf.mxu0 }
 0x3e2   :  { %v12123_v19 = vpop.f32.mrf.mxu0  ;;  %8037 = vmatmul.mubr.bf16.gmra.mxu1 %v11879_v51 }
 0x3e3   :  { %13296 = vst [vmem:[#allocation88_spill] sm:$0xff] %v12123_v19  ;;  %8046 = vmatprep.mubr.bf16.mxu1 %v11891_v4  ;;  %v10263_v19 = vld [vmem:[#allocation11 + $0x98] sm:$0xff]  }
 0x3e4   :  { %v12127_v57 = vpop.f32.mrf.mxu0  ;;  %9783 = vmatpush3.bf16.msra.mxu1 %v10263_v19 }
 0x3e5   :  { %9784 = vmatprep.subr.bf16.mxu1 %v10264_v7 }
 0x3e6   :  { %v12129_v46 = vpop.f32.mrf.mxu0 }
 0x3e7   :  { %13297 = vst [vmem:[#allocation81_spill] sm:$0xff] %v12129_v46 }
 0x3e8   :  { %v12131_v20 = vpop.f32.mrf.mxu0 }
 0x3ea   :  { %v12133_v23 = vpop.f32.mrf.mxu0  ;;  %8047 = vmatmul.mubr.bf16.gmra.mxu1 %v11895_v53 }
 0x3eb   :  { %13298 = vst [vmem:[#allocation80_spill] sm:$0xff] %v12133_v23  ;;  %8056 = vmatprep.mubr.bf16.mxu1 %v11907_v15  ;;  %v10265_v23 = vld [vmem:[#allocation11 + $0x90] sm:$0xff]  }
 0x3ec   :  { %v12137_v51 = vpop.f32.mrf.mxu0  ;;  %9785 = vmatpush3.bf16.msra.mxu1 %v10265_v23  ;;  %v7434_v23 = vadd.f32 %v12064_v41, %v11924_v62 }
 0x3ed   :  { %13299 = vst [vmem:[#allocation83_spill] sm:$0xff] %v12137_v51 }
 0x3ee   :  { %v12139_v4 = vpop.f32.mrf.mxu0 }
 0x3ef   :  { %13300 = vst [vmem:[#allocation45_spill] sm:$0xff] %v12139_v4 }
 0x3f0   :  { %v12141_v5 = vpop.f32.mrf.mxu0 }
 0x3f1   :  { %13301 = vst [vmem:[#allocation44_spill] sm:$0xff] %v12141_v5 }
 0x3f2   :  { %v12143_v46 = vpop.f32.mrf.mxu0  ;;  %8057 = vmatmul.mubr.bf16.gmra.mxu1 %v11913_v21 }
 0x3f3   :  { %13302 = vst [vmem:[#allocation46_spill] sm:$0xff] %v12143_v46  ;;  %8066 = vmatprep.mubr.bf16.mxu1 %v11933_v2  ;;  %v12156_v46 = vpop.f32.mrf.mxu1  ;;  %v7212_v2 = vadd.f32 %v11927_v36, %v11911_v18 }
 0x3f4   :  { %v12147_v53 = vpop.f32.mrf.mxu0 }
 0x3f5   :  { %13303 = vst [vmem:[#allocation48_spill] sm:$0xff] %v12147_v53  ;;  %v12164_v28 = vpop.f32.mrf.mxu1  ;;  %v7325_v53 = vadd.f32 %v11931_v43, %v7212_v2  ;;  %v7222_v43 = vadd.f32 %v11950_v12, %v11911_v18  ;;  %v7444_v12 = vadd.f32 %v12074_v32, %v11947_v63  ;;  %v7232_v63 = vadd.f32 %v11968_v16, %v11911_v18 }
 0x3f6   :  { %v12149_v15 = vpop.f32.mrf.mxu0 }
 0x3f7   :  { %13304 = vst [vmem:[#allocation51_spill] sm:$0xff] %v12149_v15  ;;  %v7345_v16 = vadd.f32 %v11972_v44, %v7232_v63 }
 0x3f8   :  { %v12151_v56 = vpop.f32.mrf.mxu0 }
 0x3f9   :  { %13305 = vst [vmem:[#allocation27_spill] sm:$0xff] %v12151_v56  ;;  %v7214_v56 = vadd.f32 %v11937_v26, %v11918_v10  ;;  %v7436_v26 = vadd.f32 %v12067_v45, %v11929_v31 }
 0x3fa   :  { %v12153_v4 = vpop.f32.mrf.mxu0  ;;  %8067 = vmatmul.mubr.bf16.gmra.mxu1 %v11935_v58  ;;  %v10267_v58 = vld [vmem:[#allocation11 + $0x88] sm:$0xff]  }
 0x3fb   :  { %13306 = vst [vmem:[#allocation79_spill] sm:$0xff] %v12153_v4  ;;  %v10266_v4 = vld [vmem:[#allocation11 + $0xc8] sm:$0xff]  }
 0x3fc   :  { %v12158_v21 = vpop.f32.mrf.mxu0  ;;  %9786 = vmatprep.subr.bf16.mxu1 %v10266_v4 }
 0x3fd   :  { %13307 = vst [vmem:[#allocation50_spill] sm:$0xff] %v12158_v21  ;;  %9787 = vmatpush3.bf16.msra.mxu1 %v10267_v58  ;;  %v7335_v58 = vadd.f32 %v11954_v25, %v7222_v43 }
 0x3fe   :  { %v12162_v19 = vpop.f32.mrf.mxu0 }
 0x3ff   :  { %13308 = vst [vmem:[#allocation49_spill] sm:$0xff] %v12162_v19  ;;  %v7327_v19 = vadd.f32 %v11939_v54, %v7214_v56  ;;  %v7224_v54 = vadd.f32 %v11956_v30, %v11918_v10 }
 0x400   :  { %v12168_v15 = vpop.f32.mrf.mxu0 }
 0x401   :  { %13309 = vst [vmem:[#allocation47_spill] sm:$0xff] %v12168_v15  ;;  %v7546_v7 = vpop.f32.mrf.mxu1  ;;  %v7438_v15 = vadd.f32 %v12069_v6, %v7325_v53  ;;  %v7440_v62 = vadd.f32 %v12071_v42, %v7327_v19 }
 0x402   :  { %v12173_v21 = vpop.f32.mrf.mxu0  ;;  %v7547_v5 = vadd.f32 %v7546_v7, %v7434_v23 }
 0x403   :  { %13310 = vst [vmem:[#allocation52_spill] sm:$0xff] %v12173_v21  ;;  %v7548_v36 = vpop.f32.mrf.mxu1 }
 0x404   :  { %v12179_v51 = vpop.f32.mrf.mxu0  ;;  %v7549_v41 = vadd.f32 %v7548_v36, %v7436_v26  ;;  %v8077_v31 = vmax.f32 %v7547_v5, 0.0  ;;  %v7337_v36 = vadd.f32 %v11958_v11, %v7224_v54  ;;  %v10268_v26 = vld [vmem:[#allocation11 + $0xc0] sm:$0xff]   ;;  %v7446_v5 = vadd.f32 %v12077_v9, %v11952_v33 }
 0x405   :  { %v7550_v2 = vpop.f32.mrf.mxu1  ;;  %9788 = vmatprep.subr.bf16.mxu1 %v10268_v26  ;;  %v7234_v33 = vadd.f32 %v11974_v50, %v11918_v10 }
 0x406   :  { %v7551_v4 = vadd.f32 %v7550_v2, %v7438_v15  ;;  %v12184_v21 = vpop.f32.mrf.mxu0  ;;  %v8078_v42 = vmax.f32 %v7549_v41, 0.0  ;;  %v7448_v2 = vadd.f32 %v12079_v3, %v7335_v58  ;;  %v7450_v41 = vadd.f32 %v12081_v40, %v7337_v36 }
 0x407   :  { %v7552_v56 = vpop.f32.mrf.mxu1  ;;  %v7454_v40 = vadd.f32 %v12083_v29, %v11965_v17  ;;  %v7347_v50 = vadd.f32 %v11976_v48, %v7234_v33  ;;  %v7242_v17 = vadd.f32 %v11986_v49, %v11911_v18 }
 0x408   :  { %v8081_v45 = vmax.f32 %v7551_v4, 0.0  ;;  %v7553_v6 = vadd.f32 %v7552_v56, %v7440_v62  ;;  %v12188_v53 = vpop.f32.mrf.mxu0  ;;  %v10269_v4 = vld [vmem:[#allocation11 + $0x80] sm:$0xff]  }
 0x409   :  { %v7556_v7 = vpop.f32.mrf.mxu1  ;;  %9789 = vmatpush3.bf16.msra.mxu1 %v10269_v4  ;;  %v7355_v49 = vadd.f32 %v11990_v35, %v7242_v17 }
 0x40a   :  { %v8141_v19 = vpack.c.bf16 %v8081_v45, %v8077_v31  ;;  %v8082_v15 = vmax.f32 %v7553_v6, 0.0  ;;  %v12193_v23 = vpop.f32.mrf.mxu0  ;;  %v7557_v62 = vadd.f32 %v7556_v7, %v7444_v12 }
 0x40b   :  { %v7558_v30 = vpop.f32.mrf.mxu1 }
 0x40c   :  { %v12199_v25 = vpop.f32.mrf.mxu0  ;;  %v8142_v43 = vpack.c.bf16 %v8082_v15, %v8078_v42  ;;  %v7559_v11 = vadd.f32 %v7558_v30, %v7446_v5  ;;  %v8085_v3 = vmax.f32 %v7557_v62, 0.0  ;;  %v7458_v30 = vadd.f32 %v12089_v27, %v7345_v16 }
 0x40d   :  { %v7560_v32 = vpop.f32.mrf.mxu1 }
 0x40e   :  { %v7561_v54 = vadd.f32 %v7560_v32, %v7448_v2  ;;  %v12204_v56 = vpop.f32.mrf.mxu0  ;;  %8468 = vmatprep.mubr.bf16.mxu0 %v8142_v43  ;;  %v8086_v7 = vmax.f32 %v7559_v11, 0.0  ;;  %v7460_v2 = vadd.f32 %v12091_v8, %v7347_v50  ;;  %v7464_v8 = vadd.f32 %v12093_v14, %v11983_v37 }
 0x40f   :  { %v7562_v9 = vpop.f32.mrf.mxu1  ;;  %8469 = vmatmul.mubr.bf16.vlgmr.msra.gmra.mxu0 %v8141_v19  ;;  %v7456_v19 = vadd.f32 %v12087_v39, %v11970_v22  ;;  %v7244_v22 = vadd.f32 %v11992_v24, %v11918_v10  ;;  %v7252_v37 = vadd.f32 %v12004_v13, %v11911_v18 }
 0x410   :  { %v8089_v31 = vmax.f32 %v7561_v54, 0.0  ;;  %v7563_v45 = vadd.f32 %v7562_v9, %v7450_v41  ;;  %v12208_v6 = vpop.f32.mrf.mxu0 }
 0x411   :  { %v7566_v58 = vpop.f32.mrf.mxu1  ;;  %v7357_v24 = vadd.f32 %v11994_v1, %v7244_v22 }
 0x412   :  { %v8145_v12 = vpack.c.bf16 %v8089_v31, %v8085_v3  ;;  %v8090_v42 = vmax.f32 %v7563_v45, 0.0  ;;  %v12213_v15 = vpop.f32.mrf.mxu0  ;;  %v7567_v26 = vadd.f32 %v7566_v58, %v7454_v40  ;;  %v7466_v31 = vadd.f32 %v12097_v47, %v11988_v60 }
 0x413   :  { %v7568_v36 = vpop.f32.mrf.mxu1  ;;  %v7468_v45 = vadd.f32 %v12099_v38, %v7355_v49  ;;  %v7470_v14 = vadd.f32 %v12101_v59, %v7357_v24  ;;  %v7254_v60 = vadd.f32 %v12010_v0, %v11918_v10  ;;  %v13314_v0 = vld [vmem:[#allocation26_spill] sm:$0xff] }
 0x414   :  { %v12219_v5 = vpop.f32.mrf.mxu0  ;;  %v8146_v44 = vpack.c.bf16 %v8090_v42, %v8086_v7  ;;  %v7569_v62 = vadd.f32 %v7568_v36, %v7456_v19  ;;  %v8093_v39 = vmax.f32 %v7567_v26, 0.0 }
 0x415   :  { %v7570_v29 = vpop.f32.mrf.mxu1 }
 0x416   :  { %v7571_v43 = vadd.f32 %v7570_v29, %v7458_v30  ;;  %v12224_v4 = vpop.f32.mrf.mxu0  ;;  %8476 = vmatprep.mubr.bf16.mxu0 %v8146_v44  ;;  %v8094_v11 = vmax.f32 %v7569_v62, 0.0  ;;  %v13311_v30 = vld [vmem:[#allocation61_spill] sm:$0xff] }
 0x417   :  { %v7572_v48 = vpop.f32.mrf.mxu1  ;;  %8477 = vmatmul.mubr.bf16.gmra.mxu0 %v8145_v12  ;;  %v7365_v13 = vadd.f32 %v13311_v30, %v7252_v37  ;;  %v13322_v30 = vld [vmem:[#allocation65_spill] sm:$0xff] }
 0x418   :  { %v8097_v27 = vmax.f32 %v7571_v43, 0.0  ;;  %v7573_v63 = vadd.f32 %v7572_v48, %v7460_v2  ;;  %v12228_v32 = vpop.f32.mrf.mxu0  ;;  %v13312_v2 = vld [vmem:[#allocation62_spill] sm:$0xff]  ;;  %v13313_v43 = vld [vmem:[#allocation60_spill] sm:$0xff] }
 0x419   :  { %v7576_v41 = vpop.f32.mrf.mxu1  ;;  %v7367_v62 = vadd.f32 %v13312_v2, %v7254_v60  ;;  %v7476_v22 = vadd.f32 %v12107_v52, %v13313_v43  ;;  %v7478_v48 = vadd.f32 %v13314_v0, %v7365_v13  ;;  %v13318_v52 = vld [vmem:[#allocation67_spill] sm:$0xff]  ;;  %v13323_v13 = vld [vmem:[#allocation33_spill] sm:$0xff] }
 0x41a   :  { %v8149_v54 = vpack.c.bf16 %v8097_v27, %v8093_v39  ;;  %v8098_v33 = vmax.f32 %v7573_v63, 0.0  ;;  %v12233_v9 = vpop.f32.mrf.mxu0  ;;  %v7577_v16 = vadd.f32 %v7576_v41, %v7464_v8  ;;  %v13315_v27 = vld [vmem:[#allocation59_spill] sm:$0xff]  ;;  %v13316_v63 = vld [vmem:[#allocation76_spill] sm:$0xff] }
 0x41b   :  { %v7578_v3 = vpop.f32.mrf.mxu1  ;;  %v7474_v49 = vadd.f32 %v13316_v63, %v13315_v27  ;;  %v13317_v8 = vld [vmem:[#allocation64_spill] sm:$0xff] }
 0x41c   :  { %v12239_v58 = vpop.f32.mrf.mxu0  ;;  %v8150_v35 = vpack.c.bf16 %v8098_v33, %v8094_v11  ;;  %v7579_v7 = vadd.f32 %v7578_v3, %v7466_v31  ;;  %v8101_v47 = vmax.f32 %v7577_v16, 0.0  ;;  %v7262_v11 = vadd.f32 %v13317_v8, %v11911_v18 }
 0x41d   :  { %v7580_v40 = vpop.f32.mrf.mxu1  ;;  %v7264_v16 = vadd.f32 %v13318_v52, %v11918_v10 }
 0x41e   :  { %v7581_v12 = vadd.f32 %v7580_v40, %v7468_v45  ;;  %v12244_v42 = vpop.f32.mrf.mxu0  ;;  %8484 = vmatprep.mubr.bf16.mxu0 %v8150_v35  ;;  %v8102_v26 = vmax.f32 %v7579_v7, 0.0 }
 0x41f   :  { %v7582_v1 = vpop.f32.mrf.mxu1  ;;  %8485 = vmatmul.mubr.bf16.gmra.mxu0 %v8149_v54  ;;  %v7480_v54 = vadd.f32 %v12111_v34, %v7367_v62 }
 0x420   :  { %v8105_v38 = vmax.f32 %v7581_v12, 0.0  ;;  %v7583_v50 = vadd.f32 %v7582_v1, %v7470_v14  ;;  %v12248_v36 = vpop.f32.mrf.mxu0  ;;  %v13319_v14 = vld [vmem:[#allocation66_spill] sm:$0xff] }
 0x421   :  { %v7586_v19 = vpop.f32.mrf.mxu1  ;;  %v7375_v7 = vadd.f32 %v13319_v14, %v7262_v11 }
 0x422   :  { %v8153_v59 = vpack.c.bf16 %v8105_v38, %v8101_v47  ;;  %v8106_v44 = vmax.f32 %v7583_v50, 0.0  ;;  %v12251_v17 = vpop.f32.mrf.mxu0  ;;  %v7587_v31 = vadd.f32 %v7586_v19, %v7474_v49  ;;  %v13321_v38 = vld [vmem:[#allocation68_spill] sm:$0xff]  ;;  %v7486_v19 = vadd.f32 %v12117_v55, %v13322_v30 }
 0x423   :  { %v7588_v29 = vpop.f32.mrf.mxu1  ;;  %v7377_v50 = vadd.f32 %v13321_v38, %v7264_v16  ;;  %v13334_v38 = vld [vmem:[#allocation88_spill] sm:$0xff] }
 0x424   :  { %v8154_v39 = vpack.c.bf16 %v8106_v44, %v8102_v26  ;;  %v7589_v33 = vadd.f32 %v7588_v29, %v7476_v22  ;;  %v12262_v24 = vpop.f32.mrf.mxu0  ;;  %v8109_v60 = vmax.f32 %v7587_v31, 0.0  ;;  %v7488_v26 = vadd.f32 %v13323_v13, %v7375_v7  ;;  %v13324_v44 = vld [vmem:[#allocation63_spill] sm:$0xff]  ;;  %v13325_v29 = vld [vmem:[#allocation77_spill] sm:$0xff]  ;;  %v13326_v22 = vld [vmem:[#allocation70_spill] sm:$0xff] }
 0x425   :  { %v7590_v41 = vpop.f32.mrf.mxu1  ;;  %v7484_v2 = vadd.f32 %v13325_v29, %v13324_v44  ;;  %v7272_v0 = vadd.f32 %v13326_v22, %v11911_v18  ;;  %v13331_v7 = vld [vmem:[#allocation71_spill] sm:$0xff]  ;;  %v13335_v13 = vld [vmem:[#allocation24_spill] sm:$0xff] }
 0x426   :  { %v7591_v3 = vadd.f32 %v7590_v41, %v7478_v48  ;;  %8492 = vmatprep.mubr.bf16.mxu0 %v8154_v39  ;;  %v8110_v12 = vmax.f32 %v7589_v33, 0.0  ;;  %v12267_v1 = vpop.f32.mrf.mxu0  ;;  %v7490_v48 = vadd.f32 %v12121_v61, %v7377_v50  ;;  %v13328_v41 = vld [vmem:[#allocation73_spill] sm:$0xff] }
 0x427   :  { %v7592_v45 = vpop.f32.mrf.mxu1  ;;  %8493 = vmatmul.mubr.bf16.gmra.mxu0 %v8153_v59  ;;  %13320 = vst [vmem:[#allocation54_spill] sm:$0xff] %v12267_v1  ;;  %v7274_v8 = vadd.f32 %v13328_v41, %v11918_v10  ;;  %v13338_v41 = vld [vmem:[#allocation72_spill] sm:$0xff] }
 0x428   :  { %v7593_v35 = vadd.f32 %v7592_v45, %v7480_v54  ;;  %v8113_v40 = vmax.f32 %v7591_v3, 0.0  ;;  %v12278_v39 = vpop.f32.mrf.mxu0  ;;  %v13329_v3 = vld [vmem:[#allocation82_spill] sm:$0xff] }
 0x429   :  { %v7596_v37 = vpop.f32.mrf.mxu1  ;;  %13327 = vst [vmem:[#allocation57_spill] sm:$0xff] %v12278_v39  ;;  %v7385_v31 = vadd.f32 %v13329_v3, %v7272_v0 }
 0x42a   :  { %v8114_v34 = vmax.f32 %v7593_v35, 0.0  ;;  %v8157_v62 = vpack.c.bf16 %v8113_v40, %v8109_v60  ;;  %v7597_v49 = vadd.f32 %v7596_v37, %v7484_v2  ;;  %v12283_v45 = vpop.f32.mrf.mxu0  ;;  %v13330_v40 = vld [vmem:[#allocation23_spill] sm:$0xff]  ;;  %v7496_v37 = vadd.f32 %v12127_v57, %v13331_v7 }
 0x42b   :  { %v7598_v47 = vpop.f32.mrf.mxu1  ;;  %v7387_v14 = vadd.f32 %v13330_v40, %v7274_v8  ;;  %v13339_v8 = vsub.s32 2, %v13338_v41  ;;  %v13344_v40 = vld [vmem:[#allocation80_spill] sm:$0xff] }
 0x42c   :  { %v8158_v59 = vpack.c.bf16 %v8114_v34, %v8110_v12  ;;  %v7599_v27 = vadd.f32 %v7598_v47, %v7486_v19  ;;  %v8117_v16 = vmax.f32 %v7597_v49, 0.0  ;;  %v13332_v12 = vld [vmem:[#allocation81_spill] sm:$0xff]  ;;  %v12294_v44 = vpop.f32.mrf.mxu0 }
 0x42d   :  { %v7600_v43 = vpop.f32.mrf.mxu1  ;;  %v7498_v34 = vadd.f32 %v13332_v12, %v7385_v31  ;;  %v13333_v47 = vld [vmem:[#allocation69_spill] sm:$0xff]  ;;  %v13340_v31 = vld [vmem:[#allocation75_spill] sm:$0xff]  ;;  %v13345_v12 = vld [vmem:[#allocation44_spill] sm:$0xff] }
 0x42e   :  { %v7601_v63 = vadd.f32 %v7600_v43, %v7488_v26  ;;  %8500 = vmatprep.mubr.bf16.mxu0 %v8158_v59  ;;  %v8118_v52 = vmax.f32 %v7599_v27, 0.0  ;;  %v7494_v50 = vadd.f32 %v13334_v38, %v13333_v47  ;;  %v7282_v26 = vadd.f32 %v13335_v13, %v11911_v18  ;;  %v13336_v43 = vld [vmem:[#allocation74_spill] sm:$0xff]  ;;  %v12299_v49 = vpop.f32.mrf.mxu0 }
 0x42f   :  { %v7602_v55 = vpop.f32.mrf.mxu1  ;;  %8501 = vmatmul.mubr.bf16.gmra.mxu0 %v8157_v62  ;;  %v7500_v59 = vadd.f32 %v12131_v20, %v7387_v14  ;;  %v7284_v22 = vadd.f32 %v13336_v43, %v11918_v10  ;;  %13337 = vst [vmem:[#allocation78_spill] sm:$0xff] %v12299_v49  ;;  %v13341_v10 = vld [vmem:[#allocation83_spill] sm:$0xff]  ;;  %v13348_v13 = vld [vmem:[#allocation46_spill] sm:$0xff] }
 0x430   :  { %v7603_v11 = vadd.f32 %v7602_v55, %v7490_v48  ;;  %v8121_v54 = vmax.f32 %v7601_v63, 0.0  ;;  %v7395_v63 = vadd.f32 %v12156_v46, %v7282_v26  ;;  %v10337_v55 = vld [vmem:[#allocation10] sm:$0xf]  ;;  %v13343_v46 = vld [vmem:[#allocation25_spill] sm:$0xff]  ;;  %v12316_v38 = vpop.f32.mrf.mxu0 }
 0x431   :  { %v7606_v33 = vpop.f32.mrf.mxu1  ;;  %v7397_v3 = vadd.f32 %v12164_v28, %v7284_v22  ;;  %v7504_v14 = vadd.f32 %v13344_v40, %v13343_v46  ;;  %13347 = vst [vmem:[#allocation34_spill] sm:$0xff] %v12316_v38 }
 0x432   :  { %v8122_v61 = vmax.f32 %v7603_v11, 0.0  ;;  %v8161_v30 = vpack.c.bf16 %v8121_v54, %v8117_v16  ;;  %v7607_v62 = vadd.f32 %v7606_v33, %v7494_v50  ;;  %v12303_v11 = vrot.slane %v10337_v55, %v13339_v8  ;;  %v12322_v43 = vpop.f32.mrf.mxu0 }
 0x433   :  { %v7608_v35 = vpop.f32.mrf.mxu1 }
 0x434   :  { %v8162_v60 = vpack.c.bf16 %v8122_v61, %v8118_v52  ;;  %v7609_v29 = vadd.f32 %v7608_v35, %v7496_v37  ;;  %v8125_v54 = vmax.f32 %v7607_v62, 0.0  ;;  %v7506_v52 = vadd.f32 %v13341_v10, %v13340_v31  ;;  %v13342_v61 = vld [vmem:[#allocation45_spill] sm:$0xff]  ;;  %v13349_v62 = vld [vmem:[#allocation48_spill] sm:$0xff]  ;;  %v12330_v8 = vpop.f32.mrf.mxu0  ;;  %v13351_v10 = vld [vmem:[#allocation50_spill] sm:$0xff] }
 0x435   :  { %v7610_v19 = vpop.f32.mrf.mxu1  ;;  %v7508_v16 = vadd.f32 %v13342_v61, %v7395_v63  ;;  %v7660_v26 = vadd.f32 %v13348_v13, %v12303_v11 }
 0x436   :  { %v7611_v2 = vadd.f32 %v7610_v19, %v7498_v34  ;;  %8508 = vmatprep.mubr.bf16.mxu0 %v8162_v60  ;;  %v8126_v18 = vmax.f32 %v7609_v29, 0.0  ;;  %v7510_v34 = vadd.f32 %v13345_v12, %v7397_v3  ;;  %v13346_v60 = vsub.s32 3, %v13338_v41  ;;  %v12338_v61 = vpop.f32.mrf.mxu0 }
 0x437   :  { %v7612_v57 = vpop.f32.mrf.mxu1  ;;  %8509 = vmatmul.mubr.bf16.gmra.mxu0 %v8161_v30 }
 0x438   :  { %v7613_v0 = vadd.f32 %v7612_v57, %v7500_v59  ;;  %v8129_v48 = vmax.f32 %v7611_v2, 0.0  ;;  %v12314_v47 = vrot.slane %v10337_v55, %v13346_v60 }
 0x439   :  { %v7616_v27 = vpop.f32.mrf.mxu1 }
 0x43a   :  { %v8130_v20 = vmax.f32 %v7613_v0, 0.0  ;;  %v8165_v7 = vpack.c.bf16 %v8129_v48, %v8125_v54  ;;  %v7617_v30 = vadd.f32 %v7616_v27, %v7504_v14  ;;  %v7662_v57 = vadd.f32 %v13349_v62, %v12314_v47  ;;  %v12346_v14 = vpop.f32.mrf.mxu0 }
 0x43b   :  { %v7618_v33 = vpop.f32.mrf.mxu1  ;;  %v7682_v60 = vadd.f32 %v12179_v51, %v12314_v47  ;;  %v7692_v51 = vadd.f32 %v12199_v25, %v12314_v47  ;;  %v7702_v25 = vadd.f32 %v12219_v5, %v12314_v47  ;;  %v7712_v5 = vadd.f32 %v12239_v58, %v12314_v47 }
 0x43c   :  { %v8166_v35 = vpack.c.bf16 %v8130_v20, %v8126_v18  ;;  %v7619_v28 = vadd.f32 %v7618_v33, %v7506_v52  ;;  %v8133_v63 = vmax.f32 %v7617_v30, 0.0  ;;  %v13350_v33 = vld [vmem:[#allocation79_spill] sm:$0xff]  ;;  %v7672_v52 = vadd.f32 %v13351_v10, %v12314_v47 }
 0x43d   :  { %v7620_v37 = vpop.f32.mrf.mxu1  ;;  %v7670_v3 = vadd.f32 %v13350_v33, %v12303_v11  ;;  %v7722_v58 = vadd.f32 %v12262_v24, %v12314_v47  ;;  %v7732_v24 = vadd.f32 %v12294_v44, %v12314_v47 }
 0x43e   :  { %v7621_v50 = vadd.f32 %v7620_v37, %v7508_v16  ;;  %8516 = vmatprep.mubr.bf16.mxu0 %v8166_v35  ;;  %v8134_v22 = vmax.f32 %v7619_v28, 0.0  ;;  %v13352_v37 = vld [vmem:[#allocation52_spill] sm:$0xff]  ;;  %v12354_v28 = vpop.f32.mrf.mxu0 }
 0x43f   :  { %v7622_v19 = vpop.f32.mrf.mxu1  ;;  %8517 = vmatmul.mubr.bf16.gmra.mxu0 %v8165_v7  ;;  %v7680_v12 = vadd.f32 %v13352_v37, %v12303_v11 }
 0x440   :  { %v7623_v59 = vadd.f32 %v7622_v19, %v7510_v34  ;;  %v8137_v29 = vmax.f32 %v7621_v50, 0.0 }
 0x441   :  { %v7772_v2 = vpop.f32.mrf.mxu1 }
 0x442   :  { %v8138_v0 = vmax.f32 %v7623_v59, 0.0  ;;  %v12324_v48 = vadd.f32 %v7772_v2, %v7660_v26  ;;  %v8169_v55 = vpack.c.bf16 %v8137_v29, %v8133_v63  ;;  %v12362_v26 = vpop.f32.mrf.mxu0  ;;  %v7690_v29 = vadd.f32 %v12193_v23, %v12303_v11 }
 0x443   :  { %v7774_v18 = vpop.f32.mrf.mxu1  ;;  %v7700_v23 = vadd.f32 %v12213_v15, %v12303_v11  ;;  %v7710_v15 = vadd.f32 %v12233_v9, %v12303_v11  ;;  %v7720_v9 = vadd.f32 %v12251_v17, %v12303_v11  ;;  %v7730_v17 = vadd.f32 %v12283_v45, %v12303_v11  ;;  %v13366_v45 = vld [vmem:[#allocation27_spill] sm:$0xff] }
 0x444   :  { %v8170_v27 = vpack.c.bf16 %v8138_v0, %v8134_v22  ;;  %v12326_v20 = vadd.f32 %v7774_v18, %v7662_v57  ;;  %v12370_v62 = vpop.f32.mrf.mxu0  ;;  %v7666_v39 = vadd.f32 %v13366_v45, %v12314_v47  ;;  %v13367_v45 = vld [vmem:[#allocation49_spill] sm:$0xff] }
 0x445   :  { %v12328_v41 = vpop.f32.mrf.mxu1 }
 0x446   :  { %8524 = vmatprep.mubr.bf16.mxu0 %v8170_v27  ;;  %v12378_v18 = vpop.f32.mrf.mxu0 }
 0x447   :  { %v12332_v54 = vpop.f32.mrf.mxu1  ;;  %8525 = vmatmul.mubr.bf16.gmra.mxu0 %v8169_v55 }
 0x448   :  { %v12386_v33 = vpop.f32.mrf.mxu0 }
 0x449   :  { %v7782_v31 = vpop.f32.mrf.mxu1 }
 0x44a   :  { %v12340_v16 = vadd.f32 %v7782_v31, %v7670_v3 }
 0x44b   :  { %v7784_v35 = vpop.f32.mrf.mxu1 }
 0x44c   :  { %v12342_v46 = vadd.f32 %v7784_v35, %v7672_v52  ;;  %v12394_v35 = vpop.f32.mrf.mxu0 }
 0x44d   :  { %v12344_v40 = vpop.f32.mrf.mxu1 }
 0x44f   :  { %v12348_v7 = vpop.f32.mrf.mxu1 }
 0x451   :  { %v7792_v34 = vpop.f32.mrf.mxu1 }
 0x452   :  { %v12356_v50 = vadd.f32 %v7792_v34, %v7680_v12  ;;  %v12402_v34 = vpop.f32.mrf.mxu0 }
 0x453   :  { %v7794_v30 = vpop.f32.mrf.mxu1 }
 0x454   :  { %v12358_v19 = vadd.f32 %v7794_v30, %v7682_v60 }
 0x455   :  { %v12360_v13 = vpop.f32.mrf.mxu1 }
 0x457   :  { %v12364_v59 = vpop.f32.mrf.mxu1 }
 0x459   :  { %v7802_v2 = vpop.f32.mrf.mxu1 }
 0x45a   :  { %v12372_v57 = vadd.f32 %v7802_v2, %v7690_v29 }
 0x45b   :  { %v7804_v22 = vpop.f32.mrf.mxu1 }
 0x45c   :  { %v12374_v0 = vadd.f32 %v7804_v22, %v7692_v51  ;;  %v12410_v51 = vpop.f32.mrf.mxu0 }
 0x45d   :  { %v12376_v63 = vpop.f32.mrf.mxu1 }
 0x45f   :  { %v12380_v27 = vpop.f32.mrf.mxu1 }
 0x461   :  { %v7812_v55 = vpop.f32.mrf.mxu1 }
 0x462   :  { %v12388_v3 = vadd.f32 %v7812_v55, %v7700_v23  ;;  %v12418_v55 = vpop.f32.mrf.mxu0 }
 0x463   :  { %v7814_v31 = vpop.f32.mrf.mxu1 }
 0x464   :  { %v12390_v10 = vadd.f32 %v7814_v31, %v7702_v25 }
 0x465   :  { %v12392_v52 = vpop.f32.mrf.mxu1 }
 0x467   :  { %v12396_v37 = vpop.f32.mrf.mxu1 }
 0x469   :  { %v7822_v12 = vpop.f32.mrf.mxu1 }
 0x46a   :  { %v12404_v60 = vadd.f32 %v7822_v12, %v7710_v15 }
 0x46b   :  { %v7824_v30 = vpop.f32.mrf.mxu1 }
 0x46c   :  { %13353 = vst [vmem:[#allocation56_spill] sm:$0xff] %v12404_v60  ;;  %v12406_v29 = vadd.f32 %v7824_v30, %v7712_v5  ;;  %v12426_v5 = vpop.f32.mrf.mxu0 }
 0x46d   :  { %v12408_v2 = vpop.f32.mrf.mxu1 }
 0x46e   :  { %13354 = vst [vmem:[#allocation55_spill] sm:$0xff] %v12406_v29  ;;  %13355 = vst [vmem:[#allocation53_spill] sm:$0xff] %v12408_v2  ;;  %v12434_v49 = vpop.f32.mrf.mxu0  ;;  %v13368_v29 = vld [vmem:[#allocation47_spill] sm:$0xff] }
 0x46f   :  { %v12412_v22 = vpop.f32.mrf.mxu1 }
 0x470   :  { %13356 = vst [vmem:[#allocation58_spill] sm:$0xff] %v12412_v22 }
 0x471   :  { %v7832_v23 = vpop.f32.mrf.mxu1 }
 0x472   :  { %v12420_v25 = vadd.f32 %v7832_v23, %v7720_v9 }
 0x473   :  { %v7834_v31 = vpop.f32.mrf.mxu1 }
 0x474   :  { %13357 = vst [vmem:[#allocation89_spill] sm:$0xff] %v12420_v25  ;;  %v12422_v15 = vadd.f32 %v7834_v31, %v7722_v58  ;;  %v12442_v25 = vpop.f32.mrf.mxu0 }
 0x475   :  { %v12424_v12 = vpop.f32.mrf.mxu1 }
 0x476   :  { %13358 = vst [vmem:[#allocation35_spill] sm:$0xff] %v12422_v15  ;;  %13359 = vst [vmem:[#allocation90_spill] sm:$0xff] %v12424_v12  ;;  %v13364_v15 = vld [vmem:[#allocation51_spill] sm:$0xff]  ;;  %v12451_v1 = vpop.f32.mrf.mxu0 }
 0x477   :  { %v12428_v30 = vpop.f32.mrf.mxu1 }
 0x478   :  { %13360 = vst [vmem:[#allocation21_spill] sm:$0xff] %v12428_v30  ;;  %v7664_v30 = vadd.f32 %v13364_v15, %v12303_v11  ;;  %v7886_v15 = vadd.f32 %v12322_v43, %v12324_v48 }
 0x479   :  { %v7842_v38 = vpop.f32.mrf.mxu1 }
 0x47a   :  { %v12436_v9 = vadd.f32 %v7842_v38, %v7730_v17  ;;  %v7777_v44 = vadd.f32 %v12328_v41, %v7664_v30  ;;  %v7779_v17 = vadd.f32 %v12332_v54, %v7666_v39  ;;  %v7674_v41 = vadd.f32 %v13367_v45, %v12303_v11 }
 0x47b   :  { %v7844_v23 = vpop.f32.mrf.mxu1 }
 0x47c   :  { %13361 = vst [vmem:[#allocation36_spill] sm:$0xff] %v12436_v9  ;;  %v12438_v58 = vadd.f32 %v7844_v23, %v7732_v24  ;;  %v7888_v23 = vadd.f32 %v12330_v8, %v12326_v20  ;;  %v7890_v9 = vadd.f32 %v12338_v61, %v7777_v44  ;;  %v7892_v60 = vadd.f32 %v12346_v14, %v7779_v17 }
 0x47d   :  { %v12440_v31 = vpop.f32.mrf.mxu1  ;;  %v7676_v20 = vadd.f32 %v13368_v29, %v12314_v47  ;;  %v7787_v8 = vadd.f32 %v12344_v40, %v7674_v41  ;;  %v7898_v14 = vadd.f32 %v12362_v26, %v12342_v46  ;;  %v7686_v46 = vadd.f32 %v12188_v53, %v12314_v47 }
 0x47e   :  { %13362 = vst [vmem:[#allocation20_spill] sm:$0xff] %v12438_v58  ;;  %13363 = vst [vmem:[#allocation91_spill] sm:$0xff] %v12440_v31  ;;  %v12457_v58 = vpop.f32.mrf.mxu0 }
 0x47f   :  { %v12446_v12 = vpop.f32.mrf.mxu1  ;;  %v7789_v48 = vadd.f32 %v12348_v7, %v7676_v20  ;;  %v7684_v7 = vadd.f32 %v12184_v21, %v12303_v11  ;;  %v7799_v21 = vadd.f32 %v12364_v59, %v7686_v46  ;;  %v7694_v59 = vadd.f32 %v12204_v56, %v12303_v11 }
 0x480   :  { %13365 = vst [vmem:[#allocation95_spill] sm:$0xff] %v12446_v12  ;;  %v12467_v44 = vpop.f32.mrf.mxu0 }
 0x481   :  { %v7797_v26 = vadd.f32 %v12360_v13, %v7684_v7 }
 0x482   :  { %v7998_v38 = vpop.f32.mrf.mxu1  ;;  %v12473_v29 = vpop.f32.mrf.mxu0 }
 0x483   :  { %v7999_v39 = vadd.f32 %v7998_v38, %v7886_v15  ;;  %v7900_v38 = vadd.f32 %v12370_v62, %v7787_v8  ;;  %v7908_v8 = vadd.f32 %v12394_v35, %v12358_v19  ;;  %v7696_v19 = vadd.f32 %v12208_v6, %v12314_v47 }
 0x484   :  { %v8000_v24 = vpop.f32.mrf.mxu1  ;;  %v7807_v35 = vadd.f32 %v12376_v63, %v7694_v59  ;;  %v7916_v63 = vadd.f32 %v12418_v55, %v12372_v57 }
 0x485   :  { %v8001_v30 = vadd.f32 %v8000_v24, %v7888_v23  ;;  %v8079_v24 = vmax.f32 %v7999_v39, 0.0 }
 0x486   :  { %v8002_v12 = vpop.f32.mrf.mxu1 }
 0x487   :  { %v8003_v31 = vadd.f32 %v8002_v12, %v7890_v9  ;;  %v8080_v2 = vmax.f32 %v8001_v30, 0.0 }
 0x488   :  { %v8004_v54 = vpop.f32.mrf.mxu1 }
 0x489   :  { %v8005_v61 = vadd.f32 %v8004_v54, %v7892_v60  ;;  %v8083_v22 = vmax.f32 %v8003_v31, 0.0  ;;  %v7896_v60 = vadd.f32 %v12354_v28, %v12340_v16 }
 0x48a   :  { %v8008_v43 = vpop.f32.mrf.mxu1 }
 0x48b   :  { %v8084_v45 = vmax.f32 %v8005_v61, 0.0  ;;  %v8143_v40 = vpack.c.bf16 %v8083_v22, %v8079_v24  ;;  %v8009_v15 = vadd.f32 %v8008_v43, %v7896_v60  ;;  %v12483_v22 = vpop.f32.mrf.mxu0  ;;  %v7910_v61 = vadd.f32 %v12402_v34, %v7797_v26 }
 0x48c   :  { %v8010_v12 = vpop.f32.mrf.mxu1  ;;  %v7906_v43 = vadd.f32 %v12386_v33, %v12356_v50 }
 0x48d   :  { %v8144_v9 = vpack.c.bf16 %v8084_v45, %v8080_v2  ;;  %v8011_v17 = vadd.f32 %v8010_v12, %v7898_v14  ;;  %v7902_v2 = vadd.f32 %v12378_v18, %v7789_v48  ;;  %v8087_v54 = vmax.f32 %v8009_v15, 0.0  ;;  %v12489_v53 = vpop.f32.mrf.mxu0 }
 0x48e   :  { %v8012_v31 = vpop.f32.mrf.mxu1  ;;  %v7912_v12 = vadd.f32 %v12410_v51, %v7799_v21  ;;  %v7918_v51 = vadd.f32 %v12426_v5, %v12374_v0 }
 0x48f   :  { %v8013_v23 = vadd.f32 %v8012_v31, %v7900_v38  ;;  %8565 = vmatprep.mubr.bf16.mxu1 %v8144_v9  ;;  %v8088_v30 = vmax.f32 %v8011_v17, 0.0  ;;  %v7939_v38 = vpop.f32.mrf.mxu0 }
 0x490   :  { %v8014_v41 = vpop.f32.mrf.mxu1  ;;  %8566 = vmatmul.mubr.bf16.vlgmr.msra.gmra.mxu1 %v8143_v40  ;;  %v7809_v40 = vadd.f32 %v12380_v27, %v7696_v19 }
 0x491   :  { %v8015_v62 = vadd.f32 %v8014_v41, %v7902_v2  ;;  %v8091_v16 = vmax.f32 %v8013_v23, 0.0  ;;  %v7920_v23 = vadd.f32 %v12434_v49, %v7807_v35  ;;  %v7941_v2 = vpop.f32.mrf.mxu0  ;;  %v7704_v41 = vadd.f32 %v12224_v4, %v12303_v11 }
 0x492   :  { %v8018_v28 = vpop.f32.mrf.mxu1  ;;  %v7922_v26 = vadd.f32 %v12442_v25, %v7809_v40  ;;  %v7706_v49 = vadd.f32 %v12228_v32, %v12314_v47 }
 0x493   :  { %v8092_v39 = vmax.f32 %v8015_v62, 0.0  ;;  %v8147_v13 = vpack.c.bf16 %v8091_v16, %v8087_v54  ;;  %v8019_v9 = vadd.f32 %v8018_v28, %v7906_v43  ;;  %v7817_v0 = vadd.f32 %v12392_v52, %v7704_v41  ;;  %v12511_v28 = vpop.f32.mrf.mxu0 }
 0x494   :  { %v8020_v20 = vpop.f32.mrf.mxu1  ;;  %v7819_v4 = vadd.f32 %v12396_v37, %v7706_v49  ;;  %v7926_v52 = vadd.f32 %v12451_v1, %v12388_v3  ;;  %v13376_v49 = vld [vmem:[#allocation21_spill] sm:$0xff] }
 0x495   :  { %v8148_v18 = vpack.c.bf16 %v8092_v39, %v8088_v30  ;;  %v8021_v45 = vadd.f32 %v8020_v20, %v7908_v8  ;;  %v8095_v31 = vmax.f32 %v8019_v9, 0.0  ;;  %v7928_v20 = vadd.f32 %v12457_v58, %v12390_v10  ;;  %v7947_v32 = vpop.f32.mrf.mxu0  ;;  %v13369_v58 = vld [vmem:[#allocation53_spill] sm:$0xff]  ;;  %v13370_v9 = vld [vmem:[#allocation58_spill] sm:$0xff] }
 0x496   :  { %v8022_v48 = vpop.f32.mrf.mxu1  ;;  %v7716_v10 = vadd.f32 %v12248_v36, %v12314_v47  ;;  %v13372_v36 = vld [vmem:[#allocation56_spill] sm:$0xff] }
 0x497   :  { %v8023_v24 = vadd.f32 %v8022_v48, %v7910_v61  ;;  %8573 = vmatprep.mubr.bf16.mxu1 %v8148_v18  ;;  %v8096_v56 = vmax.f32 %v8021_v45, 0.0  ;;  %v7930_v18 = vadd.f32 %v12467_v44, %v7817_v0  ;;  %v7932_v48 = vadd.f32 %v12473_v29, %v7819_v4  ;;  %v13371_v29 = vld [vmem:[#allocation55_spill] sm:$0xff] }
 0x498   :  { %v8024_v14 = vpop.f32.mrf.mxu1  ;;  %8574 = vmatmul.mubr.bf16.gmra.mxu1 %v8147_v13  ;;  %v7714_v13 = vadd.f32 %v12244_v42, %v12303_v11 }
 0x499   :  { %v8025_v34 = vadd.f32 %v8024_v14, %v7912_v12  ;;  %v8099_v50 = vmax.f32 %v8023_v24, 0.0  ;;  %v7949_v12 = vpop.f32.mrf.mxu0  ;;  %v7829_v14 = vadd.f32 %v13370_v9, %v7716_v10  ;;  %v13381_v10 = vld [vmem:[#allocation91_spill] sm:$0xff] }
 0x49a   :  { %v8028_v33 = vpop.f32.mrf.mxu1  ;;  %v7827_v44 = vadd.f32 %v13369_v58, %v7714_v13 }
 0x49b   :  { %v8100_v60 = vmax.f32 %v8025_v34, 0.0  ;;  %v8151_v6 = vpack.c.bf16 %v8099_v50, %v8095_v31  ;;  %v8029_v62 = vadd.f32 %v8028_v33, %v7916_v63  ;;  %v7938_v33 = vadd.f32 %v12489_v53, %v13371_v29 }
 0x49c   :  { %v8030_v7 = vpop.f32.mrf.mxu1  ;;  %v7940_v40 = vadd.f32 %v7939_v38, %v7827_v44  ;;  %v7936_v31 = vadd.f32 %v12483_v22, %v13372_v36  ;;  %v7942_v63 = vadd.f32 %v7941_v2, %v7829_v14  ;;  %v13375_v38 = vld [vmem:[#allocation90_spill] sm:$0xff]  ;;  %v13377_v2 = vld [vmem:[#allocation35_spill] sm:$0xff] }
 0x49d   :  { %v8152_v17 = vpack.c.bf16 %v8100_v60, %v8096_v56  ;;  %v8031_v27 = vadd.f32 %v8030_v7, %v7918_v51  ;;  %v8103_v39 = vmax.f32 %v8029_v62, 0.0  ;;  %v7951_v56 = vpop.f32.mrf.mxu0 }
 0x49e   :  { %v8032_v15 = vpop.f32.mrf.mxu1 }
 0x49f   :  { %v8033_v46 = vadd.f32 %v8032_v15, %v7920_v23  ;;  %8581 = vmatprep.mubr.bf16.mxu1 %v8152_v17  ;;  %v8104_v21 = vmax.f32 %v8031_v27, 0.0  ;;  %v13373_v17 = vld [vmem:[#allocation54_spill] sm:$0xff]  ;;  %v13374_v27 = vld [vmem:[#allocation57_spill] sm:$0xff]  ;;  %v7955_v62 = vpop.f32.mrf.mxu0 }
 0x4a0   :  { %v8034_v16 = vpop.f32.mrf.mxu1  ;;  %8582 = vmatmul.mubr.bf16.gmra.mxu1 %v8151_v6  ;;  %v7724_v51 = vadd.f32 %v13373_v17, %v12303_v11  ;;  %v7726_v53 = vadd.f32 %v13374_v27, %v12314_v47 }
 0x4a1   :  { %v8035_v5 = vadd.f32 %v8034_v16, %v7922_v26  ;;  %v8107_v57 = vmax.f32 %v8033_v46, 0.0 }
 0x4a2   :  { %v8038_v55 = vpop.f32.mrf.mxu1  ;;  %v7837_v46 = vadd.f32 %v13375_v38, %v7724_v51  ;;  %v7839_v0 = vadd.f32 %v13376_v49, %v7726_v53 }
 0x4a3   :  { %v8108_v30 = vmax.f32 %v8035_v5, 0.0  ;;  %v8155_v8 = vpack.c.bf16 %v8107_v57, %v8103_v39  ;;  %v8039_v59 = vadd.f32 %v8038_v55, %v7926_v52  ;;  %v13379_v52 = vld [vmem:[#allocation78_spill] sm:$0xff] }
 0x4a4   :  { %v8040_v54 = vpop.f32.mrf.mxu1  ;;  %v7950_v39 = vadd.f32 %v7949_v12, %v7837_v46 }
 0x4a5   :  { %v8156_v25 = vpack.c.bf16 %v8108_v30, %v8104_v21  ;;  %v8041_v37 = vadd.f32 %v8040_v54, %v7928_v20  ;;  %v8111_v35 = vmax.f32 %v8039_v59, 0.0  ;;  %v7948_v30 = vadd.f32 %v7947_v32, %v13377_v2  ;;  %v7957_v54 = vpop.f32.mrf.mxu0  ;;  %v13378_v20 = vld [vmem:[#allocation89_spill] sm:$0xff] }
 0x4a6   :  { %v8042_v61 = vpop.f32.mrf.mxu1 }
 0x4a7   :  { %v8043_v43 = vadd.f32 %v8042_v61, %v7930_v18  ;;  %8589 = vmatprep.mubr.bf16.mxu1 %v8156_v25  ;;  %v8112_v42 = vmax.f32 %v8041_v37, 0.0  ;;  %v7946_v18 = vadd.f32 %v12511_v28, %v13378_v20  ;;  %v7734_v61 = vadd.f32 %v13379_v52, %v12303_v11 }
 0x4a8   :  { %v8044_v45 = vpop.f32.mrf.mxu1  ;;  %8590 = vmatmul.mubr.bf16.gmra.mxu1 %v8155_v8  ;;  %v13385_v52 = vlaneseq }
 0x4a9   :  { %v8045_v24 = vadd.f32 %v8044_v45, %v7932_v48  ;;  %v8115_v1 = vmax.f32 %v8043_v43, 0.0  ;;  %v7952_v43 = vadd.f32 %v7951_v56, %v7839_v0  ;;  %v13380_v45 = vld [vmem:[#allocation34_spill] sm:$0xff]  ;;  %v7847_v58 = vadd.f32 %v13381_v10, %v7734_v61 }
 0x4aa   :  { %v8048_v3 = vpop.f32.mrf.mxu1  ;;  %v7736_v32 = vadd.f32 %v13380_v45, %v12314_v47  ;;  %v12558_v61 = vand.u32 127, %v13385_v52 }
 0x4ab   :  { %v8116_v19 = vmax.f32 %v8045_v24, 0.0  ;;  %v8159_v60 = vpack.c.bf16 %v8115_v1, %v8111_v35  ;;  %v8049_v15 = vadd.f32 %v8048_v3, %v7936_v31  ;;  %v7959_v24 = vpop.f32.mrf.mxu0  ;;  %v13382_v1 = vld [vmem:[#allocation95_spill] sm:$0xff]  ;;  %v13383_v35 = vld [vmem:[#allocation20_spill] sm:$0xff] }
 0x4ac   :  { %v8050_v34 = vpop.f32.mrf.mxu1  ;;  %v7849_v3 = vadd.f32 %v13382_v1, %v7736_v32  ;;  %vm8648_vm0 = vcmp.lt.s32.totalorder %v12558_v61, 10 }
 0x4ad   :  { %v8160_v50 = vpack.c.bf16 %v8116_v19, %v8112_v42  ;;  %v8051_v23 = vadd.f32 %v8050_v34, %v7938_v33  ;;  %v8119_v55 = vmax.f32 %v8049_v15, 0.0  ;;  %v7958_v34 = vadd.f32 %v7957_v54, %v13383_v35  ;;  %v7961_v29 = vpop.f32.mrf.mxu0 }
 0x4ae   :  { %v8052_v7 = vpop.f32.mrf.mxu1  ;;  %v7962_v31 = vadd.f32 %v7961_v29, %v7849_v3 }
 0x4af   :  { %v8053_v6 = vadd.f32 %v8052_v7, %v7940_v40  ;;  %8597 = vmatprep.mubr.bf16.mxu1 %v8160_v50  ;;  %v8120_v5 = vmax.f32 %v8051_v23, 0.0  ;;  %v7960_v50 = vadd.f32 %v7959_v24, %v7847_v58  ;;  %v13384_v40 = vld [vmem:[#allocation36_spill] sm:$0xff] }
 0x4b0   :  { %v8054_v41 = vpop.f32.mrf.mxu1  ;;  %8598 = vmatmul.mubr.bf16.gmra.mxu1 %v8159_v60  ;;  %v7956_v47 = vadd.f32 %v7955_v62, %v13384_v40 }
 0x4b1   :  { %v8055_v26 = vadd.f32 %v8054_v41, %v7942_v63  ;;  %v8123_v16 = vmax.f32 %v8053_v6, 0.0 }
 0x4b2   :  { %v8058_v22 = vpop.f32.mrf.mxu1 }
 0x4b3   :  { %v8124_v57 = vmax.f32 %v8055_v26, 0.0  ;;  %v8163_v25 = vpack.c.bf16 %v8123_v16, %v8119_v55  ;;  %v8059_v48 = vadd.f32 %v8058_v22, %v7946_v18 }
 0x4b4   :  { %v8060_v4 = vpop.f32.mrf.mxu1 }
 0x4b5   :  { %v8164_v21 = vpack.c.bf16 %v8124_v57, %v8120_v5  ;;  %v8061_v13 = vadd.f32 %v8060_v4, %v7948_v30  ;;  %v8127_v14 = vmax.f32 %v8059_v48, 0.0 }
 0x4b6   :  { %v8062_v8 = vpop.f32.mrf.mxu1 }
 0x4b7   :  { %v8063_v37 = vadd.f32 %v8062_v8, %v7950_v39  ;;  %8605 = vmatprep.mubr.bf16.mxu1 %v8164_v21  ;;  %v8128_v9 = vmax.f32 %v8061_v13, 0.0 }
 0x4b8   :  { %v8064_v59 = vpop.f32.mrf.mxu1  ;;  %8606 = vmatmul.mubr.bf16.gmra.mxu1 %v8163_v25  ;;  %v12553_v25 = vld [vmem:[#allocation13] ss:$0 sm:$0xff] }
 0x4b9   :  { %v8065_v44 = vadd.f32 %v8064_v59, %v7952_v43  ;;  %v8131_v12 = vmax.f32 %v8063_v37, 0.0 }
 0x4ba   :  { %v8068_v28 = vpop.f32.mrf.mxu1 }
 0x4bb   :  { %v8132_v11 = vmax.f32 %v8065_v44, 0.0  ;;  %v8167_v33 = vpack.c.bf16 %v8131_v12, %v8127_v14  ;;  %v8069_v7 = vadd.f32 %v8068_v28, %v7956_v47 }
 0x4bc   :  { %v8070_v42 = vpop.f32.mrf.mxu1 }
 0x4bd   :  { %v8168_v19 = vpack.c.bf16 %v8132_v11, %v8128_v9  ;;  %v8071_v60 = vadd.f32 %v8070_v42, %v7958_v34  ;;  %v8135_v15 = vmax.f32 %v8069_v7, 0.0 }
 0x4be   :  { %v8072_v56 = vpop.f32.mrf.mxu1 }
 0x4bf   :  { %v8073_v36 = vadd.f32 %v8072_v56, %v7960_v50  ;;  %8613 = vmatprep.mubr.bf16.mxu1 %v8168_v19  ;;  %v8136_v6 = vmax.f32 %v8071_v60, 0.0 }
 0x4c0   :  { %v8074_v17 = vpop.f32.mrf.mxu1  ;;  %8614 = vmatmul.mubr.bf16.gmra.mxu1 %v8167_v33 }
 0x4c1   :  { %v8075_v51 = vadd.f32 %v8074_v17, %v7962_v31  ;;  %v8139_v23 = vmax.f32 %v8073_v36, 0.0 }
 0x4c3   :  { %v8140_v63 = vmax.f32 %v8075_v51, 0.0  ;;  %v8171_v27 = vpack.c.bf16 %v8139_v23, %v8135_v15 }
 0x4c5   :  { %v8172_v41 = vpack.c.bf16 %v8140_v63, %v8136_v6 }
 0x4c7   :  { %8621 = vmatprep.mubr.bf16.mxu1 %v8172_v41 }
 0x4c8   :  { %8622 = vmatmul.mubr.bf16.gmra.mxu1 %v8171_v27 }
 0x4cf   :  { %v9726_v53 = vpop.f32.mrf.mxu0 }
 0x4d1   :  { %v9727_v38 = vpop.f32.mrf.mxu0 }
 0x4d2   :  { %v9728_v54 = vadd.f32 %v9727_v38, %v9726_v53 }
 0x4d3   :  { %v9729_v46 = vpop.f32.mrf.mxu0 }
 0x4d4   :  { %v8471_v13 = vadd.f32 %v9728_v54, %v12553_v25 }
 0x4d5   :  { %v9730_v26 = vpop.f32.mrf.mxu0 }
 0x4d6   :  { %v9731_v37 = vadd.f32 %v9730_v26, %v9729_v46 }
 0x4d7   :  { %v9732_v62 = vpop.f32.mrf.mxu0 }
 0x4d8   :  { %v8474_v10 = vadd.f32 %v9731_v37, %v12553_v25 }
 0x4d9   :  { %v9733_v16 = vpop.f32.mrf.mxu0 }
 0x4da   :  { %v9734_v58 = vadd.f32 %v9733_v16, %v9732_v62 }
 0x4db   :  { %v9735_v22 = vpop.f32.mrf.mxu0 }
 0x4dc   :  { %v8479_v11 = vadd.f32 %v9734_v58, %v12553_v25 }
 0x4dd   :  { %v9736_v49 = vpop.f32.mrf.mxu0 }
 0x4de   :  { %v9737_v14 = vadd.f32 %v9736_v49, %v9735_v22 }
 0x4df   :  { %v9738_v0 = vpop.f32.mrf.mxu0 }
 0x4e0   :  { %v8482_v40 = vadd.f32 %v9737_v14, %v12553_v25 }
 0x4e1   :  { %v9739_v5 = vpop.f32.mrf.mxu0 }
 0x4e2   :  { %v9740_v47 = vadd.f32 %v9739_v5, %v9738_v0 }
 0x4e3   :  { %v9741_v57 = vpop.f32.mrf.mxu0 }
 0x4e4   :  { %v8487_v23 = vadd.f32 %v9740_v47, %v12553_v25 }
 0x4e5   :  { %v9742_v55 = vpop.f32.mrf.mxu0 }
 0x4e6   :  { %v9743_v6 = vadd.f32 %v9742_v55, %v9741_v57 }
 0x4e7   :  { %v9744_v4 = vpop.f32.mrf.mxu0 }
 0x4e8   :  { %v8490_v26 = vadd.f32 %v9743_v6, %v12553_v25 }
 0x4e9   :  { %v9745_v21 = vpop.f32.mrf.mxu0 }
 0x4ea   :  { %v9746_v62 = vadd.f32 %v9745_v21, %v9744_v4 }
 0x4eb   :  { %v12547_v2 = vpop.f32.mrf.mxu0 }
 0x4ec   :  { %v8495_v54 = vadd.f32 %v9746_v62, %v12553_v25 }
 0x4ed   :  { %v12549_v30 = vpop.f32.mrf.mxu0 }
 0x4ef   :  { %v12551_v39 = vpop.f32.mrf.mxu0 }
 0x4f1   :  { %v12555_v20 = vpop.f32.mrf.mxu0 }
 0x4f3   :  { %v12561_v48 = vpop.f32.mrf.mxu0 }
 0x4f5   :  { %v12565_v12 = vpop.f32.mrf.mxu0 }
 0x4f7   :  { %v12573_v35 = vpop.f32.mrf.mxu0 }
 0x4f9   :  { %v9757_v36 = vpop.f32.mrf.mxu0 }
 0x4fb   :  { %v9759_v41 = vpop.f32.mrf.mxu0 }
 0x4fd   :  { %v9760_v49 = vpop.f32.mrf.mxu0 }
 0x4ff   :  { %v9762_v4 = vpop.f32.mrf.mxu0 }
 0x550   :  { %v9790_v18 = vpop.f32.mrf.mxu1 }
 0x552   :  { %v9791_v8 = vpop.f32.mrf.mxu1 }
 0x553   :  { %v9792_v43 = vadd.f32 %v9791_v8, %v9790_v18  ;;  %v9749_v18 = vadd.f32 %v12549_v30, %v12547_v2  ;;  %v9763_v2 = vpop.f32.mrf.mxu0 }
 0x554   :  { %v9793_v59 = vpop.f32.mrf.mxu1 }
 0x555   :  { %v8568_v45 = vadd.f32 %v9792_v43, %v8471_v13 }
 0x556   :  { %v9794_v32 = vpop.f32.mrf.mxu1 }
 0x557   :  { %v9795_v44 = vadd.f32 %v9794_v32, %v9793_v59  ;;  %v8630_v24 = vmax.f32 %v8568_v45, 0.0  ;;  %v8498_v59 = vadd.f32 %v9749_v18, %v12553_v25  ;;  %v9752_v45 = vadd.f32 %v12555_v20, %v12551_v39  ;;  %v9765_v39 = vpop.f32.mrf.mxu0 }
 0x558   :  { %v9796_v28 = vpop.f32.mrf.mxu1 }
 0x559   :  { %v8571_v1 = vadd.f32 %v9795_v44, %v8474_v10  ;;  %v12569_v3 = vsel %vm8648_vm0, %v8630_v24, -1e+30  ;;  %v9766_v47 = vpop.f32.mrf.mxu0 }
 0x55a   :  { %v9797_v9 = vpop.f32.mrf.mxu1  ;;  %8665 = vmax.xlane.f32.xlu0 %v12569_v3 }
 0x55b   :  { %v9798_v42 = vadd.f32 %v9797_v9, %v9796_v28  ;;  %v8631_v19 = vmax.f32 %v8571_v1, 0.0  ;;  %v8503_v28 = vadd.f32 %v9752_v45, %v12553_v25  ;;  %v9755_v1 = vadd.f32 %v12565_v12, %v12561_v48  ;;  %v9768_v6 = vpop.f32.mrf.mxu0 }
 0x55c   :  { %v9799_v34 = vpop.f32.mrf.mxu1 }
 0x55d   :  { %v8576_v50 = vadd.f32 %v9798_v42, %v8479_v11  ;;  %v12577_v29 = vsel %vm8648_vm0, %v8631_v19, -1e+30  ;;  %v9769_v62 = vpop.f32.mrf.mxu0 }
 0x55e   :  { %v9800_v33 = vpop.f32.mrf.mxu1  ;;  %8667 = vmax.xlane.f32.xlu0 %v12577_v29 }
 0x55f   :  { %v9801_v56 = vadd.f32 %v9800_v33, %v9799_v34  ;;  %v8632_v60 = vmax.f32 %v8576_v50, 0.0  ;;  %v8506_v34 = vadd.f32 %v9755_v1, %v12553_v25  ;;  %v9758_v50 = vadd.f32 %v9757_v36, %v12573_v35  ;;  %v9771_v18 = vpop.f32.mrf.mxu0 }
 0x560   :  { %v9802_v31 = vpop.f32.mrf.mxu1 }
 0x561   :  { %v8579_v7 = vadd.f32 %v9801_v56, %v8482_v40  ;;  %v12583_v17 = vsel %vm8648_vm0, %v8632_v60, -1e+30 }
 0x562   :  { %v9803_v51 = vpop.f32.mrf.mxu1  ;;  %8669 = vmax.xlane.f32.xlu1 %v12583_v17 }
 0x563   :  { %v9804_v63 = vadd.f32 %v9803_v51, %v9802_v31  ;;  %v8633_v15 = vmax.f32 %v8579_v7, 0.0  ;;  %v8511_v31 = vadd.f32 %v9758_v50, %v12553_v25  ;;  %v9761_v7 = vadd.f32 %v9760_v49, %v9759_v41 }
 0x564   :  { %v9805_v27 = vpop.f32.mrf.mxu1 }
 0x565   :  { %v8584_v53 = vadd.f32 %v9804_v63, %v8487_v23  ;;  %v12589_v38 = vsel %vm8648_vm0, %v8633_v15, -1e+30 }
 0x566   :  { %v9806_v46 = vpop.f32.mrf.mxu1  ;;  %8671 = vmax.xlane.f32.xlu1 %v12589_v38 }
 0x567   :  { %v9807_v16 = vadd.f32 %v9806_v46, %v9805_v27  ;;  %v8634_v22 = vmax.f32 %v8584_v53, 0.0  ;;  %v8514_v27 = vadd.f32 %v9761_v7, %v12553_v25  ;;  %v9764_v53 = vadd.f32 %v9763_v2, %v9762_v4 }
 0x568   :  { %v9808_v0 = vpop.f32.mrf.mxu1 }
 0x569   :  { %v8587_v5 = vadd.f32 %v9807_v16, %v8490_v26  ;;  %v12595_v57 = vsel %vm8648_vm0, %v8634_v22, -1e+30 }
 0x56a   :  { %v9809_v55 = vpop.f32.mrf.mxu1  ;;  %8673 = vmax.xlane.f32.xlu0 %v12595_v57 }
 0x56b   :  { %v9810_v8 = vadd.f32 %v9809_v55, %v9808_v0  ;;  %v8635_v52 = vmax.f32 %v8587_v5, 0.0  ;;  %v8519_v0 = vadd.f32 %v9764_v53, %v12553_v25  ;;  %v9767_v5 = vadd.f32 %v9766_v47, %v9765_v39 }
 0x56c   :  { %v9811_v21 = vpop.f32.mrf.mxu1 }
 0x56d   :  { %v8592_v13 = vadd.f32 %v9810_v8, %v8495_v54  ;;  %v12603_v37 = vsel %vm8648_vm0, %v8635_v52, -1e+30 }
 0x56e   :  { %v9812_v43 = vpop.f32.mrf.mxu1  ;;  %8675 = vmax.xlane.f32.xlu1 %v12603_v37 }
 0x56f   :  { %v9813_v32 = vadd.f32 %v9812_v43, %v9811_v21  ;;  %v8636_v10 = vmax.f32 %v8592_v13, 0.0  ;;  %v8522_v13 = vadd.f32 %v9767_v5, %v12553_v25  ;;  %v9770_v43 = vadd.f32 %v9769_v62, %v9768_v6 }
 0x570   :  { %v9814_v30 = vpop.f32.mrf.mxu1 }
 0x571   :  { %v8595_v58 = vadd.f32 %v9813_v32, %v8498_v59  ;;  %v12611_v44 = vsel %vm8648_vm0, %v8636_v10, -1e+30  ;;  %v9772_v32 = vpop.f32.mrf.mxu0 }
 0x572   :  { %v9815_v24 = vpop.f32.mrf.mxu1  ;;  %8677 = vmax.xlane.f32.xlu0 %v12611_v44 }
 0x573   :  { %v9816_v9 = vadd.f32 %v9815_v24, %v9814_v30  ;;  %v8637_v11 = vmax.f32 %v8595_v58, 0.0  ;;  %v8527_v24 = vadd.f32 %v9770_v43, %v12553_v25 }
 0x574   :  { %v9817_v20 = vpop.f32.mrf.mxu1 }
 0x575   :  { %v8600_v14 = vadd.f32 %v9816_v9, %v8503_v28  ;;  %v12619_v42 = vsel %vm8648_vm0, %v8637_v11, -1e+30  ;;  %v9773_v28 = vadd.f32 %v9772_v32, %v9771_v18 }
 0x576   :  { %v9818_v19 = vpop.f32.mrf.mxu1  ;;  %8679 = vmax.xlane.f32.xlu1 %v12619_v42 }
 0x577   :  { %v9819_v33 = vadd.f32 %v9818_v19, %v9817_v20  ;;  %v8638_v40 = vmax.f32 %v8600_v14, 0.0  ;;  %v8530_v19 = vadd.f32 %v9773_v28, %v12553_v25 }
 0x578   :  { %v9820_v48 = vpop.f32.mrf.mxu1 }
 0x579   :  { %v8603_v12 = vadd.f32 %v9819_v33, %v8506_v34  ;;  %v12626_v56 = vsel %vm8648_vm0, %v8638_v40, -1e+30 }
 0x57a   :  { %v9821_v60 = vpop.f32.mrf.mxu1  ;;  %8681 = vmax.xlane.f32.xlu0 %v12626_v56 }
 0x57b   :  { %v9822_v51 = vadd.f32 %v9821_v60, %v9820_v48  ;;  %v8639_v23 = vmax.f32 %v8603_v12, 0.0 }
 0x57c   :  { %v9823_v63 = vpop.f32.mrf.mxu1 }
 0x57d   :  { %v8608_v35 = vadd.f32 %v9822_v51, %v8511_v31  ;;  %v12632_v36 = vsel %vm8648_vm0, %v8639_v23, -1e+30 }
 0x57e   :  { %v9824_v15 = vpop.f32.mrf.mxu1  ;;  %8683 = vmax.xlane.f32.xlu1 %v12632_v36 }
 0x57f   :  { %v9825_v46 = vadd.f32 %v9824_v15, %v9823_v63  ;;  %v8640_v26 = vmax.f32 %v8608_v35, 0.0 }
 0x580   :  { %v9826_v16 = vpop.f32.mrf.mxu1 }
 0x581   :  { %v8611_v41 = vadd.f32 %v9825_v46, %v8514_v27  ;;  %v12638_v22 = vsel %vm8648_vm0, %v8640_v26, -1e+30 }
 0x582   :  { %v9827_v49 = vpop.f32.mrf.mxu1  ;;  %8685 = vmax.xlane.f32.xlu0 %v12638_v22 }
 0x583   :  { %v9828_v55 = vadd.f32 %v9827_v49, %v9826_v16  ;;  %v8641_v54 = vmax.f32 %v8611_v41, 0.0 }
 0x584   :  { %v9829_v8 = vpop.f32.mrf.mxu1 }
 0x585   :  { %v8616_v52 = vadd.f32 %v9828_v55, %v8519_v0  ;;  %v12644_v4 = vsel %vm8648_vm0, %v8641_v54, -1e+30 }
 0x586   :  { %v9830_v21 = vpop.f32.mrf.mxu1  ;;  %8687 = vmax.xlane.f32.xlu1 %v12644_v4 }
 0x587   :  { %v9831_v59 = vadd.f32 %v9830_v21, %v9829_v8  ;;  %v8642_v45 = vmax.f32 %v8616_v52, 0.0 }
 0x588   :  { %v9832_v10 = vpop.f32.mrf.mxu1 }
 0x589   :  { %v8619_v2 = vadd.f32 %v9831_v59, %v8522_v13  ;;  %v12650_v30 = vsel %vm8648_vm0, %v8642_v45, -1e+30 }
 0x58a   :  { %v9833_v58 = vpop.f32.mrf.mxu1  ;;  %8689 = vmax.xlane.f32.xlu0 %v12650_v30 }
 0x58b   :  { %v9834_v1 = vadd.f32 %v9833_v58, %v9832_v10  ;;  %v8643_v9 = vmax.f32 %v8619_v2, 0.0 }
 0x58c   :  { %v9835_v11 = vpop.f32.mrf.mxu1 }
 0x58d   :  { %v8624_v39 = vadd.f32 %v9834_v1, %v8527_v24  ;;  %v12656_v20 = vsel %vm8648_vm0, %v8643_v9, -1e+30 }
 0x58e   :  { %v9836_v14 = vpop.f32.mrf.mxu1  ;;  %8691 = vmax.xlane.f32.xlu1 %v12656_v20 }
 0x58f   :  { %v9837_v34 = vadd.f32 %v9836_v14, %v9835_v11  ;;  %v8644_v50 = vmax.f32 %v8624_v39, 0.0 }
 0x591   :  { %v8627_v33 = vadd.f32 %v9837_v34, %v8530_v19  ;;  %v12662_v40 = vsel %vm8648_vm0, %v8644_v50, -1e+30 }
 0x592   :  { %8693 = vmax.xlane.f32.xlu0 %v12662_v40 }
 0x593   :  { %v8645_v47 = vmax.f32 %v8627_v33, 0.0 }
 0x595   :  { %v12667_v48 = vsel %vm8648_vm0, %v8645_v47, -1e+30 }
 0x596   :  { %8695 = vmax.xlane.f32.xlu1 %v12667_v48 }
 0x5e3   :  { %v8666_v12 = vpop.xlane.xlu0 %8665 }
 0x5e4   :  { %v8697_v60 = vsub.f32 %v12569_v3, %v8666_v12 }
 0x5e6   :  { %v8713_v25 = vmul.f32 1.442695, %v8697_v60 }
 0x5e7   :  { %v8668_v31 = vpop.xlane.xlu0 %8667 }
 0x5e8   :  { %10270 = vpow2.f32 %v8713_v25  ;;  %v8698_v7 = vsub.f32 %v12577_v29, %v8668_v31 }
 0x5ea   :  { %v8715_v51 = vmul.f32 1.442695, %v8698_v7 }
 0x5eb   :  { %v8670_v23 = vpop.xlane.xlu1 %8669 }
 0x5ec   :  { %10272 = vpow2.f32 %v8715_v51  ;;  %v8699_v6 = vsub.f32 %v12583_v17, %v8670_v23 }
 0x5ee   :  { %v8717_v63 = vmul.f32 1.442695, %v8699_v6 }
 0x5ef   :  { %v8672_v35 = vpop.xlane.xlu1 %8671 }
 0x5f0   :  { %10274 = vpow2.f32 %v8717_v63  ;;  %v8700_v61 = vsub.f32 %v12589_v38, %v8672_v35 }
 0x5f2   :  { %v8719_v15 = vmul.f32 1.442695, %v8700_v61 }
 0x5f3   :  { %v8674_v27 = vpop.xlane.xlu0 %8673 }
 0x5f4   :  { %10276 = vpow2.f32 %v8719_v15  ;;  %v8701_v3 = vsub.f32 %v12595_v57, %v8674_v27 }
 0x5f5   :  { %v12675_v53 = vpop.eup %10270 }
 0x5f6   :  { %v8721_v46 = vmul.f32 1.442695, %v8701_v3  ;;  %8745 = vadd.xlane.f32.xlu0 %v12675_v53 }
 0x5f7   :  { %v8676_v29 = vpop.xlane.xlu1 %8675 }
 0x5f8   :  { %10278 = vpow2.f32 %v8721_v46  ;;  %v8702_v26 = vsub.f32 %v12603_v37, %v8676_v29 }
 0x5f9   :  { %v12679_v17 = vpop.eup %10272 }
 0x5fa   :  { %v8723_v62 = vmul.f32 1.442695, %v8702_v26  ;;  %8747 = vadd.xlane.f32.xlu1 %v12679_v17 }
 0x5fb   :  { %v8678_v38 = vpop.xlane.xlu0 %8677 }
 0x5fc   :  { %10280 = vpow2.f32 %v8723_v62  ;;  %v8703_v16 = vsub.f32 %v12611_v44, %v8678_v38 }
 0x5fd   :  { %v12683_v41 = vpop.eup %10274 }
 0x5fe   :  { %v8725_v57 = vmul.f32 1.442695, %v8703_v16  ;;  %8749 = vadd.xlane.f32.xlu0 %v12683_v41 }
 0x5ff   :  { %v8680_v49 = vpop.xlane.xlu1 %8679 }
 0x600   :  { %10282 = vpow2.f32 %v8725_v57  ;;  %v8704_v0 = vsub.f32 %v12619_v42, %v8680_v49 }
 0x601   :  { %v12687_v5 = vpop.eup %10276 }
 0x602   :  { %v8727_v37 = vmul.f32 1.442695, %v8704_v0  ;;  %8751 = vadd.xlane.f32.xlu1 %v12687_v5 }
 0x603   :  { %v8682_v55 = vpop.xlane.xlu0 %8681 }
 0x604   :  { %10284 = vpow2.f32 %v8727_v37  ;;  %v8705_v54 = vsub.f32 %v12626_v56, %v8682_v55 }
 0x605   :  { %v12691_v18 = vpop.eup %10278 }
 0x606   :  { %v8729_v44 = vmul.f32 1.442695, %v8705_v54  ;;  %8753 = vadd.xlane.f32.xlu0 %v12691_v18 }
 0x607   :  { %v8684_v8 = vpop.xlane.xlu1 %8683 }
 0x608   :  { %10286 = vpow2.f32 %v8729_v44  ;;  %v8706_v52 = vsub.f32 %v12632_v36, %v8684_v8 }
 0x609   :  { %v12695_v21 = vpop.eup %10280 }
 0x60a   :  { %v8731_v42 = vmul.f32 1.442695, %v8706_v52  ;;  %8755 = vadd.xlane.f32.xlu1 %v12695_v21 }
 0x60b   :  { %v8686_v13 = vpop.xlane.xlu0 %8685 }
 0x60c   :  { %10288 = vpow2.f32 %v8731_v42  ;;  %v8707_v43 = vsub.f32 %v12638_v22, %v8686_v13 }
 0x60d   :  { %v12699_v59 = vpop.eup %10282 }
 0x60e   :  { %v8733_v56 = vmul.f32 1.442695, %v8707_v43  ;;  %8757 = vadd.xlane.f32.xlu0 %v12699_v59 }
 0x60f   :  { %v8688_v45 = vpop.xlane.xlu1 %8687 }
 0x610   :  { %10290 = vpow2.f32 %v8733_v56  ;;  %v8708_v32 = vsub.f32 %v12644_v4, %v8688_v45 }
 0x611   :  { %v12703_v10 = vpop.eup %10284 }
 0x612   :  { %v8735_v36 = vmul.f32 1.442695, %v8708_v32  ;;  %8759 = vadd.xlane.f32.xlu1 %v12703_v10 }
 0x613   :  { %v8690_v2 = vpop.xlane.xlu0 %8689 }
 0x614   :  { %10292 = vpow2.f32 %v8735_v36  ;;  %v8709_v58 = vsub.f32 %v12650_v30, %v8690_v2 }
 0x615   :  { %v12707_v24 = vpop.eup %10286 }
 0x616   :  { %v8737_v22 = vmul.f32 1.442695, %v8709_v58  ;;  %8761 = vadd.xlane.f32.xlu0 %v12707_v24 }
 0x617   :  { %v8692_v28 = vpop.xlane.xlu1 %8691 }
 0x618   :  { %10294 = vpow2.f32 %v8737_v22  ;;  %v8710_v1 = vsub.f32 %v12656_v20, %v8692_v28 }
 0x619   :  { %v12711_v9 = vpop.eup %10288 }
 0x61a   :  { %v8739_v4 = vmul.f32 1.442695, %v8710_v1  ;;  %8763 = vadd.xlane.f32.xlu1 %v12711_v9 }
 0x61b   :  { %v8694_v11 = vpop.xlane.xlu0 %8693 }
 0x61c   :  { %10296 = vpow2.f32 %v8739_v4  ;;  %v8711_v39 = vsub.f32 %v12662_v40, %v8694_v11 }
 0x61d   :  { %v12715_v14 = vpop.eup %10290 }
 0x61e   :  { %v8741_v30 = vmul.f32 1.442695, %v8711_v39  ;;  %8765 = vadd.xlane.f32.xlu0 %v12715_v14 }
 0x61f   :  { %v8696_v19 = vpop.xlane.xlu1 %8695 }
 0x620   :  { %10298 = vpow2.f32 %v8741_v30  ;;  %v8712_v34 = vsub.f32 %v12667_v48, %v8696_v19 }
 0x621   :  { %v12719_v50 = vpop.eup %10292 }
 0x622   :  { %v8743_v20 = vmul.f32 1.442695, %v8712_v34  ;;  %8767 = vadd.xlane.f32.xlu1 %v12719_v50 }
 0x624   :  { %10300 = vpow2.f32 %v8743_v20 }
 0x625   :  { %v12722_v33 = vpop.eup %10294 }
 0x626   :  { %8769 = vadd.xlane.f32.xlu0 %v12722_v33 }
 0x629   :  { %v12725_v40 = vpop.eup %10296 }
 0x62a   :  { %8771 = vadd.xlane.f32.xlu1 %v12725_v40 }
 0x62d   :  { %v12728_v47 = vpop.eup %10298 }
 0x62e   :  { %8773 = vadd.xlane.f32.xlu0 %v12728_v47 }
 0x631   :  { %v12731_v12 = vpop.eup %10300 }
 0x632   :  { %8775 = vadd.xlane.f32.xlu1 %v12731_v12 }
 0x67f   :  { %v8746_v48 = vpop.xlane.xlu0 %8745 }
 0x680   :  { %10302 = vrcp.f32 %v8746_v48 }
 0x683   :  { %v8748_v60 = vpop.xlane.xlu1 %8747 }
 0x684   :  { %10304 = vrcp.f32 %v8748_v60 }
 0x687   :  { %v8750_v25 = vpop.xlane.xlu0 %8749 }
 0x688   :  { %10306 = vrcp.f32 %v8750_v25 }
 0x68b   :  { %v8752_v31 = vpop.xlane.xlu1 %8751 }
 0x68c   :  { %10308 = vrcp.f32 %v8752_v31 }
 0x68d   :  { %v10303_v7 = vpop.eup %10302 }
 0x68e   :  { %v8793_v51 = vmul.f32 %v10303_v7, %v12675_v53 }
 0x68f   :  { %v8754_v23 = vpop.xlane.xlu0 %8753 }
 0x690   :  { %8809 = vst [vmem:[#allocation14] sm:$0xff] %v8793_v51  ;;  %10310 = vrcp.f32 %v8754_v23 }
 0x691   :  { %v10305_v6 = vpop.eup %10304 }
 0x692   :  { %v8794_v63 = vmul.f32 %v10305_v6, %v12679_v17 }
 0x693   :  { %v8756_v35 = vpop.xlane.xlu1 %8755 }
 0x694   :  { %8810 = vst [vmem:[#allocation14 + $0x8] sm:$0xff] %v8794_v63  ;;  %10312 = vrcp.f32 %v8756_v35 }
 0x695   :  { %v10307_v61 = vpop.eup %10306 }
 0x696   :  { %v8795_v15 = vmul.f32 %v10307_v61, %v12683_v41 }
 0x697   :  { %v8758_v27 = vpop.xlane.xlu0 %8757 }
 0x698   :  { %8811 = vst [vmem:[#allocation14 + $0x10] sm:$0xff] %v8795_v15  ;;  %10314 = vrcp.f32 %v8758_v27 }
 0x699   :  { %v10309_v3 = vpop.eup %10308 }
 0x69a   :  { %v8796_v46 = vmul.f32 %v10309_v3, %v12687_v5 }
 0x69b   :  { %v8760_v29 = vpop.xlane.xlu1 %8759 }
 0x69c   :  { %8812 = vst [vmem:[#allocation14 + $0x18] sm:$0xff] %v8796_v46  ;;  %10316 = vrcp.f32 %v8760_v29 }
 0x69d   :  { %v10311_v53 = vpop.eup %10310 }
 0x69e   :  { %v8797_v26 = vmul.f32 %v10311_v53, %v12691_v18 }
 0x69f   :  { %v8762_v62 = vpop.xlane.xlu0 %8761 }
 0x6a0   :  { %8813 = vst [vmem:[#allocation14 + $0x20] sm:$0xff] %v8797_v26  ;;  %10318 = vrcp.f32 %v8762_v62 }
 0x6a1   :  { %v10313_v17 = vpop.eup %10312 }
 0x6a2   :  { %v8798_v38 = vmul.f32 %v10313_v17, %v12695_v21 }
 0x6a3   :  { %v8764_v16 = vpop.xlane.xlu1 %8763 }
 0x6a4   :  { %8814 = vst [vmem:[#allocation14 + $0x28] sm:$0xff] %v8798_v38  ;;  %10320 = vrcp.f32 %v8764_v16 }
 0x6a5   :  { %v10315_v41 = vpop.eup %10314 }
 0x6a6   :  { %v8799_v57 = vmul.f32 %v10315_v41, %v12699_v59 }
 0x6a7   :  { %v8766_v49 = vpop.xlane.xlu0 %8765 }
 0x6a8   :  { %8815 = vst [vmem:[#allocation14 + $0x30] sm:$0xff] %v8799_v57  ;;  %10322 = vrcp.f32 %v8766_v49 }
 0x6a9   :  { %v10317_v0 = vpop.eup %10316 }
 0x6aa   :  { %v8800_v5 = vmul.f32 %v10317_v0, %v12703_v10 }
 0x6ab   :  { %v8768_v37 = vpop.xlane.xlu1 %8767 }
 0x6ac   :  { %8816 = vst [vmem:[#allocation14 + $0x38] sm:$0xff] %v8800_v5  ;;  %10324 = vrcp.f32 %v8768_v37 }
 0x6ad   :  { %v10319_v55 = vpop.eup %10318 }
 0x6ae   :  { %v8801_v54 = vmul.f32 %v10319_v55, %v12707_v24 }
 0x6af   :  { %v8770_v18 = vpop.xlane.xlu0 %8769 }
 0x6b0   :  { %8817 = vst [vmem:[#allocation14 + $0x40] sm:$0xff] %v8801_v54  ;;  %10326 = vrcp.f32 %v8770_v18 }
 0x6b1   :  { %v10321_v44 = vpop.eup %10320 }
 0x6b2   :  { %v8802_v8 = vmul.f32 %v10321_v44, %v12711_v9 }
 0x6b3   :  { %v8772_v52 = vpop.xlane.xlu1 %8771 }
 0x6b4   :  { %8818 = vst [vmem:[#allocation14 + $0x48] sm:$0xff] %v8802_v8  ;;  %10328 = vrcp.f32 %v8772_v52 }
 0x6b5   :  { %v10323_v21 = vpop.eup %10322 }
 0x6b6   :  { %v8803_v42 = vmul.f32 %v10323_v21, %v12715_v14 }
 0x6b7   :  { %v8774_v13 = vpop.xlane.xlu0 %8773 }
 0x6b8   :  { %8819 = vst [vmem:[#allocation14 + $0x50] sm:$0xff] %v8803_v42  ;;  %10330 = vrcp.f32 %v8774_v13 }
 0x6b9   :  { %v10325_v43 = vpop.eup %10324 }
 0x6ba   :  { %v8804_v59 = vmul.f32 %v10325_v43, %v12719_v50 }
 0x6bb   :  { %v8776_v56 = vpop.xlane.xlu1 %8775 }
 0x6bc   :  { %8820 = vst [vmem:[#allocation14 + $0x58] sm:$0xff] %v8804_v59  ;;  %10332 = vrcp.f32 %v8776_v56 }
 0x6bd   :  { %v10327_v45 = vpop.eup %10326 }
 0x6be   :  { %v8805_v32 = vmul.f32 %v10327_v45, %v12722_v33 }
 0x6c0   :  { %8821 = vst [vmem:[#allocation14 + $0x60] sm:$0xff] %v8805_v32 }
 0x6c1   :  { %v10329_v10 = vpop.eup %10328 }
 0x6c2   :  { %v8806_v36 = vmul.f32 %v10329_v10, %v12725_v40 }
 0x6c4   :  { %8822 = vst [vmem:[#allocation14 + $0x68] sm:$0xff] %v8806_v36 }
 0x6c5   :  { %v10331_v2 = vpop.eup %10330 }
 0x6c6   :  { %v8807_v58 = vmul.f32 %v10331_v2, %v12728_v47 }
 0x6c8   :  { %8823 = vst [vmem:[#allocation14 + $0x70] sm:$0xff] %v8807_v58 }
 0x6c9   :  { %v10333_v24 = vpop.eup %10332 }
 0x6ca   :  { %v8808_v22 = vmul.f32 %v10333_v24, %v12731_v12 }
 0x6cc   :  { %8824 = vst [vmem:[#allocation14 + $0x78] sm:$0xff] %v8808_v22 }
 0x6cd   :  { %10489 = shalt.err (!%p10486_p11)
}
 0x6ce   :  { %s10522_s16 = smov 128   ;;  %s10523_s17 = smov 8  }
 0x6cf   :  { %8836 = dma.vmem_to_hbm [thread:$0]  %s8831_s6, 2048, %s12760_s7, [#allocation4], %s10522_s16, %s10522_s16, %s10523_s17  }
 0x6d0   :  { %10506 = dma.done.wait [#allocation4], 2048  }
 0x6d1   :  { %10507 = vsyncadd [#allocation4], 4294965248 }
 0x6d2   :  { %8840 = vsyncpa [#allocation3], 1 }
 0x6d3   :  { %8841 = vsyncpa [#allocation6], 1 }
 0x6d4   :  { %8842 = vsyncpa [#allocation9], 1 }
 0x6d5   :  { %8843 = vsyncpa [#allocation12], 1 }
 0x6d6   :  { %8844 = vsyncpa [#allocation4], 1 }

</bundles_post_ra>
